<compile_context>
chip_gen: v7x
topology: tpu7x:2x2x1
jax: 0.10.0
libtpu: 0.0.40
codegen_flags: <defaults>
</compile_context>

<pallas_src>
import functools
import math

import jax
import jax.numpy as jnp
from jax.experimental import pallas as pl
from jax.experimental.pallas import tpu as pltpu

# MXU operands in bf16 (native rate on v6e/v7x), f32 accumulation.  Set to
# jnp.float32 to reproduce the pure-f32 reference to ~1e-5.
_MXU_DTYPE = jnp.bfloat16
_MXU_ITEMSIZE = 2 if _MXU_DTYPE is jnp.bfloat16 else 4

_BN_EPS = 1e-5


def _mm(a, b):
  return jnp.dot(a.astype(_MXU_DTYPE), b.astype(_MXU_DTYPE),
                 preferred_element_type=jnp.float32)


def _bmm(eq, a, b):
  return jnp.einsum(eq, a.astype(_MXU_DTYPE), b.astype(_MXU_DTYPE),
                    preferred_element_type=jnp.float32)


# ----------------------------------------------------------------------------
# Kernel A: attention + output projection + residual + BN1 partial sums
# ----------------------------------------------------------------------------
def _attn_layer_kernel(*refs, n_heads, has_prev, write_scores):
  it = iter(refs)
  x_ref = next(it)
  prev_ref = next(it) if has_prev else None
  a_ref, c_ref = next(it), next(it)
  wqkv_ref, bqkv_ref, wo_ref, bo_ref = next(it), next(it), next(it), next(it)
  y_ref = next(it)
  scores_ref = next(it) if write_scores else None
  bn_ref = next(it)

  tb, L, D = x_ref.shape
  H = n_heads
  dk = D // H
  scale = 1.0 / math.sqrt(dk)

  # Fold the previous layer's pending BatchNorm affine into the input (f32).
  x = x_ref[...].astype(jnp.float32) * a_ref[...] + c_ref[...]
  x2d = x.reshape(tb * L, D)

  # Fused Q|K|V projection: one (tb*L, D) @ (D, 3D) MXU pass, bf16 operands.
  qkv = _mm(x2d, wqkv_ref[...]) + bqkv_ref[...]

  def split_heads(t2d):                      # (tb*L, D) -> (tb*H, L, dk)
    return (t2d.reshape(tb, L, H, dk)
                .transpose(0, 2, 1, 3)       # single relayout per tensor
                .reshape(tb * H, L, dk))

  q = split_heads(qkv[:, :D])
  k = split_heads(qkv[:, D:2 * D])
  v = split_heads(qkv[:, 2 * D:])

  # Single batched contraction over all (b, h) pairs (leading batch dim).
  s = _bmm('bld,bmd->blm', q, k) * scale
  if has_prev:
    s = s + prev_ref[...].astype(jnp.float32).reshape(tb * H, L, L)
  if write_scores:
    # lane-dense (tb, H, L*L) layout -> unmasked stores / contiguous DMA
    scores_ref[...] = s.reshape(tb, H, L * L).astype(scores_ref.dtype)

  # softmax in f32 (EUP exp + approx reciprocal)
  m = jnp.max(s, axis=-1, keepdims=True)
  p = jnp.exp(s - m)
  denom = jnp.sum(p, axis=-1, keepdims=True)
  attn_w = p * pl.reciprocal(denom, approx=True)

  o = _bmm('blm,bmd->bld', attn_w, v)
  o2d = (o.reshape(tb, H, L, dk)
           .transpose(0, 2, 1, 3)             # merge heads: one relayout
           .reshape(tb * L, D))

  attn = _mm(o2d, wo_ref[...]) + bo_ref[...]

  y = x2d + attn                               # residual (pre-BatchNorm), f32
  y_ref[...] = y.reshape(tb, L, D).astype(y_ref.dtype)

  # Per-tile partial sums for cross-tile BatchNorm statistics (direct stores).
  s1 = jnp.sum(y, axis=0, keepdims=True)[None]       # (1, 1, D)
  s2 = jnp.sum(y * y, axis=0, keepdims=True)[None]   # (1, 1, D)
  bn_ref[:, 0:1, :] = s1.astype(bn_ref.dtype)
  bn_ref[:, 1:2, :] = s2.astype(bn_ref.dtype)


# ----------------------------------------------------------------------------
# Kernel B: BN1 affine + FFN + residual + BN2 partial sums
# ----------------------------------------------------------------------------
def _ffn_layer_kernel(y_ref, a_ref, c_ref, w1_ref, b1_ref, w2_ref, b2_ref,
                      z_ref, bn_ref, *, activation):
  tb, L, D = y_ref.shape
  y = y_ref[...].astype(jnp.float32).reshape(tb * L, D)
  y = y * a_ref[...] + c_ref[...]                  # BatchNorm after attention
  h = _mm(y, w1_ref[...]) + b1_ref[...]
  if activation == 'relu':
    h = jnp.maximum(h, 0.0)
  else:                                            # exact (erf) GELU = nn.GELU()
    h = 0.5 * h * (1.0 + jax.lax.erf(h * (1.0 / math.sqrt(2.0))))
  z = y + _mm(h, w2_ref[...]) + b2_ref[...]        # residual (pre-BatchNorm)
  z_ref[...] = z.reshape(tb, L, D).astype(z_ref.dtype)
  s1 = jnp.sum(z, axis=0, keepdims=True)[None]
  s2 = jnp.sum(z * z, axis=0, keepdims=True)[None]
  bn_ref[:, 0:1, :] = s1.astype(bn_ref.dtype)
  bn_ref[:, 1:2, :] = s2.astype(bn_ref.dtype)


# ----------------------------------------------------------------------------
# Tiny affine kernel: applies the final layer's second BatchNorm
# ----------------------------------------------------------------------------
def _affine_kernel(x_ref, a_ref, c_ref, o_ref):
  o_ref[...] = (x_ref[...].astype(jnp.float32) * a_ref[...]
                + c_ref[...]).astype(o_ref.dtype)


# ----------------------------------------------------------------------------
# Generation-aware VMEM budget and BV-tile selection
# ----------------------------------------------------------------------------
def _vmem_capacity_bytes():
  try:
    info = pltpu.get_tpu_info()
    for name in ("vmem_capacity_bytes", "vmem_size_bytes", "vmem_bytes"):
      v = getattr(info, name, None)
      if v:
        return int(v)
  except Exception:
    pass
  return 64 * 1024 * 1024     # conservative fallback: v7x per-TensorCore VMEM


@functools.lru_cache(maxsize=None)
def _vmem_limit_bytes():
  # ~75% of physical VMEM: ~48 MiB on v7x (64 MiB), ~96 MiB on v5e/v6e (128 MiB)
  return min(3 * _vmem_capacity_bytes() // 4, 112 * 1024 * 1024)


def _compiler_params():
  return pltpu.CompilerParams(dimension_semantics=("parallel",),
                              vmem_limit_bytes=_vmem_limit_bytes())


def _pad_lane(n):
  return ((n + 127) // 128) * 128


def _pad_sub(n):
  return ((n + 7) // 8) * 8


def _choose_block_bv(BV, L, D, H, d_ff):
  """Largest BV tile that fits the per-generation VMEM budget, preferring an
  even number (>=2) of grid tiles so the 'parallel' axis feeds both v7x TCs."""
  dk = max(D // H, 1)
  # f32 bytes per BV row: double-buffered HBM<->VMEM windows ...
  windows = 4 * (2 * 2 * _pad_sub(L) * _pad_lane(D)          # x in + y/z out
                 + 2 * 2 * _pad_sub(H) * _pad_lane(L * L))   # prev in + scores out
  # ... plus lane-padded in-kernel intermediates (worst of kernel A / B)
  interm = 4 * (_pad_sub(L) * _pad_lane(3 * D)               # fused qkv
                + 3 * H * _pad_sub(L) * _pad_lane(dk)        # q, k, v
                + 3 * H * _pad_sub(L) * _pad_lane(L)         # s, p, attn_w
                + 3 * _pad_sub(L) * _pad_lane(D)             # x2d, o2d, y
                + _pad_sub(L) * _pad_lane(d_ff))             # FFN hidden
  per_row = windows + interm
  weights = 2 * _MXU_ITEMSIZE * (
      _pad_sub(D) * _pad_lane(3 * D) + _pad_sub(D) * _pad_lane(D)
      + _pad_sub(D) * _pad_lane(d_ff) + _pad_sub(d_ff) * _pad_lane(D))
  budget = max(int(0.6 * _vmem_limit_bytes()) - weights, per_row)
  cap = max(1, budget // per_row)
  divisors = [d for d in range(1, BV + 1) if BV % d == 0]
  fits = [d for d in divisors if d <= cap] or [1]
  even = [d for d in fits if (BV // d) >= 2 and (BV // d) % 2 == 0]
  multi = [d for d in fits if (BV // d) >= 2]
  pool = even or multi or fits
  return max(pool)


# ----------------------------------------------------------------------------
# pallas_call wrappers
# ----------------------------------------------------------------------------
def _bv_spec(block_bv, rest_shape):
  nrest = len(rest_shape)
  return pl.BlockSpec((block_bv,) + tuple(rest_shape),
                      lambda i: (i,) + (0,) * nrest)


def _full_spec(shape):
  n = len(shape)
  return pl.BlockSpec(tuple(shape), lambda i: (0,) * n)


def _attn_layer_call(x, prev, a_in, c_in, wqkv, bqkv, wo, bo, *,
                     n_heads, block_bv, write_scores):
  BV, L, D = x.shape
  H = n_heads
  dk = D // H
  nt = BV // block_bv
  has_prev = prev is not None
  kernel = functools.partial(_attn_layer_kernel, n_heads=n_heads,
                             has_prev=has_prev, write_scores=write_scores)

  in_specs = [_bv_spec(block_bv, (L, D))]
  args = [x]
  if has_prev:
    in_specs.append(_bv_spec(block_bv, (H, L * L)))      # cumulative scores
    args.append(prev)
  in_specs += [
      _full_spec((1, D)), _full_spec((1, D)),             # pending BN affine
      _full_spec((D, 3 * D)), _full_spec((1, 3 * D)),     # fused QKV
      _full_spec((D, D)), _full_spec((1, D)),             # output projection
  ]
  args += [a_in, c_in, wqkv, bqkv, wo, bo]

  out_shape = [jax.ShapeDtypeStruct((BV, L, D), jnp.float32)]
  out_specs = [_bv_spec(block_bv, (L, D))]
  if write_scores:
    out_shape.append(jax.ShapeDtypeStruct((BV, H, L * L), jnp.float32))
    out_specs.append(_bv_spec(block_bv, (H, L * L)))
  out_shape.append(jax.ShapeDtypeStruct((nt, 2, D), jnp.float32))
  out_specs.append(pl.BlockSpec((1, 2, D), lambda i: (i, 0, 0)))

  # Update the residual-score buffer in place when both read and written.
  aliases = {1: 1} if (has_prev and write_scores) else {}

  flops = (2 * BV * L * D * 3 * D            # fused QKV projection
           + 4 * BV * H * L * L * dk         # QK^T and AV
           + 2 * BV * L * D * D)             # output projection
  transcendentals = BV * H * L * L + BV * H * L
  bytes_accessed = (4 * 2 * BV * L * D
                    + 4 * BV * H * L * L * (int(has_prev) + int(write_scores))
                    + _MXU_ITEMSIZE * 4 * D * D
                    + 4 * (8 * D + nt * 2 * D))
  return pl.pallas_call(
      kernel,
      grid=(nt,),
      in_specs=in_specs,
      out_specs=tuple(out_specs),
      out_shape=tuple(out_shape),
      input_output_aliases=aliases,
      compiler_params=_compiler_params(),
      cost_estimate=pl.CostEstimate(flops=flops,
                                    transcendentals=transcendentals,
                                    bytes_accessed=bytes_accessed),
  )(*args)


def _ffn_layer_call(y, a1, c1, w1, b1, w2, b2, *, activation, block_bv):
  BV, L, D = y.shape
  d_ff = w1.shape[1]
  nt = BV // block_bv
  kernel = functools.partial(_ffn_layer_kernel, activation=activation)
  in_specs = [
      _bv_spec(block_bv, (L, D)),
      _full_spec((1, D)), _full_spec((1, D)),
      _full_spec((D, d_ff)), _full_spec((1, d_ff)),
      _full_spec((d_ff, D)), _full_spec((1, D)),
  ]
  out_shape = (jax.ShapeDtypeStruct((BV, L, D), jnp.float32),
               jax.ShapeDtypeStruct((nt, 2, D), jnp.float32))
  out_specs = (_bv_spec(block_bv, (L, D)),
               pl.BlockSpec((1, 2, D), lambda i: (i, 0, 0)))
  flops = 4 * BV * L * D * d_ff
  transcendentals = 0 if activation == 'relu' else BV * L * d_ff
  bytes_accessed = (4 * 2 * BV * L * D + _MXU_ITEMSIZE * 2 * D * d_ff
                    + 4 * (d_ff + 3 * D + nt * 2 * D))
  return pl.pallas_call(
      kernel,
      grid=(nt,),
      in_specs=in_specs,
      out_specs=out_specs,
      out_shape=out_shape,
      compiler_params=_compiler_params(),
      cost_estimate=pl.CostEstimate(flops=flops,
                                    transcendentals=transcendentals,
                                    bytes_accessed=bytes_accessed),
  )(y, a1, c1, w1, b1, w2, b2)


def _affine_call(x, a, c, *, block_bv):
  BV, L, D = x.shape
  nt = BV // block_bv
  return pl.pallas_call(
      _affine_kernel,
      grid=(nt,),
      in_specs=[_bv_spec(block_bv, (L, D)),
                _full_spec((1, D)), _full_spec((1, D))],
      out_specs=_bv_spec(block_bv, (L, D)),
      out_shape=jax.ShapeDtypeStruct((BV, L, D), jnp.float32),
      compiler_params=_compiler_params(),
  )(x, a, c)


def _bn_affine(partials, gamma, beta, n_rows):
  """Reduce per-tile (sum, sum_sq) partials into a BatchNorm affine (a, c)."""
  total = jnp.sum(partials, axis=0)            # (2, D)
  mean = total[0:1] / n_rows                   # (1, D)
  ex2 = total[1:2] / n_rows
  var = jnp.maximum(ex2 - mean * mean, 0.0)    # biased variance (BatchNorm)
  a = gamma * jax.lax.rsqrt(var + _BN_EPS)
  c = beta - mean * a
  return a, c


# ----------------------------------------------------------------------------
# PatchTSTEncoder forward: x (B, n_vars, L, D) -> (B*n_vars, L, D)
# ----------------------------------------------------------------------------
def patchtst_encoder_forward(x, layer_params, n_heads, activation,
                             block_bv=None):
  B, V, L, D = x.shape
  BV = B * V
  H = n_heads
  assert D % H == 0, (D, H)
  d_ff = layer_params[0][6].shape[1]
  if block_bv is None:
    block_bv = _choose_block_bv(BV, L, D, H, d_ff)
  block_bv = min(block_bv, BV)
  assert BV % block_bv == 0, (BV, block_bv)
  n_rows = BV * L
  wdt = _MXU_DTYPE

  xf = x.reshape(BV, L, D).astype(jnp.float32)
  scores = None                                # layer 0: no residual scores read
  a_pend = jnp.ones((1, D), jnp.float32)       # pending BatchNorm affine
  c_pend = jnp.zeros((1, D), jnp.float32)

  n_layers = len(layer_params)
  for li, p in enumerate(layer_params):
    (wqkv, bqkv, wo, bo, g1, be1, w1, b1, w2, b2, g2, be2) = p
    last = li == n_layers - 1
    outs = _attn_layer_call(
        xf, scores, a_pend, c_pend,
        wqkv.astype(wdt), bqkv, wo.astype(wdt), bo,
        n_heads=H, block_bv=block_bv, write_scores=not last)
    if last:
      y_pre, bn1 = outs
    else:
      y_pre, scores, bn1 = outs
    a1, c1 = _bn_affine(bn1, g1, be1, n_rows)
    z_pre, bn2 = _ffn_layer_call(y_pre, a1, c1,
                                 w1.astype(wdt), b1, w2.astype(wdt), b2,
                                 activation=activation, block_bv=block_bv)
    a_pend, c_pend = _bn_affine(bn2, g2, be2, n_rows)
    xf = z_pre
  # apply the final layer's second BatchNorm
  return _affine_call(xf, a_pend, c_pend, block_bv=block_bv)


# ----------------------------------------------------------------------------
# Parameter init (deterministic, mirrors the PyTorch module; QKV fused)
# ----------------------------------------------------------------------------
def init_params(key, e_layers, d_model, d_ff):
  layers = []
  s_d = 1.0 / math.sqrt(d_model)
  s_f = 1.0 / math.sqrt(d_ff)
  for l in range(e_layers):
    ks = jax.random.split(jax.random.fold_in(key, l), 8)
    u = lambda k, shape, s: jax.random.uniform(k, shape, jnp.float32, -s, s)
    wqkv = u(ks[0], (d_model, 3 * d_model), s_d)
    bqkv = u(ks[1], (1, 3 * d_model), s_d)
    wo = u(ks[2], (d_model, d_model), s_d)
    bo = u(ks[3], (1, d_model), s_d)
    w1 = u(ks[4], (d_model, d_ff), s_d)
    b1 = u(ks[5], (1, d_ff), s_d)
    w2 = u(ks[6], (d_ff, d_model), s_f)
    b2 = u(ks[7], (1, d_model), s_f)
    g1 = jnp.ones((1, d_model), jnp.float32)   # BatchNorm1d affine init
    be1 = jnp.zeros((1, d_model), jnp.float32)
    g2 = jnp.ones((1, d_model), jnp.float32)
    be2 = jnp.zeros((1, d_model), jnp.float32)
    layers.append((wqkv, bqkv, wo, bo, g1, be1, w1, b1, w2, b2, g2, be2))
  return layers


# ----------------------------------------------------------------------------
# Pure-JAX reference (same math, full f32) for correctness checking
# ----------------------------------------------------------------------------
def _layer_reference(x, prev, p, n_heads, activation):
  (wqkv, bqkv, wo, bo, g1, be1, w1, b1, w2, b2, g2, be2) = p
  BV, L, D = x.shape
  H = n_heads
  dk = D // H
  x2d = x.reshape(BV * L, D)
  qkv = x2d @ wqkv + bqkv
  def split(t):
    return t.reshape(BV, L, H, dk).transpose(0, 2, 1, 3)
  q, k, v = split(qkv[:, :D]), split(qkv[:, D:2 * D]), split(qkv[:, 2 * D:])
  s = jnp.einsum('bhld,bhmd->bhlm', q, k) / math.sqrt(dk) + prev
  a = jax.nn.softmax(s, axis=-1)
  o = jnp.einsum('bhlm,bhmd->bhld', a, v).transpose(0, 2, 1, 3).reshape(BV * L, D)
  o = o @ wo + bo
  y = x2d + o
  mu = y.mean(0, keepdims=True)
  var = ((y - mu) ** 2).mean(0, keepdims=True)
  y = (y - mu) * jax.lax.rsqrt(var + _BN_EPS) * g1 + be1
  h = y @ w1 + b1
  if activation == 'relu':
    h = jnp.maximum(h, 0.0)
  else:
    h = 0.5 * h * (1.0 + jax.lax.erf(h / math.sqrt(2.0)))
  z = y + (h @ w2 + b2)
  mu2 = z.mean(0, keepdims=True)
  var2 = ((z - mu2) ** 2).mean(0, keepdims=True)
  z = (z - mu2) * jax.lax.rsqrt(var2 + _BN_EPS) * g2 + be2
  return z.reshape(BV, L, D), s


def patchtst_encoder_reference(x, layer_params, n_heads, activation):
  B, V, L, D = x.shape
  xf = x.reshape(B * V, L, D)
  scores = jnp.zeros((B * V, n_heads, L, L), jnp.float32)
  for p in layer_params:
    xf, scores = _layer_reference(xf, scores, p, n_heads, activation)
  return xf


if __name__ == "__main__":
  # Small, module-consistent shapes: batch=2, n_vars=4, n_patches=16, d_model=32
  B, V, L, D = 2, 4, 16, 32
  H, D_FF, E_LAYERS = 4, 64, 2
  ACT = 'relu'          # 'gelu' (exact erf GELU) also supported

  key = jax.random.PRNGKey(0)
  kx, kp = jax.random.split(key)
  x = jax.random.normal(kx, (B, V, L, D), dtype=jnp.float32)
  params = init_params(kp, E_LAYERS, D, D_FF)

  fwd = jax.jit(functools.partial(patchtst_encoder_forward, n_heads=H,
                                  activation=ACT))
  out = jax.block_until_ready(fwd(x, params))

  ref = patchtst_encoder_reference(x, params, n_heads=H, activation=ACT)
  assert out.shape == (B * V, L, D), out.shape
  max_err = float(jnp.max(jnp.abs(out - ref)))
  mean_err = float(jnp.mean(jnp.abs(out - ref)))
  # bf16 MXU operands vs full-f32 reference; with _MXU_DTYPE = jnp.float32 the
  # kernel matches the reference to ~1e-5.
  assert max_err < 1e-1 and mean_err < 1e-2, (max_err, mean_err)

  # TODO(synk): dropout (stochastic, train-only) and BatchNorm1d running-stat
  # tracking / eval-mode running statistics are stateful training behaviors;
  # this kernel implements the deterministic forward with identity dropout and
  # batch-statistics normalization.
  print("KERNEL_OK")
</pallas_src>

<mosaic_0001>
module attributes {stable_mosaic.version = 11 : i64} {
  func.func @_attn_layer_kernel(%arg0: i32, %arg1: memref<4x16x32xf32, #tpu.memory_space<vmem>>, %arg2: memref<1x32xf32, #tpu.memory_space<vmem>>, %arg3: memref<1x32xf32, #tpu.memory_space<vmem>>, %arg4: memref<32x96xbf16, #tpu.memory_space<vmem>>, %arg5: memref<1x96xf32, #tpu.memory_space<vmem>>, %arg6: memref<32x32xbf16, #tpu.memory_space<vmem>>, %arg7: memref<1x32xf32, #tpu.memory_space<vmem>>, %arg8: memref<4x16x32xf32, #tpu.memory_space<vmem>>, %arg9: memref<4x4x256xf32, #tpu.memory_space<vmem>>, %arg10: memref<1x2x32xf32, #tpu.memory_space<vmem>>) attributes {dimension_semantics = [#tpu.dimension_semantics<parallel>], iteration_bounds = array<i64: 2>, scalar_prefetch = 0 : i64, scratch_operands = 0 : i64, tpu.core_type = #tpu.core_type<tc>, window_params = [{transform_indices = @transform_0, window_bounds = array<i64: 4, 16, 32>}, {pipeline_mode = #tpu.pipeline_mode<synchronous>, transform_indices = @transform_1, window_bounds = array<i64: 1, 32>}, {pipeline_mode = #tpu.pipeline_mode<synchronous>, transform_indices = @transform_2, window_bounds = array<i64: 1, 32>}, {pipeline_mode = #tpu.pipeline_mode<synchronous>, transform_indices = @transform_3, window_bounds = array<i64: 32, 96>}, {pipeline_mode = #tpu.pipeline_mode<synchronous>, transform_indices = @transform_4, window_bounds = array<i64: 1, 96>}, {pipeline_mode = #tpu.pipeline_mode<synchronous>, transform_indices = @transform_5, window_bounds = array<i64: 32, 32>}, {pipeline_mode = #tpu.pipeline_mode<synchronous>, transform_indices = @transform_6, window_bounds = array<i64: 1, 32>}, {transform_indices = @transform_7, window_bounds = array<i64: 4, 16, 32>}, {transform_indices = @transform_8, window_bounds = array<i64: 4, 4, 256>}, {transform_indices = @transform_9, window_bounds = array<i64: 1, 2, 32>}]} {
    %c0 = arith.constant 0 : index
    %c0_0 = arith.constant 0 : index
    %c0_1 = arith.constant 0 : index
    %0 = vector.load %arg1[%c0, %c0_0, %c0_1] : memref<4x16x32xf32, #tpu.memory_space<vmem>>, vector<4x16x32xf32>
    %c0_2 = arith.constant 0 : index
    %c0_3 = arith.constant 0 : index
    %1 = vector.load %arg2[%c0_2, %c0_3] : memref<1x32xf32, #tpu.memory_space<vmem>>, vector<1x32xf32>
    %2 = vector.shape_cast %1 : vector<1x32xf32> to vector<1x1x32xf32>
    %3 = vector.broadcast %2 : vector<1x1x32xf32> to vector<4x16x32xf32>
    %4 = arith.mulf %0, %3 : vector<4x16x32xf32>
    %c0_4 = arith.constant 0 : index
    %c0_5 = arith.constant 0 : index
    %5 = vector.load %arg3[%c0_4, %c0_5] : memref<1x32xf32, #tpu.memory_space<vmem>>, vector<1x32xf32>
    %6 = vector.shape_cast %5 : vector<1x32xf32> to vector<1x1x32xf32>
    %7 = vector.broadcast %6 : vector<1x1x32xf32> to vector<4x16x32xf32>
    %8 = arith.addf %4, %7 : vector<4x16x32xf32>
    %9 = vector.shape_cast %8 : vector<4x16x32xf32> to vector<64x32xf32>
    %c0_6 = arith.constant 0 : index
    %c0_7 = arith.constant 0 : index
    %10 = vector.load %arg4[%c0_6, %c0_7] : memref<32x96xbf16, #tpu.memory_space<vmem>>, vector<32x96xbf16>
    %11 = arith.truncf %9 : vector<64x32xf32> to vector<64x32xbf16>
    %cst = arith.constant dense<0.000000e+00> : vector<64x96xf32>
    %12 = tpu.matmul %11, %10, %cst {dimension_numbers = #tpu.dot_dimension_numbers<[1], [0], [0], [1], [0, 0, 1, 1], [], []>} : vector<64x32xbf16>, vector<32x96xbf16>, vector<64x96xf32> -> vector<64x96xf32>
    %c0_8 = arith.constant 0 : index
    %c0_9 = arith.constant 0 : index
    %13 = vector.load %arg5[%c0_8, %c0_9] : memref<1x96xf32, #tpu.memory_space<vmem>>, vector<1x96xf32>
    %14 = vector.broadcast %13 : vector<1x96xf32> to vector<64x96xf32>
    %15 = arith.addf %12, %14 : vector<64x96xf32>
    %16 = vector.extract_strided_slice %15 {offsets = [0, 0], sizes = [64, 32], strides = [1, 1]} : vector<64x96xf32> to vector<64x32xf32>
    %17 = vector.shape_cast %16 : vector<64x32xf32> to vector<4x16x4x8xf32>
    %18 = tpu.transpose %17, [0, 2, 1, 3] : vector<4x16x4x8xf32> -> vector<4x4x16x8xf32>
    %19 = vector.shape_cast %18 : vector<4x4x16x8xf32> to vector<16x16x8xf32>
    %20 = vector.extract_strided_slice %15 {offsets = [0, 32], sizes = [64, 32], strides = [1, 1]} : vector<64x96xf32> to vector<64x32xf32>
    %21 = vector.shape_cast %20 : vector<64x32xf32> to vector<4x16x4x8xf32>
    %22 = tpu.transpose %21, [0, 2, 1, 3] : vector<4x16x4x8xf32> -> vector<4x4x16x8xf32>
    %23 = vector.shape_cast %22 : vector<4x4x16x8xf32> to vector<16x16x8xf32>
    %24 = vector.extract_strided_slice %15 {offsets = [0, 64], sizes = [64, 32], strides = [1, 1]} : vector<64x96xf32> to vector<64x32xf32>
    %25 = vector.shape_cast %24 : vector<64x32xf32> to vector<4x16x4x8xf32>
    %26 = tpu.transpose %25, [0, 2, 1, 3] : vector<4x16x4x8xf32> -> vector<4x4x16x8xf32>
    %27 = vector.shape_cast %26 : vector<4x4x16x8xf32> to vector<16x16x8xf32>
    %28 = arith.truncf %19 : vector<16x16x8xf32> to vector<16x16x8xbf16>
    %29 = arith.truncf %23 : vector<16x16x8xf32> to vector<16x16x8xbf16>
    "tpu.trace_start"() <{level = 10 : i32, message = "bld,bmd->blm"}> : () -> ()
    %cst_10 = arith.constant dense<0.000000e+00> : vector<16x16x16xf32>
    %30 = tpu.matmul %28, %29, %cst_10 {dimension_numbers = #tpu.dot_dimension_numbers<[2], [2], [1], [1], [0, 0, 0, 1, 1, 1], [0], [0]>} : vector<16x16x8xbf16>, vector<16x16x8xbf16>, vector<16x16x16xf32> -> vector<16x16x16xf32>
    "tpu.trace_stop"() : () -> ()
    %cst_11 = arith.constant 0.353553385 : f32
    %31 = vector.broadcast %cst_11 : f32 to vector<16x16x16xf32>
    %32 = arith.mulf %30, %31 : vector<16x16x16xf32>
    %33 = vector.shape_cast %32 : vector<16x16x16xf32> to vector<4x4x256xf32>
    %c0_12 = arith.constant 0 : index
    %c0_13 = arith.constant 0 : index
    %c0_14 = arith.constant 0 : index
    %34 = vector.load %arg9[%c0_12, %c0_13, %c0_14] : memref<4x4x256xf32, #tpu.memory_space<vmem>>, vector<4x4x256xf32>
    tpu.vector_store %arg9[%c0_12, %c0_13, %c0_14], %33 {strides = array<i32>} : memref<4x4x256xf32, #tpu.memory_space<vmem>>, vector<4x4x256xf32>,
    %cst_15 = arith.constant dense<0xFF800000> : vector<16x16xf32>
    %35 = vector.multi_reduction <maximumf>, %32, %cst_15 [2] : vector<16x16x16xf32> to vector<16x16xf32>
    %36 = vector.shape_cast %35 : vector<16x16xf32> to vector<16x16x1xf32>
    %37 = vector.broadcast %36 : vector<16x16x1xf32> to vector<16x16x16xf32>
    %38 = arith.subf %32, %37 : vector<16x16x16xf32>
    %39 = math.exp %38 : vector<16x16x16xf32>
    %cst_16 = arith.constant dense<0.000000e+00> : vector<16x16xf32>
    %40 = vector.multi_reduction <add>, %39, %cst_16 [2] : vector<16x16x16xf32> to vector<16x16xf32>
    %41 = vector.shape_cast %40 : vector<16x16xf32> to vector<16x16x1xf32>
    %42 = tpu.reciprocal %41 {approx = true} : vector<16x16x1xf32> -> vector<16x16x1xf32>
    %43 = vector.broadcast %42 : vector<16x16x1xf32> to vector<16x16x16xf32>
    %44 = arith.mulf %39, %43 : vector<16x16x16xf32>
    %45 = arith.truncf %44 : vector<16x16x16xf32> to vector<16x16x16xbf16>
    %46 = arith.truncf %27 : vector<16x16x8xf32> to vector<16x16x8xbf16>
    "tpu.trace_start"() <{level = 10 : i32, message = "blm,bmd->bld"}> : () -> ()
    %cst_17 = arith.constant dense<0.000000e+00> : vector<16x16x8xf32>
    %47 = tpu.matmul %45, %46, %cst_17 {dimension_numbers = #tpu.dot_dimension_numbers<[2], [1], [1], [2], [0, 0, 0, 1, 1, 2], [0], [0]>} : vector<16x16x16xbf16>, vector<16x16x8xbf16>, vector<16x16x8xf32> -> vector<16x16x8xf32>
    "tpu.trace_stop"() : () -> ()
    %48 = vector.shape_cast %47 : vector<16x16x8xf32> to vector<4x4x16x8xf32>
    %49 = tpu.transpose %48, [0, 2, 1, 3] : vector<4x4x16x8xf32> -> vector<4x16x4x8xf32>
    %50 = vector.shape_cast %49 : vector<4x16x4x8xf32> to vector<64x32xf32>
    %c0_18 = arith.constant 0 : index
    %c0_19 = arith.constant 0 : index
    %51 = vector.load %arg6[%c0_18, %c0_19] : memref<32x32xbf16, #tpu.memory_space<vmem>>, vector<32x32xbf16>
    %52 = arith.truncf %50 : vector<64x32xf32> to vector<64x32xbf16>
    %cst_20 = arith.constant dense<0.000000e+00> : vector<64x32xf32>
    %53 = tpu.matmul %52, %51, %cst_20 {dimension_numbers = #tpu.dot_dimension_numbers<[1], [0], [0], [1], [0, 0, 1, 1], [], []>} : vector<64x32xbf16>, vector<32x32xbf16>, vector<64x32xf32> -> vector<64x32xf32>
    %c0_21 = arith.constant 0 : index
    %c0_22 = arith.constant 0 : index
    %54 = vector.load %arg7[%c0_21, %c0_22] : memref<1x32xf32, #tpu.memory_space<vmem>>, vector<1x32xf32>
    %55 = vector.broadcast %54 : vector<1x32xf32> to vector<64x32xf32>
    %56 = arith.addf %53, %55 : vector<64x32xf32>
    %57 = arith.addf %9, %56 : vector<64x32xf32>
    %58 = vector.shape_cast %57 : vector<64x32xf32> to vector<4x16x32xf32>
    %c0_23 = arith.constant 0 : index
    %c0_24 = arith.constant 0 : index
    %c0_25 = arith.constant 0 : index
    %59 = vector.load %arg8[%c0_23, %c0_24, %c0_25] : memref<4x16x32xf32, #tpu.memory_space<vmem>>, vector<4x16x32xf32>
    tpu.vector_store %arg8[%c0_23, %c0_24, %c0_25], %58 {strides = array<i32>} : memref<4x16x32xf32, #tpu.memory_space<vmem>>, vector<4x16x32xf32>,
    %cst_26 = arith.constant dense<0.000000e+00> : vector<32xf32>
    %60 = vector.multi_reduction <add>, %57, %cst_26 [0] : vector<64x32xf32> to vector<32xf32>
    %61 = vector.shape_cast %60 : vector<32xf32> to vector<1x32xf32>
    %62 = vector.shape_cast %61 : vector<1x32xf32> to vector<1x1x32xf32>
    %63 = arith.mulf %57, %57 : vector<64x32xf32>
    %cst_27 = arith.constant dense<0.000000e+00> : vector<32xf32>
    %64 = vector.multi_reduction <add>, %63, %cst_27 [0] : vector<64x32xf32> to vector<32xf32>
    %65 = vector.shape_cast %64 : vector<32xf32> to vector<1x32xf32>
    %66 = vector.shape_cast %65 : vector<1x32xf32> to vector<1x1x32xf32>
    %c0_28 = arith.constant 0 : index
    %c0_29 = arith.constant 0 : index
    %c0_30 = arith.constant 0 : index
    %67 = vector.load %arg10[%c0_28, %c0_29, %c0_30] : memref<1x2x32xf32, #tpu.memory_space<vmem>>, vector<1x1x32xf32>
    tpu.vector_store %arg10[%c0_28, %c0_29, %c0_30], %62 {strides = array<i32>} : memref<1x2x32xf32, #tpu.memory_space<vmem>>, vector<1x1x32xf32>,
    %c0_31 = arith.constant 0 : index
    %c1 = arith.constant 1 : index
    %c0_32 = arith.constant 0 : index
    %68 = vector.load %arg10[%c0_31, %c1, %c0_32] : memref<1x2x32xf32, #tpu.memory_space<vmem>>, vector<1x1x32xf32>
    tpu.vector_store %arg10[%c0_31, %c1, %c0_32], %66 {strides = array<i32>} : memref<1x2x32xf32, #tpu.memory_space<vmem>>, vector<1x1x32xf32>,
    return
  }
  func.func @transform_0(%arg0: i32) -> (i32, i32, i32) {
    %c0_i32 = arith.constant 0 : i32
    %c0_i32_0 = arith.constant 0 : i32
    %c0_i32_1 = arith.constant 0 : i32
    return %arg0, %c0_i32, %c0_i32_0 : i32, i32, i32
  }
  func.func @transform_1(%arg0: i32) -> (i32, i32) {
    %c0_i32 = arith.constant 0 : i32
    %c0_i32_0 = arith.constant 0 : i32
    %c0_i32_1 = arith.constant 0 : i32
    return %c0_i32, %c0_i32_0 : i32, i32
  }
  func.func @transform_2(%arg0: i32) -> (i32, i32) {
    %c0_i32 = arith.constant 0 : i32
    %c0_i32_0 = arith.constant 0 : i32
    %c0_i32_1 = arith.constant 0 : i32
    return %c0_i32, %c0_i32_0 : i32, i32
  }
  func.func @transform_3(%arg0: i32) -> (i32, i32) {
    %c0_i32 = arith.constant 0 : i32
    %c0_i32_0 = arith.constant 0 : i32
    %c0_i32_1 = arith.constant 0 : i32
    return %c0_i32, %c0_i32_0 : i32, i32
  }
  func.func @transform_4(%arg0: i32) -> (i32, i32) {
    %c0_i32 = arith.constant 0 : i32
    %c0_i32_0 = arith.constant 0 : i32
    %c0_i32_1 = arith.constant 0 : i32
    return %c0_i32, %c0_i32_0 : i32, i32
  }
  func.func @transform_5(%arg0: i32) -> (i32, i32) {
    %c0_i32 = arith.constant 0 : i32
    %c0_i32_0 = arith.constant 0 : i32
    %c0_i32_1 = arith.constant 0 : i32
    return %c0_i32, %c0_i32_0 : i32, i32
  }
  func.func @transform_6(%arg0: i32) -> (i32, i32) {
    %c0_i32 = arith.constant 0 : i32
    %c0_i32_0 = arith.constant 0 : i32
    %c0_i32_1 = arith.constant 0 : i32
    return %c0_i32, %c0_i32_0 : i32, i32
  }
  func.func @transform_7(%arg0: i32) -> (i32, i32, i32) {
    %c0_i32 = arith.constant 0 : i32
    %c0_i32_0 = arith.constant 0 : i32
    %c0_i32_1 = arith.constant 0 : i32
    return %arg0, %c0_i32, %c0_i32_0 : i32, i32, i32
  }
  func.func @transform_8(%arg0: i32) -> (i32, i32, i32) {
    %c0_i32 = arith.constant 0 : i32
    %c0_i32_0 = arith.constant 0 : i32
    %c0_i32_1 = arith.constant 0 : i32
    return %arg0, %c0_i32, %c0_i32_0 : i32, i32, i32
  }
  func.func @transform_9(%arg0: i32) -> (i32, i32, i32) {
    %c0_i32 = arith.constant 0 : i32
    %c0_i32_0 = arith.constant 0 : i32
    %c0_i32_1 = arith.constant 0 : i32
    return %arg0, %c0_i32, %c0_i32_0 : i32, i32, i32
  }
}

module attributes {stable_mosaic.version = 11 : i64} {
  func.func @_ffn_layer_kernel(%arg0: i32, %arg1: memref<4x16x32xf32, #tpu.memory_space<vmem>>, %arg2: memref<1x32xf32, #tpu.memory_space<vmem>>, %arg3: memref<1x32xf32, #tpu.memory_space<vmem>>, %arg4: memref<32x64xbf16, #tpu.memory_space<vmem>>, %arg5: memref<1x64xf32, #tpu.memory_space<vmem>>, %arg6: memref<64x32xbf16, #tpu.memory_space<vmem>>, %arg7: memref<1x32xf32, #tpu.memory_space<vmem>>, %arg8: memref<4x16x32xf32, #tpu.memory_space<vmem>>, %arg9: memref<1x2x32xf32, #tpu.memory_space<vmem>>) attributes {dimension_semantics = [#tpu.dimension_semantics<parallel>], iteration_bounds = array<i64: 2>, scalar_prefetch = 0 : i64, scratch_operands = 0 : i64, tpu.core_type = #tpu.core_type<tc>, window_params = [{transform_indices = @transform_0, window_bounds = array<i64: 4, 16, 32>}, {pipeline_mode = #tpu.pipeline_mode<synchronous>, transform_indices = @transform_1, window_bounds = array<i64: 1, 32>}, {pipeline_mode = #tpu.pipeline_mode<synchronous>, transform_indices = @transform_2, window_bounds = array<i64: 1, 32>}, {pipeline_mode = #tpu.pipeline_mode<synchronous>, transform_indices = @transform_3, window_bounds = array<i64: 32, 64>}, {pipeline_mode = #tpu.pipeline_mode<synchronous>, transform_indices = @transform_4, window_bounds = array<i64: 1, 64>}, {pipeline_mode = #tpu.pipeline_mode<synchronous>, transform_indices = @transform_5, window_bounds = array<i64: 64, 32>}, {pipeline_mode = #tpu.pipeline_mode<synchronous>, transform_indices = @transform_6, window_bounds = array<i64: 1, 32>}, {transform_indices = @transform_7, window_bounds = array<i64: 4, 16, 32>}, {transform_indices = @transform_8, window_bounds = array<i64: 1, 2, 32>}]} {
    %c0 = arith.constant 0 : index
    %c0_0 = arith.constant 0 : index
    %c0_1 = arith.constant 0 : index
    %0 = vector.load %arg1[%c0, %c0_0, %c0_1] : memref<4x16x32xf32, #tpu.memory_space<vmem>>, vector<4x16x32xf32>
    %1 = vector.shape_cast %0 : vector<4x16x32xf32> to vector<64x32xf32>
    %c0_2 = arith.constant 0 : index
    %c0_3 = arith.constant 0 : index
    %2 = vector.load %arg2[%c0_2, %c0_3] : memref<1x32xf32, #tpu.memory_space<vmem>>, vector<1x32xf32>
    %3 = vector.broadcast %2 : vector<1x32xf32> to vector<64x32xf32>
    %4 = arith.mulf %1, %3 : vector<64x32xf32>
    %c0_4 = arith.constant 0 : index
    %c0_5 = arith.constant 0 : index
    %5 = vector.load %arg3[%c0_4, %c0_5] : memref<1x32xf32, #tpu.memory_space<vmem>>, vector<1x32xf32>
    %6 = vector.broadcast %5 : vector<1x32xf32> to vector<64x32xf32>
    %7 = arith.addf %4, %6 : vector<64x32xf32>
    %c0_6 = arith.constant 0 : index
    %c0_7 = arith.constant 0 : index
    %8 = vector.load %arg4[%c0_6, %c0_7] : memref<32x64xbf16, #tpu.memory_space<vmem>>, vector<32x64xbf16>
    %9 = arith.truncf %7 : vector<64x32xf32> to vector<64x32xbf16>
    %cst = arith.constant dense<0.000000e+00> : vector<64x64xf32>
    %10 = tpu.matmul %9, %8, %cst {dimension_numbers = #tpu.dot_dimension_numbers<[1], [0], [0], [1], [0, 0, 1, 1], [], []>} : vector<64x32xbf16>, vector<32x64xbf16>, vector<64x64xf32> -> vector<64x64xf32>
    %c0_8 = arith.constant 0 : index
    %c0_9 = arith.constant 0 : index
    %11 = vector.load %arg5[%c0_8, %c0_9] : memref<1x64xf32, #tpu.memory_space<vmem>>, vector<1x64xf32>
    %12 = vector.broadcast %11 : vector<1x64xf32> to vector<64x64xf32>
    %13 = arith.addf %10, %12 : vector<64x64xf32>
    %cst_10 = arith.constant 0.000000e+00 : f32
    %14 = vector.broadcast %cst_10 : f32 to vector<64x64xf32>
    %15 = arith.maximumf %13, %14 : vector<64x64xf32>
    %c0_11 = arith.constant 0 : index
    %c0_12 = arith.constant 0 : index
    %16 = vector.load %arg6[%c0_11, %c0_12] : memref<64x32xbf16, #tpu.memory_space<vmem>>, vector<64x32xbf16>
    %17 = arith.truncf %15 : vector<64x64xf32> to vector<64x64xbf16>
    %cst_13 = arith.constant dense<0.000000e+00> : vector<64x32xf32>
    %18 = tpu.matmul %17, %16, %cst_13 {dimension_numbers = #tpu.dot_dimension_numbers<[1], [0], [0], [1], [0, 0, 1, 1], [], []>} : vector<64x64xbf16>, vector<64x32xbf16>, vector<64x32xf32> -> vector<64x32xf32>
    %19 = arith.addf %7, %18 : vector<64x32xf32>
    %c0_14 = arith.constant 0 : index
    %c0_15 = arith.constant 0 : index
    %20 = vector.load %arg7[%c0_14, %c0_15] : memref<1x32xf32, #tpu.memory_space<vmem>>, vector<1x32xf32>
    %21 = vector.broadcast %20 : vector<1x32xf32> to vector<64x32xf32>
    %22 = arith.addf %19, %21 : vector<64x32xf32>
    %23 = vector.shape_cast %22 : vector<64x32xf32> to vector<4x16x32xf32>
    %c0_16 = arith.constant 0 : index
    %c0_17 = arith.constant 0 : index
    %c0_18 = arith.constant 0 : index
    %24 = vector.load %arg8[%c0_16, %c0_17, %c0_18] : memref<4x16x32xf32, #tpu.memory_space<vmem>>, vector<4x16x32xf32>
    tpu.vector_store %arg8[%c0_16, %c0_17, %c0_18], %23 {strides = array<i32>} : memref<4x16x32xf32, #tpu.memory_space<vmem>>, vector<4x16x32xf32>,
    %cst_19 = arith.constant dense<0.000000e+00> : vector<32xf32>
    %25 = vector.multi_reduction <add>, %22, %cst_19 [0] : vector<64x32xf32> to vector<32xf32>
    %26 = vector.shape_cast %25 : vector<32xf32> to vector<1x32xf32>
    %27 = vector.shape_cast %26 : vector<1x32xf32> to vector<1x1x32xf32>
    %28 = arith.mulf %22, %22 : vector<64x32xf32>
    %cst_20 = arith.constant dense<0.000000e+00> : vector<32xf32>
    %29 = vector.multi_reduction <add>, %28, %cst_20 [0] : vector<64x32xf32> to vector<32xf32>
    %30 = vector.shape_cast %29 : vector<32xf32> to vector<1x32xf32>
    %31 = vector.shape_cast %30 : vector<1x32xf32> to vector<1x1x32xf32>
    %c0_21 = arith.constant 0 : index
    %c0_22 = arith.constant 0 : index
    %c0_23 = arith.constant 0 : index
    %32 = vector.load %arg9[%c0_21, %c0_22, %c0_23] : memref<1x2x32xf32, #tpu.memory_space<vmem>>, vector<1x1x32xf32>
    tpu.vector_store %arg9[%c0_21, %c0_22, %c0_23], %27 {strides = array<i32>} : memref<1x2x32xf32, #tpu.memory_space<vmem>>, vector<1x1x32xf32>,
    %c0_24 = arith.constant 0 : index
    %c1 = arith.constant 1 : index
    %c0_25 = arith.constant 0 : index
    %33 = vector.load %arg9[%c0_24, %c1, %c0_25] : memref<1x2x32xf32, #tpu.memory_space<vmem>>, vector<1x1x32xf32>
    tpu.vector_store %arg9[%c0_24, %c1, %c0_25], %31 {strides = array<i32>} : memref<1x2x32xf32, #tpu.memory_space<vmem>>, vector<1x1x32xf32>,
    return
  }
  func.func @transform_0(%arg0: i32) -> (i32, i32, i32) {
    %c0_i32 = arith.constant 0 : i32
    %c0_i32_0 = arith.constant 0 : i32
    %c0_i32_1 = arith.constant 0 : i32
    return %arg0, %c0_i32, %c0_i32_0 : i32, i32, i32
  }
  func.func @transform_1(%arg0: i32) -> (i32, i32) {
    %c0_i32 = arith.constant 0 : i32
    %c0_i32_0 = arith.constant 0 : i32
    %c0_i32_1 = arith.constant 0 : i32
    return %c0_i32, %c0_i32_0 : i32, i32
  }
  func.func @transform_2(%arg0: i32) -> (i32, i32) {
    %c0_i32 = arith.constant 0 : i32
    %c0_i32_0 = arith.constant 0 : i32
    %c0_i32_1 = arith.constant 0 : i32
    return %c0_i32, %c0_i32_0 : i32, i32
  }
  func.func @transform_3(%arg0: i32) -> (i32, i32) {
    %c0_i32 = arith.constant 0 : i32
    %c0_i32_0 = arith.constant 0 : i32
    %c0_i32_1 = arith.constant 0 : i32
    return %c0_i32, %c0_i32_0 : i32, i32
  }
  func.func @transform_4(%arg0: i32) -> (i32, i32) {
    %c0_i32 = arith.constant 0 : i32
    %c0_i32_0 = arith.constant 0 : i32
    %c0_i32_1 = arith.constant 0 : i32
    return %c0_i32, %c0_i32_0 : i32, i32
  }
  func.func @transform_5(%arg0: i32) -> (i32, i32) {
    %c0_i32 = arith.constant 0 : i32
    %c0_i32_0 = arith.constant 0 : i32
    %c0_i32_1 = arith.constant 0 : i32
    return %c0_i32, %c0_i32_0 : i32, i32
  }
  func.func @transform_6(%arg0: i32) -> (i32, i32) {
    %c0_i32 = arith.constant 0 : i32
    %c0_i32_0 = arith.constant 0 : i32
    %c0_i32_1 = arith.constant 0 : i32
    return %c0_i32, %c0_i32_0 : i32, i32
  }
  func.func @transform_7(%arg0: i32) -> (i32, i32, i32) {
    %c0_i32 = arith.constant 0 : i32
    %c0_i32_0 = arith.constant 0 : i32
    %c0_i32_1 = arith.constant 0 : i32
    return %arg0, %c0_i32, %c0_i32_0 : i32, i32, i32
  }
  func.func @transform_8(%arg0: i32) -> (i32, i32, i32) {
    %c0_i32 = arith.constant 0 : i32
    %c0_i32_0 = arith.constant 0 : i32
    %c0_i32_1 = arith.constant 0 : i32
    return %arg0, %c0_i32, %c0_i32_0 : i32, i32, i32
  }
}

module attributes {stable_mosaic.version = 11 : i64} {
  func.func @_attn_layer_kernel(%arg0: i32, %arg1: memref<4x16x32xf32, #tpu.memory_space<vmem>>, %arg2: memref<4x4x256xf32, #tpu.memory_space<vmem>>, %arg3: memref<1x32xf32, #tpu.memory_space<vmem>>, %arg4: memref<1x32xf32, #tpu.memory_space<vmem>>, %arg5: memref<32x96xbf16, #tpu.memory_space<vmem>>, %arg6: memref<1x96xf32, #tpu.memory_space<vmem>>, %arg7: memref<32x32xbf16, #tpu.memory_space<vmem>>, %arg8: memref<1x32xf32, #tpu.memory_space<vmem>>, %arg9: memref<4x16x32xf32, #tpu.memory_space<vmem>>, %arg10: memref<1x2x32xf32, #tpu.memory_space<vmem>>) attributes {dimension_semantics = [#tpu.dimension_semantics<parallel>], iteration_bounds = array<i64: 2>, scalar_prefetch = 0 : i64, scratch_operands = 0 : i64, tpu.core_type = #tpu.core_type<tc>, window_params = [{transform_indices = @transform_0, window_bounds = array<i64: 4, 16, 32>}, {transform_indices = @transform_1, window_bounds = array<i64: 4, 4, 256>}, {pipeline_mode = #tpu.pipeline_mode<synchronous>, transform_indices = @transform_2, window_bounds = array<i64: 1, 32>}, {pipeline_mode = #tpu.pipeline_mode<synchronous>, transform_indices = @transform_3, window_bounds = array<i64: 1, 32>}, {pipeline_mode = #tpu.pipeline_mode<synchronous>, transform_indices = @transform_4, window_bounds = array<i64: 32, 96>}, {pipeline_mode = #tpu.pipeline_mode<synchronous>, transform_indices = @transform_5, window_bounds = array<i64: 1, 96>}, {pipeline_mode = #tpu.pipeline_mode<synchronous>, transform_indices = @transform_6, window_bounds = array<i64: 32, 32>}, {pipeline_mode = #tpu.pipeline_mode<synchronous>, transform_indices = @transform_7, window_bounds = array<i64: 1, 32>}, {transform_indices = @transform_8, window_bounds = array<i64: 4, 16, 32>}, {transform_indices = @transform_9, window_bounds = array<i64: 1, 2, 32>}]} {
    %c0 = arith.constant 0 : index
    %c0_0 = arith.constant 0 : index
    %c0_1 = arith.constant 0 : index
    %0 = vector.load %arg1[%c0, %c0_0, %c0_1] : memref<4x16x32xf32, #tpu.memory_space<vmem>>, vector<4x16x32xf32>
    %c0_2 = arith.constant 0 : index
    %c0_3 = arith.constant 0 : index
    %1 = vector.load %arg3[%c0_2, %c0_3] : memref<1x32xf32, #tpu.memory_space<vmem>>, vector<1x32xf32>
    %2 = vector.shape_cast %1 : vector<1x32xf32> to vector<1x1x32xf32>
    %3 = vector.broadcast %2 : vector<1x1x32xf32> to vector<4x16x32xf32>
    %4 = arith.mulf %0, %3 : vector<4x16x32xf32>
    %c0_4 = arith.constant 0 : index
    %c0_5 = arith.constant 0 : index
    %5 = vector.load %arg4[%c0_4, %c0_5] : memref<1x32xf32, #tpu.memory_space<vmem>>, vector<1x32xf32>
    %6 = vector.shape_cast %5 : vector<1x32xf32> to vector<1x1x32xf32>
    %7 = vector.broadcast %6 : vector<1x1x32xf32> to vector<4x16x32xf32>
    %8 = arith.addf %4, %7 : vector<4x16x32xf32>
    %9 = vector.shape_cast %8 : vector<4x16x32xf32> to vector<64x32xf32>
    %c0_6 = arith.constant 0 : index
    %c0_7 = arith.constant 0 : index
    %10 = vector.load %arg5[%c0_6, %c0_7] : memref<32x96xbf16, #tpu.memory_space<vmem>>, vector<32x96xbf16>
    %11 = arith.truncf %9 : vector<64x32xf32> to vector<64x32xbf16>
    %cst = arith.constant dense<0.000000e+00> : vector<64x96xf32>
    %12 = tpu.matmul %11, %10, %cst {dimension_numbers = #tpu.dot_dimension_numbers<[1], [0], [0], [1], [0, 0, 1, 1], [], []>} : vector<64x32xbf16>, vector<32x96xbf16>, vector<64x96xf32> -> vector<64x96xf32>
    %c0_8 = arith.constant 0 : index
    %c0_9 = arith.constant 0 : index
    %13 = vector.load %arg6[%c0_8, %c0_9] : memref<1x96xf32, #tpu.memory_space<vmem>>, vector<1x96xf32>
    %14 = vector.broadcast %13 : vector<1x96xf32> to vector<64x96xf32>
    %15 = arith.addf %12, %14 : vector<64x96xf32>
    %16 = vector.extract_strided_slice %15 {offsets = [0, 0], sizes = [64, 32], strides = [1, 1]} : vector<64x96xf32> to vector<64x32xf32>
    %17 = vector.shape_cast %16 : vector<64x32xf32> to vector<4x16x4x8xf32>
    %18 = tpu.transpose %17, [0, 2, 1, 3] : vector<4x16x4x8xf32> -> vector<4x4x16x8xf32>
    %19 = vector.shape_cast %18 : vector<4x4x16x8xf32> to vector<16x16x8xf32>
    %20 = vector.extract_strided_slice %15 {offsets = [0, 32], sizes = [64, 32], strides = [1, 1]} : vector<64x96xf32> to vector<64x32xf32>
    %21 = vector.shape_cast %20 : vector<64x32xf32> to vector<4x16x4x8xf32>
    %22 = tpu.transpose %21, [0, 2, 1, 3] : vector<4x16x4x8xf32> -> vector<4x4x16x8xf32>
    %23 = vector.shape_cast %22 : vector<4x4x16x8xf32> to vector<16x16x8xf32>
    %24 = vector.extract_strided_slice %15 {offsets = [0, 64], sizes = [64, 32], strides = [1, 1]} : vector<64x96xf32> to vector<64x32xf32>
    %25 = vector.shape_cast %24 : vector<64x32xf32> to vector<4x16x4x8xf32>
    %26 = tpu.transpose %25, [0, 2, 1, 3] : vector<4x16x4x8xf32> -> vector<4x4x16x8xf32>
    %27 = vector.shape_cast %26 : vector<4x4x16x8xf32> to vector<16x16x8xf32>
    %28 = arith.truncf %19 : vector<16x16x8xf32> to vector<16x16x8xbf16>
    %29 = arith.truncf %23 : vector<16x16x8xf32> to vector<16x16x8xbf16>
    "tpu.trace_start"() <{level = 10 : i32, message = "bld,bmd->blm"}> : () -> ()
    %cst_10 = arith.constant dense<0.000000e+00> : vector<16x16x16xf32>
    %30 = tpu.matmul %28, %29, %cst_10 {dimension_numbers = #tpu.dot_dimension_numbers<[2], [2], [1], [1], [0, 0, 0, 1, 1, 1], [0], [0]>} : vector<16x16x8xbf16>, vector<16x16x8xbf16>, vector<16x16x16xf32> -> vector<16x16x16xf32>
    "tpu.trace_stop"() : () -> ()
    %cst_11 = arith.constant 0.353553385 : f32
    %31 = vector.broadcast %cst_11 : f32 to vector<16x16x16xf32>
    %32 = arith.mulf %30, %31 : vector<16x16x16xf32>
    %c0_12 = arith.constant 0 : index
    %c0_13 = arith.constant 0 : index
    %c0_14 = arith.constant 0 : index
    %33 = vector.load %arg2[%c0_12, %c0_13, %c0_14] : memref<4x4x256xf32, #tpu.memory_space<vmem>>, vector<4x4x256xf32>
    %34 = vector.shape_cast %33 : vector<4x4x256xf32> to vector<16x16x16xf32>
    %35 = arith.addf %32, %34 : vector<16x16x16xf32>
    %cst_15 = arith.constant dense<0xFF800000> : vector<16x16xf32>
    %36 = vector.multi_reduction <maximumf>, %35, %cst_15 [2] : vector<16x16x16xf32> to vector<16x16xf32>
    %37 = vector.shape_cast %36 : vector<16x16xf32> to vector<16x16x1xf32>
    %38 = vector.broadcast %37 : vector<16x16x1xf32> to vector<16x16x16xf32>
    %39 = arith.subf %35, %38 : vector<16x16x16xf32>
    %40 = math.exp %39 : vector<16x16x16xf32>
    %cst_16 = arith.constant dense<0.000000e+00> : vector<16x16xf32>
    %41 = vector.multi_reduction <add>, %40, %cst_16 [2] : vector<16x16x16xf32> to vector<16x16xf32>
    %42 = vector.shape_cast %41 : vector<16x16xf32> to vector<16x16x1xf32>
    %43 = tpu.reciprocal %42 {approx = true} : vector<16x16x1xf32> -> vector<16x16x1xf32>
    %44 = vector.broadcast %43 : vector<16x16x1xf32> to vector<16x16x16xf32>
    %45 = arith.mulf %40, %44 : vector<16x16x16xf32>
    %46 = arith.truncf %45 : vector<16x16x16xf32> to vector<16x16x16xbf16>
    %47 = arith.truncf %27 : vector<16x16x8xf32> to vector<16x16x8xbf16>
    "tpu.trace_start"() <{level = 10 : i32, message = "blm,bmd->bld"}> : () -> ()
    %cst_17 = arith.constant dense<0.000000e+00> : vector<16x16x8xf32>
    %48 = tpu.matmul %46, %47, %cst_17 {dimension_numbers = #tpu.dot_dimension_numbers<[2], [1], [1], [2], [0, 0, 0, 1, 1, 2], [0], [0]>} : vector<16x16x16xbf16>, vector<16x16x8xbf16>, vector<16x16x8xf32> -> vector<16x16x8xf32>
    "tpu.trace_stop"() : () -> ()
    %49 = vector.shape_cast %48 : vector<16x16x8xf32> to vector<4x4x16x8xf32>
    %50 = tpu.transpose %49, [0, 2, 1, 3] : vector<4x4x16x8xf32> -> vector<4x16x4x8xf32>
    %51 = vector.shape_cast %50 : vector<4x16x4x8xf32> to vector<64x32xf32>
    %c0_18 = arith.constant 0 : index
    %c0_19 = arith.constant 0 : index
    %52 = vector.load %arg7[%c0_18, %c0_19] : memref<32x32xbf16, #tpu.memory_space<vmem>>, vector<32x32xbf16>
    %53 = arith.truncf %51 : vector<64x32xf32> to vector<64x32xbf16>
    %cst_20 = arith.constant dense<0.000000e+00> : vector<64x32xf32>
    %54 = tpu.matmul %53, %52, %cst_20 {dimension_numbers = #tpu.dot_dimension_numbers<[1], [0], [0], [1], [0, 0, 1, 1], [], []>} : vector<64x32xbf16>, vector<32x32xbf16>, vector<64x32xf32> -> vector<64x32xf32>
    %c0_21 = arith.constant 0 : index
    %c0_22 = arith.constant 0 : index
    %55 = vector.load %arg8[%c0_21, %c0_22] : memref<1x32xf32, #tpu.memory_space<vmem>>, vector<1x32xf32>
    %56 = vector.broadcast %55 : vector<1x32xf32> to vector<64x32xf32>
    %57 = arith.addf %54, %56 : vector<64x32xf32>
    %58 = arith.addf %9, %57 : vector<64x32xf32>
    %59 = vector.shape_cast %58 : vector<64x32xf32> to vector<4x16x32xf32>
    %c0_23 = arith.constant 0 : index
    %c0_24 = arith.constant 0 : index
    %c0_25 = arith.constant 0 : index
    %60 = vector.load %arg9[%c0_23, %c0_24, %c0_25] : memref<4x16x32xf32, #tpu.memory_space<vmem>>, vector<4x16x32xf32>
    tpu.vector_store %arg9[%c0_23, %c0_24, %c0_25], %59 {strides = array<i32>} : memref<4x16x32xf32, #tpu.memory_space<vmem>>, vector<4x16x32xf32>,
    %cst_26 = arith.constant dense<0.000000e+00> : vector<32xf32>
    %61 = vector.multi_reduction <add>, %58, %cst_26 [0] : vector<64x32xf32> to vector<32xf32>
    %62 = vector.shape_cast %61 : vector<32xf32> to vector<1x32xf32>
    %63 = vector.shape_cast %62 : vector<1x32xf32> to vector<1x1x32xf32>
    %64 = arith.mulf %58, %58 : vector<64x32xf32>
    %cst_27 = arith.constant dense<0.000000e+00> : vector<32xf32>
    %65 = vector.multi_reduction <add>, %64, %cst_27 [0] : vector<64x32xf32> to vector<32xf32>
    %66 = vector.shape_cast %65 : vector<32xf32> to vector<1x32xf32>
    %67 = vector.shape_cast %66 : vector<1x32xf32> to vector<1x1x32xf32>
    %c0_28 = arith.constant 0 : index
    %c0_29 = arith.constant 0 : index
    %c0_30 = arith.constant 0 : index
    %68 = vector.load %arg10[%c0_28, %c0_29, %c0_30] : memref<1x2x32xf32, #tpu.memory_space<vmem>>, vector<1x1x32xf32>
    tpu.vector_store %arg10[%c0_28, %c0_29, %c0_30], %63 {strides = array<i32>} : memref<1x2x32xf32, #tpu.memory_space<vmem>>, vector<1x1x32xf32>,
    %c0_31 = arith.constant 0 : index
    %c1 = arith.constant 1 : index
    %c0_32 = arith.constant 0 : index
    %69 = vector.load %arg10[%c0_31, %c1, %c0_32] : memref<1x2x32xf32, #tpu.memory_space<vmem>>, vector<1x1x32xf32>
    tpu.vector_store %arg10[%c0_31, %c1, %c0_32], %67 {strides = array<i32>} : memref<1x2x32xf32, #tpu.memory_space<vmem>>, vector<1x1x32xf32>,
    return
  }
  func.func @transform_0(%arg0: i32) -> (i32, i32, i32) {
    %c0_i32 = arith.constant 0 : i32
    %c0_i32_0 = arith.constant 0 : i32
    %c0_i32_1 = arith.constant 0 : i32
    return %arg0, %c0_i32, %c0_i32_0 : i32, i32, i32
  }
  func.func @transform_1(%arg0: i32) -> (i32, i32, i32) {
    %c0_i32 = arith.constant 0 : i32
    %c0_i32_0 = arith.constant 0 : i32
    %c0_i32_1 = arith.constant 0 : i32
    return %arg0, %c0_i32, %c0_i32_0 : i32, i32, i32
  }
  func.func @transform_2(%arg0: i32) -> (i32, i32) {
    %c0_i32 = arith.constant 0 : i32
    %c0_i32_0 = arith.constant 0 : i32
    %c0_i32_1 = arith.constant 0 : i32
    return %c0_i32, %c0_i32_0 : i32, i32
  }
  func.func @transform_3(%arg0: i32) -> (i32, i32) {
    %c0_i32 = arith.constant 0 : i32
    %c0_i32_0 = arith.constant 0 : i32
    %c0_i32_1 = arith.constant 0 : i32
    return %c0_i32, %c0_i32_0 : i32, i32
  }
  func.func @transform_4(%arg0: i32) -> (i32, i32) {
    %c0_i32 = arith.constant 0 : i32
    %c0_i32_0 = arith.constant 0 : i32
    %c0_i32_1 = arith.constant 0 : i32
    return %c0_i32, %c0_i32_0 : i32, i32
  }
  func.func @transform_5(%arg0: i32) -> (i32, i32) {
    %c0_i32 = arith.constant 0 : i32
    %c0_i32_0 = arith.constant 0 : i32
    %c0_i32_1 = arith.constant 0 : i32
    return %c0_i32, %c0_i32_0 : i32, i32
  }
  func.func @transform_6(%arg0: i32) -> (i32, i32) {
    %c0_i32 = arith.constant 0 : i32
    %c0_i32_0 = arith.constant 0 : i32
    %c0_i32_1 = arith.constant 0 : i32
    return %c0_i32, %c0_i32_0 : i32, i32
  }
  func.func @transform_7(%arg0: i32) -> (i32, i32) {
    %c0_i32 = arith.constant 0 : i32
    %c0_i32_0 = arith.constant 0 : i32
    %c0_i32_1 = arith.constant 0 : i32
    return %c0_i32, %c0_i32_0 : i32, i32
  }
  func.func @transform_8(%arg0: i32) -> (i32, i32, i32) {
    %c0_i32 = arith.constant 0 : i32
    %c0_i32_0 = arith.constant 0 : i32
    %c0_i32_1 = arith.constant 0 : i32
    return %arg0, %c0_i32, %c0_i32_0 : i32, i32, i32
  }
  func.func @transform_9(%arg0: i32) -> (i32, i32, i32) {
    %c0_i32 = arith.constant 0 : i32
    %c0_i32_0 = arith.constant 0 : i32
    %c0_i32_1 = arith.constant 0 : i32
    return %arg0, %c0_i32, %c0_i32_0 : i32, i32, i32
  }
}

module attributes {stable_mosaic.version = 11 : i64} {
  func.func @_affine_kernel(%arg0: i32, %arg1: memref<4x16x32xf32, #tpu.memory_space<vmem>>, %arg2: memref<1x32xf32, #tpu.memory_space<vmem>>, %arg3: memref<1x32xf32, #tpu.memory_space<vmem>>, %arg4: memref<4x16x32xf32, #tpu.memory_space<vmem>>) attributes {dimension_semantics = [#tpu.dimension_semantics<parallel>], iteration_bounds = array<i64: 2>, scalar_prefetch = 0 : i64, scratch_operands = 0 : i64, tpu.core_type = #tpu.core_type<tc>, window_params = [{transform_indices = @transform_0, window_bounds = array<i64: 4, 16, 32>}, {pipeline_mode = #tpu.pipeline_mode<synchronous>, transform_indices = @transform_1, window_bounds = array<i64: 1, 32>}, {pipeline_mode = #tpu.pipeline_mode<synchronous>, transform_indices = @transform_2, window_bounds = array<i64: 1, 32>}, {transform_indices = @transform_3, window_bounds = array<i64: 4, 16, 32>}]} {
    %c0 = arith.constant 0 : index
    %c0_0 = arith.constant 0 : index
    %c0_1 = arith.constant 0 : index
    %0 = vector.load %arg1[%c0, %c0_0, %c0_1] : memref<4x16x32xf32, #tpu.memory_space<vmem>>, vector<4x16x32xf32>
    %c0_2 = arith.constant 0 : index
    %c0_3 = arith.constant 0 : index
    %1 = vector.load %arg2[%c0_2, %c0_3] : memref<1x32xf32, #tpu.memory_space<vmem>>, vector<1x32xf32>
    %2 = vector.shape_cast %1 : vector<1x32xf32> to vector<1x1x32xf32>
    %3 = vector.broadcast %2 : vector<1x1x32xf32> to vector<4x16x32xf32>
    %4 = arith.mulf %0, %3 : vector<4x16x32xf32>
    %c0_4 = arith.constant 0 : index
    %c0_5 = arith.constant 0 : index
    %5 = vector.load %arg3[%c0_4, %c0_5] : memref<1x32xf32, #tpu.memory_space<vmem>>, vector<1x32xf32>
    %6 = vector.shape_cast %5 : vector<1x32xf32> to vector<1x1x32xf32>
    %7 = vector.broadcast %6 : vector<1x1x32xf32> to vector<4x16x32xf32>
    %8 = arith.addf %4, %7 : vector<4x16x32xf32>
    %c0_6 = arith.constant 0 : index
    %c0_7 = arith.constant 0 : index
    %c0_8 = arith.constant 0 : index
    %9 = vector.load %arg4[%c0_6, %c0_7, %c0_8] : memref<4x16x32xf32, #tpu.memory_space<vmem>>, vector<4x16x32xf32>
    tpu.vector_store %arg4[%c0_6, %c0_7, %c0_8], %8 {strides = array<i32>} : memref<4x16x32xf32, #tpu.memory_space<vmem>>, vector<4x16x32xf32>,
    return
  }
  func.func @transform_0(%arg0: i32) -> (i32, i32, i32) {
    %c0_i32 = arith.constant 0 : i32
    %c0_i32_0 = arith.constant 0 : i32
    %c0_i32_1 = arith.constant 0 : i32
    return %arg0, %c0_i32, %c0_i32_0 : i32, i32, i32
  }
  func.func @transform_1(%arg0: i32) -> (i32, i32) {
    %c0_i32 = arith.constant 0 : i32
    %c0_i32_0 = arith.constant 0 : i32
    %c0_i32_1 = arith.constant 0 : i32
    return %c0_i32, %c0_i32_0 : i32, i32
  }
  func.func @transform_2(%arg0: i32) -> (i32, i32) {
    %c0_i32 = arith.constant 0 : i32
    %c0_i32_0 = arith.constant 0 : i32
    %c0_i32_1 = arith.constant 0 : i32
    return %c0_i32, %c0_i32_0 : i32, i32
  }
  func.func @transform_3(%arg0: i32) -> (i32, i32, i32) {
    %c0_i32 = arith.constant 0 : i32
    %c0_i32_0 = arith.constant 0 : i32
    %c0_i32_1 = arith.constant 0 : i32
    return %arg0, %c0_i32, %c0_i32_0 : i32, i32, i32
  }
}

</mosaic_0001>

<bundles_post_ra>
// kernel: patchtst_encoder_forward.9
= control target key start
LH: loop header
LB: loop body
LE: loop exit
PB: predicated region body
PF: predicated region fallthrough
CT: control target
= control target key end

     0   :  { %8 = vsyncpa [#allocation3], 0  ;;  %s566_s0 = inlined_call_operand.vmem [shape: f32[8,16,32], index: 0, kind: input, shape index: {}]   ;;  %s567_s1 = inlined_call_operand.vmem [shape: f32[1,32], index: 1, kind: input, shape index: {}]   ;;  %s568_s2 = inlined_call_operand.vmem [shape: f32[1,32], index: 2, kind: input, shape index: {}]   ;;  %s569_s3 = inlined_call_operand.hbm [shape: f32[8,16,32], index: 3, kind: output, shape index: {}]  }
   0x1   :  { %10 = vsyncpa [#allocation3 + $0x1], 0  ;;  %s446_s12 = smov 0   ;;  %s448_s13 = smov 0  }
   0x2   :  { %s450_s14 = smov 0   ;;  %s452_s15 = smov 0  }
   0x3 LB: > { %s467_s16 = sadd.s32 4294967295, %s421_s15   ;;  %s299_s17 = sadd.s32 4294967294, %s421_s15   ;;  %s421_s15 = sphi %s452_s15, %s575_s15   ;;  %s417_s14 = sphi %s450_s14, %s574_s14   ;;  %s413_s13 = sphi %s448_s13, %s573_s13   ;;  %s409_s12 = sphi %s446_s12, %s572_s12  }
   0x4   : > { %s471_s18 = sadd.s32 1, %s421_s15   ;;  %s91_s19 = sadd.s32 1, %s417_s14 }
   0x5   : > { %s88_s20 = ssub.s32 %s421_s15, %s471_s18  ;;  %p101_p0 = scmp.ne.s32.totalorder %s417_s14, %s413_s13 }
   0x6   : > { %p89_p1 = scmp.eq.s32.totalorder %s88_s20, 0  ;;  %p102_p2 = scmp.eq.s32.totalorder %s467_s16, 1 }
   0x7   : > { %p107_p3 = scmp.ne.s32.totalorder %s413_s13, %s409_s12  ;;  %p108_p4 = scmp.eq.s32.totalorder %s299_s17, 1 }
   0x8   : > { %s482_s21 = scalar_select %p89_p1, %s417_s14, %s91_s19  }
   0x9   : > { %p484_p5 = por %p102_p2, %p101_p0  ;;  %p488_p6 = por %p108_p4, %p107_p3 }
   0xa   : > { %p302_p7 = scmp.ge.s32.totalorder %s421_s15, 1  ;;  %p142_p8 = scmp.lt.s32.totalorder %s421_s15, 3 }
   0xc   : > { %p143_p9 = pnand %p302_p7, %p142_p8 }
   0xd   : > { %s164_s24 = sand.u32 (!%p143_p9), 1, %s413_s13   ;;  %s304_s25 = sshll.u32 (!%p143_p9), %s467_s16, 2  ;;  %v307_v0 = vld [vmem:[%s567_s1] ss:$0 sm:$0xff] (!%p143_p9)  ;;  %vm213_vm0 = vcmask (!%p143_p9), 261120  }
   0xe   : > { %146 = sbr.rel (%p143_p9) target bundleno = 47 (0x2f), region = 32  ;;  %p168_p10 = scmp.lt.s32.totalorder (!%p143_p9), %s304_s25, 7  ;;  %v308_v1 = vld [vmem:[%s568_s2] ss:$0 sm:$0xff] (!%p143_p9) }
   0xf   : > { %s303_s26 = sshll.u32 (!%p143_p9), %s164_s24, 6  ;;  %s317_s10 = sshll.u32 (!%p143_p9), %s467_s16, 10 }
  0x10   : > { %s166_s8 = scalar_lea.vmem (!%p143_p9), [#allocation2], %s303_s26  ;;  %s516_s17 = scalar_lea.hbm (!%p143_p9), %s569_s3, %s317_s10 }
  0x11   : > { %s237_s9 = sshll.u32 (!%p143_p9), %s166_s8, 4  ;;  %s525_s19 = scalar_lea.sflag (!%p143_p9), [#allocation3], %s164_s24  ;;  %s509_s9 = int_to_ptr.vmem [resolvable:$true] %s237_s9 }
  0x12   : > { %s359_s20 = scalar_lea.vmem (!%p143_p9), %s509_s9, 1024 }
  0x13   : > { %p360_p11 = scmp.ne.s32.totalorder (!%p143_p9), %s509_s9, %s359_s20 }
  0x15   : > { %s577_s25 = smov (!%p168_p10, %s304_s25), 7  ;;  %p361_p12 = pnand %p360_p11, %p484_p5 }
  0x16   : > { %s315_s27 = sshll.u32 %s577_s25, 4  ;;  %s423_s25 = smov [#allocation2]  }
  0x17   : > { %s172_s5 = scalar_lea.vmem %s566_s0, %s315_s27  ;;  %p362_p13 = pneg %p361_p12 }
  0x18   : > { %v175_v2 = vld [vmem:[%s172_s5] sm:$0xff]  ;;  %v176_v3 = vld [vmem:[%s172_s5 + $0x8] sm:$0xff]  ;;  %v177_v4 = vld [vmem:[%s172_s5 + $0x10] sm:$0xff]  ;;  %s363_s26 = sshll.u32 %s423_s25, 4  ;;  %s364_s26 = int_to_ptr.vmem [resolvable:$false] %s363_s26 }
  0x19   : > { %v190_v5 = vmul.f32 %v307_v0, %v175_v2  ;;  %v191_v6 = vmul.f32 %v307_v0, %v176_v3  ;;  %v192_v7 = vmul.f32 %v307_v0, %v177_v4  ;;  %v178_v8 = vld [vmem:[%s172_s5 + $0x18] sm:$0xff]  ;;  %v179_v9 = vld [vmem:[%s172_s5 + $0x20] sm:$0xff]  ;;  %v180_v10 = vld [vmem:[%s172_s5 + $0x28] sm:$0xff]  ;;  %s365_s27 = scalar_lea.vmem %s364_s26, 2048  ;;  %p366_p0 = scmp.lt.s32.totalorder %s509_s9, %s364_s26 }
  0x1a   : > { %v193_v11 = vmul.f32 %v307_v0, %v178_v8  ;;  %v194_v12 = vmul.f32 %v307_v0, %v179_v9  ;;  %v195_v13 = vmul.f32 %v307_v0, %v180_v10  ;;  %v181_v14 = vld [vmem:[%s172_s5 + $0x30] sm:$0xff]  ;;  %v182_v15 = vld [vmem:[%s172_s5 + $0x38] sm:$0xff]  ;;  %p367_p1 = scmp.lt.s32.totalorder %s365_s27, %s359_s20 }
  0x1b   : > { %v205_v16 = vadd.f32 %v308_v1, %v190_v5  ;;  %v206_v17 = vadd.f32 %v308_v1, %v191_v6  ;;  %v207_v18 = vadd.f32 %v308_v1, %v192_v7  ;;  %v196_v19 = vmul.f32 %v307_v0, %v181_v14 }
  0x1c   : > { %v208_v20 = vadd.f32 %v308_v1, %v193_v11  ;;  %v209_v21 = vadd.f32 %v308_v1, %v194_v12  ;;  %v210_v22 = vadd.f32 %v308_v1, %v195_v13  ;;  %v197_v23 = vmul.f32 %v307_v0, %v182_v15  ;;  %p368_p2 = por %p367_p1, %p366_p0 }
  0x1d   : > { %214 = vst.msk [vmem:[%s166_s8] sm:$0xff] %vm213_vm0, %v205_v16  ;;  %215 = vst.msk [vmem:[%s166_s8 + $0x8] sm:$0xff] %vm213_vm0, %v206_v17  ;;  %v211_v24 = vadd.f32 %v308_v1, %v196_v19 }
  0x1e   : > { %216 = vst.msk [vmem:[%s166_s8 + $0x10] sm:$0xff] %vm213_vm0, %v207_v18  ;;  %217 = vst.msk [vmem:[%s166_s8 + $0x18] sm:$0xff] %vm213_vm0, %v208_v20  ;;  %v212_v25 = vadd.f32 %v308_v1, %v197_v23  ;;  %p369_p3 = pnand %p368_p2, %p362_p13 }
  0x1f   : > { %218 = vst.msk [vmem:[%s166_s8 + $0x20] sm:$0xff] %vm213_vm0, %v209_v21  ;;  %219 = vst.msk [vmem:[%s166_s8 + $0x28] sm:$0xff] %vm213_vm0, %v210_v22 }
  0x20   : > { %220 = vst.msk [vmem:[%s166_s8 + $0x30] sm:$0xff] %vm213_vm0, %v211_v24  ;;  %221 = vst.msk [vmem:[%s166_s8 + $0x38] sm:$0xff] %vm213_vm0, %v212_v25 }
  0x21   : > { %372 = shalt.err (!%p369_p3)
}
  0x22   : > { %s373_s24 = scalar_lea.hbm %s516_s17, 1024  ;;  %s377_s30 = scalar_lea.hbm %s569_s3, 2048 }
  0x23   : > { %p374_p4 = scmp.ne.s32.totalorder %s516_s17, %s373_s24  ;;  %p378_p9 = scmp.lt.u32.totalorder %s516_s17, %s569_s3 }
  0x24   : > { %p379_p10 = scmp.lt.u32.totalorder %s377_s30, %s373_s24  ;;  %p381_p12 = scmp.lt.u32.totalorder %s373_s24, %s516_s17 }
  0x25   : > { %p375_p7 = pnand %p374_p4, %p484_p5 }
  0x26   : > { %p380_p11 = por %p379_p10, %p378_p9 }
  0x27   : > { %p376_p8 = pneg %p375_p7 }
  0x28   : > { %p382_p13 = por %p381_p12, %p380_p11 }
  0x2a   : > { %p383_p0 = pnand %p382_p13, %p376_p8 }
  0x2c   : > { %386 = shalt.err (!%p383_p0)
}
  0x2d   : > { %s424_s6 = smov 128   ;;  %s425_s7 = smov 8  }
  0x2e   : > { %318 = dma.vmem_to_hbm [thread:$0]  (%p484_p5), %s509_s9, 1024, %s516_s17, %s525_s19, %s424_s6, %s424_s6, %s425_s7  }
  0x2f PF: > { %p324_p1 = scmp.ge.s32.totalorder %s421_s15, 2  ;;  %s252_s8 = sand.u32 1, %s409_s12  }
  0x30   : > { %s253_s10 = scalar_lea.sflag [#allocation3], %s252_s8 }
  0x31   : > { %p321_p2 = pnand %p324_p1, %p488_p6 }
  0x33   : > { %404 = dma.done.wait (!%p321_p2), %s253_s10, 1024  }
  0x34   : > { %406 = vsyncadd (!%p321_p2), %s253_s10, 4294966272  ;;  %p13_p3 = scmp.ge.s32.totalorder %s471_s18, 4   ;;  %s572_s12 = smov %s413_s13 }
  0x35   : > { %s573_s13 = smov %s417_s14  ;;  %s574_s14 = smov %s482_s21 }
  0x36   : > { %s575_s15 = smov %s471_s18  ;;  %15 = sbr.rel (!%p13_p3) target bundleno = 3 (0x3), region = 67 }
  0x3d   :  { %258 = vsyncpa [#allocation3], 1 }
  0x3e   :  { %260 = vsyncpa [#allocation3 + $0x1], 1 }

// kernel: patchtst_encoder_forward.6
= control target key start
LH: loop header
LB: loop body
LE: loop exit
PB: predicated region body
PF: predicated region fallthrough
CT: control target
= control target key end

     0   :  { %s907_s27 = smov 0   ;;  %s1031_s0 = inlined_call_operand.vmem [shape: f32[8,16,32], index: 0, kind: input, shape index: {}]   ;;  %s1032_s1 = inlined_call_operand.vmem [shape: f32[1,32], index: 1, kind: input, shape index: {}]   ;;  %s1033_s2 = inlined_call_operand.vmem [shape: f32[1,32], index: 2, kind: input, shape index: {}]   ;;  %s1034_s3 = inlined_call_operand.vmem [shape: bf16[32,64], index: 3, kind: input, shape index: {}]   ;;  %s1035_s4 = inlined_call_operand.vmem [shape: f32[1,64], index: 4, kind: input, shape index: {}]   ;;  %s1036_s5 = inlined_call_operand.vmem [shape: bf16[64,32], index: 5, kind: input, shape index: {}]   ;;  %s1037_s6 = inlined_call_operand.vmem [shape: f32[1,32], index: 6, kind: input, shape index: {}]   ;;  %s1038_s7 = inlined_call_operand.vmem [shape: f32[8,16,32], index: 7, kind: output, shape index: {0}]   ;;  %s1039_s8 = inlined_call_operand.vmem [shape: f32[2,2,32], index: 8, kind: output, shape index: {1}]  }
   0x1 LB: > { %s913_s28 = sadd.s32 4294967295, %s860_s27   ;;  %p768_p0 = scmp.ge.s32.totalorder %s860_s27, 1  ;;  %s860_s27 = sphi %s907_s27, %s19_s27  }
   0x2   : > { %p267_p1 = scmp.lt.s32.totalorder %s860_s27, 3 }
   0x4   : > { %p268_p2 = pnand %p768_p0, %p267_p1 }
   0x5   : > { %v848_v0 = vld [vmem:[%s1034_s3] sm:$0xff] (!%p268_p2)   ;;  %s769_s9 = sshll.u32 (!%p268_p2), %s913_s28, 2  ;;  %v849_v1 = vld [vmem:[%s1034_s3 + $0x8] sm:$0xff] (!%p268_p2)   ;;  %vm391_vm0 = vcmask (!%p268_p2), 261120   ;;  %v852_v34 = vld [vmem:[%s1036_s5 + $0x10] sm:$0xff] (!%p268_p2)   ;;  %vm513_vm1 = vcmask (!%p268_p2), 523264  }
   0x6   : > { %271 = sbr.rel (%p268_p2) target bundleno = 495 (0x1ef), region = 48  ;;  %p308_p3 = scmp.lt.s32.totalorder (!%p268_p2), %s769_s9, 7  ;;  %812 = vmatprep.subr.bf16.mxu0 (!%p268_p2), %v848_v0  ;;  %v850_v2 = vld [vmem:[%s1036_s5] sm:$0xff] (!%p268_p2)   ;;  %v851_v4 = vld [vmem:[%s1036_s5 + $0x8] sm:$0xff] (!%p268_p2)   ;;  %v853_v35 = vld [vmem:[%s1036_s5 + $0x18] sm:$0xff] (!%p268_p2)   ;;  %vm672_vm2 = vcmask (!%p268_p2), 253952  }
   0x7   : > { %813 = vmatpush3.bf16.msra.mxu0 (!%p268_p2), %v848_v0  ;;  %v776_v3 = vld [vmem:[%s1032_s1] ss:$0 sm:$0xff] (!%p268_p2)  ;;  %824 = vmatprep.subr.bf16.mxu1 (!%p268_p2), %v850_v2  ;;  %p321_p4 = scmp.lt.s32.totalorder (!%p268_p2), %s913_s28, 1 }
   0x8   : > { %814 = vmatprep.subr.bf16.mxu0 (!%p268_p2), %v849_v1  ;;  %825 = vmatpush3.bf16.msra.mxu1 (!%p268_p2), %v850_v2  ;;  %v777_v5 = vld [vmem:[%s1033_s2] ss:$0 sm:$0xff] (!%p268_p2) }
   0x9   : > { %826 = vmatprep.subr.bf16.mxu1 (!%p268_p2), %v851_v4  ;;  %v778_v36 = vld [vmem:[%s1035_s4] ss:$0 sm:$0xff] (!%p268_p2) }
   0xb   : > { %815 = vmatpush3.bf16.msra.mxu0 (!%p268_p2), %v849_v1 }
   0xc   : > { %827 = vmatpush3.bf16.msra.mxu1 (!%p268_p2), %v851_v4 }
   0xd   : > { %s1041_s9 = smov (!%p308_p3, %s769_s9), 7  ;;  %828 = vmatprep.subr.bf16.mxu1 %v852_v34  ;;  %s1043_s28 = smov (!%p321_p4, %s913_s28), 1 }
   0xe   : > { %s796_s18 = sshll.u32 %s1041_s9, 4  ;;  %s775_s9 = sshll.u32 %s1043_s28, 1 }
   0xf   : > { %s312_s21 = scalar_lea.vmem %s1031_s0, %s796_s18  ;;  %s984_s15 = scalar_lea.vmem %s1038_s7, %s796_s18 }
  0x10   : > { %v326_v6 = vld [vmem:[%s312_s21] sm:$0xff]  ;;  %v327_v7 = vld [vmem:[%s312_s21 + $0x8] sm:$0xff]  ;;  %v328_v8 = vld [vmem:[%s312_s21 + $0x10] sm:$0xff]  ;;  %829 = vmatpush3.bf16.msra.mxu1 %v852_v34  ;;  %s324_s18 = scalar_lea.vmem %s1039_s8, %s775_s9 }
  0x11   : > { %v341_v9 = vmul.f32 %v776_v3, %v326_v6  ;;  %v342_v10 = vmul.f32 %v776_v3, %v327_v7  ;;  %v329_v11 = vld [vmem:[%s312_s21 + $0x18] sm:$0xff]  ;;  %v343_v12 = vmul.f32 %v776_v3, %v328_v8  ;;  %v330_v13 = vld [vmem:[%s312_s21 + $0x20] sm:$0xff]  ;;  %v331_v14 = vld [vmem:[%s312_s21 + $0x28] sm:$0xff]  ;;  %830 = vmatprep.subr.bf16.mxu1 %v853_v35 }
  0x12   : > { %v344_v15 = vmul.f32 %v776_v3, %v329_v11  ;;  %v345_v16 = vmul.f32 %v776_v3, %v330_v13  ;;  %v346_v17 = vmul.f32 %v776_v3, %v331_v14  ;;  %v332_v18 = vld [vmem:[%s312_s21 + $0x30] sm:$0xff]  ;;  %v333_v19 = vld [vmem:[%s312_s21 + $0x38] sm:$0xff] }
  0x13   : > { %v356_v20 = vadd.f32 %v777_v5, %v341_v9  ;;  %v944_v21 = vadd.f32 %v777_v5, %v342_v10  ;;  %v358_v22 = vadd.f32 %v777_v5, %v343_v12  ;;  %v347_v23 = vmul.f32 %v776_v3, %v332_v18 }
  0x14   : > { %v359_v24 = vadd.f32 %v777_v5, %v344_v15  ;;  %v946_v25 = vadd.f32 %v777_v5, %v345_v16  ;;  %v948_v26 = vadd.f32 %v777_v5, %v346_v17  ;;  %v348_v27 = vmul.f32 %v776_v3, %v333_v19  ;;  %831 = vmatpush3.bf16.msra.mxu1 %v853_v35  ;;  %v793_v3 = vld [vmem:[%s1037_s6] ss:$0 sm:$0xff] }
  0x15   : > { %v368_v28 = vpack.c.bf16 %v944_v21, %v356_v20  ;;  %v955_v31 = vadd.f32 %v777_v5, %v347_v23 }
  0x16   : > { %v369_v29 = vpack.c.bf16 %v359_v24, %v358_v22  ;;  %v370_v30 = vpack.c.bf16 %v948_v26, %v946_v25  ;;  %v957_v32 = vadd.f32 %v777_v5, %v348_v27 }
  0x17   : > { %816 = vmatprep.mubr.msk.bf16.mxu0 %vm391_vm0, %v368_v28 }
  0x18   : > { %817 = vmatmul.mubr.msk.bf16.vlgmr.msra.gmra.mrb[0].mxu0 %vm391_vm0, %v369_v29  ;;  %v371_v33 = vpack.c.bf16 %v957_v32, %v955_v31 }
  0x19   : > { %820 = vmatprep.mubr.msk.bf16.mxu0 %vm391_vm0, %v370_v30 }
  0x20   : > { %821 = vmatmul.mubr.msk.bf16.gmra.mrb[4].mxu0 %vm391_vm0, %v371_v33 }
  0xeb   : > { %v818_v37 = vpop.f32.mrb[0].mxu0 }
  0xec   : > { %v447_v38 = vadd.f32 %v818_v37, %v778_v36  ;;  %v438_v39 = vpop.f32.mrb[1].mxu0 }
  0xed   : > { %v439_v40 = vadd.f32 %v778_v36, %v438_v39  ;;  %v819_v41 = vpop.f32.mrb[2].mxu0 }
  0xee   : > { %v450_v42 = vadd.f32 %v819_v41, %v778_v36  ;;  %v441_v43 = vpop.f32.mrb[3].mxu0  ;;  %v471_v45 = vmax.f32 %v447_v38, 0.0 }
  0xef   : > { %v442_v44 = vadd.f32 %v778_v36, %v441_v43  ;;  %v469_v47 = vmax.f32 %v439_v40, 0.0 }
  0xf0   : > { %v472_v46 = vmax.f32 %v450_v42, 0.0 }
  0xf1   : > { %v470_v48 = vmax.f32 %v442_v44, 0.0 }
  0xf2   : > { %v486_v49 = vpack.c.bf16 %v472_v46, %v471_v45 }
  0xf3   : > { %v822_v50 = vpop.f32.mrb[4].mxu0  ;;  %v485_v51 = vpack.c.bf16 %v470_v48, %v469_v47 }
  0xf4   : > { %v463_v52 = vadd.f32 %v822_v50, %v778_v36  ;;  %v454_v53 = vpop.f32.mrb[5].mxu0 }
  0xf5   : > { %v455_v54 = vadd.f32 %v778_v36, %v454_v53  ;;  %v823_v55 = vpop.f32.mrb[6].mxu0  ;;  %832 = vmatprep.mubr.msk.bf16.mxu1 %vm513_vm1, %v485_v51 }
  0xf6   : > { %v466_v56 = vadd.f32 %v823_v55, %v778_v36  ;;  %v457_v57 = vpop.f32.mrb[7].mxu0  ;;  %833 = vmatmul.mubr.msk.bf16.vlgmr.msra.gmra.mrb[0].mxu1 %vm513_vm1, %v486_v49  ;;  %v475_v59 = vmax.f32 %v463_v52, 0.0 }
  0xf7   : > { %v458_v58 = vadd.f32 %v778_v36, %v457_v57  ;;  %v473_v61 = vmax.f32 %v455_v54, 0.0 }
  0xf8   : > { %v476_v60 = vmax.f32 %v466_v56, 0.0 }
  0xf9   : > { %v474_v62 = vmax.f32 %v458_v58, 0.0 }
  0xfa   : > { %v488_v63 = vpack.c.bf16 %v476_v60, %v475_v59 }
  0xfb   : > { %v487_v0 = vpack.c.bf16 %v474_v62, %v473_v61 }
  0xfd   : > { %836 = vmatprep.mubr.msk.bf16.mxu1 %vm513_vm1, %v487_v0 }
  0xfe   : > { %837 = vmatmul.mubr.msk.bf16.gmra.mrb[4].mxu1 %vm513_vm1, %v488_v63 }
 0x1c9   : > { %v834_v1 = vpop.f32.mrb[0].mxu1 }
 0x1ca   : > { %v593_v2 = vadd.f32 %v834_v1, %v358_v22  ;;  %v560_v4 = vpop.f32.mrb[1].mxu1 }
 0x1cb   : > { %v591_v5 = vadd.f32 %v560_v4, %v356_v20  ;;  %v835_v6 = vpop.f32.mrb[2].mxu1 }
 0x1cc   : > { %v594_v7 = vadd.f32 %v835_v6, %v359_v24  ;;  %v563_v8 = vpop.f32.mrb[3].mxu1  ;;  %v608_v9 = vadd.f32 %v793_v3, %v593_v2 }
 0x1cd   : > { %v606_v10 = vadd.f32 %v793_v3, %v591_v5  ;;  %v592_v11 = vadd.f32 %v563_v8, %v944_v21 }
 0x1ce   : > { %v609_v13 = vadd.f32 %v793_v3, %v594_v7  ;;  %616 = vst.msk [vmem:[%s984_s15 + $0x10] sm:$0xff] %vm391_vm0, %v608_v9  ;;  %v645_v15 = vmul.f32 %v608_v9, %v608_v9  ;;  %v625_v20 = vsel %vm391_vm0, %v608_v9, 0.0 }
 0x1cf   : > { %614 = vst.msk [vmem:[%s984_s15] sm:$0xff] %vm391_vm0, %v606_v10  ;;  %v643_v12 = vmul.f32 %v606_v10, %v606_v10  ;;  %v607_v14 = vadd.f32 %v793_v3, %v592_v11  ;;  %v622_v16 = vsel %vm391_vm0, %v606_v10, 0.0 }
 0x1d0   : > { %617 = vst.msk [vmem:[%s984_s15 + $0x18] sm:$0xff] %vm391_vm0, %v609_v13  ;;  %v646_v27 = vmul.f32 %v609_v13, %v609_v13  ;;  %v654_v37 = vsel %vm391_vm0, %v645_v15, 0.0 }
 0x1d1   : > { %615 = vst.msk [vmem:[%s984_s15 + $0x8] sm:$0xff] %vm391_vm0, %v607_v14  ;;  %v623_v17 = vsel %vm391_vm0, %v607_v14, 0.0  ;;  %v644_v18 = vmul.f32 %v607_v14, %v607_v14  ;;  %v838_v19 = vpop.f32.mrb[4].mxu1  ;;  %v651_v24 = vsel %vm391_vm0, %v643_v12, 0.0 }
 0x1d2   : > { %v624_v21 = vadd.f32 %v623_v17, %v622_v16  ;;  %v597_v22 = vadd.f32 %v838_v19, %v955_v31  ;;  %v576_v23 = vpop.f32.mrb[5].mxu1  ;;  %v627_v31 = vsel %vm391_vm0, %v609_v13, 0.0 }
 0x1d3   : > { %v652_v28 = vsel %vm391_vm0, %v644_v18, 0.0  ;;  %v595_v29 = vadd.f32 %v576_v23, %v946_v25  ;;  %v839_v30 = vpop.f32.mrb[6].mxu1  ;;  %v656_v25 = vsel %vm391_vm0, %v646_v27, 0.0 }
 0x1d4   : > { %v626_v33 = vadd.f32 %v625_v20, %v624_v21  ;;  %v653_v34 = vadd.f32 %v652_v28, %v651_v24  ;;  %v598_v35 = vadd.f32 %v839_v30, %v957_v32  ;;  %v579_v36 = vpop.f32.mrb[7].mxu1  ;;  %v612_v41 = vadd.f32 %v793_v3, %v597_v22 }
 0x1d5   : > { %v610_v38 = vadd.f32 %v793_v3, %v595_v29  ;;  %v596_v39 = vadd.f32 %v579_v36, %v948_v26 }
 0x1d6   : > { %v655_v40 = vadd.f32 %v654_v37, %v653_v34  ;;  %v628_v42 = vadd.f32 %v627_v31, %v626_v33  ;;  %620 = vst.msk [vmem:[%s984_s15 + $0x30] sm:$0xff] %vm391_vm0, %v612_v41  ;;  %v613_v47 = vadd.f32 %v793_v3, %v598_v35  ;;  %v649_v49 = vmul.f32 %v612_v41, %v612_v41 }
 0x1d7   : > { %618 = vst.msk [vmem:[%s984_s15 + $0x20] sm:$0xff] %vm391_vm0, %v610_v38  ;;  %v629_v43 = vsel %vm391_vm0, %v610_v38, 0.0  ;;  %v647_v32 = vmul.f32 %v610_v38, %v610_v38  ;;  %v611_v44 = vadd.f32 %v793_v3, %v596_v39  ;;  %v633_v53 = vsel %vm391_vm0, %v612_v41, 0.0 }
 0x1d8   : > { %v630_v45 = vadd.f32 %v629_v43, %v628_v42  ;;  %v657_v46 = vadd.f32 %v656_v25, %v655_v40  ;;  %621 = vst.msk [vmem:[%s984_s15 + $0x38] sm:$0xff] %vm391_vm0, %v613_v47  ;;  %v650_v54 = vmul.f32 %v613_v47, %v613_v47  ;;  %v635_v57 = vsel %vm391_vm0, %v613_v47, 0.0 }
 0x1d9   : > { %v658_v26 = vsel %vm391_vm0, %v647_v32, 0.0  ;;  %619 = vst.msk [vmem:[%s984_s15 + $0x28] sm:$0xff] %vm391_vm0, %v611_v44  ;;  %v631_v48 = vsel %vm391_vm0, %v611_v44, 0.0  ;;  %v648_v52 = vmul.f32 %v611_v44, %v611_v44  ;;  %v662_v59 = vsel %vm391_vm0, %v649_v49, 0.0 }
 0x1da   : > { %v659_v50 = vadd.f32 %v658_v26, %v657_v46  ;;  %v632_v51 = vadd.f32 %v631_v48, %v630_v45  ;;  %v664_v62 = vsel %vm391_vm0, %v650_v54, 0.0 }
 0x1db   : > { %v660_v56 = vsel %vm391_vm0, %v648_v52, 0.0 }
 0x1dc   : > { %v634_v55 = vadd.f32 %v633_v53, %v632_v51  ;;  %v661_v58 = vadd.f32 %v660_v56, %v659_v50 }
 0x1de   : > { %v636_v60 = vadd.f32 %v635_v57, %v634_v55  ;;  %v663_v61 = vadd.f32 %v662_v59, %v661_v58 }
 0x1e0   : > { %v637_v63 = vrot.slane %v636_v60, 4  ;;  %v665_v0 = vadd.f32 %v664_v62, %v663_v61 }
 0x1e2   : > { %v638_v1 = vadd.f32 %v637_v63, %v636_v60  ;;  %v666_v2 = vrot.slane %v665_v0, 4 }
 0x1e4   : > { %v639_v3 = vrot.slane %v638_v1, 2  ;;  %v667_v4 = vadd.f32 %v666_v2, %v665_v0 }
 0x1e6   : > { %v640_v5 = vadd.f32 %v639_v3, %v638_v1  ;;  %v668_v6 = vrot.slane %v667_v4, 2 }
 0x1e8   : > { %v641_v7 = vrot.slane %v640_v5, 1  ;;  %v669_v8 = vadd.f32 %v668_v6, %v667_v4 }
 0x1ea   : > { %v642_v9 = vadd.f32 %v641_v7, %v640_v5  ;;  %v670_v10 = vrot.slane %v669_v8, 1 }
 0x1ec   : > { %673 = vst.msk [vmem:[%s324_s18] sm:$0x1] %vm672_vm2, %v642_v9  ;;  %v671_v11 = vadd.f32 %v670_v10, %v669_v8 }
 0x1ee   : > { %674 = vst.msk [vmem:[%s324_s18 + $0x1] sm:$0x1] %vm672_vm2, %v671_v11 }
 0x1ef PF: > { %s19_s27 = sadd.s32 1, %s860_s27  }
 0x1f0   : > { %p16_p5 = scmp.ge.s32.totalorder %s19_s27, 4  }
 0x1f2   :  { %18 = sbr.rel (!%p16_p5) target bundleno = 1 (0x1), region = 90 }

// kernel: patchtst_encoder_forward.5
= control target key start
LH: loop header
LB: loop body
LE: loop exit
PB: predicated region body
PF: predicated region fallthrough
CT: control target
= control target key end

     0   :  { %s9025_s30 = smov 0   ;;  %s11829_s0 = inlined_call_operand.vmem [shape: f32[8,16,32], index: 0, kind: input, shape index: {}]   ;;  %s11830_s1 = inlined_call_operand.vmem [shape: f32[1,32], index: 1, kind: input, shape index: {}]   ;;  %s11831_s2 = inlined_call_operand.vmem [shape: f32[1,32], index: 2, kind: input, shape index: {}]   ;;  %s11832_s3 = inlined_call_operand.vmem [shape: bf16[32,96], index: 3, kind: input, shape index: {}]   ;;  %s11833_s4 = inlined_call_operand.vmem [shape: f32[1,96], index: 4, kind: input, shape index: {}]   ;;  %s11834_s5 = inlined_call_operand.vmem [shape: bf16[32,32], index: 5, kind: input, shape index: {}]   ;;  %s11835_s6 = inlined_call_operand.vmem [shape: f32[1,32], index: 6, kind: input, shape index: {}]   ;;  %s11836_s7 = inlined_call_operand.vmem [shape: f32[8,16,32], index: 7, kind: output, shape index: {0}]   ;;  %s11837_s8 = inlined_call_operand.vmem [shape: f32[8,4,256], index: 8, kind: output, shape index: {1}]   ;;  %s11838_s9 = inlined_call_operand.vmem [shape: f32[2,2,32], index: 9, kind: output, shape index: {2}]  }
   0x1 LB: > { %s9031_s10 = sadd.s32 4294967295, %s8958_s30   ;;  %p8313_p0 = scmp.ge.s32.totalorder %s8958_s30, 1  ;;  %s8958_s30 = sphi %s9025_s30, %s20_s30  }
   0x2   : > { %p294_p1 = scmp.lt.s32.totalorder %s8958_s30, 3 }
   0x4   : > { %p295_p2 = pnand %p8313_p0, %p294_p1 }
   0x6   : > { %298 = sbr.rel (%p295_p2) target bundleno = 1785 (0x6f9), region = 48 }
   0xd   : > { %v8820_v0 = vld [vmem:[%s11832_s3] sm:$0xff]   ;;  %s8314_s13 = sshll.u32 %s9031_s10, 2  ;;  %v8821_v1 = vld [vmem:[%s11832_s3 + $0x8] sm:$0xff]   ;;  %vm433_vm0 = vcmask 261120   ;;  %s8960_s26 = smov 112   ;;  %v11839_v63 = vmov 0.0  }
   0xe   : > { %p343_p3 = scmp.lt.s32.totalorder %s8314_s13, 7  ;;  %8517 = vmatprep.subr.bf16.mxu0 %v8820_v0  ;;  %8733 = vmatprep.subr.bf16.mxu1 %v8820_v0  ;;  %v8324_v2 = vld [vmem:[%s11830_s1] ss:$0 sm:$0xff]  ;;  %s8961_s27 = smov 120   ;;  %vm8965_vm1 = vmmov 0   ;;  %vm4079_vm2 = vcmask 64512  }
   0xf   : > { %8518 = vmatpush3.bf16.msra.mxu0 %v8820_v0  ;;  %8735 = vmatpush3.bf16.msra.mxu1 %v8820_v0  ;;  %v8325_v3 = vld [vmem:[%s11831_s2] ss:$0 sm:$0xff]  ;;  %s8962_s28 = smov 104   ;;  %s8963_s29 = smov 96   ;;  %vm5632_vm3 = vcmask 130048   ;;  %vm8002_vm4 = vcmask 195584  }
  0x10   : > { %s12098_s13 = smov (!%p343_p3, %s8314_s13), 7  ;;  %8519 = vmatprep.subr.bf16.mxu0 %v8821_v1  ;;  %8734 = vmatprep.subr.bf16.mxu1 %v8821_v1  ;;  %v8326_v32 = vld [vmem:[%s11833_s4] ss:$0 sm:$0xff]  ;;  %s8968_s11 = smov 64   ;;  %vm5641_vm5 = vcmask 392192   ;;  %vm5646_vm6 = vcmask 523264  }
  0x11   : > { %s8438_s16 = sshll.u32 %s12098_s13, 4  ;;  %s8969_s12 = smov 24   ;;  %vm5651_vm7 = vcmask 654336   ;;  %vm5656_vm8 = vcmask 785408   ;;  %vm5661_vm9 = vcmask 916480   ;;  %vm8181_vm10 = vcmask 253952  }
  0x12   : > { %s347_s21 = scalar_lea.vmem %s11829_s0, %s8438_s16  ;;  %s8970_s14 = smov 8  }
  0x13   : > { %8520 = vmatpush3.bf16.msra.mxu0 %v8821_v1  ;;  %v368_v4 = vld [vmem:[%s347_s21] sm:$0xff]  ;;  %v369_v5 = vld [vmem:[%s347_s21 + $0x8] sm:$0xff]  ;;  %v370_v6 = vld [vmem:[%s347_s21 + $0x10] sm:$0xff]  ;;  %8736 = vmatpush3.bf16.msra.mxu1 %v8821_v1  ;;  %s8971_s15 = smov 16   ;;  %s8973_s22 = smov 32  }
  0x14   : > { %v383_v7 = vmul.f32 %v8324_v2, %v368_v4  ;;  %v384_v8 = vmul.f32 %v8324_v2, %v369_v5  ;;  %v371_v9 = vld [vmem:[%s347_s21 + $0x18] sm:$0xff]  ;;  %v385_v10 = vmul.f32 %v8324_v2, %v370_v6  ;;  %v372_v11 = vld [vmem:[%s347_s21 + $0x20] sm:$0xff]  ;;  %v373_v12 = vld [vmem:[%s347_s21 + $0x28] sm:$0xff]  ;;  %8529 = vmatprep.subr.bf16.mxu1 %v11839_v63  ;;  %8541 = vmatprep.subr.bf16.mxu0 %v11839_v63  ;;  %s8974_s23 = smov 80   ;;  %s8440_s24 = sshll.u32 %s12098_s13, 3 }
  0x15   : > { %v386_v13 = vmul.f32 %v8324_v2, %v371_v9  ;;  %v387_v14 = vmul.f32 %v8324_v2, %v372_v11  ;;  %v388_v15 = vmul.f32 %v8324_v2, %v373_v12  ;;  %v374_v16 = vld [vmem:[%s347_s21 + $0x30] sm:$0xff]  ;;  %v375_v17 = vld [vmem:[%s347_s21 + $0x38] sm:$0xff]  ;;  %s8972_s21 = smov 48   ;;  %p363_p4 = scmp.lt.s32.totalorder %s9031_s10, 1 }
  0x16   : > { %v9056_v18 = vadd.f32 %v8325_v3, %v383_v7  ;;  %v9058_v19 = vadd.f32 %v8325_v3, %v384_v8  ;;  %v9060_v20 = vadd.f32 %v8325_v3, %v385_v10  ;;  %v389_v21 = vmul.f32 %v8324_v2, %v374_v16 }
  0x17   : > { %v9062_v22 = vadd.f32 %v8325_v3, %v386_v13  ;;  %v9064_v23 = vadd.f32 %v8325_v3, %v387_v14  ;;  %v9066_v24 = vadd.f32 %v8325_v3, %v388_v15  ;;  %v390_v25 = vmul.f32 %v8324_v2, %v375_v17  ;;  %s12100_s10 = smov (!%p363_p4, %s9031_s10), 1 }
  0x18   : > { %11939 = vst [vmem:[#allocation2_spill] sm:$0xff] %v9056_v18  ;;  %11940 = vst [vmem:[#allocation3_spill] sm:$0xff] %v9058_v19  ;;  %v410_v26 = vpack.c.bf16 %v9058_v19, %v9056_v18  ;;  %v9070_v27 = vadd.f32 %v8325_v3, %v389_v21  ;;  %v8966_v8 = vmov 1983009808   ;;  %v596_v10 = vlaneseq  ;;  %s8323_s13 = sshll.u32 %s12100_s10, 1 }
  0x19   : > { %11941 = vst [vmem:[#allocation4_spill] sm:$0xff] %v9060_v20  ;;  %11942 = vst [vmem:[#allocation5_spill] sm:$0xff] %v9062_v22  ;;  %v411_v28 = vpack.c.bf16 %v9062_v22, %v9060_v20  ;;  %v412_v29 = vpack.c.bf16 %v9066_v24, %v9064_v23  ;;  %v9076_v30 = vadd.f32 %v8325_v3, %v390_v25  ;;  %v594_v9 = vunpack.c.l.s4 %v8966_v8  ;;  %s366_s17 = scalar_lea.vmem %s11838_s9, %s8323_s13 }
  0x1a   : > { %11943 = vst [vmem:[#allocation6_spill] sm:$0xff] %v9064_v23  ;;  %11944 = vst [vmem:[#allocation7_spill] sm:$0xff] %v9066_v24  ;;  %8521 = vmatprep.mubr.msk.bf16.mxu0 %vm433_vm0, %v410_v26  ;;  %v597_v14 = vshrl.u32 %v596_v10, 7  ;;  %v8967_v15 = vmov 1934713408  }
  0x1b   : > { %11945 = vst [vmem:[#allocation8_spill] sm:$0xff] %v9070_v27  ;;  %11946 = vst [vmem:[#allocation9_spill] sm:$0xff] %v9076_v30  ;;  %8522 = vmatmul.mubr.msk.bf16.vlgmr.msra.gmra.mrb[0].mxu0 %vm433_vm0, %v411_v28  ;;  %8525 = vmatprep.mubr.msk.bf16.mxu1 %vm433_vm0, %v412_v29  ;;  %v413_v31 = vpack.c.bf16 %v9076_v30, %v9070_v27  ;;  %v595_v13 = vunpack.c.0.s8 %v594_v9  ;;  %v626_v16 = vunpack.c.l.s4 %v8967_v15 }
  0x1c   : > { %8543 = vmatprep.mubr.msk.bf16.mxu0 %vm8965_vm1, %v11839_v63 }
  0x1d   : > { %8526 = vmatmul.mubr.msk.bf16.vlgmr.msra.gmra.mrb[0].mxu1 %vm433_vm0, %v413_v31  ;;  %v9259_v25 = vsub.s32 %v595_v13, %v597_v14  ;;  %v627_v28 = vunpack.c.0.s8 %v626_v16 }
  0x1e   : > { %8531 = vmatprep.mubr.msk.bf16.mxu1 %vm8965_vm1, %v11839_v63 }
  0xee   : > { %v8523_v33 = vpop.f32.mrb[0].mxu0 }
  0xef   : > { %v480_v34 = vpop.f32.mrb[1].mxu0  ;;  %v9099_v43 = vadd.f32 %v8523_v33, %v8326_v32 }
  0xf0   : > { %v9087_v35 = vadd.f32 %v8326_v32, %v480_v34  ;;  %v8524_v36 = vpop.f32.mrb[2].mxu0  ;;  %v8527_v37 = vpop.f32.mrb[0].mxu1 }
  0xf1   : > { %v483_v38 = vpop.f32.mrb[3].mxu0  ;;  %v496_v39 = vpop.f32.mrb[1].mxu1  ;;  %v9101_v44 = vadd.f32 %v8524_v36, %v8326_v32  ;;  %v9125_v48 = vadd.f32 %v8527_v37, %v8326_v32 }
  0xf2   : > { %543 = vrot.lane.b32.xlu1 %v9087_v35, %s8960_s26  ;;  %519 = vrot.lane.b32.xlu0 %v9087_v35, %s8961_s27  ;;  %v8528_v40 = vpop.f32.mrb[2].mxu1  ;;  %v9092_v42 = vadd.f32 %v8326_v32, %v483_v38  ;;  %v9109_v45 = vadd.f32 %v8326_v32, %v496_v39  ;;  %v9280_v39 = vsub.s32 %v627_v28, %v597_v14 }
  0xf3   : > { %v499_v41 = vpop.f32.mrb[3].mxu1  ;;  %v9113_v46 = vadd.f32 %v8528_v40, %v8326_v32 }
  0xf4   : > { %v9121_v47 = vadd.f32 %v8326_v32, %v499_v41 }
  0xf6   : > { %545 = vrot.lane.b32.xlu1 %v9092_v42, %s8960_s26  ;;  %521 = vrot.lane.b32.xlu0 %v9092_v42, %s8961_s27 }
  0xfa   : > { %569 = vrot.lane.b32.xlu1 %v9092_v42, %s8962_s28  ;;  %567 = vrot.lane.b32.xlu0 %v9087_v35, %s8962_s28 }
  0xfe   : > { %525 = vrot.lane.b32.xlu1 %v9101_v44, %s8961_s27  ;;  %523 = vrot.lane.b32.xlu0 %v9099_v43, %s8961_s27 }
 0x102   : > { %549 = vrot.lane.b32.xlu1 %v9101_v44, %s8960_s26  ;;  %547 = vrot.lane.b32.xlu0 %v9099_v43, %s8960_s26 }
 0x106   : > { %573 = vrot.lane.b32.xlu1 %v9101_v44, %s8962_s28  ;;  %571 = vrot.lane.b32.xlu0 %v9099_v43, %s8962_s28 }
 0x10a   : > { %533 = vrot.lane.b32.xlu1 %v9113_v46, %s8961_s27  ;;  %527 = vrot.lane.b32.xlu0 %v9109_v45, %s8961_s27 }
 0x10e   : > { %557 = vrot.lane.b32.xlu1 %v9113_v46, %s8960_s26  ;;  %551 = vrot.lane.b32.xlu0 %v9109_v45, %s8960_s26 }
 0x112   : > { %529 = vrot.lane.b32.xlu1 %v9121_v47, %s8961_s27  ;;  %575 = vrot.lane.b32.xlu0 %v9109_v45, %s8962_s28 }
 0x116   : > { %553 = vrot.lane.b32.xlu1 %v9121_v47, %s8960_s26  ;;  %531 = vrot.lane.b32.xlu0 %v9125_v48, %s8961_s27  ;;  %s11718_s27 = scalar_lea.vmem %s11837_s8, %s8440_s24 }
 0x11a   : > { %577 = vrot.lane.b32.xlu1 %v9121_v47, %s8962_s28  ;;  %555 = vrot.lane.b32.xlu0 %v9125_v48, %s8960_s26 }
 0x11e   : > { %581 = vrot.lane.b32.xlu1 %v9113_v46, %s8962_s28  ;;  %579 = vrot.lane.b32.xlu0 %v9125_v48, %s8962_s28 }
 0x122   : > { %1681 = vrot.lane.b32.xlu1 %v9092_v42, %s8963_s29  ;;  %1679 = vrot.lane.b32.xlu0 %v9087_v35, %s8963_s29 }
 0x164   : > { %v9139_v49 = vpop.permute.xlu1 %543  ;;  %v9141_v50 = vpop.permute.xlu0 %519 }
 0x165   : > { %1695 = vrot.lane.b32.xlu0 %v9141_v50, %s8963_s29  ;;  %v591_v31 = vcombine.low %v9087_v35, %v9139_v49  ;;  %v592_v32 = vcombine.high %v9087_v35, %v9139_v49 }
 0x167   : > { %v606_v41 = vrot.slane %v592_v32, %v9259_v25 }
 0x168   : > { %v9145_v51 = vpop.permute.xlu1 %545  ;;  %v9147_v52 = vpop.permute.xlu0 %521 }
 0x169   : > { %1711 = vrot.lane.b32.xlu0 %v9139_v49, %s8963_s29  ;;  %1697 = vrot.lane.b32.xlu1 %v9147_v52, %s8963_s29  ;;  %v659_v26 = vcombine.low %v9092_v42, %v9145_v51  ;;  %v660_v34 = vcombine.high %v9092_v42, %v9145_v51 }
 0x16b   : > { %v667_v38 = vrot.slane %v659_v26, %v9259_v25  ;;  %v674_v8 = vrot.slane %v660_v34, %v9259_v25 }
 0x16c   : > { %v9153_v53 = vpop.permute.xlu1 %569  ;;  %v9155_v54 = vpop.permute.xlu0 %567 }
 0x16d   : > { %1713 = vrot.lane.b32.xlu1 %v9145_v51, %s8963_s29  ;;  %1727 = vrot.lane.b32.xlu0 %v9155_v54, %s8963_s29  ;;  %v675_v17 = vcombine.low %v9147_v52, %v9153_v53  ;;  %v607_v21 = vcombine.low %v9141_v50, %v9155_v54  ;;  %v608_v29 = vcombine.high %v9141_v50, %v9155_v54 }
 0x16e   : > { %v676_v33 = vcombine.high %v9147_v52, %v9153_v53 }
 0x16f   : > { %v683_v36 = vrot.slane %v675_v17, %v9259_v25  ;;  %v615_v37 = vrot.slane %v607_v21, %v9259_v25  ;;  %v622_v40 = vrot.slane %v608_v29, %v9259_v25 }
 0x170   : > { %v9161_v55 = vpop.permute.xlu1 %525  ;;  %v9163_v56 = vpop.permute.xlu0 %523 }
 0x171   : > { %1729 = vrot.lane.b32.xlu1 %v9153_v53, %s8963_s29  ;;  %1683 = vrot.lane.b32.xlu0 %v9099_v43, %s8963_s29  ;;  %v691_v9 = vcombine.low %v667_v38, %v683_v36  ;;  %v692_v10 = vcombine.high %v667_v38, %v683_v36  ;;  %v639_v17 = vcombine.low %v606_v41, %v622_v40 }
 0x172   : > { %v640_v21 = vcombine.high %v606_v41, %v622_v40 }
 0x173   : > { %v706_v34 = vrot.slane %v692_v10, %v9280_v39 }
 0x174   : > { %v9169_v57 = vpop.permute.xlu1 %549  ;;  %v9171_v58 = vpop.permute.xlu0 %547 }
 0x175   : > { %1685 = vrot.lane.b32.xlu1 %v9101_v44, %s8963_s29  ;;  %1699 = vrot.lane.b32.xlu0 %v9163_v56, %s8963_s29  ;;  %v795_v15 = vcombine.low %v9101_v44, %v9169_v57  ;;  %v728_v36 = vcombine.high %v9099_v43, %v9171_v58 }
 0x178   : > { %v9177_v59 = vpop.permute.xlu1 %573  ;;  %v9179_v60 = vpop.permute.xlu0 %571 }
 0x179   : > { %1701 = vrot.lane.b32.xlu1 %v9161_v55, %s8963_s29  ;;  %1715 = vrot.lane.b32.xlu0 %v9171_v58, %s8963_s29  ;;  %v812_v13 = vcombine.high %v9161_v55, %v9177_v59  ;;  %v743_v16 = vcombine.low %v9163_v56, %v9179_v60  ;;  %v744_v26 = vcombine.high %v9163_v56, %v9179_v60 }
 0x17b   : > { %v751_v41 = vrot.slane %v743_v16, %v9259_v25 }
 0x17c   : > { %v9185_v61 = vpop.permute.xlu1 %533  ;;  %v9191_v62 = vpop.permute.xlu0 %527 }
 0x17d   : > { %1717 = vrot.lane.b32.xlu1 %v9169_v57, %s8963_s29  ;;  %1731 = vrot.lane.b32.xlu0 %v9179_v60, %s8963_s29 }
 0x180   : > { %v9194_v0 = vpop.permute.xlu1 %557  ;;  %v9203_v2 = vpop.permute.xlu0 %551 }
 0x181   : > { %1733 = vrot.lane.b32.xlu1 %v9177_v59, %s8963_s29  ;;  %1687 = vrot.lane.b32.xlu0 %v9109_v45, %s8963_s29 }
 0x184   : > { %v9201_v1 = vpop.permute.xlu1 %529  ;;  %v9219_v4 = vpop.permute.xlu0 %575 }
 0x185   : > { %1689 = vrot.lane.b32.xlu1 %v9121_v47, %s8963_s29  ;;  %1703 = vrot.lane.b32.xlu0 %v9191_v62, %s8963_s29 }
 0x188   : > { %v9213_v3 = vpop.permute.xlu1 %553  ;;  %v9227_v6 = vpop.permute.xlu0 %531 }
 0x189   : > { %1705 = vrot.lane.b32.xlu1 %v9201_v1, %s8963_s29  ;;  %1719 = vrot.lane.b32.xlu0 %v9203_v2, %s8963_s29 }
 0x18c   : > { %v9225_v5 = vpop.permute.xlu1 %577  ;;  %v9237_v7 = vpop.permute.xlu0 %555 }
 0x18d   : > { %1721 = vrot.lane.b32.xlu1 %v9213_v3, %s8963_s29  ;;  %1735 = vrot.lane.b32.xlu0 %v9219_v4, %s8963_s29 }
 0x190   : > { %v9243_v11 = vpop.permute.xlu0 %579  ;;  %v9249_v12 = vpop.permute.xlu1 %581 }
 0x191   : > { %1737 = vrot.lane.b32.xlu1 %v9225_v5, %s8963_s29  ;;  %1691 = vrot.lane.b32.xlu0 %v9125_v48, %s8963_s29  ;;  %11947 = vst [vmem:[#allocation10_spill] sm:$0xff] %v9243_v11  ;;  %11948 = vst [vmem:[#allocation11_spill] sm:$0xff] %v9249_v12 }
 0x195   : > { %1693 = vrot.lane.b32.xlu1 %v9113_v46, %s8963_s29  ;;  %1707 = vrot.lane.b32.xlu0 %v9227_v6, %s8963_s29 }
 0x199   : > { %1709 = vrot.lane.b32.xlu1 %v9185_v61, %s8963_s29  ;;  %1723 = vrot.lane.b32.xlu0 %v9237_v7, %s8963_s29 }
 0x19d   : > { %1725 = vrot.lane.b32.xlu1 %v9194_v0, %s8963_s29  ;;  %1739 = vrot.lane.b32.xlu0 %v9243_v11, %s8963_s29 }
 0x1a1   : > { %1741 = vrot.lane.b32.xlu1 %v9249_v12, %s8963_s29  ;;  %2865 = vrot.lane.b32.xlu0 %v9092_v42, %s8968_s11  ;;  %v811_v42 = vcombine.low %v9161_v55, %v9177_v59 }
 0x1a3   : > { %v819_v32 = vrot.slane %v811_v42, %v9259_v25 }
 0x1a5   : > { %2863 = vrot.lane.b32.xlu1 %v9087_v35, %s8968_s11  ;;  %2895 = vrot.lane.b32.xlu0 %v9139_v49, %s8968_s11  ;;  %v599_v35 = vrot.slane %v591_v31, %v9259_v25  ;;  %v690_v49 = vrot.slane %v676_v33, %v9259_v25  ;;  %v727_v31 = vcombine.low %v9099_v43, %v9171_v58 }
 0x1a6   : > { %v699_v33 = vrot.slane %v691_v9, %v9280_v39 }
 0x1a7   : > { %v624_v14 = vcombine.high %v599_v35, %v615_v37  ;;  %v707_v28 = vcombine.low %v674_v8, %v690_v49  ;;  %v708_v29 = vcombine.high %v674_v8, %v690_v49  ;;  %v647_v49 = vrot.slane %v639_v17, %v9280_v39 }
 0x1a8   : > { %v758_v8 = vrot.slane %v744_v26, %v9259_v25  ;;  %v735_v9 = vrot.slane %v727_v31, %v9259_v25  ;;  %v1203_v31 = vcombine.low %v699_v33, %v706_v34 }
 0x1a9   : > { %2879 = vrot.lane.b32.xlu1 %v9141_v50, %s8968_s11  ;;  %2911 = vrot.lane.b32.xlu0 %v9155_v54, %s8968_s11  ;;  %v623_v50 = vcombine.low %v599_v35, %v615_v37  ;;  %v796_v54 = vcombine.high %v9101_v44, %v9169_v57  ;;  %v826_v37 = vrot.slane %v812_v13, %v9259_v25 }
 0x1aa   : > { %v638_v40 = vrot.slane %v624_v14, %v9280_v39  ;;  %v803_v35 = vrot.slane %v795_v15, %v9259_v25  ;;  %v742_v14 = vrot.slane %v728_v36, %v9259_v25  ;;  %v760_v26 = vcombine.high %v735_v9, %v751_v41 }
 0x1ab   : > { %v631_v38 = vrot.slane %v623_v50, %v9280_v39  ;;  %v810_v42 = vrot.slane %v796_v54, %v9259_v25  ;;  %v722_v50 = vrot.slane %v708_v29, %v9280_v39  ;;  %v759_v54 = vcombine.low %v735_v9, %v751_v41 }
 0x1ac   : > { %v827_v10 = vcombine.low %v803_v35, %v819_v32  ;;  %v828_v13 = vcombine.high %v803_v35, %v819_v32  ;;  %v776_v24 = vcombine.high %v742_v14, %v758_v8  ;;  %v8335_v32 = vcombine.high %v699_v33, %v706_v34 }
 0x1ad   : > { %2867 = vrot.lane.b32.xlu1 %v9099_v43, %s8968_s11  ;;  %2869 = vrot.lane.b32.xlu0 %v9101_v44, %s8968_s11  ;;  %v654_v44 = vrot.slane %v640_v21, %v9280_v39  ;;  %v715_v43 = vrot.slane %v707_v28, %v9280_v39  ;;  %v843_v15 = vcombine.low %v810_v42, %v826_v37 }
 0x1ae   : > { %v844_v16 = vcombine.high %v810_v42, %v826_v37  ;;  %v1135_v17 = vcombine.low %v631_v38, %v638_v40  ;;  %v8333_v21 = vcombine.high %v631_v38, %v638_v40  ;;  %v775_v28 = vcombine.low %v742_v14, %v758_v8 }
 0x1af   : > { %v8334_v63 = vcombine.high %v647_v49, %v654_v44  ;;  %v842_v29 = vrot.slane %v828_v13, %v9280_v39  ;;  %v1219_v36 = vcombine.low %v715_v43, %v722_v50  ;;  %v8336_v37 = vcombine.high %v715_v43, %v722_v50 }
 0x1b0   : > { %v851_v38 = vrot.slane %v843_v15, %v9280_v39  ;;  %v858_v40 = vrot.slane %v844_v16, %v9280_v39  ;;  %v9340_v35 = vrot.slane %v1135_v17, %v9259_v25  ;;  %v767_v33 = vrot.slane %v759_v54, %v9280_v39 }
 0x1b1   : > { %2883 = vrot.lane.b32.xlu1 %v9163_v56, %s8968_s11  ;;  %2899 = vrot.lane.b32.xlu0 %v9171_v58, %s8968_s11  ;;  %v1151_v56 = vcombine.low %v647_v49, %v654_v44  ;;  %v835_v58 = vrot.slane %v827_v10, %v9280_v39  ;;  %v774_v34 = vrot.slane %v760_v26, %v9280_v39 }
 0x1b2   : > { %v783_v49 = vrot.slane %v775_v28, %v9280_v39  ;;  %v790_v44 = vrot.slane %v776_v24, %v9280_v39  ;;  %v9360_v43 = vrot.slane %v1203_v31, %v9259_v25  ;;  %v9363_v9 = vrot.slane %v8335_v32, %v9259_v25 }
 0x1b3   : > { %v9348_v41 = vrot.slane %v1151_v56, %v9259_v25  ;;  %v1339_v42 = vcombine.low %v835_v58, %v842_v29  ;;  %v8339_v8 = vcombine.high %v835_v58, %v842_v29  ;;  %v8340_v10 = vcombine.high %v851_v38, %v858_v40 }
 0x1b4   : > { %v9366_v13 = vrot.slane %v1219_v36, %v9259_v25  ;;  %v9369_v24 = vrot.slane %v8336_v37, %v9259_v25  ;;  %v8337_v14 = vcombine.high %v767_v33, %v774_v34  ;;  %v1287_v15 = vcombine.low %v783_v49, %v790_v44 }
 0x1b5   : > { %2885 = vrot.lane.b32.xlu1 %v9161_v55, %s8968_s11  ;;  %2915 = vrot.lane.b32.xlu0 %v9179_v60, %s8968_s11  ;;  %v9343_v55 = vrot.slane %v8333_v21, %v9259_v25  ;;  %v9351_v60 = vrot.slane %v8334_v63, %v9259_v25  ;;  %v1355_v63 = vcombine.low %v851_v38, %v858_v40 }
 0x1b6   : > { %v879_v16 = vcombine.low %v9191_v62, %v9219_v4  ;;  %v9380_v21 = vrot.slane %v1339_v42, %v9259_v25  ;;  %v9383_v54 = vrot.slane %v8339_v8, %v9259_v25  ;;  %v8338_v26 = vcombine.high %v783_v49, %v790_v44 }
 0x1b7   : > { %v1167_v50 = vcombine.low %v9340_v35, %v9343_v55  ;;  %v1183_v17 = vcombine.low %v9348_v41, %v9351_v60  ;;  %v880_v56 = vcombine.high %v9191_v62, %v9219_v4  ;;  %v9390_v28 = vrot.slane %v1355_v63, %v9259_v25 }
 0x1b8   : > { %v1067_v31 = vcombine.low %v9113_v46, %v9194_v0  ;;  %v863_v32 = vcombine.low %v9109_v45, %v9203_v2  ;;  %v1068_v29 = vcombine.high %v9113_v46, %v9194_v0  ;;  %v864_v36 = vcombine.high %v9109_v45, %v9203_v2 }
 0x1b9   : > { %2901 = vrot.lane.b32.xlu1 %v9169_v57, %s8968_s11  ;;  %2873 = vrot.lane.b32.xlu0 %v9121_v47, %s8968_s11  ;;  %v1271_v57 = vcombine.low %v767_v33, %v774_v34  ;;  %v947_v37 = vcombine.low %v9201_v1, %v9225_v5  ;;  %v9409_v38 = vrot.slane %v8337_v14, %v9259_v25 }
 0x1ba   : > { %v9412_v40 = vrot.slane %v1287_v15, %v9259_v25  ;;  %v887_v33 = vrot.slane %v879_v16, %v9259_v25  ;;  %v948_v34 = vcombine.high %v9201_v1, %v9225_v5  ;;  %v9420_v49 = vrot.slane %v8338_v26, %v9259_v25 }
 0x1bb   : > { %v9400_v58 = vrot.slane %v1271_v57, %v9259_v25  ;;  %v931_v44 = vcombine.low %v9121_v47, %v9213_v3  ;;  %v9428_v42 = vrot.slane %v1167_v50, %v9280_v39  ;;  %v1075_v8 = vrot.slane %v1067_v31, %v9259_v25 }
 0x1bc   : > { %v871_v63 = vrot.slane %v863_v32, %v9259_v25  ;;  %v1082_v57 = vrot.slane %v1068_v29, %v9259_v25  ;;  %v878_v14 = vrot.slane %v864_v36, %v9259_v25  ;;  %v955_v15 = vrot.slane %v947_v37, %v9259_v25 }
 0x1bd   : > { %2917 = vrot.lane.b32.xlu1 %v9177_v59, %s8968_s11  ;;  %2903 = vrot.lane.b32.xlu0 %v9203_v2, %s8968_s11  ;;  %v9393_v59 = vrot.slane %v8340_v10, %v9259_v25  ;;  %v894_v2 = vrot.slane %v880_v56, %v9259_v25  ;;  %v1083_v10 = vcombine.low %v9185_v61, %v9249_v12 }
 0x1be   : > { %v895_v50 = vcombine.low %v871_v63, %v887_v33  ;;  %v962_v16 = vrot.slane %v948_v34, %v9259_v25  ;;  %v1084_v26 = vcombine.high %v9185_v61, %v9249_v12  ;;  %v896_v56 = vcombine.high %v871_v63, %v887_v33 }
 0x1bf   : > { %v911_v31 = vcombine.low %v878_v14, %v894_v2  ;;  %v912_v32 = vcombine.high %v878_v14, %v894_v2  ;;  %v939_v29 = vrot.slane %v931_v44, %v9259_v25  ;;  %v1091_v36 = vrot.slane %v1083_v10, %v9259_v25 }
 0x1c0   : > { %v1015_v37 = vcombine.low %v9227_v6, %v9243_v11  ;;  %v999_v33 = vcombine.low %v9125_v48, %v9237_v7  ;;  %v1016_v2 = vcombine.high %v9227_v6, %v9243_v11  ;;  %v910_v10 = vrot.slane %v896_v56, %v9280_v39 }
 0x1c1   : > { %2871 = vrot.lane.b32.xlu1 %v9109_v45, %s8968_s11  ;;  %2919 = vrot.lane.b32.xlu0 %v9219_v4, %s8968_s11  ;;  %v932_v45 = vcombine.high %v9121_v47, %v9213_v3  ;;  %v9440_v4 = vrot.slane %v1183_v17, %v9280_v39  ;;  %v1235_v47 = vcombine.low %v9360_v43, %v9363_v9 }
 0x1c2   : > { %v963_v34 = vcombine.low %v939_v29, %v955_v15  ;;  %v964_v30 = vcombine.high %v939_v29, %v955_v15  ;;  %v919_v14 = vrot.slane %v911_v31, %v9280_v39  ;;  %v926_v15 = vrot.slane %v912_v32, %v9280_v39 }
 0x1c3   : > { %v946_v17 = vrot.slane %v932_v45, %v9259_v25  ;;  %v1098_v45 = vrot.slane %v1084_v26, %v9259_v25  ;;  %v1000_v29 = vcombine.high %v9125_v48, %v9237_v7  ;;  %v1007_v31 = vrot.slane %v999_v33, %v9259_v25 }
 0x1c4   : > { %v978_v56 = vrot.slane %v964_v30, %v9280_v39  ;;  %v1030_v32 = vrot.slane %v1016_v2, %v9259_v25  ;;  %v8342_v19 = vcombine.high %v919_v14, %v926_v15 }
 0x1c5   : > { %2887 = vrot.lane.b32.xlu1 %v9191_v62, %s8968_s11  ;;  %2877 = vrot.lane.b32.xlu0 %v9113_v46, %s8968_s11  ;;  %v903_v46 = vrot.slane %v895_v50, %v9280_v39  ;;  %v979_v44 = vcombine.low %v946_v17, %v962_v16  ;;  %v980_v63 = vcombine.high %v946_v17, %v962_v16 }
 0x1c6   : > { %v1099_v50 = vcombine.low %v1075_v8, %v1091_v36  ;;  %v1100_v62 = vcombine.high %v1075_v8, %v1091_v36  ;;  %v1023_v16 = vrot.slane %v1015_v37, %v9259_v25  ;;  %v971_v17 = vrot.slane %v963_v34, %v9280_v39 }
 0x1c7   : > { %v994_v23 = vrot.slane %v980_v63, %v9280_v39  ;;  %v1116_v27 = vcombine.high %v1082_v57, %v1098_v45  ;;  %v1407_v8 = vcombine.low %v903_v46, %v910_v10  ;;  %v8341_v36 = vcombine.high %v903_v46, %v910_v10 }
 0x1c8   : > { %v1423_v37 = vcombine.low %v919_v14, %v926_v15  ;;  %v1014_v34 = vrot.slane %v1000_v29, %v9259_v25  ;;  %v1107_v30 = vrot.slane %v1099_v50, %v9280_v39  ;;  %v1114_v33 = vrot.slane %v1100_v62, %v9280_v39 }
 0x1c9   : > { %2875 = vrot.lane.b32.xlu1 %v9125_v48, %s8968_s11  ;;  %2907 = vrot.lane.b32.xlu0 %v9237_v7, %s8968_s11  ;;  %v987_v48 = vrot.slane %v979_v44, %v9280_v39  ;;  %v1115_v7 = vcombine.low %v1082_v57, %v1098_v45  ;;  %v1031_v26 = vcombine.low %v1007_v31, %v1023_v16 }
 0x1ca   : > { %v1032_v2 = vcombine.high %v1007_v31, %v1023_v16  ;;  %v1475_v44 = vcombine.low %v971_v17, %v978_v56  ;;  %v1047_v22 = vcombine.low %v1014_v34, %v1030_v32  ;;  %v1048_v63 = vcombine.high %v1014_v34, %v1030_v32  ;;  %v9503_v16 = vpop.permute.xlu0 %1679  ;;  %v9535_v34 = vpop.permute.xlu1 %1681 }
 0x1cb   : > { %v8343_v18 = vcombine.high %v971_v17, %v978_v56  ;;  %v1491_v57 = vcombine.low %v987_v48, %v994_v23  ;;  %v1123_v45 = vrot.slane %v1115_v7, %v9280_v39  ;;  %v9492_v46 = vrot.slane %v1407_v8, %v9259_v25 }
 0x1cc   : > { %v9495_v62 = vrot.slane %v8341_v36, %v9259_v25  ;;  %v9498_v10 = vrot.slane %v1423_v37, %v9259_v25  ;;  %v1243_v14 = vrot.slane %v1235_v47, %v9280_v39  ;;  %v8344_v15 = vcombine.high %v987_v48, %v994_v23 }
 0x1cd   : > { %2891 = vrot.lane.b32.xlu1 %v9227_v6, %s8968_s11  ;;  %v1130_v6 = vrot.slane %v1116_v27, %v9280_v39  ;;  %v1611_v29 = vcombine.low %v1107_v30, %v1114_v33  ;;  %v1039_v50 = vrot.slane %v1031_v26, %v9280_v39  ;;  %v1046_v27 = vrot.slane %v1032_v2, %v9280_v39 }
 0x1ce   : > { %v8347_v17 = vcombine.high %v1107_v30, %v1114_v33  ;;  %v1055_v56 = vrot.slane %v1047_v22, %v9280_v39  ;;  %v1062_v31 = vrot.slane %v1048_v63, %v9280_v39  ;;  %v9511_v32 = vrot.slane %v1475_v44, %v9259_v25 }
 0x1cf   : > { %v9514_v23 = vrot.slane %v8343_v18, %v9259_v25  ;;  %v9517_v47 = vrot.slane %v1491_v57, %v9259_v25  ;;  %v1627_v26 = vcombine.low %v1123_v45, %v1130_v6  ;;  %v11949_v22 = vcombine.low %v9366_v13, %v9369_v24 }
 0x1d0   : > { %v1168_v7 = vcombine.high %v9340_v35, %v9343_v55  ;;  %v1184_v18 = vcombine.high %v9348_v41, %v9351_v60  ;;  %v9530_v8 = vrot.slane %v8344_v15, %v9259_v25  ;;  %v9533_v36 = vrot.slane %v1611_v29, %v9259_v25 }
 0x1d1   : > { %2893 = vrot.lane.b32.xlu1 %v9185_v61, %s8968_s11  ;;  %v9506_v61 = vrot.slane %v8342_v19, %v9259_v25  ;;  %v8348_v19 = vcombine.high %v1123_v45, %v1130_v6  ;;  %v1259_v48 = vrot.slane %v11949_v22, %v9280_v39  ;;  %v1543_v37 = vcombine.low %v1039_v50, %v1046_v27 }
 0x1d2   : > { %11950 = vst [vmem:[#allocation12_spill] sm:$0xff] %v9533_v36  ;;  %v9538_v33 = vrot.slane %v8347_v17, %v9259_v25  ;;  %v1559_v2 = vcombine.low %v1055_v56, %v1062_v31  ;;  %v1236_v35 = vcombine.high %v9360_v43, %v9363_v9  ;;  %v1252_v55 = vcombine.high %v9366_v13, %v9369_v24 }
 0x1d3   : > { %v9545_v41 = vrot.slane %v1627_v26, %v9259_v25  ;;  %v8346_v60 = vcombine.high %v1055_v56, %v1062_v31  ;;  %v1303_v44 = vcombine.low %v9400_v58, %v9409_v38  ;;  %v1319_v63 = vcombine.low %v9412_v40, %v9420_v49 }
 0x1d4   : > { %v9554_v57 = vrot.slane %v8348_v19, %v9259_v25  ;;  %v1267_v43 = vcombine.low %v1243_v14, %v1259_v48  ;;  %v9557_v9 = vrot.slane %v1168_v7, %v9280_v39  ;;  %v9560_v13 = vrot.slane %v1184_v18, %v9280_v39 }
 0x1d5   : > { %2909 = vrot.lane.b32.xlu1 %v9194_v0, %s8968_s11  ;;  %v8345_v0 = vcombine.high %v1039_v50, %v1046_v27  ;;  %11951 = vst [vmem:[#allocation13_spill] sm:$0xff] %v9545_v41  ;;  %v9563_v24 = vrot.slane %v1543_v37, %v9259_v25  ;;  %v1200_v15 = vcombine.high %v9428_v42, %v9440_v4 }
 0x1d6   : > { %11952 = vst [vmem:[#allocation14_spill] sm:$0xff] %v9554_v57  ;;  %v1268_v29 = vcombine.high %v1243_v14, %v1259_v48  ;;  %v9571_v50 = vrot.slane %v1559_v2, %v9259_v25  ;;  %v9574_v27 = vrot.slane %v1236_v35, %v9280_v39  ;;  %v9577_v17 = vrot.slane %v1252_v55, %v9280_v39 }
 0x1d7   : > { %v1696_v30 = vpop.permute.xlu0 %1695  ;;  %v1371_v56 = vcombine.low %v9380_v21, %v9383_v54  ;;  %v9582_v31 = vrot.slane %v8346_v60, %v9259_v25  ;;  %v9587_v14 = vrot.slane %v1303_v44, %v9280_v39  ;;  %v9590_v26 = vrot.slane %v1319_v63, %v9280_v39 }
 0x1d8   : > { %v1387_v19 = vcombine.low %v9390_v28, %v9393_v59  ;;  %v11953_v22 = vcombine.low %v9428_v42, %v9440_v4  ;;  %v1201_v7 = vcombine.low %v9557_v9, %v9560_v13  ;;  %v1304_v18 = vcombine.high %v9400_v58, %v9409_v38 }
 0x1d9   : > { %2881 = vrot.lane.b32.xlu1 %v9147_v52, %s8968_s11  ;;  %v9566_v52 = vrot.slane %v8345_v0, %v9259_v25  ;;  %v9607_v35 = vpack.c.bf16 %v1268_v29, %v1200_v15  ;;  %v1320_v42 = vcombine.high %v9412_v40, %v9420_v49  ;;  %v1269_v55 = vcombine.low %v9574_v27, %v9577_v17 }
 0x1da   : > { %v9597_v48 = vpack.c.bf16 %v1267_v43, %v11953_v22  ;;  %v1270_v60 = vcombine.high %v9574_v27, %v9577_v17  ;;  %v9616_v44 = vrot.slane %v1371_v56, %v9280_v39  ;;  %v1372_v58 = vcombine.high %v9380_v21, %v9383_v54 }
 0x1db   : > { %v1698_v45 = vpop.permute.xlu1 %1697  ;;  %v1712_v6 = vpop.permute.xlu0 %1711  ;;  %v9625_v49 = vrot.slane %v1387_v19, %v9280_v39  ;;  %v9632_v21 = vrot.slane %v1304_v18, %v9280_v39  ;;  %v1388_v27 = vcombine.high %v9390_v28, %v9393_v59  ;;  %v1439_v17 = vcombine.low %v9492_v46, %v9495_v62 }
 0x1dc   : > { %v1775_v37 = vcombine.low %v9503_v16, %v1712_v6  ;;  %v1776_v0 = vcombine.high %v9503_v16, %v1712_v6  ;;  %v1507_v59 = vcombine.low %v9511_v32, %v9514_v23 }
 0x1dd   : > { %2897 = vrot.lane.b32.xlu1 %v9145_v51, %s8968_s11  ;;  %v1202_v51 = vcombine.high %v9557_v9, %v9560_v13  ;;  %v1403_v9 = vcombine.low %v9616_v44, %v9625_v49  ;;  %v1404_v13 = vcombine.high %v9616_v44, %v9625_v49  ;;  %v9746_v12 = vrot.slane %v1388_v27, %v9280_v39 }
 0x1de   : > { %v1783_v54 = vrot.slane %v1775_v37, %v9259_v25 }
 0x1df   : > { %v1714_v2 = vpop.permute.xlu1 %1713  ;;  %v1728_v4 = vpop.permute.xlu0 %1727 }
 0x1e0   : > { %v1791_v38 = vcombine.low %v1696_v30, %v1728_v4  ;;  %v1792_v16 = vcombine.high %v1696_v30, %v1728_v4  ;;  %v1843_v63 = vcombine.low %v9535_v34, %v1714_v2  ;;  %v1844_v43 = vcombine.high %v9535_v34, %v1714_v2 }
 0x1e1   : > { %2913 = vrot.lane.b32.xlu1 %v9153_v53, %s8968_s11  ;;  %v1790_v53 = vrot.slane %v1776_v0, %v9259_v25  ;;  %v9640_v34 = vpack.c.bf16 %v1269_v55, %v1201_v7  ;;  %v9643_v2 = vrot.slane %v1320_v42, %v9280_v39 }
 0x1e2   : > { %v1799_v30 = vrot.slane %v1791_v38, %v9259_v25  ;;  %v1806_v15 = vrot.slane %v1792_v16, %v9259_v25  ;;  %v1851_v0 = vrot.slane %v1843_v63, %v9259_v25  ;;  %v1858_v38 = vrot.slane %v1844_v43, %v9259_v25 }
 0x1e3   : > { %v1730_v29 = vpop.permute.xlu1 %1729  ;;  %v9638_v22 = vpop.permute.xlu0 %1683 }
 0x1e4   : > { %v1859_v56 = vcombine.low %v1698_v45, %v1730_v29  ;;  %v1860_v19 = vcombine.high %v1698_v45, %v1730_v29  ;;  %v1807_v18 = vcombine.low %v1783_v54, %v1799_v30  ;;  %v1808_v4 = vcombine.high %v1783_v54, %v1799_v30 }
 0x1e5   : > { %v1823_v6 = vcombine.low %v1790_v53, %v1806_v15  ;;  %v1824_v37 = vcombine.high %v1790_v53, %v1806_v15  ;;  %2889 = vrot.lane.b32.xlu1 %v9201_v1, %s8968_s11 }
 0x1e6   : > { %v1867_v45 = vrot.slane %v1859_v56, %v9259_v25  ;;  %v1874_v16 = vrot.slane %v1860_v19, %v9259_v25  ;;  %v1815_v7 = vrot.slane %v1807_v18, %v9280_v39  ;;  %v1822_v42 = vrot.slane %v1808_v4, %v9280_v39 }
 0x1e7   : > { %v1831_v55 = vrot.slane %v1823_v6, %v9280_v39  ;;  %v1838_v54 = vrot.slane %v1824_v37, %v9280_v39  ;;  %v9655_v53 = vpop.permute.xlu1 %1685  ;;  %v9657_v29 = vpop.permute.xlu0 %1699 }
 0x1e8   : > { %v1875_v30 = vcombine.low %v1851_v0, %v1867_v45  ;;  %v1876_v1 = vcombine.high %v1851_v0, %v1867_v45  ;;  %v1891_v15 = vcombine.low %v1858_v38, %v1874_v16  ;;  %v1892_v63 = vcombine.high %v1858_v38, %v1874_v16 }
 0x1e9   : > { %v2319_v43 = vcombine.low %v1815_v7, %v1822_v42  ;;  %v8349_v56 = vcombine.high %v1815_v7, %v1822_v42  ;;  %v2335_v40 = vcombine.low %v1831_v55, %v1838_v54  ;;  %v8350_v19 = vcombine.high %v1831_v55, %v1838_v54  ;;  %2905 = vrot.lane.b32.xlu1 %v9213_v3, %s8968_s11 }
 0x1ea   : > { %v1883_v18 = vrot.slane %v1875_v30, %v9280_v39  ;;  %v1890_v6 = vrot.slane %v1876_v1, %v9280_v39  ;;  %v1899_v4 = vrot.slane %v1891_v15, %v9280_v39  ;;  %v1906_v37 = vrot.slane %v1892_v63, %v9280_v39 }
 0x1eb   : > { %v9665_v0 = vpop.permute.xlu1 %1701  ;;  %v9668_v38 = vrot.slane %v2319_v43, %v9259_v25  ;;  %v9671_v45 = vrot.slane %v8349_v56, %v9259_v25  ;;  %v9674_v16 = vrot.slane %v2335_v40, %v9259_v25  ;;  %v9677_v3 = vrot.slane %v8350_v19, %v9259_v25  ;;  %v1716_v30 = vpop.permute.xlu0 %1715 }
 0x1ec   : > { %v2387_v7 = vcombine.low %v1883_v18, %v1890_v6  ;;  %v8351_v42 = vcombine.high %v1883_v18, %v1890_v6  ;;  %v2403_v55 = vcombine.low %v1899_v4, %v1906_v37  ;;  %v8352_v54 = vcombine.high %v1899_v4, %v1906_v37 }
 0x1ed   : > { %2921 = vrot.lane.b32.xlu1 %v9225_v5, %s8968_s11  ;;  %v2351_v1 = vcombine.low %v9668_v38, %v9671_v45  ;;  %v2367_v15 = vcombine.low %v9674_v16, %v9677_v3  ;;  %v9691_v40 = vpack.c.bf16 %v1270_v60, %v1202_v51  ;;  %v9694_v63 = vrot.slane %v1372_v58, %v9280_v39 }
 0x1ee   : > { %v2394_v43 = vrot.slane %v2387_v7, %v9259_v25  ;;  %v2402_v5 = vrot.slane %v8351_v42, %v9259_v25  ;;  %v9699_v56 = vrot.slane %v2403_v55, %v9259_v25  ;;  %v9702_v19 = vrot.slane %v8352_v54, %v9259_v25 }
 0x1ef   : > { %v1718_v18 = vpop.permute.xlu1 %1717  ;;  %v1732_v51 = vpop.permute.xlu0 %1731  ;;  %v1455_v4 = vcombine.low %v9498_v10, %v9506_v61  ;;  %v9720_v49 = vrot.slane %v2351_v1, %v9280_v39  ;;  %v9723_v28 = vrot.slane %v2367_v15, %v9280_v39  ;;  %v1911_v37 = vcombine.low %v9638_v22, %v1716_v30 }
 0x1f0   : > { %v2419_v60 = vcombine.low %v2394_v43, %v2402_v5  ;;  %v2435_v58 = vcombine.low %v9699_v56, %v9702_v19  ;;  %v1927_v44 = vcombine.low %v9657_v29, %v1732_v51  ;;  %v1928_v7 = vcombine.high %v9657_v29, %v1732_v51 }
 0x1f1   : > { %v11954_v1 = vcombine.low %v9587_v14, %v9590_v26  ;;  %v11955_v15 = vcombine.high %v9587_v14, %v9590_v26  ;;  %v1912_v51 = vcombine.high %v9638_v22, %v1716_v30  ;;  %v2383_v26 = vcombine.low %v9720_v49, %v9723_v28 }
 0x1f2   : > { %v9730_v42 = vrot.slane %v2419_v60, %v9280_v39  ;;  %v9733_v55 = vrot.slane %v2435_v58, %v9280_v39  ;;  %v1935_v60 = vrot.slane %v1927_v44, %v9259_v25  ;;  %v9766_v22 = vrot.slane %v1507_v59, %v9280_v39 }
 0x1f3   : > { %v1734_v54 = vpop.permute.xlu1 %1733  ;;  %v9738_v6 = vpack.c.bf16 %v1403_v9, %v11954_v1  ;;  %v9743_v20 = vpack.c.bf16 %v1404_v13, %v11955_v15  ;;  %v9752_v58 = vpop.permute.xlu0 %1687  ;;  %v9757_v1 = vrot.slane %v1439_v17, %v9280_v39  ;;  %v9763_v13 = vrot.slane %v1455_v4, %v9280_v39 }
 0x1f4   : > { %v2451_v9 = vcombine.low %v9730_v42, %v9733_v55  ;;  %v1995_v14 = vcombine.low %v9665_v0, %v1734_v54  ;;  %v1919_v30 = vrot.slane %v1911_v37, %v9259_v25  ;;  %v1979_v27 = vcombine.low %v9655_v53, %v1718_v18 }
 0x1f5   : > { %v1942_v44 = vrot.slane %v1928_v7, %v9259_v25  ;;  %v2352_v17 = vcombine.high %v9668_v38, %v9671_v45  ;;  %v2368_v11 = vcombine.high %v9674_v16, %v9677_v3  ;;  %v2420_v4 = vcombine.high %v2394_v43, %v2402_v5 }
 0x1f6   : > { %v4063_v29 = vpack.c.bf16 %v2451_v9, %v2383_v26  ;;  %v1523_v59 = vcombine.low %v9517_v47, %v9530_v8  ;;  %v1926_v41 = vrot.slane %v1912_v51, %v9259_v25  ;;  %v1980_v37 = vcombine.high %v9655_v53, %v1718_v18 }
 0x1f7   : > { %v9773_v15 = vpop.permute.xlu1 %1689  ;;  %v1943_v57 = vcombine.low %v1919_v30, %v1935_v60  ;;  %v1996_v7 = vcombine.high %v9665_v0, %v1734_v54  ;;  %v9782_v36 = vpop.permute.xlu0 %1703  ;;  %v1944_v38 = vcombine.high %v1919_v30, %v1935_v60  ;;  %v2003_v45 = vrot.slane %v1995_v14, %v9259_v25 }
 0x1f8   : > { %v1405_v9 = vcombine.low %v9694_v63, %v9746_v12  ;;  %v1440_v16 = vcombine.high %v9492_v46, %v9495_v62  ;;  %v1987_v3 = vrot.slane %v1979_v27, %v9259_v25  ;;  %v1959_v43 = vcombine.low %v1926_v41, %v1942_v44 }
 0x1f9   : > { %v1960_v5 = vcombine.high %v1926_v41, %v1942_v44  ;;  %v9791_v53 = vrot.slane %v2352_v17, %v9280_v39  ;;  %v4084_v0 = vsel %vm4079_vm2, %v4063_v29, 0  ;;  %v2382_v18 = vrot.slane %v2368_v11, %v9280_v39 }
 0x1fa   : > { %v2434_v54 = vrot.slane %v2420_v4, %v9280_v39  ;;  %v2436_v51 = vcombine.high %v9699_v56, %v9702_v19  ;;  %v1994_v46 = vrot.slane %v1980_v37, %v9259_v25  ;;  %v1951_v62 = vrot.slane %v1943_v57, %v9280_v39  ;;  %8530 = vmatpush3.bf16.xpose.msra.mxu1 %v4084_v0 }
 0x1fb   : > { %v9798_v60 = vpop.permute.xlu1 %1705  ;;  %v2010_v41 = vrot.slane %v1996_v7, %v9259_v25  ;;  %v9803_v14 = vpop.permute.xlu0 %1719  ;;  %v1406_v29 = vcombine.high %v9694_v63, %v9746_v12  ;;  %v1958_v11 = vrot.slane %v1944_v38, %v9280_v39  ;;  %v2011_v26 = vcombine.low %v1987_v3, %v2003_v45 }
 0x1fc   : > { %v2012_v30 = vcombine.high %v1987_v3, %v2003_v45  ;;  %v2450_v56 = vrot.slane %v2436_v51, %v9280_v39  ;;  %v11956_v19 = vmov 0.0   ;;  %v1967_v27 = vrot.slane %v1959_v43, %v9280_v39 }
 0x1fd   : > { %8535 = vmatprep.subr.bf16.mxu1 %v11956_v19  ;;  %v1974_v57 = vrot.slane %v1960_v5, %v9280_v39  ;;  %v2384_v44 = vcombine.high %v9720_v49, %v9723_v28  ;;  %v2452_v17 = vcombine.high %v9730_v42, %v9733_v55  ;;  %v2385_v12 = vcombine.low %v9791_v53, %v2382_v18 }
 0x1fe   : > { %v2453_v63 = vcombine.low %v2434_v54, %v2450_v56  ;;  %v1456_v37 = vcombine.high %v9498_v10, %v9506_v61  ;;  %v1508_v7 = vcombine.high %v9511_v32, %v9514_v23  ;;  %v2027_v38 = vcombine.low %v1994_v46, %v2010_v41 }
 0x1ff   : > { %v9817_v4 = vpop.permute.xlu1 %1721  ;;  %v1736_v45 = vpop.permute.xlu0 %1735  ;;  %v4064_v3 = vpack.c.bf16 %v2452_v17, %v2384_v44  ;;  %v1471_v49 = vcombine.low %v9757_v1, %v9763_v13  ;;  %v9826_v28 = vrot.slane %v1523_v59, %v9280_v39  ;;  %v2019_v42 = vrot.slane %v2011_v26, %v9280_v39 }
 0x200   : > { %v2026_v55 = vrot.slane %v2012_v30, %v9280_v39  ;;  %v2028_v43 = vcombine.high %v1994_v46, %v2010_v41  ;;  %v4065_v5 = vpack.c.bf16 %v2453_v63, %v2385_v12  ;;  %v2455_v0 = vcombine.low %v1951_v62, %v1958_v11 }
 0x201   : > { %v8353_v10 = vcombine.high %v1951_v62, %v1958_v11  ;;  %v2471_v61 = vcombine.low %v1967_v27, %v1974_v57  ;;  %v1472_v32 = vcombine.high %v9757_v1, %v9763_v13  ;;  %v8354_v23 = vcombine.high %v1967_v27, %v1974_v57  ;;  %8532 = vmatmul.mubr.msk.bf16.vlgmr.msra.gmra.mrb[4].mxu1 %vm4079_vm2, %v9597_v48 }
 0x202   : > { %v4178_v51 = vsel %vm4079_vm2, %v4065_v5, 0  ;;  %v4131_v59 = vsel %vm4079_vm2, %v4064_v3, 0  ;;  %v2454_v26 = vcombine.high %v2434_v54, %v2450_v56  ;;  %v2063_v46 = vcombine.low %v9782_v36, %v1736_v45  ;;  %8537 = vmatprep.mubr.msk.bf16.mxu1 %vm8965_vm1, %v11956_v19 }
 0x203   : > { %v1738_v44 = vpop.permute.xlu1 %1737  ;;  %8542 = vmatpush3.bf16.xpose.msra.mxu0 %v4178_v51  ;;  %8536 = vmatpush3.bf16.xpose.msra.mxu1 %v4131_v59  ;;  %v9837_v41 = vpop.permute.xlu0 %1691  ;;  %v11957_v62 = vcombine.low %v9632_v21, %v9643_v2  ;;  %v9845_v30 = vrot.slane %v1440_v16, %v9280_v39  ;;  %v2035_v48 = vrot.slane %v2027_v38, %v9280_v39 }
 0x204   : > { %v2042_v27 = vrot.slane %v2028_v43, %v9280_v39  ;;  %v2523_v57 = vcombine.low %v2019_v42, %v2026_v55  ;;  %v2386_v54 = vcombine.high %v9791_v53, %v2382_v18  ;;  %v2047_v56 = vcombine.low %v9752_v58, %v9803_v14  ;;  %8547 = vmatprep.subr.bf16.mxu1 %v11956_v19 }
 0x205   : > { %v9842_v11 = vpack.c.bf16 %v1405_v9, %v11957_v62  ;;  %8553 = vmatprep.subr.bf16.mxu0 %v11956_v19  ;;  %v9857_v9 = vrot.slane %v2455_v0, %v9259_v25  ;;  %v9860_v16 = vrot.slane %v8353_v10, %v9259_v25  ;;  %v8355_v17 = vcombine.high %v2019_v42, %v2026_v55 }
 0x206   : > { %v4066_v63 = vpack.c.bf16 %v2454_v26, %v2386_v54  ;;  %v9865_v38 = vrot.slane %v2471_v61, %v9259_v25  ;;  %v9868_v53 = vrot.slane %v8354_v23, %v9259_v25  ;;  %v2064_v18 = vcombine.high %v9782_v36, %v1736_v45 }
 0x207   : > { %v9862_v12 = vpop.permute.xlu1 %1693  ;;  %v2071_v3 = vrot.slane %v2063_v46, %v9259_v25  ;;  %v9872_v43 = vpop.permute.xlu0 %1707  ;;  %v11958_v5 = vcombine.high %v9632_v21, %v9643_v2  ;;  %v9880_v42 = vrot.slane %v1456_v37, %v9280_v39  ;;  %v2539_v55 = vcombine.low %v2035_v48, %v2042_v27 }
 0x208   : > { %v8356_v10 = vcombine.high %v2035_v48, %v2042_v27  ;;  %v2048_v61 = vcombine.high %v9752_v58, %v9803_v14  ;;  %v9885_v23 = vrot.slane %v1508_v7, %v9280_v39  ;;  %v2055_v36 = vrot.slane %v2047_v56, %v9259_v25 }
 0x209   : > { %v9877_v0 = vpack.c.bf16 %v1406_v29, %v11958_v5  ;;  %v2131_v45 = vcombine.low %v9798_v60, %v1738_v44  ;;  %v2132_v51 = vcombine.high %v9798_v60, %v1738_v44  ;;  %v2487_v21 = vcombine.low %v9857_v9, %v9860_v16 }
 0x20a   : > { %8544 = vmatmul.mubr.msk.bf16.vlgmr.msra.gmra.mrb[4].mxu0 %vm4079_vm2, %v9640_v34  ;;  %8538 = vmatmul.mubr.msk.bf16.vlgmr.msra.gmra.mrb[8].mxu1 %vm4079_vm2, %v9607_v35  ;;  %v4225_v2 = vsel %vm4079_vm2, %v4066_v63, 0  ;;  %v2503_v58 = vcombine.low %v9865_v38, %v9868_v53  ;;  %v2530_v14 = vrot.slane %v2523_v57, %v9259_v25  ;;  %v2538_v29 = vrot.slane %v8355_v17, %v9259_v25 }
 0x20b   : > { %v9901_v37 = vpop.permute.xlu1 %1709  ;;  %v2115_v60 = vcombine.low %v9773_v15, %v9817_v4  ;;  %v2116_v34 = vcombine.high %v9773_v15, %v9817_v4  ;;  %v2078_v7 = vrot.slane %v2064_v18, %v9259_v25  ;;  %v2079_v35 = vcombine.low %v2055_v36, %v2071_v3  ;;  %8548 = vmatpush3.bf16.xpose.msra.mxu1 %v4225_v2  ;;  %v9910_v62 = vpop.permute.xlu0 %1723 }
 0x20c   : > { %v2080_v59 = vcombine.high %v2055_v36, %v2071_v3  ;;  %v2546_v44 = vrot.slane %v2539_v55, %v9259_v25  ;;  %v2554_v26 = vrot.slane %v8356_v10, %v9259_v25  ;;  %v2555_v46 = vcombine.low %v2530_v14, %v2538_v29  ;;  %8549 = vmatprep.mubr.msk.bf16.mxu1 %vm8965_vm1, %v11956_v19 }
 0x20d   : > { %v2062_v48 = vrot.slane %v2048_v61, %v9259_v25  ;;  %v2139_v27 = vrot.slane %v2131_v45, %v9259_v25  ;;  %v2146_v15 = vrot.slane %v2132_v51, %v9259_v25  ;;  %8555 = vmatprep.mubr.msk.bf16.mxu0 %vm8965_vm1, %v11956_v19  ;;  %8559 = vmatprep.subr.bf16.mxu1 %v11956_v19 }
 0x20e   : > { %v2495_v4 = vrot.slane %v2487_v21, %v9280_v39  ;;  %v2511_v57 = vrot.slane %v2503_v58, %v9280_v39  ;;  %v2563_v54 = vrot.slane %v2555_v46, %v9280_v39  ;;  %v2571_v56 = vcombine.low %v2546_v44, %v2554_v26 }
 0x20f   : > { %v9923_v17 = vpop.permute.xlu1 %1725  ;;  %v2123_v63 = vrot.slane %v2115_v60, %v9259_v25  ;;  %v2130_v18 = vrot.slane %v2116_v34, %v9259_v25  ;;  %v2095_v3 = vcombine.low %v2062_v48, %v2078_v7  ;;  %v2096_v5 = vcombine.high %v2062_v48, %v2078_v7  ;;  %v1740_v7 = vpop.permute.xlu0 %1739 }
 0x210   : > { %v9928_v55 = vrot.slane %v2079_v35, %v9280_v39  ;;  %v9931_v10 = vrot.slane %v2080_v59, %v9280_v39  ;;  %v2579_v61 = vrot.slane %v2571_v56, %v9280_v39  ;;  %v2488_v36 = vcombine.high %v9857_v9, %v9860_v16 }
 0x211   : > { %v2147_v45 = vcombine.low %v2123_v63, %v2139_v27  ;;  %v2148_v51 = vcombine.high %v2123_v63, %v2139_v27  ;;  %v2504_v21 = vcombine.high %v9865_v38, %v9868_v53  ;;  %v2556_v2 = vcombine.high %v2530_v14, %v2538_v29 }
 0x212   : > { %v2163_v58 = vcombine.low %v2130_v18, %v2146_v15  ;;  %v2519_v60 = vcombine.low %v2495_v4, %v2511_v57  ;;  %v2587_v34 = vcombine.low %v2563_v54, %v2579_v61  ;;  %8550 = vmatmul.mubr.msk.bf16.vlgmr.msra.gmra.mrb[12].mxu1 %vm4079_vm2, %v9691_v40  ;;  %v2588_v35 = vcombine.high %v2563_v54, %v2579_v61 }
 0x213   : > { %v9940_v59 = vpop.permute.xlu1 %1741  ;;  %v2164_v46 = vcombine.high %v2130_v18, %v2146_v15  ;;  %v2520_v48 = vcombine.high %v2495_v4, %v2511_v57  ;;  %v2570_v9 = vrot.slane %v2556_v2, %v9280_v39  ;;  %v2572_v16 = vcombine.high %v2546_v44, %v2554_v26  ;;  %8561 = vmatprep.mubr.msk.bf16.mxu1 %vm8965_vm1, %v11956_v19 }
 0x214   : > { %v2103_v38 = vrot.slane %v2095_v3, %v9280_v39  ;;  %v4067_v53 = vpack.c.bf16 %v2587_v34, %v2519_v60  ;;  %v2502_v14 = vrot.slane %v2488_v36, %v9280_v39  ;;  %v2518_v29 = vrot.slane %v2504_v21, %v9280_v39 }
 0x215   : > { %v2110_v40 = vrot.slane %v2096_v5, %v9280_v39  ;;  %v2199_v27 = vcombine.low %v9872_v43, %v1740_v7  ;;  %v4068_v54 = vpack.c.bf16 %v2588_v35, %v2520_v48  ;;  %v2586_v15 = vrot.slane %v2572_v16, %v9280_v39 }
 0x216   : > { %v2155_v4 = vrot.slane %v2147_v45, %v9280_v39  ;;  %v2162_v44 = vrot.slane %v2148_v51, %v9280_v39  ;;  %v2171_v26 = vrot.slane %v2163_v58, %v9280_v39  ;;  %v4272_v57 = vsel %vm4079_vm2, %v4067_v53, 0 }
 0x217   : > { %v9955_v56 = vpop.permute.xlu1 %2863  ;;  %v2178_v63 = vrot.slane %v2164_v46, %v9280_v39  ;;  %8554 = vmatpush3.bf16.xpose.msra.mxu0 %v4272_v57  ;;  %v2183_v18 = vcombine.low %v9837_v41, %v9910_v62  ;;  %v4319_v3 = vsel %vm4079_vm2, %v4068_v54, 0  ;;  %v2589_v5 = vcombine.low %v2570_v9, %v2586_v15 }
 0x218   : > { %v2184_v61 = vcombine.high %v9837_v41, %v9910_v62  ;;  %v2200_v36 = vcombine.high %v9872_v43, %v1740_v7  ;;  %8565 = vmatprep.subr.bf16.mxu0 %v11956_v19  ;;  %8560 = vmatpush3.bf16.xpose.msra.mxu1 %v4319_v3  ;;  %v2521_v45 = vcombine.low %v2502_v14, %v2518_v29 }
 0x219   : > { %v2591_v51 = vcombine.low %v9928_v55, %v9931_v10  ;;  %v8357_v21 = vcombine.high %v9928_v55, %v9931_v10  ;;  %v2607_v2 = vcombine.low %v2103_v38, %v2110_v40  ;;  %v2207_v58 = vrot.slane %v2199_v27, %v9259_v25  ;;  %8571 = vmatprep.subr.bf16.mxu1 %v11956_v19 }
 0x21a   : > { %v8358_v60 = vcombine.high %v2103_v38, %v2110_v40  ;;  %v2659_v34 = vcombine.low %v2155_v4, %v2162_v44  ;;  %v8359_v41 = vcombine.high %v2155_v4, %v2162_v44  ;;  %v4069_v62 = vpack.c.bf16 %v2589_v5, %v2521_v45 }
 0x21b   : > { %v9971_v43 = vpop.permute.xlu1 %2879  ;;  %v2675_v7 = vcombine.low %v2171_v26, %v2178_v63  ;;  %v8360_v35 = vcombine.high %v2171_v26, %v2178_v63  ;;  %v2191_v46 = vrot.slane %v2183_v18, %v9259_v25  ;;  %v2267_v48 = vcombine.low %v9901_v37, %v9940_v59 }
 0x21c   : > { %v2198_v55 = vrot.slane %v2184_v61, %v9259_v25  ;;  %v2251_v10 = vcombine.low %v9862_v12, %v9923_v17  ;;  %v2252_v16 = vcombine.high %v9862_v12, %v9923_v17  ;;  %v2214_v38 = vrot.slane %v2200_v36, %v9259_v25 }
 0x21d   : > { %v2215_v53 = vcombine.low %v2191_v46, %v2207_v58  ;;  %v2522_v40 = vcombine.high %v2502_v14, %v2518_v29  ;;  %v2590_v27 = vcombine.high %v2570_v9, %v2586_v15  ;;  %v9983_v54 = vrot.slane %v2591_v51, %v9259_v25 }
 0x21e   : > { %v2216_v4 = vcombine.high %v2191_v46, %v2207_v58  ;;  %8556 = vmatmul.mubr.msk.bf16.vlgmr.msra.gmra.mrb[8].mxu0 %vm4079_vm2, %v9738_v6  ;;  %v4366_v44 = vsel %vm4079_vm2, %v4069_v62, 0  ;;  %v2606_v26 = vrot.slane %v8357_v21, %v9259_v25  ;;  %v2614_v57 = vrot.slane %v2607_v2, %v9259_v25 }
 0x21f   : > { %v9990_v63 = vpop.permute.xlu1 %2867  ;;  %8566 = vmatpush3.bf16.xpose.msra.mxu0 %v4366_v44  ;;  %v2268_v12 = vcombine.high %v9901_v37, %v9940_v59  ;;  %v2275_v17 = vrot.slane %v2267_v48, %v9259_v25  ;;  %8567 = vmatprep.mubr.msk.bf16.mxu0 %vm8965_vm1, %v11956_v19  ;;  %v4070_v9 = vpack.c.bf16 %v2590_v27, %v2522_v40 }
 0x220   : > { %8562 = vmatmul.mubr.msk.bf16.vlgmr.msra.gmra.mrb[16].mxu1 %vm4079_vm2, %v9743_v20  ;;  %8577 = vmatprep.subr.bf16.mxu0 %v11956_v19  ;;  %v2622_v6 = vrot.slane %v8358_v60, %v9259_v25  ;;  %v2623_v14 = vcombine.low %v9983_v54, %v2606_v26  ;;  %v2666_v29 = vrot.slane %v2659_v34, %v9259_v25 }
 0x221   : > { %v4413_v15 = vsel %vm4079_vm2, %v4070_v9, 0  ;;  %v2674_v37 = vrot.slane %v8359_v41, %v9259_v25  ;;  %v2682_v59 = vrot.slane %v2675_v7, %v9259_v25  ;;  %v2690_v18 = vrot.slane %v8360_v35, %v9259_v25  ;;  %8573 = vmatprep.mubr.msk.bf16.mxu1 %vm8965_vm1, %v11956_v19  ;;  %v10023_v41 = vpop.permute.xlu0 %2865 }
 0x222   : > { %v2259_v20 = vrot.slane %v2251_v10, %v9259_v25  ;;  %v2266_v3 = vrot.slane %v2252_v16, %v9259_v25  ;;  %8572 = vmatpush3.bf16.xpose.msra.mxu1 %v4413_v15  ;;  %v2639_v5 = vcombine.low %v2614_v57, %v2622_v6  ;;  %v1539_v61 = vcombine.low %v9766_v22, %v9826_v28 }
 0x223   : > { %v10013_v36 = vpop.permute.xlu1 %2883  ;;  %v2231_v45 = vcombine.low %v2198_v55, %v2214_v38  ;;  %v2631_v51 = vrot.slane %v2623_v14, %v9280_v39  ;;  %v2691_v21 = vcombine.low %v2666_v29, %v2674_v37  ;;  %v2707_v2 = vcombine.low %v2682_v59, %v2690_v18  ;;  %8583 = vmatprep.subr.bf16.mxu1 %v11956_v19 }
 0x224   : > { %v10018_v58 = vrot.slane %v2215_v53, %v9280_v39  ;;  %v10021_v60 = vrot.slane %v2216_v4, %v9280_v39  ;;  %v2232_v34 = vcombine.high %v2198_v55, %v2214_v38  ;;  %v2647_v62 = vrot.slane %v2639_v5, %v9280_v39 }
 0x225   : > { %v2282_v7 = vrot.slane %v2268_v12, %v9259_v25  ;;  %v2283_v35 = vcombine.low %v2259_v20, %v2275_v17  ;;  %v2699_v46 = vrot.slane %v2691_v21, %v9280_v39  ;;  %v2715_v48 = vrot.slane %v2707_v2, %v9280_v39  ;;  %v10044_v14 = vpop.permute.xlu0 %2895 }
 0x226   : > { %v2284_v10 = vcombine.high %v2259_v20, %v2275_v17  ;;  %8568 = vmatmul.mubr.msk.bf16.vlgmr.msra.gmra.mrb[12].mxu0 %vm4079_vm2, %v9842_v11  ;;  %v2624_v16 = vcombine.high %v9983_v54, %v2606_v26  ;;  %v2640_v53 = vcombine.high %v2614_v57, %v2622_v6  ;;  %v2692_v40 = vcombine.high %v2666_v29, %v2674_v37 }
 0x227   : > { %v10032_v55 = vpop.permute.xlu1 %2885  ;;  %v2655_v38 = vcombine.low %v2631_v51, %v2647_v62  ;;  %v2723_v27 = vcombine.low %v2699_v46, %v2715_v48  ;;  %8579 = vmatprep.mubr.msk.bf16.mxu0 %vm8965_vm1, %v11956_v19  ;;  %v2656_v4 = vcombine.high %v2631_v51, %v2647_v62  ;;  %v2724_v44 = vcombine.high %v2699_v46, %v2715_v48 }
 0x228   : > { %v2239_v12 = vrot.slane %v2231_v45, %v9280_v39  ;;  %v2246_v17 = vrot.slane %v2232_v34, %v9280_v39  ;;  %v2727_v11 = vcombine.low %v10018_v58, %v10021_v60  ;;  %v1540_v54 = vcombine.high %v9766_v22, %v9826_v28 }
 0x229   : > { %v2299_v26 = vcombine.low %v2266_v3, %v2282_v7  ;;  %v2300_v57 = vcombine.high %v2266_v3, %v2282_v7  ;;  %v4071_v9 = vpack.c.bf16 %v2723_v27, %v2655_v38  ;;  %8574 = vmatmul.mubr.msk.bf16.vlgmr.msra.gmra.mrb[20].mxu1 %vm4079_vm2, %v9877_v0  ;;  %v4072_v6 = vpack.c.bf16 %v2724_v44, %v2656_v4 }
 0x22a   : > { %v2638_v29 = vrot.slane %v2624_v16, %v9280_v39  ;;  %v2654_v15 = vrot.slane %v2640_v53, %v9280_v39  ;;  %v2706_v37 = vrot.slane %v2692_v40, %v9280_v39  ;;  %v2708_v20 = vcombine.high %v2682_v59, %v2690_v18  ;;  %8585 = vmatprep.mubr.msk.bf16.mxu1 %vm8965_vm1, %v11956_v19 }
 0x22b   : > { %v10051_v22 = vpop.permute.xlu1 %2901  ;;  %v2291_v28 = vrot.slane %v2283_v35, %v9280_v39  ;;  %v2298_v3 = vrot.slane %v2284_v10, %v9280_v39  ;;  %v4460_v0 = vsel %vm4079_vm2, %v4071_v9, 0  ;;  %v4507_v5 = vsel %vm4079_vm2, %v4072_v6, 0  ;;  %v11959_v9 = vld [vmem:[#allocation12_spill] sm:$0xff] }
 0x22c   : > { %v8361_v45 = vcombine.high %v10018_v58, %v10021_v60  ;;  %v2743_v51 = vcombine.low %v2239_v12, %v2246_v17  ;;  %8578 = vmatpush3.bf16.xpose.msra.mxu0 %v4460_v0  ;;  %8584 = vmatpush3.bf16.xpose.msra.mxu1 %v4507_v5  ;;  %v2722_v59 = vrot.slane %v2708_v20, %v9280_v39 }
 0x22d   : > { %v8362_v18 = vcombine.high %v2239_v12, %v2246_v17  ;;  %v4055_v21 = vpack.c.bf16 %v1539_v61, %v1471_v49  ;;  %8589 = vmatprep.subr.bf16.mxu0 %v11956_v19  ;;  %v1524_v2 = vcombine.high %v9517_v47, %v9530_v8  ;;  %v1575_v34 = vcombine.low %v9563_v24, %v9566_v52  ;;  %v2912_v8 = vpop.permute.xlu0 %2911 }
 0x22e   : > { %v2307_v58 = vrot.slane %v2299_v26, %v9280_v39  ;;  %v2314_v60 = vrot.slane %v2300_v57, %v9280_v39  ;;  %v2657_v62 = vcombine.low %v2638_v29, %v2654_v15  ;;  %v2725_v7 = vcombine.low %v2706_v37, %v2722_v59  ;;  %8595 = vmatprep.subr.bf16.mxu1 %v11956_v19 }
 0x22f   : > { %v10071_v35 = vpop.permute.xlu1 %2917  ;;  %v2795_v46 = vcombine.low %v2291_v28, %v2298_v3  ;;  %v4056_v49 = vpack.c.bf16 %v1540_v54, %v1472_v32  ;;  %v2658_v61 = vcombine.high %v2638_v29, %v2654_v15  ;;  %v2726_v47 = vcombine.high %v2706_v37, %v2722_v59 }
 0x230   : > { %v4073_v48 = vpack.c.bf16 %v2725_v7, %v2657_v62  ;;  %v10077_v10 = vrot.slane %v2727_v11, %v9259_v25  ;;  %v10080_v16 = vrot.slane %v8361_v45, %v9259_v25  ;;  %v10083_v53 = vrot.slane %v2743_v51, %v9259_v25 }
 0x231   : > { %v8363_v40 = vcombine.high %v2291_v28, %v2298_v3  ;;  %v1538_v38 = vrot.slane %v1524_v2, %v9280_v39  ;;  %v4074_v27 = vpack.c.bf16 %v2726_v47, %v2658_v61  ;;  %v10087_v1 = vrot.slane %v8362_v18, %v9259_v25  ;;  %v11961_v18 = vld [vmem:[#allocation13_spill] sm:$0xff] }
 0x232   : > { %v2811_v13 = vcombine.low %v2307_v58, %v2314_v60  ;;  %v8364_v32 = vcombine.high %v2307_v58, %v2314_v60  ;;  %v1473_v4 = vcombine.low %v9845_v30, %v9880_v42  ;;  %v1474_v44 = vcombine.high %v9845_v30, %v9880_v42 }
 0x233   : > { %v10093_v12 = vpop.permute.xlu1 %2871  ;;  %v2975_v17 = vcombine.low %v9971_v43, %v2912_v8  ;;  %8580 = vmatmul.mubr.msk.bf16.vlgmr.msra.gmra.mrb[16].mxu0 %vm4079_vm2, %v4055_v21  ;;  %v4554_v11 = vsel %vm4079_vm2, %v4073_v48, 0  ;;  %8586 = vmatmul.mubr.msk.bf16.vlgmr.msra.gmra.mrb[24].mxu1 %vm4079_vm2, %v4056_v49  ;;  %v10100_v54 = vrot.slane %v2795_v46, %v9259_v25  ;;  %v1591_v26 = vcombine.low %v9571_v50, %v9582_v31 }
 0x234   : > { %8590 = vmatpush3.bf16.xpose.msra.mxu0 %v4554_v11  ;;  %8591 = vmatprep.mubr.msk.bf16.mxu0 %vm8965_vm1, %v11956_v19  ;;  %v4601_v30 = vsel %vm4079_vm2, %v4074_v27, 0  ;;  %v2759_v42 = vcombine.low %v10077_v10, %v10080_v16  ;;  %v2775_v57 = vcombine.low %v10083_v53, %v10087_v1  ;;  %v1643_v6 = vcombine.low %v11959_v9, %v9538_v33 }
 0x235   : > { %v2959_v29 = vcombine.low %v9955_v56, %v10044_v14  ;;  %v1541_v15 = vcombine.low %v9885_v23, %v1538_v38  ;;  %8601 = vmatprep.subr.bf16.mxu0 %v11956_v19  ;;  %8596 = vmatpush3.bf16.xpose.msra.mxu1 %v4601_v30  ;;  %v2810_v37 = vrot.slane %v8363_v40, %v9259_v25 }
 0x236   : > { %v2976_v20 = vcombine.high %v9971_v43, %v2912_v8  ;;  %v10120_v28 = vrot.slane %v2811_v13, %v9259_v25  ;;  %v2826_v3 = vrot.slane %v8364_v32, %v9259_v25  ;;  %8597 = vmatprep.mubr.msk.bf16.mxu1 %vm8965_vm1, %v11956_v19  ;;  %v1542_v0 = vcombine.high %v9885_v23, %v1538_v38  ;;  %v11960_v43 = vld [vmem:[#allocation14_spill] sm:$0xff] }
 0x237   : > { %v10126_v5 = vpop.permute.xlu1 %2887  ;;  %v2960_v45 = vcombine.high %v9955_v56, %v10044_v14  ;;  %v2983_v51 = vrot.slane %v2975_v17, %v9259_v25  ;;  %v2827_v59 = vcombine.low %v10100_v54, %v2810_v37  ;;  %v1659_v21 = vcombine.low %v11961_v18, %v11960_v43  ;;  %8607 = vmatprep.subr.bf16.mxu1 %v11956_v19 }
 0x238   : > { %v2767_v2 = vrot.slane %v2759_v42, %v9280_v39  ;;  %v2783_v58 = vrot.slane %v2775_v57, %v9280_v39  ;;  %v2843_v23 = vcombine.low %v10120_v28, %v2826_v3  ;;  %v10139_v60 = vrot.slane %v1575_v34, %v9280_v39 }
 0x239   : > { %v2967_v56 = vrot.slane %v2959_v29, %v9259_v25  ;;  %v4057_v14 = vpack.c.bf16 %v1541_v15, %v1473_v4  ;;  %v2835_v62 = vrot.slane %v2827_v59, %v9280_v39  ;;  %v10144_v7 = vrot.slane %v1591_v26, %v9280_v39 }
 0x23a   : > { %v2990_v46 = vrot.slane %v2976_v20, %v9259_v25  ;;  %v2851_v49 = vrot.slane %v2843_v23, %v9280_v39  ;;  %v4058_v61 = vpack.c.bf16 %v1542_v0, %v1474_v44  ;;  %v1651_v47 = vrot.slane %v1643_v6, %v9280_v39 }
 0x23b   : > { %v10149_v8 = vpop.permute.xlu1 %2875  ;;  %v2974_v34 = vrot.slane %v2960_v45, %v9259_v25  ;;  %v2991_v48 = vcombine.low %v2967_v56, %v2983_v51  ;;  %v2992_v40 = vcombine.high %v2967_v56, %v2983_v51  ;;  %8592 = vmatmul.mubr.msk.bf16.vlgmr.msra.gmra.mrb[20].mxu0 %vm4079_vm2, %v4057_v14  ;;  %v1667_v38 = vrot.slane %v1659_v21, %v9280_v39 }
 0x23c   : > { %11962 = vst [vmem:[#allocation12_spill] sm:$0xff] %v10149_v8  ;;  %v2791_v27 = vcombine.low %v2767_v2, %v2783_v58  ;;  %v2859_v13 = vcombine.low %v2835_v62, %v2851_v49  ;;  %8603 = vmatprep.mubr.msk.bf16.mxu0 %vm8965_vm1, %v11956_v19  ;;  %8598 = vmatmul.mubr.msk.bf16.vlgmr.msra.gmra.mrb[28].mxu1 %vm4079_vm2, %v4058_v61 }
 0x23d   : > { %v2760_v32 = vcombine.high %v10077_v10, %v10080_v16  ;;  %v2792_v4 = vcombine.high %v2767_v2, %v2783_v58  ;;  %v2860_v44 = vcombine.high %v2835_v62, %v2851_v49  ;;  %v2776_v17 = vcombine.high %v10083_v53, %v10087_v1  ;;  %8609 = vmatprep.mubr.msk.bf16.mxu1 %vm8965_vm1, %v11956_v19 }
 0x23e   : > { %v2828_v11 = vcombine.high %v10100_v54, %v2810_v37  ;;  %v3007_v26 = vcombine.low %v2974_v34, %v2990_v46  ;;  %v3008_v30 = vcombine.high %v2974_v34, %v2990_v46  ;;  %v4075_v42 = vpack.c.bf16 %v2859_v13, %v2791_v27 }
 0x23f   : > { %v1576_v57 = vcombine.high %v9563_v24, %v9566_v52  ;;  %v10166_v6 = vpop.permute.xlu1 %2891  ;;  %v1607_v10 = vcombine.low %v10139_v60, %v10144_v7  ;;  %v1675_v16 = vcombine.low %v1651_v47, %v1667_v38  ;;  %v4076_v29 = vpack.c.bf16 %v2860_v44, %v2792_v4 }
 0x240   : > { %11963 = vst [vmem:[#allocation14_spill] sm:$0xff] %v10166_v6  ;;  %v1592_v53 = vcombine.high %v9571_v50, %v9582_v31  ;;  %v2999_v1 = vrot.slane %v2991_v48, %v9280_v39  ;;  %v3006_v54 = vrot.slane %v2992_v40, %v9280_v39  ;;  %v4648_v15 = vsel %vm4079_vm2, %v4075_v42, 0 }
 0x241   : > { %v2774_v37 = vrot.slane %v2760_v32, %v9280_v39  ;;  %8602 = vmatpush3.bf16.xpose.msra.mxu0 %v4648_v15  ;;  %v4695_v24 = vsel %vm4079_vm2, %v4076_v29, 0  ;;  %v2790_v52 = vrot.slane %v2776_v17, %v9280_v39  ;;  %v2842_v20 = vrot.slane %v2828_v11, %v9280_v39 }
 0x242   : > { %v2844_v0 = vcombine.high %v10120_v28, %v2826_v3  ;;  %v3015_v45 = vrot.slane %v3007_v26, %v9280_v39  ;;  %v3022_v50 = vrot.slane %v3008_v30, %v9280_v39  ;;  %8613 = vmatprep.subr.bf16.mxu0 %v11956_v19  ;;  %8608 = vmatpush3.bf16.xpose.msra.mxu1 %v4695_v24 }
 0x243   : > { %v1644_v31 = vcombine.high %v11959_v9, %v9538_v33  ;;  %v10185_v51 = vpop.permute.xlu1 %2893  ;;  %v1608_v21 = vcombine.high %v10139_v60, %v10144_v7  ;;  %v1676_v2 = vcombine.high %v1651_v47, %v1667_v38  ;;  %v1660_v28 = vcombine.high %v11961_v18, %v11960_v43  ;;  %8619 = vmatprep.subr.bf16.mxu1 %v11956_v19 }
 0x244   : > { %11964 = vst [vmem:[#allocation13_spill] sm:$0xff] %v10185_v51  ;;  %v2858_v59 = vrot.slane %v2844_v0, %v9280_v39  ;;  %v4059_v3 = vpack.c.bf16 %v1675_v16, %v1607_v10  ;;  %v1590_v58 = vrot.slane %v1576_v57, %v9280_v39  ;;  %v1606_v23 = vrot.slane %v1592_v53, %v9280_v39 }
 0x245   : > { %v3503_v56 = vcombine.low %v2999_v1, %v3006_v54  ;;  %v8365_v33 = vcombine.high %v2999_v1, %v3006_v54  ;;  %v2793_v9 = vcombine.low %v2774_v37, %v2790_v52  ;;  %v3519_v62 = vcombine.low %v3015_v45, %v3022_v50 }
 0x246   : > { %v2861_v14 = vcombine.low %v2842_v20, %v2858_v59  ;;  %v8366_v46 = vcombine.high %v3015_v45, %v3022_v50  ;;  %v2794_v49 = vcombine.high %v2774_v37, %v2790_v52  ;;  %v2862_v61 = vcombine.high %v2842_v20, %v2858_v59 }
 0x247   : > { %v10195_v60 = vpop.permute.xlu1 %2909  ;;  %v4060_v47 = vpack.c.bf16 %v1676_v2, %v1608_v21  ;;  %v1658_v43 = vrot.slane %v1644_v31, %v9280_v39  ;;  %v1674_v18 = vrot.slane %v1660_v28, %v9280_v39  ;;  %v3510_v48 = vrot.slane %v3503_v56, %v9259_v25 }
 0x248   : > { %11965 = vst [vmem:[#allocation15_spill] sm:$0xff] %v10195_v60  ;;  %v4077_v7 = vpack.c.bf16 %v2861_v14, %v2793_v9  ;;  %8604 = vmatmul.mubr.msk.bf16.vlgmr.msra.gmra.mrb[24].mxu0 %vm4079_vm2, %v4059_v3  ;;  %v4078_v34 = vpack.c.bf16 %v2862_v61, %v2794_v49  ;;  %v3518_v40 = vrot.slane %v8365_v33, %v9259_v25 }
 0x249   : > { %8615 = vmatprep.mubr.msk.bf16.mxu0 %vm8965_vm1, %v11956_v19  ;;  %8610 = vmatmul.mubr.msk.bf16.vlgmr.msra.gmra.mrb[32].mxu1 %vm4079_vm2, %v4060_v47  ;;  %v3526_v27 = vrot.slane %v3519_v62, %v9259_v25  ;;  %v3534_v13 = vrot.slane %v8366_v46, %v9259_v25  ;;  %v1609_v44 = vcombine.low %v1590_v58, %v1606_v23 }
 0x24a   : > { %v4742_v38 = vsel %vm4079_vm2, %v4077_v7, 0  ;;  %v4789_v32 = vsel %vm4079_vm2, %v4078_v34, 0  ;;  %8621 = vmatprep.mubr.msk.bf16.mxu1 %vm8965_vm1, %v11956_v19  ;;  %v1677_v17 = vcombine.low %v1658_v43, %v1674_v18  ;;  %v1610_v11 = vcombine.high %v1590_v58, %v1606_v23 }
 0x24b   : > { %8614 = vmatpush3.bf16.xpose.msra.mxu0 %v4742_v38  ;;  %v2882_v4 = vpop.permute.xlu1 %2881  ;;  %8620 = vmatpush3.bf16.xpose.msra.mxu1 %v4789_v32  ;;  %v1678_v26 = vcombine.high %v1658_v43, %v1674_v18  ;;  %v3536_v30 = vcombine.high %v3510_v48, %v3518_v40  ;;  %v3552_v57 = vcombine.high %v3526_v27, %v3534_v13 }
 0x24c   : > { %8625 = vmatprep.subr.bf16.mxu0 %v11956_v19  ;;  %8631 = vmatprep.subr.bf16.mxu1 %v11956_v19  ;;  %v4061_v10 = vpack.c.bf16 %v1677_v17, %v1609_v44  ;;  %v3535_v56 = vcombine.low %v3510_v48, %v3518_v40  ;;  %v3551_v33 = vcombine.low %v3526_v27, %v3534_v13 }
 0x24d   : > { %v4062_v16 = vpack.c.bf16 %v1678_v26, %v1610_v11  ;;  %v3550_v29 = vrot.slane %v3536_v30, %v9280_v39  ;;  %v3566_v53 = vrot.slane %v3552_v57, %v9280_v39 }
 0x24e   : > { %v3543_v43 = vrot.slane %v3535_v56, %v9280_v39  ;;  %v3559_v18 = vrot.slane %v3551_v33, %v9280_v39 }
 0x24f   : > { %v2898_v42 = vpop.permute.xlu1 %2897  ;;  %v3569_v37 = vcombine.low %v3550_v29, %v3566_v53  ;;  %v3570_v20 = vcombine.high %v3550_v29, %v3566_v53 }
 0x250   : > { %v3027_v1 = vcombine.low %v10023_v41, %v2898_v42  ;;  %v3028_v54 = vcombine.high %v10023_v41, %v2898_v42  ;;  %v3567_v44 = vcombine.low %v3543_v43, %v3559_v18  ;;  %v3568_v11 = vcombine.high %v3543_v43, %v3559_v18 }
 0x252   : > { %8616 = vmatmul.mubr.msk.bf16.vlgmr.msra.gmra.mrb[28].mxu0 %vm4079_vm2, %v4061_v10  ;;  %8622 = vmatmul.mubr.msk.bf16.vlgmr.msra.gmra.mrb[36].mxu1 %vm4079_vm2, %v4062_v16  ;;  %v3035_v0 = vrot.slane %v3027_v1, %v9259_v25  ;;  %v3042_v45 = vrot.slane %v3028_v54, %v9259_v25 }
 0x253   : > { %v2914_v15 = vpop.permute.xlu1 %2913  ;;  %8627 = vmatprep.mubr.msk.bf16.mxu0 %vm8965_vm1, %v11956_v19  ;;  %8633 = vmatprep.mubr.msk.bf16.mxu1 %vm8965_vm1, %v11956_v19 }
 0x254   : > { %v3043_v24 = vcombine.low %v2882_v4, %v2914_v15  ;;  %v3044_v52 = vcombine.high %v2882_v4, %v2914_v15 }
 0x256   : > { %v3051_v50 = vrot.slane %v3043_v24, %v9259_v25  ;;  %v3058_v41 = vrot.slane %v3044_v52, %v9259_v25 }
 0x258   : > { %v3059_v31 = vcombine.low %v3035_v0, %v3051_v50  ;;  %v3060_v59 = vcombine.high %v3035_v0, %v3051_v50  ;;  %v3075_v21 = vcombine.low %v3042_v45, %v3058_v41  ;;  %v3076_v2 = vcombine.high %v3042_v45, %v3058_v41 }
 0x25a   : > { %v3067_v28 = vrot.slane %v3059_v31, %v9280_v39  ;;  %v3074_v3 = vrot.slane %v3060_v59, %v9280_v39  ;;  %v3083_v58 = vrot.slane %v3075_v21, %v9280_v39  ;;  %v3090_v23 = vrot.slane %v3076_v2, %v9280_v39 }
 0x25c   : > { %v3571_v9 = vcombine.low %v3067_v28, %v3074_v3  ;;  %v8367_v14 = vcombine.high %v3067_v28, %v3074_v3  ;;  %v3587_v62 = vcombine.low %v3083_v58, %v3090_v23  ;;  %v8368_v46 = vcombine.high %v3083_v58, %v3090_v23 }
 0x25e   : > { %v3578_v49 = vrot.slane %v3571_v9, %v9259_v25  ;;  %v3586_v61 = vrot.slane %v8367_v14, %v9259_v25  ;;  %v3594_v7 = vrot.slane %v3587_v62, %v9259_v25  ;;  %v3602_v47 = vrot.slane %v8368_v46, %v9259_v25 }
 0x260   : > { %v3603_v34 = vcombine.low %v3578_v49, %v3586_v61  ;;  %v3619_v38 = vcombine.low %v3594_v7, %v3602_v47  ;;  %v3604_v48 = vcombine.high %v3578_v49, %v3586_v61  ;;  %v3620_v40 = vcombine.high %v3594_v7, %v3602_v47 }
 0x262   : > { %v3611_v27 = vrot.slane %v3603_v34, %v9280_v39  ;;  %v3627_v13 = vrot.slane %v3619_v38, %v9280_v39  ;;  %v3618_v32 = vrot.slane %v3604_v48, %v9280_v39  ;;  %v3634_v4 = vrot.slane %v3620_v40, %v9280_v39 }
 0x264   : > { %v3635_v17 = vcombine.low %v3611_v27, %v3627_v13  ;;  %v3636_v26 = vcombine.high %v3611_v27, %v3627_v13  ;;  %v3637_v30 = vcombine.low %v3618_v32, %v3634_v4  ;;  %v3638_v16 = vcombine.high %v3618_v32, %v3634_v4 }
 0x266   : > { %v6082_v42 = vpack.c.bf16 %v3635_v17, %v3567_v44  ;;  %v6083_v57 = vpack.c.bf16 %v3636_v26, %v3568_v11  ;;  %v10241_v10 = vpack.c.bf16 %v3637_v30, %v3569_v37  ;;  %v10243_v29 = vpack.c.bf16 %v3638_v16, %v3570_v20 }
 0x268   : > { %8626 = vmatpush3.bf16.msra.mxu0 %v6082_v42  ;;  %8632 = vmatpush3.bf16.msra.mxu1 %v6083_v57  ;;  %11966 = vst [vmem:[#allocation16_spill] sm:$0xff] %v10243_v29 }
 0x269   : > { %8637 = vmatprep.subr.bf16.mxu0 %v11956_v19  ;;  %8643 = vmatprep.subr.bf16.mxu1 %v11956_v19 }
 0x2d4   : > { %v4120_v53 = vpop.f32.mrb[4].mxu1 }
 0x2d5   : > { %v10247_v1 = vmul.f32 0.35355338, %v4120_v53  ;;  %v8533_v54 = vpop.f32.mrb[5].mxu1 }
 0x2d6   : > { %v4123_v15 = vpop.f32.mrb[6].mxu1 }
 0x2d7   : > { %11967 = vst [vmem:[#allocation17_spill] sm:$0xff] %v10247_v1  ;;  %v8534_v24 = vpop.f32.mrb[7].mxu1  ;;  %v5714_v37 = vsel %vm5632_vm3, %v10247_v1, -inf  ;;  %v10253_v41 = vmul.f32 0.35355338, %v4123_v15 }
 0x2d8   : > { %5715 = vmax.xlane.f32.xlu0 %v5714_v37 }
 0x2d9   : > { %11969 = vst [vmem:[#allocation19_spill] sm:$0xff] %v10253_v41  ;;  %v5717_v56 = vsel %vm5632_vm3, %v10253_v41, -inf }
 0x2dd   : > { %v4214_v52 = vpop.f32.mrb[4].mxu0  ;;  %v4167_v0 = vpop.f32.mrb[8].mxu1 }
 0x2de   : > { %v10251_v45 = vmul.f32 0.35355338, %v4214_v52  ;;  %v8545_v20 = vpop.f32.mrb[5].mxu0  ;;  %v8539_v50 = vpop.f32.mrb[9].mxu1  ;;  %v10259_v58 = vmul.f32 0.35355338, %v4167_v0 }
 0x2df   : > { %v4217_v31 = vpop.f32.mrb[6].mxu0  ;;  %v4170_v59 = vpop.f32.mrb[10].mxu1 }
 0x2e0   : > { %11968 = vst [vmem:[#allocation18_spill] sm:$0xff] %v10251_v45  ;;  %v10255_v21 = vmul.f32 0.35355338, %v4217_v31  ;;  %v8546_v2 = vpop.f32.mrb[7].mxu0  ;;  %v5726_v28 = vsel %vm5632_vm3, %v10251_v45, -inf  ;;  %v8540_v3 = vpop.f32.mrb[11].mxu1 }
 0x2e1   : > { %5727 = vmax.xlane.f32.xlu1 %v5726_v28  ;;  %11971 = vst [vmem:[#allocation21_spill] sm:$0xff] %v10259_v58  ;;  %v5720_v33 = vsel %vm5632_vm3, %v10259_v58, -inf  ;;  %v10267_v62 = vmul.f32 0.35355338, %v4170_v59 }
 0x2e2   : > { %11970 = vst [vmem:[#allocation20_spill] sm:$0xff] %v10255_v21  ;;  %v5729_v23 = vsel %vm5632_vm3, %v10255_v21, -inf }
 0x2e3   : > { %5730 = vmax.xlane.f32.xlu0 %v5729_v23  ;;  %11972 = vst [vmem:[#allocation22_spill] sm:$0xff] %v10267_v62  ;;  %v5723_v61 = vsel %vm5632_vm3, %v10267_v62, -inf }
 0x2e5   : > { %5718 = vmax.xlane.f32.xlu1 %v5717_v56  ;;  %v4261_v9 = vpop.f32.mrb[12].mxu1 }
 0x2e6   : > { %v8551_v14 = vpop.f32.mrb[13].mxu1  ;;  %v10273_v38 = vmul.f32 0.35355338, %v4261_v9 }
 0x2e7   : > { %v4264_v46 = vpop.f32.mrb[14].mxu1  ;;  %5721 = vmax.xlane.f32.xlu0 %v5720_v33 }
 0x2e8   : > { %v8552_v49 = vpop.f32.mrb[15].mxu1  ;;  %11974 = vst [vmem:[#allocation24_spill] sm:$0xff] %v10273_v38  ;;  %v10279_v32 = vmul.f32 0.35355338, %v4264_v46  ;;  %v5732_v11 = vsel %vm5632_vm3, %v10273_v38, -inf }
 0x2ea   : > { %11976 = vst [vmem:[#allocation26_spill] sm:$0xff] %v10279_v32  ;;  %v5735_v57 = vsel %vm5632_vm3, %v10279_v32, -inf }
 0x2eb   : > { %5724 = vmax.xlane.f32.xlu0 %v5723_v61 }
 0x2f1   : > { %v4308_v7 = vpop.f32.mrb[8].mxu0 }
 0x2f2   : > { %v10271_v47 = vmul.f32 0.35355338, %v4308_v7  ;;  %v8557_v43 = vpop.f32.mrb[9].mxu0 }
 0x2f3   : > { %v4311_v18 = vpop.f32.mrb[10].mxu0  ;;  %v4355_v34 = vpop.f32.mrb[16].mxu1 }
 0x2f4   : > { %11973 = vst [vmem:[#allocation23_spill] sm:$0xff] %v10271_v47  ;;  %v10275_v48 = vmul.f32 0.35355338, %v4311_v18  ;;  %v8558_v40 = vpop.f32.mrb[11].mxu0  ;;  %v5738_v27 = vsel %vm5632_vm3, %v10271_v47, -inf  ;;  %v8563_v13 = vpop.f32.mrb[17].mxu1 }
 0x2f5   : > { %5739 = vmax.xlane.f32.xlu1 %v5738_v27  ;;  %v4358_v44 = vpop.f32.mrb[18].mxu1  ;;  %v10289_v16 = vmul.f32 0.35355338, %v4355_v34 }
 0x2f6   : > { %11975 = vst [vmem:[#allocation25_spill] sm:$0xff] %v10275_v48  ;;  %v5741_v4 = vsel %vm5632_vm3, %v10275_v48, -inf  ;;  %v8564_v17 = vpop.f32.mrb[19].mxu1  ;;  %v10295_v20 = vmul.f32 0.35355338, %v4358_v44 }
 0x2f7   : > { %5742 = vmax.xlane.f32.xlu0 %v5741_v4  ;;  %11978 = vst [vmem:[#allocation28_spill] sm:$0xff] %v10289_v16  ;;  %v5744_v59 = vsel %vm5632_vm3, %v10289_v16, -inf }
 0x2f8   : > { %11980 = vst [vmem:[#allocation30_spill] sm:$0xff] %v10295_v20  ;;  %v5747_v2 = vsel %vm5632_vm3, %v10295_v20, -inf }
 0x2f9   : > { %5733 = vmax.xlane.f32.xlu1 %v5732_v11  ;;  %v4402_v26 = vpop.f32.mrb[12].mxu0 }
 0x2fa   : > { %v10285_v30 = vmul.f32 0.35355338, %v4402_v26  ;;  %v8569_v42 = vpop.f32.mrb[13].mxu0 }
 0x2fb   : > { %5736 = vmax.xlane.f32.xlu0 %v5735_v57  ;;  %v4405_v53 = vpop.f32.mrb[14].mxu0 }
 0x2fc   : > { %11977 = vst [vmem:[#allocation27_spill] sm:$0xff] %v10285_v30  ;;  %v10291_v54 = vmul.f32 0.35355338, %v4405_v53  ;;  %v8570_v15 = vpop.f32.mrb[15].mxu0  ;;  %v5750_v24 = vsel %vm5632_vm3, %v10285_v30, -inf  ;;  %v4449_v37 = vpop.f32.mrb[20].mxu1 }
 0x2fd   : > { %5751 = vmax.xlane.f32.xlu1 %v5750_v24  ;;  %v8575_v52 = vpop.f32.mrb[21].mxu1  ;;  %v10305_v46 = vmul.f32 0.35355338, %v4449_v37 }
 0x2fe   : > { %11979 = vst [vmem:[#allocation29_spill] sm:$0xff] %v10291_v54  ;;  %v4452_v0 = vpop.f32.mrb[22].mxu1  ;;  %v5753_v50 = vsel %vm5632_vm3, %v10291_v54, -inf }
 0x2ff   : > { %v8576_v31 = vpop.f32.mrb[23].mxu1  ;;  %5754 = vmax.xlane.f32.xlu0 %v5753_v50  ;;  %11982 = vst [vmem:[#allocation32_spill] sm:$0xff] %v10305_v46  ;;  %v10311_v18 = vmul.f32 0.35355338, %v4452_v0  ;;  %v5756_v40 = vsel %vm5632_vm3, %v10305_v46, -inf }
 0x301   : > { %5745 = vmax.xlane.f32.xlu1 %v5744_v59  ;;  %11984 = vst [vmem:[#allocation34_spill] sm:$0xff] %v10311_v18  ;;  %v5759_v44 = vsel %vm5632_vm3, %v10311_v18, -inf }
 0x303   : > { %5748 = vmax.xlane.f32.xlu0 %v5747_v2 }
 0x306   : > { %v4496_v28 = vpop.f32.mrb[16].mxu0  ;;  %v4543_v3 = vpop.f32.mrb[24].mxu1 }
 0x307   : > { %v10303_v23 = vmul.f32 0.35355338, %v4496_v28  ;;  %v8581_v56 = vpop.f32.mrb[17].mxu0  ;;  %v8587_v33 = vpop.f32.mrb[25].mxu1  ;;  %v10321_v11 = vmul.f32 0.35355338, %v4543_v3 }
 0x308   : > { %v4499_v9 = vpop.f32.mrb[18].mxu0  ;;  %v4546_v14 = vpop.f32.mrb[26].mxu1 }
 0x309   : > { %11981 = vst [vmem:[#allocation31_spill] sm:$0xff] %v10303_v23  ;;  %v10307_v49 = vmul.f32 0.35355338, %v4499_v9  ;;  %v8582_v61 = vpop.f32.mrb[19].mxu0  ;;  %v5762_v7 = vsel %vm5632_vm3, %v10303_v23, -inf  ;;  %v8588_v43 = vpop.f32.mrb[27].mxu1 }
 0x30a   : > { %5763 = vmax.xlane.f32.xlu1 %v5762_v7  ;;  %11986 = vst [vmem:[#allocation36_spill] sm:$0xff] %v10321_v11  ;;  %v10336_v59 = vmul.f32 0.35355338, %v4546_v14  ;;  %v5768_v3 = vsel %vm5632_vm3, %v10321_v11, -inf }
 0x30b   : > { %11983 = vst [vmem:[#allocation33_spill] sm:$0xff] %v10307_v49  ;;  %v5765_v34 = vsel %vm5632_vm3, %v10307_v49, -inf }
 0x30c   : > { %5766 = vmax.xlane.f32.xlu0 %v5765_v34  ;;  %11990 = vst [vmem:[#allocation40_spill] sm:$0xff] %v10336_v59  ;;  %v5771_v33 = vsel %vm5632_vm3, %v10336_v59, -inf }
 0x30e   : > { %5757 = vmax.xlane.f32.xlu1 %v5756_v40  ;;  %v4590_v27 = vpop.f32.mrb[20].mxu0 }
 0x30f   : > { %v10317_v13 = vmul.f32 0.35355338, %v4590_v27  ;;  %v8593_v4 = vpop.f32.mrb[21].mxu0  ;;  %v4637_v17 = vpop.f32.mrb[28].mxu1 }
 0x310   : > { %5760 = vmax.xlane.f32.xlu0 %v5759_v44  ;;  %v4593_v26 = vpop.f32.mrb[22].mxu0  ;;  %v10323_v42 = vmul.f32 0.35355338, %v4637_v17  ;;  %v8599_v57 = vpop.f32.mrb[29].mxu1 }
 0x311   : > { %11985 = vst [vmem:[#allocation35_spill] sm:$0xff] %v10317_v13  ;;  %v5136_v53 = vcombine.low %v10303_v23, %v10317_v13  ;;  %v10327_v15 = vmul.f32 0.35355338, %v4593_v26  ;;  %v8594_v24 = vpop.f32.mrb[23].mxu0  ;;  %v5774_v37 = vsel %vm5632_vm3, %v10317_v13, -inf  ;;  %v4640_v52 = vpop.f32.mrb[30].mxu1 }
 0x312   : > { %11987 = vst [vmem:[#allocation37_spill] sm:$0xff] %v10323_v42  ;;  %5775 = vmax.xlane.f32.xlu1 %v5774_v37  ;;  %v5152_v0 = vcombine.low %v10321_v11, %v10323_v42  ;;  %v8600_v50 = vpop.f32.mrb[31].mxu1  ;;  %v10355_v26 = vmul.f32 0.35355338, %v4640_v52 }
 0x313   : > { %11988 = vst [vmem:[#allocation38_spill] sm:$0xff] %v10327_v15  ;;  %v10334_v31 = vrot.slane %v5136_v53, %v9259_v25  ;;  %v5777_v2 = vsel %vm5632_vm3, %v10327_v15, -inf  ;;  %v5780_v53 = vsel %vm5632_vm3, %v10323_v42, -inf }
 0x314   : > { %v10341_v28 = vrot.slane %v5152_v0, %v9259_v25  ;;  %5778 = vmax.xlane.f32.xlu0 %v5777_v2  ;;  %11994 = vst [vmem:[#allocation44_spill] sm:$0xff] %v10355_v26  ;;  %v5783_v37 = vsel %vm5632_vm3, %v10355_v26, -inf }
 0x315   : > { %11989 = vst [vmem:[#allocation39_spill] sm:$0xff] %v10334_v31 }
 0x316   : > { %11991 = vst [vmem:[#allocation41_spill] sm:$0xff] %v10341_v28  ;;  %5769 = vmax.xlane.f32.xlu1 %v5768_v3 }
 0x318   : > { %5772 = vmax.xlane.f32.xlu0 %v5771_v33 }
 0x31b   : > { %v4684_v9 = vpop.f32.mrb[24].mxu0 }
 0x31c   : > { %v10349_v14 = vmul.f32 0.35355338, %v4684_v9  ;;  %v8605_v61 = vpop.f32.mrb[25].mxu0  ;;  %v4731_v7 = vpop.f32.mrb[32].mxu1 }
 0x31d   : > { %v4687_v43 = vpop.f32.mrb[26].mxu0  ;;  %v8611_v34 = vpop.f32.mrb[33].mxu1  ;;  %v10365_v3 = vmul.f32 0.35355338, %v4731_v7 }
 0x31e   : > { %11992 = vst [vmem:[#allocation42_spill] sm:$0xff] %v10349_v14  ;;  %v10351_v40 = vmul.f32 0.35355338, %v4687_v43  ;;  %v8606_v27 = vpop.f32.mrb[27].mxu0  ;;  %v5786_v4 = vsel %vm5632_vm3, %v10349_v14, -inf  ;;  %v4734_v44 = vpop.f32.mrb[34].mxu1 }
 0x31f   : > { %5787 = vmax.xlane.f32.xlu1 %v5786_v4  ;;  %v8612_v17 = vpop.f32.mrb[35].mxu1  ;;  %11996 = vst [vmem:[#allocation46_spill] sm:$0xff] %v10365_v3  ;;  %v5792_v7 = vsel %vm5632_vm3, %v10365_v3, -inf }
 0x320   : > { %11993 = vst [vmem:[#allocation43_spill] sm:$0xff] %v10351_v40  ;;  %v5789_v57 = vsel %vm5632_vm3, %v10351_v40, -inf  ;;  %v10373_v17 = vmul.f32 0.35355338, %v4734_v44 }
 0x321   : > { %5790 = vmax.xlane.f32.xlu0 %v5789_v57 }
 0x322   : > { %11999 = vst [vmem:[#allocation49_spill] sm:$0xff] %v10373_v17 }
 0x323   : > { %5781 = vmax.xlane.f32.xlu1 %v5780_v53 }
 0x325   : > { %v4778_v24 = vpop.f32.mrb[28].mxu0  ;;  %5784 = vmax.xlane.f32.xlu0 %v5783_v37  ;;  %v4825_v2 = vpop.f32.mrb[36].mxu1  ;;  %v5795_v37 = vsel %vm5632_vm3, %v10373_v17, -inf }
 0x326   : > { %v10363_v0 = vmul.f32 0.35355338, %v4778_v24  ;;  %v8617_v50 = vpop.f32.mrb[29].mxu0  ;;  %v8623_v33 = vpop.f32.mrb[37].mxu1  ;;  %v10371_v4 = vmul.f32 0.35355338, %v4825_v2 }
 0x327   : > { %v4781_v52 = vpop.f32.mrb[30].mxu0  ;;  %v4828_v34 = vpop.f32.mrb[38].mxu1  ;;  %v12001_v33 = vld [vmem:[#allocation10_spill] sm:$0xff] }
 0x328   : > { %11995 = vst [vmem:[#allocation45_spill] sm:$0xff] %v10363_v0  ;;  %v10367_v9 = vmul.f32 0.35355338, %v4781_v52  ;;  %v8618_v61 = vpop.f32.mrb[31].mxu0  ;;  %v5798_v43 = vsel %vm5632_vm3, %v10363_v0, -inf  ;;  %v8624_v27 = vpop.f32.mrb[39].mxu1 }
 0x329   : > { %5799 = vmax.xlane.f32.xlu1 %v5798_v43  ;;  %11998 = vst [vmem:[#allocation48_spill] sm:$0xff] %v10371_v4  ;;  %v10379_v53 = vmul.f32 0.35355338, %v4828_v34  ;;  %v5804_v24 = vsel %vm5632_vm3, %v10371_v4, -inf  ;;  %v10387_v50 = vpop.permute.xlu0 %2869 }
 0x32a   : > { %11997 = vst [vmem:[#allocation47_spill] sm:$0xff] %v10367_v9  ;;  %v5801_v57 = vsel %vm5632_vm3, %v10367_v9, -inf }
 0x32b   : > { %5802 = vmax.xlane.f32.xlu0 %v5801_v57  ;;  %12000 = vst [vmem:[#allocation50_spill] sm:$0xff] %v10379_v53  ;;  %v5807_v44 = vsel %vm5632_vm3, %v10379_v53, -inf  ;;  %v10403_v57 = vpop.permute.xlu1 %2889 }
 0x32d   : > { %5793 = vmax.xlane.f32.xlu1 %v5792_v7  ;;  %v10389_v2 = vpop.permute.xlu0 %2899 }
 0x32f   : > { %5796 = vmax.xlane.f32.xlu0 %v5795_v37 }
 0x331   : > { %5805 = vmax.xlane.f32.xlu1 %v5804_v24  ;;  %v10391_v52 = vpop.permute.xlu0 %2915  ;;  %v10407_v24 = vpop.permute.xlu1 %2905 }
 0x333   : > { %5808 = vmax.xlane.f32.xlu0 %v5807_v44 }
 0x335   : > { %v10395_v61 = vpop.permute.xlu0 %2873  ;;  %v10410_v31 = vpop.permute.xlu1 %2921 }
 0x339   : > { %v10397_v43 = vpop.permute.xlu0 %2903 }
 0x33d   : > { %v10399_v34 = vpop.permute.xlu0 %2919 }
 0x341   : > { %v10401_v27 = vpop.permute.xlu0 %2877 }
 0x342   : > { %12002 = vst [vmem:[#allocation10_spill] sm:$0xff] %v10401_v27 }
 0x345   : > { %v10405_v7 = vpop.permute.xlu0 %2907 }
 0x346   : > { %12003 = vst [vmem:[#allocation51_spill] sm:$0xff] %v10405_v7 }
 0x349   : > { %2923 = vrot.lane.b32.xlu0 %v12001_v33, %s8968_s11 }
 0x365   : > { %v5716_v37 = vpop.xlane.xlu0 %5715 }
 0x366   : > { %v5810_v44 = vsub.f32 %v10247_v1, %v5716_v37 }
 0x368   : > { %v5842_v56 = vmul.f32 1.442695, %v5810_v44 }
 0x36a   : > { %8824 = vpow2.f32 %v5842_v56 }
 0x36e   : > { %v5728_v33 = vpop.xlane.xlu1 %5727 }
 0x36f   : > { %v5814_v28 = vsub.f32 %v10251_v45, %v5728_v33 }
 0x370   : > { %v5731_v60 = vpop.xlane.xlu0 %5730 }
 0x371   : > { %v5850_v51 = vmul.f32 1.442695, %v5814_v28  ;;  %v5815_v27 = vsub.f32 %v10255_v21, %v5731_v60 }
 0x372   : > { %v5719_v8 = vpop.xlane.xlu1 %5718 }
 0x373   : > { %8826 = vpow2.f32 %v5850_v51  ;;  %v5811_v7 = vsub.f32 %v10253_v41, %v5719_v8  ;;  %v5852_v6 = vmul.f32 1.442695, %v5815_v27 }
 0x374   : > { %v10415_v29 = vpop.eup %8824  ;;  %v5722_v37 = vpop.xlane.xlu0 %5721 }
 0x375   : > { %v5844_v19 = vmul.f32 1.442695, %v5811_v7  ;;  %8828 = vpow2.f32 %v5852_v6  ;;  %v5812_v44 = vsub.f32 %v10259_v58, %v5722_v37  ;;  %v5906_v56 = vsel %vm5632_vm3, %v10415_v29, 0.0 }
 0x376   : > { %5907 = vadd.xlane.f32.xlu1 %v5906_v56 }
 0x377   : > { %8830 = vpow2.f32 %v5844_v19  ;;  %v5846_v28 = vmul.f32 1.442695, %v5812_v44 }
 0x378   : > { %v5725_v33 = vpop.xlane.xlu0 %5724 }
 0x379   : > { %8832 = vpow2.f32 %v5846_v28  ;;  %v5813_v51 = vsub.f32 %v10267_v62, %v5725_v33 }
 0x37b   : > { %v5848_v60 = vmul.f32 1.442695, %v5813_v51 }
 0x37d   : > { %v10421_v8 = vpop.eup %8826  ;;  %8834 = vpow2.f32 %v5848_v60 }
 0x37e   : > { %v5918_v27 = vsel %vm5632_vm3, %v10421_v8, 0.0 }
 0x37f   : > { %5919 = vadd.xlane.f32.xlu0 %v5918_v27  ;;  %v10425_v6 = vpop.eup %8828 }
 0x380   : > { %v5921_v19 = vsel %vm5632_vm3, %v10425_v6, 0.0 }
 0x381   : > { %v10427_v7 = vpop.eup %8830  ;;  %5922 = vadd.xlane.f32.xlu1 %v5921_v19 }
 0x382   : > { %v5740_v37 = vpop.xlane.xlu1 %5739  ;;  %v5909_v44 = vsel %vm5632_vm3, %v10427_v7, 0.0 }
 0x383   : > { %v5818_v56 = vsub.f32 %v10271_v47, %v5740_v37  ;;  %5910 = vadd.xlane.f32.xlu0 %v5909_v44  ;;  %v10434_v28 = vpop.eup %8832 }
 0x384   : > { %v5743_v33 = vpop.xlane.xlu0 %5742  ;;  %v5912_v27 = vsel %vm5632_vm3, %v10434_v28, 0.0 }
 0x385   : > { %v5858_v51 = vmul.f32 1.442695, %v5818_v56  ;;  %v5819_v60 = vsub.f32 %v10275_v48, %v5743_v33  ;;  %5913 = vadd.xlane.f32.xlu1 %v5912_v27 }
 0x386   : > { %v5734_v41 = vpop.xlane.xlu1 %5733 }
 0x387   : > { %8836 = vpow2.f32 %v5858_v51  ;;  %v5860_v21 = vmul.f32 1.442695, %v5819_v60  ;;  %v5816_v62 = vsub.f32 %v10273_v38, %v5734_v41  ;;  %v10440_v1 = vpop.eup %8834 }
 0x388   : > { %v5737_v19 = vpop.xlane.xlu0 %5736  ;;  %v5915_v44 = vsel %vm5632_vm3, %v10440_v1, 0.0 }
 0x389   : > { %8838 = vpow2.f32 %v5860_v21  ;;  %v5854_v37 = vmul.f32 1.442695, %v5816_v62  ;;  %5916 = vadd.xlane.f32.xlu0 %v5915_v44  ;;  %v5817_v33 = vsub.f32 %v10279_v32, %v5737_v19 }
 0x38a   : > { %v5752_v56 = vpop.xlane.xlu1 %5751 }
 0x38b   : > { %8840 = vpow2.f32 %v5854_v37  ;;  %v5822_v48 = vsub.f32 %v10285_v30, %v5752_v56  ;;  %v5856_v47 = vmul.f32 1.442695, %v5817_v33 }
 0x38c   : > { %v5755_v51 = vpop.xlane.xlu0 %5754 }
 0x38d   : > { %v5866_v27 = vmul.f32 1.442695, %v5822_v48  ;;  %v5823_v60 = vsub.f32 %v10291_v54, %v5755_v51 }
 0x38e   : > { %v5746_v41 = vpop.xlane.xlu1 %5745 }
 0x38f   : > { %8842 = vpow2.f32 %v5866_v27  ;;  %v5820_v21 = vsub.f32 %v10289_v16, %v5746_v41  ;;  %v5868_v62 = vmul.f32 1.442695, %v5823_v60 }
 0x390   : > { %v5749_v38 = vpop.xlane.xlu0 %5748 }
 0x391   : > { %v10448_v45 = vpop.eup %8836  ;;  %v5862_v58 = vmul.f32 1.442695, %v5820_v21  ;;  %8844 = vpow2.f32 %v5868_v62  ;;  %v5821_v37 = vsub.f32 %v10295_v20, %v5749_v38 }
 0x392   : > { %v5930_v19 = vsel %vm5632_vm3, %v10448_v45, 0.0  ;;  %8846 = vpow2.f32 %v5856_v47 }
 0x393   : > { %v10453_v48 = vpop.eup %8838  ;;  %5931 = vadd.xlane.f32.xlu1 %v5930_v19  ;;  %8848 = vpow2.f32 %v5862_v58  ;;  %v5864_v44 = vmul.f32 1.442695, %v5821_v37 }
 0x394   : > { %v5933_v56 = vsel %vm5632_vm3, %v10453_v48, 0.0 }
 0x395   : > { %v10457_v33 = vpop.eup %8840  ;;  %5934 = vadd.xlane.f32.xlu0 %v5933_v56  ;;  %8850 = vpow2.f32 %v5864_v44 }
 0x396   : > { %v5924_v38 = vsel %vm5632_vm3, %v10457_v33, 0.0 }
 0x397   : > { %v5764_v27 = vpop.xlane.xlu1 %5763 }
 0x398   : > { %v5826_v51 = vsub.f32 %v10303_v23, %v5764_v27 }
 0x399   : > { %v10462_v60 = vpop.eup %8842  ;;  %v5767_v41 = vpop.xlane.xlu0 %5766  ;;  %5925 = vadd.xlane.f32.xlu0 %v5924_v38 }
 0x39a   : > { %v5874_v47 = vmul.f32 1.442695, %v5826_v51  ;;  %v5827_v58 = vsub.f32 %v10307_v49, %v5767_v41  ;;  %v5942_v44 = vsel %vm5632_vm3, %v10462_v60, 0.0 }
 0x39b   : > { %v5758_v21 = vpop.xlane.xlu1 %5757  ;;  %v10465_v62 = vpop.eup %8844 }
 0x39c   : > { %8852 = vpow2.f32 %v5874_v47  ;;  %v5876_v37 = vmul.f32 1.442695, %v5827_v58  ;;  %v5824_v19 = vsub.f32 %v10305_v46, %v5758_v21  ;;  %v10470_v56 = vpop.eup %8846  ;;  %v5945_v38 = vsel %vm5632_vm3, %v10465_v62, 0.0 }
 0x39d   : > { %v5761_v27 = vpop.xlane.xlu0 %5760  ;;  %5943 = vadd.xlane.f32.xlu0 %v5942_v44  ;;  %v10474_v51 = vpop.eup %8848  ;;  %5946 = vadd.xlane.f32.xlu1 %v5945_v38  ;;  %v5927_v21 = vsel %vm5632_vm3, %v10470_v56, 0.0 }
 0x39e   : > { %8854 = vpow2.f32 %v5876_v37  ;;  %v5870_v41 = vmul.f32 1.442695, %v5824_v19  ;;  %v5825_v47 = vsub.f32 %v10311_v18, %v5761_v27  ;;  %v5936_v44 = vsel %vm5632_vm3, %v10474_v51, 0.0 }
 0x39f   : > { %v5776_v23 = vpop.xlane.xlu1 %5775  ;;  %v10480_v49 = vpop.eup %8850 }
 0x3a0   : > { %8856 = vpow2.f32 %v5870_v41  ;;  %v5830_v58 = vsub.f32 %v10317_v13, %v5776_v23  ;;  %v5872_v38 = vmul.f32 1.442695, %v5825_v47  ;;  %v5939_v23 = vsel %vm5632_vm3, %v10480_v49, 0.0 }
 0x3a1   : > { %5928 = vadd.xlane.f32.xlu0 %v5927_v21  ;;  %v5779_v54 = vpop.xlane.xlu0 %5778  ;;  %5937 = vadd.xlane.f32.xlu1 %v5936_v44 }
 0x3a2   : > { %v5882_v32 = vmul.f32 1.442695, %v5830_v58  ;;  %v5831_v37 = vsub.f32 %v10327_v15, %v5779_v54 }
 0x3a3   : > { %v5770_v19 = vpop.xlane.xlu1 %5769 }
 0x3a4   : > { %8858 = vpow2.f32 %v5882_v32  ;;  %v5828_v27 = vsub.f32 %v10321_v11, %v5770_v19  ;;  %v5884_v41 = vmul.f32 1.442695, %v5831_v37 }
 0x3a5   : > { %5940 = vadd.xlane.f32.xlu0 %v5939_v23  ;;  %v5773_v20 = vpop.xlane.xlu0 %5772 }
 0x3a6   : > { %v10488_v13 = vpop.eup %8852  ;;  %v5878_v21 = vmul.f32 1.442695, %v5828_v27  ;;  %8860 = vpow2.f32 %v5884_v41  ;;  %v5829_v58 = vsub.f32 %v10336_v59, %v5773_v20 }
 0x3a7   : > { %v5954_v54 = vsel %vm5632_vm3, %v10488_v13, 0.0  ;;  %8862 = vpow2.f32 %v5872_v38 }
 0x3a8   : > { %v10493_v44 = vpop.eup %8854  ;;  %5955 = vadd.xlane.f32.xlu1 %v5954_v54  ;;  %8864 = vpow2.f32 %v5878_v21  ;;  %v5880_v32 = vmul.f32 1.442695, %v5829_v58 }
 0x3a9   : > { %v5957_v47 = vsel %vm5632_vm3, %v10493_v44, 0.0 }
 0x3aa   : > { %v10497_v37 = vpop.eup %8856  ;;  %5958 = vadd.xlane.f32.xlu0 %v5957_v47  ;;  %8866 = vpow2.f32 %v5880_v32 }
 0x3ab   : > { %v5948_v20 = vsel %vm5632_vm3, %v10497_v37, 0.0 }
 0x3ac   : > { %v5788_v19 = vpop.xlane.xlu1 %5787 }
 0x3ad   : > { %v5834_v27 = vsub.f32 %v10349_v14, %v5788_v19 }
 0x3ae   : > { %v10502_v23 = vpop.eup %8858  ;;  %v5791_v41 = vpop.xlane.xlu0 %5790  ;;  %5949 = vadd.xlane.f32.xlu0 %v5948_v20 }
 0x3af   : > { %v5890_v38 = vmul.f32 1.442695, %v5834_v27  ;;  %v5835_v21 = vsub.f32 %v10351_v40, %v5791_v41  ;;  %v5966_v47 = vsel %vm5632_vm3, %v10502_v23, 0.0 }
 0x3b0   : > { %v5782_v58 = vpop.xlane.xlu1 %5781  ;;  %v10505_v54 = vpop.eup %8860 }
 0x3b1   : > { %8868 = vpow2.f32 %v5890_v38  ;;  %v5892_v11 = vmul.f32 1.442695, %v5835_v21  ;;  %v5832_v32 = vsub.f32 %v10323_v42, %v5782_v58  ;;  %v10510_v19 = vpop.eup %8862  ;;  %v5969_v59 = vsel %vm5632_vm3, %v10505_v54, 0.0 }
 0x3b2   : > { %v5785_v15 = vpop.xlane.xlu0 %5784  ;;  %5967 = vadd.xlane.f32.xlu0 %v5966_v47  ;;  %v10514_v27 = vpop.eup %8864  ;;  %5970 = vadd.xlane.f32.xlu1 %v5969_v59  ;;  %v5951_v58 = vsel %vm5632_vm3, %v10510_v19, 0.0 }
 0x3b3   : > { %8870 = vpow2.f32 %v5892_v11  ;;  %v5886_v20 = vmul.f32 1.442695, %v5832_v32  ;;  %v5833_v41 = vsub.f32 %v10355_v26, %v5785_v15  ;;  %v5960_v47 = vsel %vm5632_vm3, %v10514_v27, 0.0 }
 0x3b4   : > { %v10519_v42 = vpop.eup %8866 }
 0x3b5   : > { %8872 = vpow2.f32 %v5886_v20  ;;  %v5888_v38 = vmul.f32 1.442695, %v5833_v41  ;;  %v5963_v59 = vsel %vm5632_vm3, %v10519_v42, 0.0 }
 0x3b6   : > { %v5800_v21 = vpop.xlane.xlu1 %5799  ;;  %5952 = vadd.xlane.f32.xlu0 %v5951_v58  ;;  %5961 = vadd.xlane.f32.xlu1 %v5960_v47 }
 0x3b7   : > { %v5838_v40 = vsub.f32 %v10363_v0, %v5800_v21  ;;  %8874 = vpow2.f32 %v5888_v38 }
 0x3b8   : > { %v5803_v11 = vpop.xlane.xlu0 %5802 }
 0x3b9   : > { %v5898_v32 = vmul.f32 1.442695, %v5838_v40 }
 0x3ba   : > { %v5794_v15 = vpop.xlane.xlu1 %5793  ;;  %5964 = vadd.xlane.f32.xlu0 %v5963_v59 }
 0x3bb   : > { %v5836_v20 = vsub.f32 %v10365_v3, %v5794_v15  ;;  %v10527_v41 = vpop.eup %8868  ;;  %8876 = vpow2.f32 %v5898_v32 }
 0x3bc   : > { %12004 = vst [vmem:[#allocation52_spill] sm:$0xff] %v10527_v41  ;;  %v5797_v14 = vpop.xlane.xlu0 %5796  ;;  %v5978_v21 = vsel %vm5632_vm3, %v10527_v41, 0.0 }
 0x3bd   : > { %v5894_v26 = vmul.f32 1.442695, %v5836_v20  ;;  %v10531_v0 = vpop.eup %8870  ;;  %v5837_v38 = vsub.f32 %v10373_v17, %v5797_v14  ;;  %5979 = vadd.xlane.f32.xlu1 %v5978_v21 }
 0x3be   : > { %v5806_v40 = vpop.xlane.xlu1 %5805  ;;  %v5981_v47 = vsel %vm5632_vm3, %v10531_v0, 0.0 }
 0x3bf   : > { %8878 = vpow2.f32 %v5894_v26  ;;  %v5840_v58 = vsub.f32 %v10371_v4, %v5806_v40  ;;  %v10537_v15 = vpop.eup %8872  ;;  %v5896_v59 = vmul.f32 1.442695, %v5837_v38  ;;  %5982 = vadd.xlane.f32.xlu0 %v5981_v47  ;;  %v3096_v4 = vcombine.high %v9990_v63, %v10389_v2 }
 0x3c0   : > { %v5809_v20 = vpop.xlane.xlu0 %5808  ;;  %v5972_v14 = vsel %vm5632_vm3, %v10537_v15, 0.0 }
 0x3c1   : > { %8880 = vpow2.f32 %v5896_v59  ;;  %v5902_v3 = vmul.f32 1.442695, %v5840_v58  ;;  %v5841_v18 = vsub.f32 %v10379_v53, %v5809_v20  ;;  %v10542_v32 = vpop.eup %8874  ;;  %v3111_v53 = vcombine.low %v10013_v36, %v10391_v52 }
 0x3c2   : > { %v5975_v21 = vsel %vm5632_vm3, %v10542_v32, 0.0 }
 0x3c3   : > { %5973 = vadd.xlane.f32.xlu0 %v5972_v14  ;;  %8882 = vpow2.f32 %v5902_v3  ;;  %v5904_v26 = vmul.f32 1.442695, %v5841_v18 }
 0x3c5   : > { %v10546_v40 = vpop.eup %8876  ;;  %8884 = vpow2.f32 %v5904_v26 }
 0x3c6   : > { %12005 = vst [vmem:[#allocation53_spill] sm:$0xff] %v10546_v40  ;;  %v5990_v47 = vsel %vm5632_vm3, %v10546_v40, 0.0 }
 0x3c7   : > { %5976 = vadd.xlane.f32.xlu0 %v5975_v21  ;;  %v12009_v21 = vld [vmem:[#allocation11_spill] sm:$0xff] }
 0x3c9   : > { %v10548_v38 = vpop.eup %8878 }
 0x3ca   : > { %12006 = vst [vmem:[#allocation54_spill] sm:$0xff] %v10548_v38  ;;  %v5984_v58 = vsel %vm5632_vm3, %v10548_v38, 0.0 }
 0x3cb   : > { %5985 = vadd.xlane.f32.xlu1 %v5984_v58  ;;  %v10554_v59 = vpop.eup %8880  ;;  %5991 = vadd.xlane.f32.xlu0 %v5990_v47  ;;  %v5839_v58 = vsub.f32 %v10367_v9, %v5803_v11  ;;  %v3180_v11 = vcombine.high %v10032_v55, %v10071_v35 }
 0x3cc   : > { %v5987_v18 = vsel %vm5632_vm3, %v10554_v59, 0.0 }
 0x3cd   : > { %v10558_v3 = vpop.eup %8882  ;;  %v5900_v47 = vmul.f32 1.442695, %v5839_v58  ;;  %v3112_v58 = vcombine.high %v10013_v36, %v10391_v52  ;;  %v10596_v52 = vpop.permute.xlu0 %2923 }
 0x3ce   : > { %12007 = vst [vmem:[#allocation55_spill] sm:$0xff] %v10558_v3  ;;  %v5996_v20 = vsel %vm5632_vm3, %v10558_v3, 0.0 }
 0x3cf   : > { %5988 = vadd.xlane.f32.xlu0 %v5987_v18  ;;  %v10562_v14 = vpop.eup %8884  ;;  %8886 = vpow2.f32 %v5900_v47  ;;  %v3119_v47 = vrot.slane %v3111_v53, %v9259_v25  ;;  %v3126_v16 = vrot.slane %v3112_v58, %v9259_v25 }
 0x3d0   : > { %12008 = vst [vmem:[#allocation56_spill] sm:$0xff] %v10562_v14  ;;  %v5999_v26 = vsel %vm5632_vm3, %v10562_v14, 0.0 }
 0x3d3   : > { %5997 = vadd.xlane.f32.xlu0 %v5996_v20  ;;  %v3179_v20 = vcombine.low %v10032_v55, %v10071_v35  ;;  %v3194_v55 = vrot.slane %v3180_v11, %v9259_v25 }
 0x3d5   : > { %v3187_v9 = vrot.slane %v3179_v20, %v9259_v25 }
 0x3d7   : > { %6000 = vadd.xlane.f32.xlu0 %v5999_v26  ;;  %v3095_v26 = vcombine.low %v9990_v63, %v10389_v2 }
 0x3d9   : > { %v10569_v17 = vpop.eup %8886  ;;  %v3103_v30 = vrot.slane %v3095_v26, %v9259_v25 }
 0x3da   : > { %12010 = vst [vmem:[#allocation11_spill] sm:$0xff] %v10569_v17  ;;  %v5993_v18 = vsel %vm5632_vm3, %v10569_v17, 0.0  ;;  %v3110_v17 = vrot.slane %v3096_v4, %v9259_v25 }
 0x3db   : > { %v3127_v46 = vcombine.low %v3103_v30, %v3119_v47  ;;  %v3128_v36 = vcombine.high %v3103_v30, %v3119_v47 }
 0x3dc   : > { %2925 = vrot.lane.b32.xlu1 %v12009_v21, %s8968_s11  ;;  %v3163_v21 = vcombine.low %v10387_v50, %v10051_v22  ;;  %v3144_v40 = vcombine.high %v3110_v17, %v3126_v16 }
 0x3dd   : > { %v3135_v26 = vrot.slane %v3127_v46, %v9280_v39  ;;  %v3142_v11 = vrot.slane %v3128_v36, %v9280_v39 }
 0x3de   : > { %v3171_v35 = vrot.slane %v3163_v21, %v9259_v25  ;;  %v3143_v21 = vcombine.low %v3110_v17, %v3126_v16 }
 0x3df   : > { %v3639_v46 = vcombine.low %v3135_v26, %v3142_v11  ;;  %v8369_v17 = vcombine.high %v3135_v26, %v3142_v11  ;;  %v3315_v26 = vcombine.low %v10403_v57, %v10410_v31 }
 0x3e0   : > { %v3151_v4 = vrot.slane %v3143_v21, %v9280_v39 }
 0x400   : > { %5994 = vadd.xlane.f32.xlu1 %v5993_v18  ;;  %v3164_v18 = vcombine.high %v10387_v50, %v10051_v22  ;;  %v3195_v22 = vcombine.low %v3171_v35, %v3187_v9  ;;  %v3196_v50 = vcombine.high %v3171_v35, %v3187_v9 }
 0x402   : > { %v3178_v53 = vrot.slane %v3164_v18, %v9259_v25  ;;  %v3203_v30 = vrot.slane %v3195_v22, %v9280_v39  ;;  %v3210_v47 = vrot.slane %v3196_v50, %v9280_v39  ;;  %v3247_v50 = vcombine.low %v10126_v5, %v10399_v34 }
 0x403   : > { %v5908_v20 = vpop.xlane.xlu1 %5907 }
 0x404   : > { %v3211_v63 = vcombine.low %v3178_v53, %v3194_v55  ;;  %v3212_v2 = vcombine.high %v3178_v53, %v3194_v55  ;;  %8888 = vrcp.f32 %v5908_v20  ;;  %v3158_v55 = vrot.slane %v3144_v40, %v9280_v39 }
 0x405   : > { %v3707_v36 = vcombine.low %v3203_v30, %v3210_v47  ;;  %v8371_v3 = vcombine.high %v3203_v30, %v3210_v47  ;;  %v3231_v40 = vcombine.low %v10093_v12, %v10397_v43  ;;  %v3248_v47 = vcombine.high %v10126_v5, %v10399_v34 }
 0x406   : > { %v3219_v18 = vrot.slane %v3211_v63, %v9280_v39  ;;  %v3226_v9 = vrot.slane %v3212_v2, %v9280_v39  ;;  %v10610_v2 = vrot.slane %v3639_v46, %v9259_v25  ;;  %v3655_v20 = vcombine.low %v3151_v4, %v3158_v55 }
 0x407   : > { %v8370_v14 = vcombine.high %v3151_v4, %v3158_v55  ;;  %v10615_v21 = vrot.slane %v3707_v36, %v9259_v25  ;;  %v10618_v30 = vrot.slane %v8371_v3, %v9259_v25  ;;  %v3255_v3 = vrot.slane %v3247_v50, %v9259_v25 }
 0x408   : > { %v3723_v16 = vcombine.low %v3219_v18, %v3226_v9  ;;  %v8372_v22 = vcombine.high %v3219_v18, %v3226_v9  ;;  %v3316_v18 = vcombine.high %v10403_v57, %v10410_v31  ;;  %v3299_v4 = vcombine.low %v10395_v61, %v10407_v24 }
 0x409   : > { %v10636_v55 = vrot.slane %v8369_v17, %v9259_v25  ;;  %v10639_v46 = vrot.slane %v3655_v20, %v9259_v25  ;;  %v3300_v5 = vcombine.high %v10395_v61, %v10407_v24  ;;  %v10644_v34 = vrot.slane %v8370_v14, %v9259_v25 }
 0x40a   : > { %v10623_v11 = vrot.slane %v3723_v16, %v9259_v25  ;;  %v10630_v9 = vrot.slane %v8372_v22, %v9259_v25  ;;  %v3232_v57 = vcombine.high %v10093_v12, %v10397_v43  ;;  %v3262_v36 = vrot.slane %v3248_v47, %v9259_v25 }
 0x40b   : > { %v3330_v16 = vrot.slane %v3316_v18, %v9259_v25  ;;  %v3307_v61 = vrot.slane %v3299_v4, %v9259_v25  ;;  %v3739_v24 = vcombine.low %v10615_v21, %v10618_v30  ;;  %v3314_v12 = vrot.slane %v3300_v5, %v9259_v25 }
 0x40c   : > { %v5920_v58 = vpop.xlane.xlu0 %5919  ;;  %v3755_v14 = vcombine.low %v10623_v11, %v10630_v9  ;;  %v3246_v20 = vrot.slane %v3232_v57, %v9259_v25  ;;  %v3687_v47 = vcombine.low %v10639_v46, %v10644_v34 }
 0x40d   : > { %v3347_v4 = vcombine.low %v3314_v12, %v3330_v16  ;;  %v10666_v5 = vrot.slane %v3739_v24, %v9280_v39  ;;  %v12011_v24 = vmov 0.0  }
 0x40e   : > { %v5923_v35 = vpop.xlane.xlu1 %5922  ;;  %v8889_v31 = vpop.eup %8888  ;;  %v3279_v57 = vcombine.low %v3246_v20, %v3262_v36 }
 0x40f   : > { %v6034_v43 = vmul.f32 %v8889_v31, %v10415_v29  ;;  %v10669_v29 = vrot.slane %v3755_v14, %v9280_v39  ;;  %v3355_v14 = vrot.slane %v3347_v4, %v9280_v39 }
 0x410   : > { %v5911_v53 = vpop.xlane.xlu0 %5910 }
 0x411   : > { %8890 = vrcp.f32 %v5911_v53  ;;  %v3323_v53 = vrot.slane %v3315_v26, %v9259_v25 }
 0x412   : > { %v5914_v63 = vpop.xlane.xlu1 %5913  ;;  %8892 = vrcp.f32 %v5923_v35 }
 0x413   : > { %8894 = vrcp.f32 %v5914_v63  ;;  %v3671_v63 = vcombine.low %v10610_v2, %v10636_v55  ;;  %v3332_v26 = vcombine.high %v3307_v61, %v3323_v53 }
 0x414   : > { %8896 = vrcp.f32 %v5920_v58  ;;  %v3239_v58 = vrot.slane %v3231_v40, %v9259_v25  ;;  %v3331_v40 = vcombine.low %v3307_v61, %v3323_v53  ;;  %v3280_v53 = vcombine.high %v3246_v20, %v3262_v36 }
 0x415   : > { %v3346_v61 = vrot.slane %v3332_v26, %v9280_v39  ;;  %v3771_v20 = vcombine.low %v10666_v5, %v10669_v29 }
 0x416   : > { %v5917_v35 = vpop.xlane.xlu0 %5916  ;;  %v3263_v22 = vcombine.low %v3239_v58, %v3255_v3  ;;  %v3264_v18 = vcombine.high %v3239_v58, %v3255_v3  ;;  %v10676_v3 = vrot.slane %v3671_v63, %v9280_v39  ;;  %v3294_v26 = vrot.slane %v3280_v53, %v9280_v39 }
 0x417   : > { %8898 = vrcp.f32 %v5917_v35  ;;  %v3348_v35 = vcombine.high %v3314_v12, %v3330_v16  ;;  %v3339_v16 = vrot.slane %v3331_v40, %v9280_v39  ;;  %v3287_v40 = vrot.slane %v3279_v57, %v9280_v39 }
 0x418   : > { %v10672_v31 = vrot.slane %v3263_v22, %v9280_v39  ;;  %v10684_v22 = vrot.slane %v3687_v47, %v9280_v39 }
 0x419   : > { %v3362_v12 = vrot.slane %v3348_v35, %v9280_v39  ;;  %v8375_v4 = vcombine.high %v3339_v16, %v3346_v61 }
 0x41b   : > { %v8891_v17 = vpop.eup %8890  ;;  %v3859_v35 = vcombine.low %v3355_v14, %v3362_v12 }
 0x41c   : > { %v6035_v50 = vmul.f32 %v8891_v17, %v10427_v7  ;;  %v8893_v38 = vpop.eup %8892 }
 0x41d   : > { %v8895_v7 = vpop.eup %8894 }
 0x41e   : > { %v6066_v41 = vpack.c.bf16 %v6035_v50, %v6034_v43  ;;  %v8897_v58 = vpop.eup %8896  ;;  %v6039_v43 = vmul.f32 %v8893_v38, %v10425_v6  ;;  %v3740_v6 = vcombine.high %v10615_v21, %v10618_v30  ;;  %v3843_v38 = vcombine.low %v3339_v16, %v3346_v61 }
 0x41f   : > { %v6038_v47 = vmul.f32 %v8897_v58, %v10421_v8  ;;  %v3672_v21 = vcombine.high %v10610_v2, %v10636_v55  ;;  %v3688_v30 = vcombine.high %v10639_v46, %v10644_v34  ;;  %v10725_v46 = vrot.slane %v8375_v4, %v9259_v25 }
 0x420   : > { %v5932_v17 = vpop.xlane.xlu1 %5931  ;;  %8628 = vmatmul.mubr.msk.bf16.vlgmr.msra.gmra.mrb[32].mxu0 %vm5632_vm3, %v6066_v41  ;;  %v3278_v41 = vrot.slane %v3264_v18, %v9280_v39  ;;  %v10714_v16 = vrot.slane %v3843_v38, %v9259_v25  ;;  %v10719_v2 = vrot.slane %v3740_v6, %v9280_v39  ;;  %v10728_v34 = vrot.slane %v3859_v35, %v9259_v25 }
 0x421   : > { %8900 = vrcp.f32 %v5932_v17  ;;  %8638 = vmatpush3.bf16.msra.mxu0 %v10241_v10  ;;  %8639 = vmatprep.mubr.msk.bf16.mxu0 %vm8965_vm1, %v12011_v24  ;;  %v8899_v36 = vpop.eup %8898  ;;  %v6036_v10 = vmul.f32 %v8895_v7, %v10434_v28  ;;  %v3703_v28 = vcombine.low %v10676_v3, %v10684_v22  ;;  %v8376_v7 = vcombine.high %v3355_v14, %v3362_v12 }
 0x422   : > { %v5935_v50 = vpop.xlane.xlu0 %5934  ;;  %8649 = vmatprep.subr.bf16.mxu0 %v12011_v24  ;;  %v6037_v63 = vmul.f32 %v8899_v36, %v10440_v1  ;;  %v3756_v1 = vcombine.high %v10623_v11, %v10630_v9  ;;  %v6068_v57 = vpack.c.bf16 %v6039_v43, %v6038_v47  ;;  %v3775_v53 = vcombine.low %v10672_v31, %v3278_v41  ;;  %v12012_v9 = vld [vmem:[#allocation16_spill] sm:$0xff] }
 0x423   : > { %8902 = vrcp.f32 %v5935_v50  ;;  %v6086_v8 = vpack.c.bf16 %v3771_v20, %v3703_v28  ;;  %v8373_v58 = vcombine.high %v10672_v31, %v3278_v41  ;;  %v3791_v36 = vcombine.low %v3287_v40, %v3294_v26 }
 0x424   : > { %v6067_v18 = vpack.c.bf16 %v6037_v63, %v6036_v10  ;;  %v8374_v11 = vcombine.high %v3287_v40, %v3294_v26  ;;  %v10722_v55 = vrot.slane %v3756_v1, %v9280_v39  ;;  %v10731_v31 = vrot.slane %v8376_v7, %v9259_v25 }
 0x425   : > { %v10737_v14 = vrot.slane %v3775_v53, %v9259_v25  ;;  %v10740_v43 = vrot.slane %v3672_v21, %v9280_v39  ;;  %v10743_v50 = vrot.slane %v3688_v30, %v9280_v39  ;;  %v10747_v10 = vrot.slane %v8373_v58, %v9259_v25 }
 0x426   : > { %v5926_v17 = vpop.xlane.xlu0 %5925  ;;  %8634 = vmatmul.mubr.msk.bf16.vlgmr.msra.gmra.mrb[40].mxu1 %vm5632_vm3, %v6067_v18  ;;  %v10750_v63 = vrot.slane %v3791_v36, %v9259_v25  ;;  %v10753_v20 = vrot.slane %v8374_v11, %v9259_v25  ;;  %v3773_v26 = vcombine.low %v10719_v2, %v10722_v55  ;;  %v3875_v18 = vcombine.low %v10714_v16, %v10725_v46 }
 0x427   : > { %8644 = vmatpush3.bf16.msra.mxu1 %v12012_v9  ;;  %8645 = vmatprep.mubr.msk.bf16.mxu1 %vm8965_vm1, %v12011_v24  ;;  %v3891_v28 = vcombine.low %v10728_v34, %v10731_v31  ;;  %v3705_v4 = vcombine.low %v10740_v43, %v10743_v50  ;;  %v3807_v7 = vcombine.low %v10737_v14, %v10747_v10 }
 0x428   : > { %8640 = vmatmul.mubr.msk.bf16.vlgmr.msra.gmra.mrb[36].mxu0 %vm5632_vm3, %v6068_v57  ;;  %8655 = vmatprep.subr.bf16.mxu1 %v12011_v24  ;;  %v10771_v57 = vrot.slane %v3875_v18, %v9280_v39 }
 0x429   : > { %8650 = vmatpush3.bf16.msra.mxu0 %v6086_v8  ;;  %8651 = vmatprep.mubr.msk.bf16.mxu0 %vm8965_vm1, %v12011_v24  ;;  %v10774_v53 = vrot.slane %v3891_v28, %v9280_v39  ;;  %v10780_v8 = vrot.slane %v3807_v7, %v9280_v39 }
 0x42a   : > { %v5944_v61 = vpop.xlane.xlu0 %5943  ;;  %8661 = vmatprep.subr.bf16.mxu0 %v12011_v24  ;;  %v5947_v12 = vpop.xlane.xlu1 %5946 }
 0x42b   : > { %v8901_v41 = vpop.eup %8900  ;;  %8904 = vrcp.f32 %v5944_v61  ;;  %v3907_v9 = vcombine.low %v10771_v57, %v10774_v53 }
 0x42c   : > { %8906 = vrcp.f32 %v5947_v12  ;;  %v6042_v47 = vmul.f32 %v8901_v41, %v10448_v45  ;;  %v3823_v45 = vcombine.low %v10750_v63, %v10753_v20 }
 0x42d   : > { %v8903_v40 = vpop.eup %8902  ;;  %8908 = vrcp.f32 %v5926_v17 }
 0x42e   : > { %v6043_v6 = vmul.f32 %v8903_v40, %v10453_v48  ;;  %v5929_v38 = vpop.xlane.xlu0 %5928  ;;  %v5938_v1 = vpop.xlane.xlu1 %5937  ;;  %v6088_v48 = vpack.c.bf16 %v3773_v26, %v3705_v4  ;;  %v10783_v21 = vrot.slane %v3823_v45, %v9280_v39  ;;  %v3704_v4 = vcombine.high %v10676_v3, %v10684_v22 }
 0x42f   : > { %8910 = vrcp.f32 %v5929_v38 }
 0x430   : > { %v6070_v35 = vpack.c.bf16 %v6043_v6, %v6042_v47  ;;  %v3839_v40 = vcombine.low %v10780_v8, %v10783_v21  ;;  %v3772_v6 = vcombine.high %v10666_v5, %v10669_v29 }
 0x432   : > { %v5941_v17 = vpop.xlane.xlu0 %5940  ;;  %8652 = vmatmul.mubr.msk.bf16.vlgmr.msra.gmra.mrb[40].mxu0 %vm5632_vm3, %v6070_v35  ;;  %v6090_v28 = vpack.c.bf16 %v3907_v9, %v3839_v40  ;;  %v6087_v29 = vpack.c.bf16 %v3772_v6, %v3704_v4  ;;  %v3908_v4 = vcombine.high %v10771_v57, %v10774_v53 }
 0x433   : > { %8912 = vrcp.f32 %v5941_v17  ;;  %8662 = vmatpush3.bf16.msra.mxu0 %v6088_v48  ;;  %8663 = vmatprep.mubr.msk.bf16.mxu0 %vm8965_vm1, %v12011_v24 }
 0x434   : > { %8673 = vmatprep.subr.bf16.mxu0 %v12011_v24  ;;  %8914 = vrcp.f32 %v5938_v1 }
 0x435   : > { %v8905_v30 = vpop.eup %8904  ;;  %v5956_v58 = vpop.xlane.xlu1 %5955 }
 0x436   : > { %v8907_v36 = vpop.eup %8906  ;;  %v6046_v11 = vmul.f32 %v8905_v30, %v10462_v60  ;;  %8916 = vrcp.f32 %v5956_v58  ;;  %v3876_v60 = vcombine.high %v10714_v16, %v10725_v46  ;;  %v3706_v58 = vcombine.high %v10740_v43, %v10743_v50  ;;  %v12013_v43 = vld [vmem:[#allocation14_spill] sm:$0xff] }
 0x437   : > { %v8909_v61 = vpop.eup %8908  ;;  %v6047_v41 = vmul.f32 %v8907_v36, %v10465_v62  ;;  %v5959_v12 = vpop.xlane.xlu0 %5958  ;;  %v3892_v62 = vcombine.high %v10728_v34, %v10731_v31  ;;  %v3383_v50 = vcombine.low %v12013_v43, %v10596_v52 }
 0x438   : > { %8918 = vrcp.f32 %v5959_v12  ;;  %v6040_v38 = vmul.f32 %v8909_v61, %v10457_v33  ;;  %v3808_v33 = vcombine.high %v10737_v14, %v10747_v10  ;;  %v10811_v16 = vrot.slane %v3876_v60, %v9280_v39 }
 0x439   : > { %v8911_v26 = vpop.eup %8910  ;;  %v6072_v47 = vpack.c.bf16 %v6047_v41, %v6046_v11  ;;  %v10814_v3 = vrot.slane %v3892_v62, %v9280_v39  ;;  %v3384_v41 = vcombine.high %v12013_v43, %v10596_v52  ;;  %v3391_v62 = vrot.slane %v3383_v50, %v9259_v25 }
 0x43a   : > { %v6041_v18 = vmul.f32 %v8911_v26, %v10470_v56  ;;  %v3824_v56 = vcombine.high %v10750_v63, %v10753_v20  ;;  %v10821_v10 = vrot.slane %v3808_v33, %v9280_v39  ;;  %v3774_v20 = vcombine.high %v10719_v2, %v10722_v55  ;;  %v12014_v26 = vld [vmem:[#allocation51_spill] sm:$0xff] }
 0x43b   : > { %v5950_v1 = vpop.xlane.xlu0 %5949  ;;  %8664 = vmatmul.mubr.msk.bf16.vlgmr.msra.gmra.mrb[44].mxu0 %vm5632_vm3, %v6072_v47  ;;  %v12015_v47 = vld [vmem:[#allocation12_spill] sm:$0xff]  ;;  %v3398_v52 = vrot.slane %v3384_v41, %v9259_v25 }
 0x43c   : > { %8674 = vmatpush3.bf16.msra.mxu0 %v6090_v28  ;;  %v6069_v35 = vpack.c.bf16 %v6041_v18, %v6040_v38  ;;  %8675 = vmatprep.mubr.msk.bf16.mxu0 %vm8965_vm1, %v12011_v24  ;;  %v10824_v63 = vrot.slane %v3824_v56, %v9280_v39  ;;  %v6089_v55 = vpack.c.bf16 %v3774_v20, %v3706_v58  ;;  %v12017_v58 = vld [vmem:[#allocation10_spill] sm:$0xff] }
 0x43d   : > { %v8913_v5 = vpop.eup %8912  ;;  %8685 = vmatprep.subr.bf16.mxu0 %v12011_v24  ;;  %v3367_v6 = vcombine.low %v12015_v47, %v12014_v26  ;;  %v3368_v18 = vcombine.high %v12015_v47, %v12014_v26  ;;  %v3840_v56 = vcombine.high %v10780_v8, %v10783_v21 }
 0x43e   : > { %8646 = vmatmul.mubr.msk.bf16.vlgmr.msra.gmra.mrb[44].mxu1 %vm5632_vm3, %v6069_v35  ;;  %v8915_v22 = vpop.eup %8914  ;;  %v6045_v31 = vmul.f32 %v8913_v5, %v10480_v49  ;;  %v3909_v49 = vcombine.low %v10811_v16, %v10814_v3  ;;  %v3841_v2 = vcombine.low %v10821_v10, %v10824_v63 }
 0x43f   : > { %8656 = vmatpush3.bf16.msra.mxu1 %v6087_v29  ;;  %v5968_v46 = vpop.xlane.xlu0 %5967  ;;  %8657 = vmatprep.mubr.msk.bf16.mxu1 %vm8965_vm1, %v12011_v24  ;;  %v5971_v14 = vpop.xlane.xlu1 %5970  ;;  %v6044_v45 = vmul.f32 %v8915_v22, %v10474_v51  ;;  %v3375_v33 = vrot.slane %v3367_v6, %v9259_v25  ;;  %v3382_v5 = vrot.slane %v3368_v18, %v9259_v25 }
 0x440   : > { %v8917_v34 = vpop.eup %8916  ;;  %8920 = vrcp.f32 %v5968_v46  ;;  %8667 = vmatprep.subr.bf16.mxu1 %v12011_v24  ;;  %v6092_v51 = vpack.c.bf16 %v3909_v49, %v3841_v2 }
 0x441   : > { %8922 = vrcp.f32 %v5971_v14  ;;  %v6050_v48 = vmul.f32 %v8917_v34, %v10488_v13  ;;  %v6071_v36 = vpack.c.bf16 %v6045_v31, %v6044_v45  ;;  %v3399_v53 = vcombine.low %v3375_v33, %v3391_v62 }
 0x442   : > { %v8919_v7 = vpop.eup %8918  ;;  %8924 = vrcp.f32 %v5950_v1  ;;  %v3400_v22 = vcombine.high %v3375_v33, %v3391_v62  ;;  %v3415_v46 = vcombine.low %v3382_v5, %v3398_v52 }
 0x443   : > { %v6051_v17 = vmul.f32 %v8919_v7, %v10493_v44  ;;  %v5953_v30 = vpop.xlane.xlu0 %5952  ;;  %v5962_v9 = vpop.xlane.xlu1 %5961  ;;  %v3407_v21 = vrot.slane %v3399_v53, %v9280_v39  ;;  %v3910_v7 = vcombine.high %v10811_v16, %v10814_v3 }
 0x444   : > { %8926 = vrcp.f32 %v5953_v30  ;;  %v3414_v20 = vrot.slane %v3400_v22, %v9280_v39  ;;  %v3423_v45 = vrot.slane %v3415_v46, %v9280_v39  ;;  %v12016_v30 = vld [vmem:[#allocation15_spill] sm:$0xff] }
 0x445   : > { %v6074_v11 = vpack.c.bf16 %v6051_v17, %v6050_v48 }
 0x446   : > { %8658 = vmatmul.mubr.msk.bf16.vlgmr.msra.gmra.mrb[48].mxu1 %vm5632_vm3, %v6071_v36  ;;  %v3435_v36 = vcombine.low %v12017_v58, %v12016_v30  ;;  %v3911_v16 = vcombine.low %v3407_v21, %v3414_v20  ;;  %v8377_v3 = vcombine.high %v3407_v21, %v3414_v20 }
 0x447   : > { %8668 = vmatpush3.bf16.msra.mxu1 %v6089_v55  ;;  %8676 = vmatmul.mubr.msk.bf16.vlgmr.msra.gmra.mrb[48].mxu0 %vm5632_vm3, %v6074_v11  ;;  %v5965_v13 = vpop.xlane.xlu0 %5964  ;;  %v3436_v11 = vcombine.high %v12017_v58, %v12016_v30 }
 0x448   : > { %8686 = vmatpush3.bf16.msra.mxu0 %v6092_v51  ;;  %8928 = vrcp.f32 %v5965_v13  ;;  %8687 = vmatprep.mubr.msk.bf16.mxu0 %vm8965_vm1, %v12011_v24 }
 0x449   : > { %8669 = vmatprep.mubr.msk.bf16.mxu1 %vm8965_vm1, %v12011_v24  ;;  %8679 = vmatprep.subr.bf16.mxu1 %v12011_v24  ;;  %8930 = vrcp.f32 %v5962_v9  ;;  %v3450_v41 = vrot.slane %v3436_v11, %v9259_v25 }
 0x44a   : > { %v8921_v44 = vpop.eup %8920  ;;  %8697 = vmatprep.subr.bf16.mxu0 %v12011_v24  ;;  %v5980_v31 = vpop.xlane.xlu1 %5979 }
 0x44b   : > { %v8923_v61 = vpop.eup %8922  ;;  %v6054_v12 = vmul.f32 %v8921_v44, %v10502_v23  ;;  %v12018_v44 = vld [vmem:[#allocation13_spill] sm:$0xff] }
 0x44c   : > { %v8925_v40 = vpop.eup %8924  ;;  %v6055_v60 = vmul.f32 %v8923_v61, %v10505_v54  ;;  %v5983_v38 = vpop.xlane.xlu0 %5982 }
 0x44d   : > { %v6048_v23 = vmul.f32 %v8925_v40, %v10497_v37  ;;  %v6091_v37 = vpack.c.bf16 %v3908_v4, %v3840_v56  ;;  %v3926_v40 = vrot.slane %v8377_v3, %v9259_v25 }
 0x44e   : > { %v8927_v28 = vpop.eup %8926  ;;  %v6076_v1 = vpack.c.bf16 %v6055_v60, %v6054_v12  ;;  %v3918_v12 = vrot.slane %v3911_v16, %v9259_v25 }
 0x44f   : > { %v6049_v35 = vmul.f32 %v8927_v28, %v10510_v19  ;;  %v3416_v19 = vcombine.high %v3382_v5, %v3398_v52 }
 0x450   : > { %8688 = vmatmul.mubr.msk.bf16.vlgmr.msra.gmra.mrb[52].mxu0 %vm5632_vm3, %v6076_v1  ;;  %v5974_v54 = vpop.xlane.xlu0 %5973  ;;  %v3944_v20 = vcombine.high %v3918_v12, %v3926_v40 }
 0x451   : > { %v6073_v29 = vpack.c.bf16 %v6049_v35, %v6048_v23  ;;  %8699 = vmatprep.mubr.msk.bf16.mxu0 %vm8965_vm1, %v12011_v24  ;;  %8932 = vrcp.f32 %v5974_v54  ;;  %v3430_v49 = vrot.slane %v3416_v19, %v9280_v39 }
 0x452   : > { %v8929_v57 = vpop.eup %8928  ;;  %v3958_v3 = vrot.slane %v3944_v20, %v9280_v39 }
 0x453   : > { %8670 = vmatmul.mubr.msk.bf16.vlgmr.msra.gmra.mrb[52].mxu1 %vm5632_vm3, %v6073_v29  ;;  %v8931_v34 = vpop.eup %8930  ;;  %v6053_v8 = vmul.f32 %v8929_v57, %v10519_v42  ;;  %v3842_v42 = vcombine.high %v10821_v10, %v10824_v63  ;;  %v3927_v9 = vcombine.low %v3423_v45, %v3430_v49  ;;  %v3443_v63 = vrot.slane %v3435_v36, %v9259_v25 }
 0x454   : > { %8680 = vmatpush3.bf16.msra.mxu1 %v6091_v37  ;;  %v5977_v14 = vpop.xlane.xlu0 %5976  ;;  %8681 = vmatprep.mubr.msk.bf16.mxu1 %vm8965_vm1, %v12011_v24  ;;  %v6052_v48 = vmul.f32 %v8931_v34, %v10514_v27  ;;  %v8378_v27 = vcombine.high %v3423_v45, %v3430_v49 }
 0x455   : > { %8934 = vrcp.f32 %v5977_v14  ;;  %8691 = vmatprep.subr.bf16.mxu1 %v12011_v24  ;;  %v6093_v51 = vpack.c.bf16 %v3910_v7, %v3842_v42  ;;  %v3934_v47 = vrot.slane %v3927_v9, %v9259_v25 }
 0x456   : > { %v6075_v55 = vpack.c.bf16 %v6053_v8, %v6052_v48  ;;  %8936 = vrcp.f32 %v5983_v38  ;;  %v3942_v18 = vrot.slane %v8378_v27, %v9259_v25 }
 0x458   : > { %v5986_v17 = vpop.xlane.xlu1 %5985  ;;  %v10884_v2 = vpop.xlane.xlu0 %5991  ;;  %v3959_v29 = vcombine.low %v3934_v47, %v3942_v18  ;;  %v3960_v7 = vcombine.high %v3934_v47, %v3942_v18 }
 0x45a   : > { %v3967_v21 = vrot.slane %v3959_v29, %v9280_v39  ;;  %v12024_v29 = vld [vmem:[#allocation11_spill] sm:$0xff] }
 0x45b   : > { %8682 = vmatmul.mubr.msk.bf16.vlgmr.msra.gmra.mrb[56].mxu1 %vm5632_vm3, %v6075_v55  ;;  %v8933_v10 = vpop.eup %8932 }
 0x45c   : > { %v2926_v13 = vpop.permute.xlu1 %2925  ;;  %8692 = vmatpush3.bf16.msra.mxu1 %v6093_v51  ;;  %8693 = vmatprep.mubr.msk.bf16.mxu1 %vm8965_vm1, %v12011_v24  ;;  %v5989_v61 = vpop.xlane.xlu0 %5988  ;;  %v6056_v28 = vmul.f32 %v8933_v10, %v10537_v15  ;;  %v3943_v15 = vcombine.low %v3918_v12, %v3926_v40  ;;  %v3974_v51 = vrot.slane %v3960_v7, %v9280_v39 }
 0x45d   : > { %v3451_v43 = vcombine.low %v12018_v44, %v2926_v13  ;;  %v3452_v50 = vcombine.high %v12018_v44, %v2926_v13  ;;  %8703 = vmatprep.subr.bf16.mxu1 %v12011_v24  ;;  %8938 = vrcp.f32 %v5989_v61 }
 0x45e   : > { %8940 = vrcp.f32 %v5986_v17  ;;  %v3951_v8 = vrot.slane %v3943_v15, %v9280_v39  ;;  %v3978_v18 = vcombine.high %v3958_v3, %v3974_v51 }
 0x45f   : > { %v8935_v26 = vpop.eup %8934  ;;  %v3459_v6 = vrot.slane %v3451_v43, %v9259_v25  ;;  %v3466_v60 = vrot.slane %v3452_v50, %v9259_v25  ;;  %8942 = vrcp.f32 %v5980_v31  ;;  %v12019_v43 = vld [vmem:[#allocation54_spill] sm:$0xff] }
 0x460   : > { %v6057_v62 = vmul.f32 %v8935_v26, %v10542_v32  ;;  %v5998_v38 = vpop.xlane.xlu0 %5997  ;;  %v8937_v14 = vpop.eup %8936  ;;  %v3975_v27 = vcombine.low %v3951_v8, %v3967_v21  ;;  %v3976_v10 = vcombine.high %v3951_v8, %v3967_v21 }
 0x461   : > { %v3467_v1 = vcombine.low %v3443_v63, %v3459_v6  ;;  %v3468_v4 = vcombine.high %v3443_v63, %v3459_v6  ;;  %v3483_v52 = vcombine.low %v3450_v41, %v3466_v60  ;;  %v3484_v23 = vcombine.high %v3450_v41, %v3466_v60 }
 0x462   : > { %v6077_v35 = vpack.c.bf16 %v6057_v62, %v6056_v28  ;;  %v6059_v44 = vmul.f32 %v8937_v14, %v10531_v0  ;;  %v3977_v60 = vcombine.low %v3958_v3, %v3974_v51 }
 0x463   : > { %v3475_v33 = vrot.slane %v3467_v1, %v9280_v39  ;;  %v3482_v54 = vrot.slane %v3468_v4, %v9280_v39  ;;  %v3491_v56 = vrot.slane %v3483_v52, %v9280_v39  ;;  %v3498_v5 = vrot.slane %v3484_v23, %v9280_v39  ;;  %v12021_v4 = vld [vmem:[#allocation56_spill] sm:$0xff]  ;;  %v12022_v23 = vld [vmem:[#allocation55_spill] sm:$0xff] }
 0x464   : > { %8694 = vmatmul.mubr.msk.bf16.vlgmr.msra.gmra.mrb[60].mxu1 %vm5632_vm3, %v6077_v35  ;;  %v6001_v37 = vpop.xlane.xlu0 %6000 }
 0x465   : > { %v3979_v32 = vcombine.low %v3475_v33, %v3482_v54  ;;  %v8379_v57 = vcombine.high %v3475_v33, %v3482_v54  ;;  %v3995_v53 = vcombine.low %v3491_v56, %v3498_v5  ;;  %v8380_v22 = vcombine.high %v3491_v56, %v3498_v5  ;;  %8705 = vmatprep.mubr.msk.bf16.mxu1 %vm8965_vm1, %v12011_v24  ;;  %v12023_v5 = vld [vmem:[#allocation53_spill] sm:$0xff] }
 0x466   : > { %8944 = vrcp.f32 %v6001_v37 }
 0x467   : > { %v3986_v46 = vrot.slane %v3979_v32, %v9259_v25  ;;  %v3994_v19 = vrot.slane %v8379_v57, %v9259_v25  ;;  %v4002_v34 = vrot.slane %v3995_v53, %v9259_v25  ;;  %v4010_v31 = vrot.slane %v8380_v22, %v9259_v25  ;;  %v8939_v45 = vpop.eup %8938 }
 0x468   : > { %8946 = vrcp.f32 %v5998_v38  ;;  %v8941_v42 = vpop.eup %8940  ;;  %v6061_v16 = vmul.f32 %v8939_v45, %v10554_v59  ;;  %v12020_v59 = vld [vmem:[#allocation52_spill] sm:$0xff] }
 0x469   : > { %v4011_v49 = vcombine.low %v3986_v46, %v3994_v19  ;;  %v4027_v48 = vcombine.low %v4002_v34, %v4010_v31  ;;  %v4012_v17 = vcombine.high %v3986_v46, %v3994_v19  ;;  %v4028_v30 = vcombine.high %v4002_v34, %v4010_v31  ;;  %v8943_v11 = vpop.eup %8942 }
 0x46a   : > { %v6060_v50 = vmul.f32 %v8941_v42, %v12019_v43  ;;  %v6058_v47 = vmul.f32 %v8943_v11, %v12020_v59  ;;  %8948 = vrcp.f32 %v10884_v2 }
 0x46b   : > { %v4019_v58 = vrot.slane %v4011_v49, %v9280_v39  ;;  %v4035_v36 = vrot.slane %v4027_v48, %v9280_v39  ;;  %v4026_v55 = vrot.slane %v4012_v17, %v9280_v39  ;;  %v4042_v9 = vrot.slane %v4028_v30, %v9280_v39 }
 0x46c   : > { %v6079_v6 = vpack.c.bf16 %v6061_v16, %v6060_v50  ;;  %v6078_v28 = vpack.c.bf16 %v6059_v44, %v6058_v47 }
 0x46d   : > { %v4043_v13 = vcombine.low %v4019_v58, %v4035_v36  ;;  %v4044_v63 = vcombine.high %v4019_v58, %v4035_v36  ;;  %v4045_v12 = vcombine.low %v4026_v55, %v4042_v9  ;;  %v4046_v40 = vcombine.high %v4026_v55, %v4042_v9 }
 0x46f   : > { %v6094_v61 = vpack.c.bf16 %v4043_v13, %v3975_v27  ;;  %v6095_v41 = vpack.c.bf16 %v4044_v63, %v3976_v10  ;;  %v6096_v62 = vpack.c.bf16 %v4045_v12, %v3977_v60  ;;  %v6097_v1 = vpack.c.bf16 %v4046_v40, %v3978_v18 }
 0x470   : > { %v8945_v26 = vpop.eup %8944 }
 0x471   : > { %8698 = vmatpush3.bf16.msra.mxu0 %v6094_v61  ;;  %8704 = vmatpush3.bf16.msra.mxu1 %v6095_v41  ;;  %v6065_v52 = vmul.f32 %v8945_v26, %v12021_v4 }
 0x472   : > { %8709 = vmatprep.subr.bf16.mxu0 %v12011_v24  ;;  %8715 = vmatprep.subr.bf16.mxu1 %v12011_v24  ;;  %v8947_v0 = vpop.eup %8946 }
 0x473   : > { %v6064_v38 = vmul.f32 %v8947_v0, %v12022_v23 }
 0x474   : > { %8700 = vmatmul.mubr.msk.bf16.vlgmr.msra.gmra.mrb[56].mxu0 %vm5632_vm3, %v6078_v28  ;;  %8706 = vmatmul.mubr.msk.bf16.vlgmr.msra.gmra.mrb[64].mxu1 %vm5632_vm3, %v6079_v6  ;;  %v8949_v54 = vpop.eup %8948 }
 0x475   : > { %8710 = vmatpush3.bf16.msra.mxu0 %v6096_v62  ;;  %8716 = vmatpush3.bf16.msra.mxu1 %v6097_v1  ;;  %v6081_v35 = vpack.c.bf16 %v6065_v52, %v6064_v38  ;;  %v6062_v15 = vmul.f32 %v8949_v54, %v12023_v5 }
 0x476   : > { %8717 = vmatprep.mubr.msk.bf16.mxu1 %vm8965_vm1, %v12011_v24  ;;  %8711 = vmatprep.mubr.msk.bf16.mxu0 %vm8965_vm1, %v12011_v24 }
 0x47c   : > { %8718 = vmatmul.mubr.msk.bf16.vlgmr.msra.gmra.mrb[68].mxu1 %vm5632_vm3, %v6081_v35 }
 0x48d   : > { %v5995_v33 = vpop.xlane.xlu1 %5994 }
 0x48e   : > { %8950 = vrcp.f32 %v5995_v33 }
 0x498   : > { %v8951_v56 = vpop.eup %8950 }
 0x499   : > { %v6063_v32 = vmul.f32 %v8951_v56, %v12024_v29 }
 0x49b   : > { %v6080_v57 = vpack.c.bf16 %v6063_v32, %v6062_v15 }
 0x49d   : > { %8712 = vmatmul.mubr.msk.bf16.vlgmr.msra.gmra.mrb[60].mxu0 %vm5632_vm3, %v6080_v57 }
 0x4f3   : > { %v6135_v53 = vpop.f32.mrb[32].mxu0 }
 0x4f4   : > { %v8629_v22 = vpop.f32.mrb[33].mxu0 }
 0x4f5   : > { %v6138_v37 = vpop.f32.mrb[34].mxu0 }
 0x4f6   : > { %v8630_v46 = vpop.f32.mrb[35].mxu0 }
 0x4f9   : > { %v6179_v19 = vpop.f32.mrb[40].mxu1 }
 0x4fa   : > { %v8635_v31 = vpop.f32.mrb[41].mxu1 }
 0x4fb   : > { %v6223_v34 = vpop.f32.mrb[36].mxu0  ;;  %v6182_v21 = vpop.f32.mrb[42].mxu1 }
 0x4fc   : > { %v6802_v14 = vcombine.low %v6135_v53, %v6223_v34  ;;  %v6803_v2 = vcombine.high %v6135_v53, %v6223_v34  ;;  %v8641_v8 = vpop.f32.mrb[37].mxu0  ;;  %v8636_v7 = vpop.f32.mrb[43].mxu1 }
 0x4fd   : > { %v6226_v20 = vpop.f32.mrb[38].mxu0 }
 0x4fe   : > { %v6870_v45 = vcombine.low %v6138_v37, %v6226_v20  ;;  %v6871_v49 = vcombine.high %v6138_v37, %v6226_v20  ;;  %v8642_v48 = vpop.f32.mrb[39].mxu0  ;;  %v6810_v43 = vrot.slane %v6802_v14, %v9259_v25  ;;  %v6817_v50 = vrot.slane %v6803_v2, %v9259_v25 }
 0x500   : > { %v6878_v28 = vrot.slane %v6870_v45, %v9259_v25  ;;  %v6885_v0 = vrot.slane %v6871_v49, %v9259_v25 }
 0x505   : > { %v10942_v17 = vpop.f32.mrb[40].mxu0 }
 0x506   : > { %v8653_v42 = vpop.f32.mrb[41].mxu0 }
 0x507   : > { %v10944_v30 = vpop.f32.mrb[42].mxu0 }
 0x508   : > { %v8654_v58 = vpop.f32.mrb[43].mxu0 }
 0x50e   : > { %v10946_v36 = vpop.f32.mrb[44].mxu0 }
 0x50f   : > { %v6938_v55 = vcombine.low %v10942_v17, %v10946_v36  ;;  %v6939_v11 = vcombine.high %v10942_v17, %v10946_v36  ;;  %v8665_v16 = vpop.f32.mrb[45].mxu0 }
 0x510   : > { %v10952_v3 = vpop.f32.mrb[46].mxu0 }
 0x511   : > { %v6267_v51 = vpop.f32.mrb[44].mxu1  ;;  %v7006_v9 = vcombine.low %v10944_v30, %v10952_v3  ;;  %v7007_v27 = vcombine.high %v10944_v30, %v10952_v3  ;;  %v8666_v13 = vpop.f32.mrb[47].mxu0 }
 0x512   : > { %v6818_v10 = vcombine.low %v6179_v19, %v6267_v51  ;;  %v6819_v63 = vcombine.high %v6179_v19, %v6267_v51  ;;  %v8647_v44 = vpop.f32.mrb[45].mxu1 }
 0x513   : > { %v6270_v61 = vpop.f32.mrb[46].mxu1  ;;  %v7014_v17 = vrot.slane %v7006_v9, %v9259_v25  ;;  %v7021_v36 = vrot.slane %v7007_v27, %v9259_v25 }
 0x514   : > { %v6826_v41 = vrot.slane %v6818_v10, %v9259_v25  ;;  %v6833_v12 = vrot.slane %v6819_v63, %v9259_v25  ;;  %v6886_v40 = vcombine.low %v6182_v21, %v6270_v61  ;;  %v6887_v26 = vcombine.high %v6182_v21, %v6270_v61  ;;  %v8648_v59 = vpop.f32.mrb[47].mxu1 }
 0x516   : > { %v6834_v47 = vcombine.low %v6810_v43, %v6826_v41  ;;  %v6835_v6 = vcombine.high %v6810_v43, %v6826_v41  ;;  %v6850_v60 = vcombine.low %v6817_v50, %v6833_v12  ;;  %v6851_v18 = vcombine.high %v6817_v50, %v6833_v12 }
 0x517   : > { %v6894_v62 = vrot.slane %v6886_v40, %v9259_v25  ;;  %v6901_v1 = vrot.slane %v6887_v26, %v9259_v25 }
 0x518   : > { %v6842_v4 = vrot.slane %v6834_v47, %v9280_v39  ;;  %v6849_v52 = vrot.slane %v6835_v6, %v9280_v39  ;;  %v6858_v23 = vrot.slane %v6850_v60, %v9280_v39  ;;  %v6865_v38 = vrot.slane %v6851_v18, %v9280_v39 }
 0x519   : > { %v6902_v35 = vcombine.low %v6878_v28, %v6894_v62  ;;  %v6903_v33 = vcombine.high %v6878_v28, %v6894_v62  ;;  %v6918_v54 = vcombine.low %v6885_v0, %v6901_v1  ;;  %v6919_v56 = vcombine.high %v6885_v0, %v6901_v1  ;;  %v10970_v5 = vpop.f32.mrb[48].mxu1 }
 0x51a   : > { %v7346_v15 = vcombine.low %v6842_v4, %v6849_v52  ;;  %v8413_v29 = vcombine.high %v6842_v4, %v6849_v52  ;;  %v7362_v32 = vcombine.low %v6858_v23, %v6865_v38  ;;  %v8414_v57 = vcombine.high %v6858_v23, %v6865_v38  ;;  %v10972_v53 = vpop.f32.mrb[48].mxu0  ;;  %v8659_v22 = vpop.f32.mrb[49].mxu1 }
 0x51b   : > { %v6910_v37 = vrot.slane %v6902_v35, %v9280_v39  ;;  %v6917_v46 = vrot.slane %v6903_v33, %v9280_v39  ;;  %v6926_v19 = vrot.slane %v6918_v54, %v9280_v39  ;;  %v6933_v34 = vrot.slane %v6919_v56, %v9280_v39  ;;  %v8677_v31 = vpop.f32.mrb[49].mxu0  ;;  %v10978_v14 = vpop.f32.mrb[50].mxu1 }
 0x51c   : > { %v7353_v2 = vrot.slane %v7346_v15, %v9259_v25  ;;  %v7361_v8 = vrot.slane %v8413_v29, %v9259_v25  ;;  %v7369_v21 = vrot.slane %v7362_v32, %v9259_v25  ;;  %v7377_v20 = vrot.slane %v8414_v57, %v9259_v25  ;;  %v10984_v7 = vpop.f32.mrb[50].mxu0  ;;  %v8660_v45 = vpop.f32.mrb[51].mxu1 }
 0x51d   : > { %v7414_v49 = vcombine.low %v6910_v37, %v6917_v46  ;;  %v8415_v48 = vcombine.high %v6910_v37, %v6917_v46  ;;  %v7430_v42 = vcombine.low %v6926_v19, %v6933_v34  ;;  %v8416_v58 = vcombine.high %v6926_v19, %v6933_v34  ;;  %v8678_v16 = vpop.f32.mrb[51].mxu0 }
 0x51e   : > { %v7379_v51 = vcombine.high %v7353_v2, %v7361_v8  ;;  %v7395_v13 = vcombine.high %v7369_v21, %v7377_v20  ;;  %v7378_v10 = vcombine.low %v7353_v2, %v7361_v8  ;;  %v7394_v63 = vcombine.low %v7369_v21, %v7377_v20 }
 0x51f   : > { %v7421_v44 = vrot.slane %v7414_v49, %v9259_v25  ;;  %v7429_v43 = vrot.slane %v8415_v48, %v9259_v25  ;;  %v7437_v50 = vrot.slane %v7430_v42, %v9259_v25  ;;  %v7445_v61 = vrot.slane %v8416_v58, %v9259_v25 }
 0x520   : > { %v7393_v41 = vrot.slane %v7379_v51, %v9280_v39  ;;  %v7409_v12 = vrot.slane %v7395_v13, %v9280_v39  ;;  %v10993_v40 = vrot.slane %v7378_v10, %v9280_v39  ;;  %v10996_v26 = vrot.slane %v7394_v63, %v9280_v39 }
 0x521   : > { %v7447_v59 = vcombine.high %v7421_v44, %v7429_v43  ;;  %v7463_v47 = vcombine.high %v7437_v50, %v7445_v61  ;;  %v7446_v6 = vcombine.low %v7421_v44, %v7429_v43  ;;  %v7462_v60 = vcombine.low %v7437_v50, %v7445_v61 }
 0x522   : > { %v7413_v18 = vcombine.high %v7393_v41, %v7409_v12  ;;  %v7411_v28 = vcombine.high %v10993_v40, %v10996_v26  ;;  %v7412_v0 = vcombine.low %v7393_v41, %v7409_v12  ;;  %v6946_v21 = vrot.slane %v6938_v55, %v9259_v25 }
 0x523   : > { %v6575_v1 = vpop.f32.mrb[52].mxu0  ;;  %v7461_v4 = vrot.slane %v7447_v59, %v9280_v39  ;;  %v7477_v52 = vrot.slane %v7463_v47, %v9280_v39  ;;  %v11005_v23 = vrot.slane %v7446_v6, %v9280_v39  ;;  %v11008_v38 = vrot.slane %v7462_v60, %v9280_v39 }
 0x524   : > { %v7074_v35 = vcombine.low %v10972_v53, %v6575_v1  ;;  %v7075_v33 = vcombine.high %v10972_v53, %v6575_v1  ;;  %v8689_v54 = vpop.f32.mrb[53].mxu0  ;;  %v6953_v20 = vrot.slane %v6939_v11, %v9259_v25 }
 0x525   : > { %v11012_v56 = vpop.f32.mrb[54].mxu0  ;;  %v7481_v15 = vcombine.high %v7461_v4, %v7477_v52  ;;  %v7479_v29 = vcombine.high %v11005_v23, %v11008_v38  ;;  %v7480_v32 = vcombine.low %v7461_v4, %v7477_v52 }
 0x526   : > { %v7142_v22 = vcombine.low %v10984_v7, %v11012_v56  ;;  %v7143_v37 = vcombine.high %v10984_v7, %v11012_v56  ;;  %v8690_v46 = vpop.f32.mrb[55].mxu0  ;;  %v6443_v19 = vpop.f32.mrb[52].mxu1  ;;  %v11047_v13 = vrot.slane %v7074_v35, %v9259_v25  ;;  %v11050_v10 = vrot.slane %v7075_v33, %v9259_v25 }
 0x527   : > { %v6954_v53 = vcombine.low %v10970_v5, %v6443_v19  ;;  %v6955_v34 = vcombine.high %v10970_v5, %v6443_v19  ;;  %v8671_v31 = vpop.f32.mrb[53].mxu1  ;;  %v8770_v2 = vpack.i.bf16 %v7481_v15, %v7413_v18  ;;  %v8760_v8 = vpack.i.bf16 %v7479_v29, %v7411_v28 }
 0x528   : > { %v6446_v45 = vpop.f32.mrb[54].mxu1  ;;  %v8765_v49 = vpack.i.bf16 %v7480_v32, %v7412_v0 }
 0x529   : > { %v6962_v48 = vrot.slane %v6954_v53, %v9259_v25  ;;  %v6969_v42 = vrot.slane %v6955_v34, %v9259_v25  ;;  %v7022_v5 = vcombine.low %v10978_v14, %v6446_v45  ;;  %v7023_v58 = vcombine.high %v10978_v14, %v6446_v45  ;;  %8771 = vrot.lane.b32.xlu0 %v8770_v2, %s8969_s12  ;;  %v8672_v16 = vpop.f32.mrb[55].mxu1 }
 0x52a   : > { %8761 = vrot.lane.b32.xlu1 %v8760_v8, %s8970_s14 }
 0x52b   : > { %v6970_v55 = vcombine.low %v6946_v21, %v6962_v48  ;;  %v6971_v11 = vcombine.high %v6946_v21, %v6962_v48  ;;  %v6986_v14 = vcombine.low %v6953_v20, %v6969_v42  ;;  %v6987_v51 = vcombine.high %v6953_v20, %v6969_v42 }
 0x52c   : > { %v7030_v9 = vrot.slane %v7022_v5, %v9259_v25  ;;  %v7037_v63 = vrot.slane %v7023_v58, %v9259_v25 }
 0x52d   : > { %v6978_v30 = vrot.slane %v6970_v55, %v9280_v39  ;;  %v6985_v3 = vrot.slane %v6971_v11, %v9280_v39  ;;  %v6994_v27 = vrot.slane %v6986_v14, %v9280_v39  ;;  %v7001_v44 = vrot.slane %v6987_v51, %v9280_v39 }
 0x52e   : > { %v7038_v43 = vcombine.low %v7014_v17, %v7030_v9  ;;  %v7039_v50 = vcombine.high %v7014_v17, %v7030_v9  ;;  %v7054_v61 = vcombine.low %v7021_v36, %v7037_v63  ;;  %v7055_v41 = vcombine.high %v7021_v36, %v7037_v63  ;;  %8766 = vrot.lane.b32.xlu1 %v8765_v49, %s8971_s15  ;;  %v6531_v12 = vpop.f32.mrb[56].mxu1 }
 0x52f   : > { %v7482_v59 = vcombine.low %v6978_v30, %v6985_v3  ;;  %v8417_v47 = vcombine.high %v6978_v30, %v6985_v3  ;;  %v7498_v6 = vcombine.low %v6994_v27, %v7001_v44  ;;  %v8418_v60 = vcombine.high %v6994_v27, %v7001_v44  ;;  %v8683_v18 = vpop.f32.mrb[57].mxu1 }
 0x530   : > { %v7046_v28 = vrot.slane %v7038_v43, %v9280_v39  ;;  %v7053_v0 = vrot.slane %v7039_v50, %v9280_v39  ;;  %v7062_v1 = vrot.slane %v7054_v61, %v9280_v39  ;;  %v7069_v4 = vrot.slane %v7055_v41, %v9280_v39  ;;  %v6534_v52 = vpop.f32.mrb[58].mxu1 }
 0x531   : > { %v7489_v35 = vrot.slane %v7482_v59, %v9259_v25  ;;  %v7497_v33 = vrot.slane %v8417_v47, %v9259_v25  ;;  %v7505_v54 = vrot.slane %v7498_v6, %v9259_v25  ;;  %v7513_v15 = vrot.slane %v8418_v60, %v9259_v25  ;;  %v8684_v29 = vpop.f32.mrb[59].mxu1 }
 0x532   : > { %v7550_v32 = vcombine.low %v7046_v28, %v7053_v0  ;;  %v8419_v46 = vcombine.high %v7046_v28, %v7053_v0  ;;  %v7566_v19 = vcombine.low %v7062_v1, %v7069_v4  ;;  %v8420_v53 = vcombine.high %v7062_v1, %v7069_v4 }
 0x533   : > { %v7515_v34 = vcombine.high %v7489_v35, %v7497_v33  ;;  %v7531_v31 = vcombine.high %v7505_v54, %v7513_v15  ;;  %v7514_v2 = vcombine.low %v7489_v35, %v7497_v33  ;;  %v7530_v8 = vcombine.low %v7505_v54, %v7513_v15 }
 0x534   : > { %v7557_v21 = vrot.slane %v7550_v32, %v9259_v25  ;;  %v7565_v20 = vrot.slane %v8419_v46, %v9259_v25  ;;  %v7573_v45 = vrot.slane %v7566_v19, %v9259_v25  ;;  %v7581_v49 = vrot.slane %v8420_v53, %v9259_v25 }
 0x535   : > { %v11072_v48 = vrot.slane %v7515_v34, %v9280_v39  ;;  %v11075_v42 = vrot.slane %v7531_v31, %v9280_v39  ;;  %v11078_v5 = vrot.slane %v7514_v2, %v9280_v39  ;;  %v11081_v58 = vrot.slane %v7530_v8, %v9280_v39 }
 0x536   : > { %v7583_v16 = vcombine.high %v7557_v21, %v7565_v20  ;;  %v7599_v17 = vcombine.high %v7573_v45, %v7581_v49  ;;  %v7582_v36 = vcombine.low %v7557_v21, %v7565_v20  ;;  %v7598_v55 = vcombine.low %v7573_v45, %v7581_v49  ;;  %v8823_v45 = vld [vmem:[%s11834_s5 + $0x8] sm:$0xff]  }
 0x537   : > { %v7150_v11 = vrot.slane %v7142_v22, %v9259_v25  ;;  %v6619_v14 = vpop.f32.mrb[60].mxu1  ;;  %v7548_v51 = vcombine.low %v11072_v48, %v11075_v42  ;;  %v7547_v9 = vcombine.high %v11078_v5, %v11081_v58  ;;  %v7549_v63 = vcombine.high %v11072_v48, %v11075_v42 }
 0x538   : > { %v7090_v30 = vcombine.low %v6531_v12, %v6619_v14  ;;  %v7091_v3 = vcombine.high %v6531_v12, %v6619_v14  ;;  %v8695_v27 = vpop.f32.mrb[61].mxu1  ;;  %v7597_v44 = vrot.slane %v7583_v16, %v9280_v39  ;;  %v7613_v43 = vrot.slane %v7599_v17, %v9280_v39  ;;  %v12050_v12 = vld [vmem:[#allocation49_spill] sm:$0xff] }
 0x539   : > { %v7157_v22 = vrot.slane %v7143_v37, %v9259_v25  ;;  %v6622_v50 = vpop.f32.mrb[62].mxu1  ;;  %v11100_v61 = vrot.slane %v7582_v36, %v9280_v39  ;;  %v11103_v41 = vrot.slane %v7598_v55, %v9280_v39 }
 0x53a   : > { %v7098_v59 = vrot.slane %v7090_v30, %v9259_v25  ;;  %v7105_v47 = vrot.slane %v7091_v3, %v9259_v25  ;;  %v7158_v6 = vcombine.low %v6534_v52, %v6622_v50  ;;  %v7159_v60 = vcombine.high %v6534_v52, %v6622_v50  ;;  %v8696_v18 = vpop.f32.mrb[63].mxu1  ;;  %v8822_v52 = vld [vmem:[%s11834_s5] sm:$0xff]  }
 0x53b   : > { %v7616_v28 = vcombine.low %v7597_v44, %v7613_v43  ;;  %v7615_v7 = vcombine.high %v11100_v61, %v11103_v41  ;;  %v7617_v56 = vcombine.high %v7597_v44, %v7613_v43  ;;  %8721 = vmatprep.subr.bf16.mxu0 %v8822_v52 }
 0x53c   : > { %v7106_v0 = vcombine.low %v11047_v13, %v7098_v59  ;;  %v7107_v1 = vcombine.high %v11047_v13, %v7098_v59  ;;  %v7122_v4 = vcombine.low %v11050_v10, %v7105_v47  ;;  %v7123_v35 = vcombine.high %v11050_v10, %v7105_v47  ;;  %8722 = vmatpush3.bf16.msra.mxu0 %v8822_v52  ;;  %v12028_v52 = vld [vmem:[#allocation21_spill] sm:$0xff] }
 0x53d   : > { %v7166_v33 = vrot.slane %v7158_v6, %v9259_v25  ;;  %v7173_v54 = vrot.slane %v7159_v60, %v9259_v25  ;;  %v8780_v15 = vpack.i.bf16 %v7616_v28, %v7548_v51  ;;  %v8775_v29 = vpack.i.bf16 %v7615_v7, %v7547_v9  ;;  %8723 = vmatprep.subr.bf16.mxu0 %v8823_v45 }
 0x53e   : > { %v7114_v32 = vrot.slane %v7106_v0, %v9280_v39  ;;  %v7121_v46 = vrot.slane %v7107_v1, %v9280_v39  ;;  %v7130_v13 = vrot.slane %v7122_v4, %v9280_v39  ;;  %v7137_v19 = vrot.slane %v7123_v35, %v9280_v39  ;;  %v12027_v35 = vld [vmem:[#allocation24_spill] sm:$0xff] }
 0x53f   : > { %v7174_v10 = vcombine.low %v7150_v11, %v7166_v33  ;;  %v7175_v53 = vcombine.high %v7150_v11, %v7166_v33  ;;  %v7190_v34 = vcombine.low %v7157_v22, %v7173_v54  ;;  %v7191_v31 = vcombine.high %v7157_v22, %v7173_v54  ;;  %8781 = vrot.lane.b32.xlu1 %v8780_v15, %s8971_s15 }
 0x540   : > { %v7618_v2 = vcombine.low %v7114_v32, %v7121_v46  ;;  %v8421_v8 = vcombine.high %v7114_v32, %v7121_v46  ;;  %v7634_v21 = vcombine.low %v7130_v13, %v7137_v19  ;;  %v8422_v20 = vcombine.high %v7130_v13, %v7137_v19  ;;  %8776 = vrot.lane.b32.xlu0 %v8775_v29, %s8970_s14  ;;  %v12048_v46 = vld [vmem:[#allocation42_spill] sm:$0xff] }
 0x541   : > { %v7182_v49 = vrot.slane %v7174_v10, %v9280_v39  ;;  %v7189_v48 = vrot.slane %v7175_v53, %v9280_v39  ;;  %v7198_v42 = vrot.slane %v7190_v34, %v9280_v39  ;;  %v7205_v16 = vrot.slane %v7191_v31, %v9280_v39  ;;  %8724 = vmatpush3.bf16.msra.mxu0 %v8823_v45 }
 0x542   : > { %v7625_v17 = vrot.slane %v7618_v2, %v9259_v25  ;;  %v7633_v36 = vrot.slane %v8421_v8, %v9259_v25  ;;  %v7641_v55 = vrot.slane %v7634_v21, %v9259_v25  ;;  %v7649_v11 = vrot.slane %v8422_v20, %v9259_v25  ;;  %v12029_v2 = vld [vmem:[#allocation18_spill] sm:$0xff]  ;;  %v12030_v8 = vld [vmem:[#allocation17_spill] sm:$0xff] }
 0x543   : > { %v7686_v14 = vcombine.low %v7182_v49, %v7189_v48  ;;  %v8423_v51 = vcombine.high %v7182_v49, %v7189_v48  ;;  %v7702_v9 = vcombine.low %v7198_v42, %v7205_v16  ;;  %v8424_v30 = vcombine.high %v7198_v42, %v7205_v16 }
 0x544   : > { %v8785_v3 = vpack.i.bf16 %v7617_v56, %v7549_v63  ;;  %v7650_v27 = vcombine.low %v7625_v17, %v7633_v36  ;;  %v7666_v44 = vcombine.low %v7641_v55, %v7649_v11  ;;  %v7651_v43 = vcombine.high %v7625_v17, %v7633_v36 }
 0x545   : > { %v7693_v22 = vrot.slane %v7686_v14, %v9259_v25  ;;  %v7701_v50 = vrot.slane %v8423_v51, %v9259_v25  ;;  %v7709_v59 = vrot.slane %v7702_v9, %v9259_v25  ;;  %v7717_v47 = vrot.slane %v8424_v30, %v9259_v25  ;;  %v12032_v14 = vld [vmem:[#allocation28_spill] sm:$0xff] }
 0x546   : > { %8786 = vrot.lane.b32.xlu1 %v8785_v3, %s8969_s12  ;;  %v11145_v6 = vrot.slane %v7650_v27, %v9280_v39  ;;  %v11148_v60 = vrot.slane %v7666_v44, %v9280_v39  ;;  %v7665_v63 = vrot.slane %v7651_v43, %v9280_v39  ;;  %v7667_v18 = vcombine.high %v7641_v55, %v7649_v11  ;;  %v12031_v11 = vld [vmem:[#allocation32_spill] sm:$0xff]  ;;  %v12033_v44 = vld [vmem:[#allocation27_spill] sm:$0xff] }
 0x547   : > { %v11151_v28 = vpop.f32.mrb[56].mxu0  ;;  %v11153_v7 = vpop.f32.mrb[64].mxu1  ;;  %v7718_v56 = vcombine.low %v7693_v22, %v7701_v50  ;;  %v7734_v0 = vcombine.low %v7709_v59, %v7717_v47  ;;  %v7719_v1 = vcombine.high %v7693_v22, %v7701_v50  ;;  %v7735_v4 = vcombine.high %v7709_v59, %v7717_v47  ;;  %v12034_v43 = vld [vmem:[#allocation23_spill] sm:$0xff] }
 0x548   : > { %12025 = vst [vmem:[#allocation16_spill] sm:$0xff] %v11145_v6  ;;  %12026 = vst [vmem:[#allocation14_spill] sm:$0xff] %v11148_v60  ;;  %v4880_v33 = vcombine.low %v12028_v52, %v12027_v35  ;;  %v8701_v54 = vpop.f32.mrb[57].mxu0  ;;  %v8707_v15 = vpop.f32.mrb[65].mxu1  ;;  %v7683_v29 = vcombine.high %v11145_v6, %v11148_v60  ;;  %v7681_v32 = vrot.slane %v7667_v18, %v9280_v39 }
 0x549   : > { %v11162_v13 = vpop.f32.mrb[58].mxu0  ;;  %v11164_v19 = vpop.f32.mrb[66].mxu1  ;;  %v11167_v10 = vrot.slane %v7718_v56, %v9280_v39  ;;  %v11170_v53 = vrot.slane %v7734_v0, %v9280_v39  ;;  %v7733_v34 = vrot.slane %v7719_v1, %v9280_v39  ;;  %v7749_v31 = vrot.slane %v7735_v4, %v9280_v39  ;;  %v12035_v56 = vld [vmem:[#allocation34_spill] sm:$0xff]  ;;  %v12051_v15 = vld [vmem:[#allocation47_spill] sm:$0xff] }
 0x54a   : > { %v4864_v21 = vcombine.low %v12030_v8, %v12029_v2  ;;  %v8702_v20 = vpop.f32.mrb[59].mxu0  ;;  %v8708_v45 = vpop.f32.mrb[67].mxu1  ;;  %v7684_v49 = vcombine.low %v7665_v63, %v7681_v32  ;;  %v7685_v48 = vcombine.high %v7665_v63, %v7681_v32  ;;  %v4888_v55 = vrot.slane %v4880_v33, %v9259_v25  ;;  %v12036_v0 = vld [vmem:[#allocation30_spill] sm:$0xff] }
 0x54b   : > { %v7751_v42 = vcombine.high %v11167_v10, %v11170_v53  ;;  %v7752_v16 = vcombine.low %v7733_v34, %v7749_v31  ;;  %v7753_v17 = vcombine.high %v7733_v34, %v7749_v31  ;;  %v5016_v51 = vcombine.low %v12032_v14, %v12031_v11  ;;  %v12037_v34 = vld [vmem:[#allocation29_spill] sm:$0xff] }
 0x54c   : > { %v4872_v27 = vrot.slane %v4864_v21, %v9259_v25  ;;  %v5000_v22 = vcombine.low %v12034_v43, %v12033_v44  ;;  %v5084_v1 = vcombine.low %v12036_v0, %v12035_v56  ;;  %v12038_v31 = vld [vmem:[#allocation25_spill] sm:$0xff]  ;;  %v5017_v59 = vcombine.high %v12032_v14, %v12031_v11 }
 0x54d   : > { %v8790_v9 = vpack.i.bf16 %v7751_v42, %v7683_v29  ;;  %v8795_v30 = vpack.i.bf16 %v7752_v16, %v7684_v49  ;;  %v8800_v3 = vpack.i.bf16 %v7753_v17, %v7685_v48  ;;  %v5024_v18 = vrot.slane %v5016_v51, %v9259_v25 }
 0x54e   : > { %v4896_v33 = vcombine.low %v4872_v27, %v4888_v55  ;;  %v5008_v32 = vrot.slane %v5000_v22, %v9259_v25  ;;  %v5068_v21 = vcombine.low %v12038_v31, %v12037_v34  ;;  %v5092_v20 = vrot.slane %v5084_v1, %v9259_v25  ;;  %v12043_v22 = vld [vmem:[#allocation39_spill] sm:$0xff]  ;;  %v12045_v1 = vld [vmem:[#allocation46_spill] sm:$0xff] }
 0x54f   : > { %v11186_v50 = vpop.f32.mrb[68].mxu1  ;;  %8791 = vrot.lane.b32.xlu0 %v8790_v9, %s8970_s14  ;;  %v11268_v11 = vrot.slane %v5017_v59, %v9259_v25 }
 0x550   : > { %v8719_v63 = vpop.f32.mrb[69].mxu1  ;;  %v11208_v45 = vrot.slane %v4896_v33, %v9280_v39  ;;  %v5032_v49 = vcombine.low %v5008_v32, %v5024_v18  ;;  %v5076_v48 = vrot.slane %v5068_v21, %v9259_v25 }
 0x551   : > { %v11196_v4 = vpop.f32.mrb[70].mxu1 }
 0x552   : > { %v8720_v29 = vpop.f32.mrb[71].mxu1  ;;  %12039 = vst [vmem:[#allocation51_spill] sm:$0xff] %v11208_v45  ;;  %v4928_v42 = vcombine.high %v11208_v45, %v12011_v24  ;;  %v11215_v16 = vrot.slane %v5032_v49, %v9280_v39  ;;  %v5100_v17 = vcombine.low %v5076_v48, %v5092_v20  ;;  %v4897_v49 = vcombine.high %v4872_v27, %v4888_v55 }
 0x553   : > { %8796 = vrot.lane.b32.xlu0 %v8795_v30, %s8971_s15  ;;  %v12042_v30 = vld [vmem:[#allocation41_spill] sm:$0xff] }
 0x554   : > { %12040 = vst [vmem:[#allocation12_spill] sm:$0xff] %v11215_v16  ;;  %v5064_v51 = vcombine.high %v11215_v16, %v12011_v24  ;;  %v11221_v9 = vrot.slane %v5100_v17, %v9280_v39  ;;  %v5168_v63 = vcombine.low %v12043_v22, %v12042_v30  ;;  %v12049_v17 = vld [vmem:[#allocation50_spill] sm:$0xff]  ;;  %v11242_v62 = vrot.slane %v4897_v49, %v9280_v39 }
 0x555   : > { %v5356_v37 = vcombine.low %v12050_v12, %v12049_v17 }
 0x556   : > { %12041 = vst [vmem:[#allocation15_spill] sm:$0xff] %v11221_v9  ;;  %v5132_v29 = vcombine.high %v11221_v9, %v12011_v24  ;;  %v11231_v21 = vrot.slane %v5168_v63, %v9280_v39  ;;  %v12052_v63 = vld [vmem:[#allocation43_spill] sm:$0xff] }
 0x557   : > { %8801 = vrot.lane.b32.xlu0 %v8800_v3, %s8969_s12  ;;  %v12044_v3 = vld [vmem:[#allocation48_spill] sm:$0xff]  ;;  %v5340_v54 = vcombine.low %v12052_v63, %v12051_v15  ;;  %v11249_v27 = vrot.slane %v5356_v37, %v9259_v25 }
 0x558   : > { %v5288_v33 = vcombine.low %v12045_v1, %v12044_v3  ;;  %12046 = vst [vmem:[#allocation10_spill] sm:$0xff] %v11231_v21  ;;  %v5200_v57 = vcombine.high %v11231_v21, %v12011_v24 }
 0x559   : > { %v11256_v49 = vrot.slane %v5340_v54, %v9259_v25 }
 0x55b   : > { %5412 = vrot.lane.b32.xlu0 %v4928_v42, %s8971_s15  ;;  %v12047_v42 = vld [vmem:[#allocation45_spill] sm:$0xff]  ;;  %v5372_v37 = vcombine.low %v11256_v49, %v11249_v27 }
 0x55c   : > { %v5272_v36 = vcombine.low %v12048_v46, %v12047_v42 }
 0x55e   : > { %v5280_v55 = vrot.slane %v5272_v36, %v9259_v25  ;;  %v5033_v36 = vcombine.high %v5008_v32, %v5024_v18  ;;  %v12055_v32 = vld [vmem:[#allocation26_spill] sm:$0xff] }
 0x55f   : > { %5414 = vrot.lane.b32.xlu0 %v5064_v51, %s8971_s15  ;;  %v5296_v51 = vrot.slane %v5288_v33, %v9259_v25  ;;  %v5101_v33 = vcombine.high %v5076_v48, %v5092_v20 }
 0x561   : > { %v5304_v47 = vcombine.low %v5280_v55, %v5296_v51  ;;  %v5115_v21 = vrot.slane %v5101_v33, %v9280_v39  ;;  %v5305_v18 = vcombine.high %v5280_v55, %v5296_v51  ;;  %v12058_v51 = vcombine.high %v11153_v7, %v11186_v50 }
 0x563   : > { %5526 = vrot.lane.b32.xlu0 %v5132_v29, %s8971_s15  ;;  %v4929_v29 = vcombine.high %v11242_v62, %v12011_v24  ;;  %v11265_v20 = vrot.slane %v5304_v47, %v9280_v39  ;;  %v12056_v47 = vld [vmem:[#allocation22_spill] sm:$0xff]  ;;  %v7241_v55 = vrot.slane %v12058_v51, %v9259_v25  ;;  %v11309_v51 = vrot.slane %v5305_v18, %v9280_v39 }
 0x565   : > { %12053 = vst [vmem:[#allocation13_spill] sm:$0xff] %v11265_v20 }
 0x567   : > { %5416 = vrot.lane.b32.xlu0 %v5200_v57, %s8971_s15  ;;  %v5001_v57 = vcombine.high %v12034_v43, %v12033_v44  ;;  %v11275_v44 = vrot.slane %v5033_v36, %v9280_v39  ;;  %v11278_v43 = vrot.slane %v5372_v37, %v9280_v39  ;;  %v12057_v36 = vcombine.low %v11153_v7, %v11186_v50 }
 0x568   : > { %v5133_v50 = vcombine.high %v5115_v21, %v12011_v24 }
 0x569   : > { %v11272_v14 = vrot.slane %v5001_v57, %v9259_v25  ;;  %12054 = vst [vmem:[#allocation54_spill] sm:$0xff] %v11278_v43  ;;  %v5336_v57 = vcombine.high %v11265_v20, %v12011_v24  ;;  %v7234_v37 = vrot.slane %v12057_v36, %v9259_v25  ;;  %v5065_v36 = vcombine.high %v11275_v44, %v12011_v24 }
 0x56a   : > { %v5404_v7 = vcombine.high %v11278_v43, %v12011_v24 }
 0x56b   : > { %5444 = vrot.lane.b32.xlu0 %v4929_v29, %s8972_s21 }
 0x56f   : > { %5542 = vrot.lane.b32.xlu0 %v5115_v21, %s8973_s22 }
 0x570   : > { %v6751_v54 = vpop.f32.mrb[60].mxu0 }
 0x571   : > { %v7210_v59 = vcombine.low %v11151_v28, %v6751_v54  ;;  %v7211_v29 = vcombine.high %v11151_v28, %v6751_v54  ;;  %v8713_v33 = vpop.f32.mrb[61].mxu0 }
 0x572   : > { %v6754_v48 = vpop.f32.mrb[62].mxu0 }
 0x573   : > { %v7218_v54 = vrot.slane %v7210_v59, %v9259_v25  ;;  %v7225_v33 = vrot.slane %v7211_v29, %v9259_v25  ;;  %v7278_v16 = vcombine.low %v11162_v13, %v6754_v48  ;;  %v7279_v20 = vcombine.high %v11162_v13, %v6754_v48  ;;  %v8714_v45 = vpop.f32.mrb[63].mxu0  ;;  %5418 = vrot.lane.b32.xlu0 %v5336_v57, %s8971_s15 }
 0x574   : > { %v12059_v13 = vcombine.low %v11164_v19, %v11196_v4  ;;  %v12060_v48 = vcombine.high %v11164_v19, %v11196_v4 }
 0x575   : > { %v7242_v59 = vcombine.low %v7218_v54, %v7234_v37  ;;  %v7243_v29 = vcombine.high %v7218_v54, %v7234_v37  ;;  %v7258_v28 = vcombine.low %v7225_v33, %v7241_v55  ;;  %v7259_v9 = vcombine.high %v7225_v33, %v7241_v55 }
 0x576   : > { %v7302_v45 = vrot.slane %v12059_v13, %v9259_v25  ;;  %v7309_v57 = vrot.slane %v12060_v48, %v9259_v25  ;;  %v7286_v43 = vrot.slane %v7278_v16, %v9259_v25  ;;  %v7293_v21 = vrot.slane %v7279_v20, %v9259_v25 }
 0x577   : > { %v7250_v18 = vrot.slane %v7242_v59, %v9280_v39  ;;  %v7257_v37 = vrot.slane %v7243_v29, %v9280_v39  ;;  %v7266_v55 = vrot.slane %v7258_v28, %v9280_v39  ;;  %v7273_v54 = vrot.slane %v7259_v9, %v9280_v39  ;;  %5446 = vrot.lane.b32.xlu0 %v5065_v36, %s8972_s21 }
 0x578   : > { %v7310_v33 = vcombine.low %v7286_v43, %v7302_v45  ;;  %v7311_v13 = vcombine.high %v7286_v43, %v7302_v45  ;;  %v7326_v60 = vcombine.low %v7293_v21, %v7309_v57  ;;  %v7327_v6 = vcombine.high %v7293_v21, %v7309_v57 }
 0x579   : > { %v7754_v19 = vcombine.low %v7250_v18, %v7257_v37  ;;  %v8425_v4 = vcombine.high %v7250_v18, %v7257_v37  ;;  %v7770_v48 = vcombine.low %v7266_v55, %v7273_v54  ;;  %v8426_v16 = vcombine.high %v7266_v55, %v7273_v54 }
 0x57a   : > { %v7318_v20 = vrot.slane %v7310_v33, %v9280_v39  ;;  %v7325_v59 = vrot.slane %v7311_v13, %v9280_v39  ;;  %v7334_v29 = vrot.slane %v7326_v60, %v9280_v39  ;;  %v7341_v28 = vrot.slane %v7327_v6, %v9280_v39 }
 0x57b   : > { %v7761_v9 = vrot.slane %v7754_v19, %v9259_v25  ;;  %v7769_v36 = vrot.slane %v8425_v4, %v9259_v25  ;;  %v7777_v43 = vrot.slane %v7770_v48, %v9259_v25  ;;  %v7785_v45 = vrot.slane %v8426_v16, %v9259_v25  ;;  %5530 = vrot.lane.b32.xlu0 %v5404_v7, %s8971_s15 }
 0x57c   : > { %v7822_v57 = vcombine.low %v7318_v20, %v7325_v59  ;;  %v8427_v21 = vcombine.high %v7318_v20, %v7325_v59  ;;  %v7838_v18 = vcombine.low %v7334_v29, %v7341_v28  ;;  %v8428_v37 = vcombine.high %v7334_v29, %v7341_v28 }
 0x57d   : > { %v7786_v55 = vcombine.low %v7761_v9, %v7769_v36  ;;  %v7802_v54 = vcombine.low %v7777_v43, %v7785_v45  ;;  %v7787_v33 = vcombine.high %v7761_v9, %v7769_v36  ;;  %v7803_v60 = vcombine.high %v7777_v43, %v7785_v45 }
 0x57e   : > { %v7829_v6 = vrot.slane %v7822_v57, %v9259_v25  ;;  %v7837_v13 = vrot.slane %v8427_v21, %v9259_v25  ;;  %v7845_v19 = vrot.slane %v7838_v18, %v9259_v25  ;;  %v7853_v4 = vrot.slane %v8428_v37, %v9259_v25 }
 0x57f   : > { %v11340_v48 = vrot.slane %v7786_v55, %v9280_v39  ;;  %v11343_v7 = vrot.slane %v7802_v54, %v9280_v39  ;;  %5558 = vrot.lane.b32.xlu0 %v5133_v50, %s8972_s21  ;;  %v7801_v16 = vrot.slane %v7787_v33, %v9280_v39  ;;  %v7817_v20 = vrot.slane %v7803_v60, %v9280_v39  ;;  %v12061_v55 = vld [vmem:[#allocation20_spill] sm:$0xff]  ;;  %v12062_v54 = vld [vmem:[#allocation19_spill] sm:$0xff] }
 0x580   : > { %v7854_v59 = vcombine.low %v7829_v6, %v7837_v13  ;;  %v7870_v29 = vcombine.low %v7845_v19, %v7853_v4  ;;  %v7855_v28 = vcombine.high %v7829_v6, %v7837_v13  ;;  %v7871_v9 = vcombine.high %v7845_v19, %v7853_v4 }
 0x581   : > { %v7819_v36 = vcombine.high %v11340_v48, %v11343_v7  ;;  %v7820_v43 = vcombine.low %v7801_v16, %v7817_v20  ;;  %v7821_v45 = vcombine.high %v7801_v16, %v7817_v20  ;;  %v7818_v57 = vcombine.low %v11340_v48, %v11343_v7 }
 0x582   : > { %v11353_v21 = vrot.slane %v7854_v59, %v9280_v39  ;;  %v11356_v50 = vrot.slane %v7870_v29, %v9280_v39  ;;  %v7869_v18 = vrot.slane %v7855_v28, %v9280_v39  ;;  %v7885_v37 = vrot.slane %v7871_v9, %v9280_v39 }
 0x583   : > { %v4932_v33 = vcombine.low %v12062_v54, %v12061_v55  ;;  %v5069_v60 = vcombine.high %v12038_v31, %v12037_v34  ;;  %5434 = vrot.lane.b32.xlu0 %v11309_v51, %s8973_s22  ;;  %v12063_v16 = vcombine.high %v12036_v0, %v12035_v56  ;;  %v12064_v34 = vcombine.low %v11272_v14, %v11268_v11 }
 0x584   : > { %v7887_v6 = vcombine.high %v11353_v21, %v11356_v50  ;;  %v7888_v13 = vcombine.low %v7869_v18, %v7885_v37  ;;  %v7889_v19 = vcombine.high %v7869_v18, %v7885_v37  ;;  %v7886_v4 = vcombine.low %v11353_v21, %v11356_v50 }
 0x585   : > { %v11374_v20 = vrot.slane %v12063_v16, %v9259_v25  ;;  %v5056_v31 = vrot.slane %v12064_v34, %v9280_v39  ;;  %v5373_v59 = vcombine.high %v11256_v49, %v11249_v27  ;;  %v12065_v29 = vcombine.low %v12056_v47, %v12055_v32 }
 0x586   : > { %v8805_v9 = vpack.i.bf16 %v7887_v6, %v7819_v36  ;;  %v8810_v18 = vpack.i.bf16 %v7888_v13, %v7820_v43  ;;  %v8815_v37 = vpack.i.bf16 %v7889_v19, %v7821_v45  ;;  %v11387_v56 = vrot.slane %v5069_v60, %v9259_v25  ;;  %v12066_v45 = vld [vmem:[#allocation44_spill] sm:$0xff]  ;;  %v12068_v13 = vld [vmem:[#allocation38_spill] sm:$0xff]  ;;  %v12069_v19 = vld [vmem:[#allocation33_spill] sm:$0xff] }
 0x587   : > { %v4956_v28 = vrot.slane %v12065_v29, %v9259_v25  ;;  %5462 = vrot.lane.b32.xlu0 %v5056_v31, %s8968_s11  ;;  %v4940_v0 = vrot.slane %v4932_v33, %v9259_v25  ;;  %v5387_v16 = vrot.slane %v5373_v59, %v9280_v39  ;;  %v12067_v33 = vld [vmem:[#allocation40_spill] sm:$0xff]  ;;  %v5337_v6 = vcombine.high %v11309_v51, %v12011_v24 }
 0x588   : > { %8806 = vrot.lane.b32.xlu1 %v8805_v9, %s8970_s14  ;;  %v5116_v27 = vcombine.low %v11387_v56, %v11374_v20  ;;  %v5220_v60 = vcombine.low %v12067_v33, %v12066_v45  ;;  %v5204_v34 = vcombine.low %v12069_v19, %v12068_v13  ;;  %v5289_v9 = vcombine.high %v12045_v1, %v12044_v3  ;;  %s11779_s14 = scalar_lea.vmem %s11836_s7, %s8438_s16 }
 0x589   : > { %v4964_v49 = vcombine.low %v4940_v0, %v4956_v28  ;;  %v5405_v1 = vcombine.high %v5387_v16, %v12011_v24 }
 0x58a   : > { %v5124_v36 = vrot.slane %v5116_v27, %v9280_v39  ;;  %v11413_v29 = vrot.slane %v5220_v60, %v9259_v25  ;;  %v11420_v51 = vrot.slane %v5204_v34, %v9259_v25  ;;  %v5273_v27 = vcombine.high %v12048_v46, %v12047_v42 }
 0x58b   : > { %5546 = vrot.lane.b32.xlu0 %v5387_v16, %s8973_s22  ;;  %v11399_v43 = vrot.slane %v4964_v49, %v9280_v39  ;;  %v11430_v3 = vrot.slane %v5289_v9, %v9259_v25  ;;  %v5357_v46 = vcombine.high %v12050_v12, %v12049_v17  ;;  %v5341_v34 = vcombine.high %v12052_v63, %v12051_v15 }
 0x58c   : > { %8811 = vrot.lane.b32.xlu1 %v8810_v18, %s8971_s15  ;;  %v5066_v18 = vcombine.high %v5056_v31, %v12011_v24  ;;  %v5236_v49 = vcombine.low %v11420_v51, %v11413_v29  ;;  %v4881_v12 = vcombine.high %v12028_v52, %v12027_v35  ;;  %v12070_v35 = vcombine.low %v10993_v40, %v10996_v26 }
 0x58d   : > { %v4996_v59 = vcombine.high %v11399_v43, %v12011_v24  ;;  %v11453_v17 = vrot.slane %v5357_v46, %v9259_v25  ;;  %v11471_v46 = vrot.slane %v5341_v34, %v9259_v25  ;;  %v4865_v40 = vcombine.high %v12030_v8, %v12029_v2 }
 0x58e   : > { %v4949_v34 = vcombine.high %v12056_v47, %v12055_v32  ;;  %v5237_v47 = vcombine.high %v11420_v51, %v11413_v29 }
 0x58f   : > { %5574 = vrot.lane.b32.xlu0 %v5124_v36, %s8968_s11  ;;  %v11491_v2 = vrot.slane %v4865_v40, %v9259_v25 }
 0x590   : > { %8816 = vrot.lane.b32.xlu1 %v8815_v37, %s8969_s12  ;;  %v4965_v37 = vcombine.high %v4940_v0, %v4956_v28  ;;  %v11435_v28 = vrot.slane %v5273_v27, %v9259_v25  ;;  %v5134_v0 = vcombine.high %v5124_v36, %v12011_v24 }
 0x592   : > { %v4979_v31 = vrot.slane %v4965_v37, %v9280_v39  ;;  %v5320_v16 = vcombine.low %v11435_v28, %v11430_v3 }
 0x593   : > { %5450 = vrot.lane.b32.xlu0 %v5337_v6, %s8972_s21 }
 0x594   : > { %5524 = vrot.lane.b32.xlu1 %v4996_v59, %s8971_s15  ;;  %v5328_v37 = vrot.slane %v5320_v16, %v9280_v39  ;;  %v11485_v16 = vrot.slane %v4881_v12, %v9259_v25 }
 0x596   : > { %v4912_v12 = vcombine.low %v11491_v2, %v11485_v16 }
 0x597   : > { %5478 = vrot.lane.b32.xlu0 %v5066_v18, %s8974_s23  ;;  %v5049_v18 = vcombine.high %v11272_v14, %v11268_v11 }
 0x598   : > { %5428 = vrot.lane.b32.xlu1 %v11242_v62, %s8973_s22  ;;  %v11442_v62 = vrot.slane %v5236_v49, %v9280_v39 }
 0x59a   : > { %v5268_v36 = vcombine.high %v11442_v62, %v12011_v24 }
 0x59b   : > { %5562 = vrot.lane.b32.xlu0 %v5405_v1, %s8972_s21  ;;  %v8772_v59 = vpop.permute.xlu0 %8771 }
 0x59c   : > { %5540 = vrot.lane.b32.xlu1 %v4979_v31, %s8973_s22  ;;  %v8762_v42 = vpop.permute.xlu1 %8761  ;;  %v8774_v49 = vunpack.i.h.bf16 %v8772_v59  ;;  %v8773_v1 = vunpack.i.l.bf16 %v8772_v59 }
 0x59d   : > { %v8764_v60 = vunpack.i.h.bf16 %v8762_v42  ;;  %v8763_v6 = vunpack.i.l.bf16 %v8762_v42 }
 0x59f   : > { %5590 = vrot.lane.b32.xlu0 %v5134_v0, %s8974_s23  ;;  %v7986_v52 = vsel %vm4079_vm2, %v12070_v35, %v8763_v6  ;;  %v5388_v0 = vcombine.low %v11471_v46, %v11453_v17  ;;  %v5117_v6 = vcombine.high %v11387_v56, %v11374_v20  ;;  %v5221_v20 = vcombine.high %v12067_v33, %v12066_v45 }
 0x5a0   : > { %5430 = vrot.lane.b32.xlu1 %v11275_v44, %s8973_s22  ;;  %v8767_v9 = vpop.permute.xlu1 %8766  ;;  %v12071_v44 = vcombine.low %v11005_v23, %v11008_v38  ;;  %v5063_v38 = vrot.slane %v5049_v18, %v9280_v39  ;;  %v5205_v56 = vcombine.high %v12069_v19, %v12068_v13  ;;  %v5338_v45 = vcombine.high %v5328_v37, %v12011_v24 }
 0x5a1   : > { %v8769_v15 = vunpack.i.h.bf16 %v8767_v9  ;;  %v8768_v63 = vunpack.i.l.bf16 %v8767_v9  ;;  %v11495_v8 = vrot.slane %v5388_v0, %v9280_v39  ;;  %v11515_v32 = vrot.slane %v5117_v6, %v9280_v39  ;;  %v12075_v0 = vld [vmem:[#allocation37_spill] sm:$0xff] }
 0x5a2   : > { %v7987_v27 = vsel %vm4079_vm2, %v12071_v44, %v8764_v60  ;;  %v4997_v60 = vcombine.high %v4979_v31, %v12011_v24  ;;  %v12072_v31 = vcombine.high %v12043_v22, %v12042_v30  ;;  %v11518_v30 = vrot.slane %v4949_v34, %v9259_v25 }
 0x5a3   : > { %v7994_v11 = vsel %vm5632_vm3, %v7986_v52, %v8768_v63  ;;  %v7995_v14 = vsel %vm5632_vm3, %v7987_v27, %v8769_v15  ;;  %5466 = vrot.lane.b32.xlu0 %v5328_v37, %s8968_s11  ;;  %v4920_v22 = vrot.slane %v4912_v12, %v9280_v39  ;;  %v5251_v33 = vrot.slane %v5237_v47, %v9280_v39 }
 0x5a4   : > { %5528 = vrot.lane.b32.xlu1 %v5268_v36, %s8971_s15  ;;  %v8003_v26 = vsel %vm8002_vm4, %v7994_v11, %v8773_v1  ;;  %v8004_v23 = vsel %vm8002_vm4, %v7995_v14, %v8774_v49  ;;  %v5183_v59 = vrot.slane %v12072_v31, %v9280_v39  ;;  %v4933_v36 = vcombine.high %v12062_v54, %v12061_v55  ;;  %v12077_v31 = vld [vmem:[#allocation35_spill] sm:$0xff] }
 0x5a5   : > { %v8015_v42 = vpack.c.bf16 %v8004_v23, %v8003_v26  ;;  %v11532_v54 = vrot.slane %v5221_v20, %v9259_v25  ;;  %v11539_v19 = vrot.slane %v5205_v56, %v9259_v25  ;;  %v5067_v15 = vcombine.high %v5063_v38, %v12011_v24 }
 0x5a6   : > { %v11528_v55 = vrot.slane %v4933_v36, %v9259_v25  ;;  %v12073_v44 = vcombine.low %v11100_v61, %v11103_v41  ;;  %v12074_v49 = vcombine.low %v11078_v5, %v11081_v58  ;;  %v5321_v61 = vcombine.high %v11435_v28, %v11430_v3 }
 0x5a7   : > { %5494 = vrot.lane.b32.xlu0 %v5063_v38, %s8963_s29  ;;  %8725 = vmatprep.mubr.msk.bf16.mxu0 %vm433_vm0, %v8015_v42  ;;  %v5253_v63 = vcombine.high %v11539_v19, %v11532_v54  ;;  %v5201_v41 = vcombine.high %v5183_v59, %v12011_v24  ;;  %v5389_v28 = vcombine.high %v11471_v46, %v11453_v17 }
 0x5a8   : > { %5556 = vrot.lane.b32.xlu1 %v4997_v60, %s8972_s21  ;;  %v4980_v29 = vcombine.low %v11528_v55, %v11518_v30  ;;  %v12076_v60 = vld [vmem:[#allocation36_spill] sm:$0xff]  ;;  %v5335_v3 = vrot.slane %v5321_v61, %v9280_v39  ;;  %v4930_v34 = vcombine.high %v4920_v22, %v12011_v24  ;;  %v5269_v56 = vcombine.high %v5251_v33, %v12011_v24 }
 0x5a9   : > { %v11558_v26 = vrot.slane %v5253_v63, %v9280_v39  ;;  %v5153_v6 = vcombine.high %v12076_v60, %v12075_v0  ;;  %v11583_v47 = vrot.slane %v5389_v28, %v9280_v39  ;;  %v12079_v63 = vcombine.low %v11167_v10, %v11170_v53  ;;  %v12083_v60 = vld [vmem:[#allocation15_spill] sm:$0xff] }
 0x5aa   : > { %v4988_v37 = vrot.slane %v4980_v29, %v9280_v39  ;;  %v5252_v61 = vcombine.low %v11539_v19, %v11532_v54 }
 0x5ab   : > { %5578 = vrot.lane.b32.xlu0 %v11495_v8, %s8968_s11  ;;  %v5167_v36 = vrot.slane %v5153_v6, %v9259_v25 }
 0x5ac   : > { %5432 = vrot.lane.b32.xlu1 %v5183_v59, %s8973_s22  ;;  %v12078_v59 = vld [vmem:[#allocation31_spill] sm:$0xff]  ;;  %v4998_v29 = vcombine.high %v4988_v37, %v12011_v24 }
 0x5ad   : > { %v5137_v12 = vcombine.high %v12078_v59, %v12077_v31  ;;  %v5406_v59 = vcombine.high %v11495_v8, %v12011_v24 }
 0x5af   : > { %5606 = vrot.lane.b32.xlu0 %v11515_v32, %s8963_s29  ;;  %v5151_v17 = vrot.slane %v5137_v12, %v9259_v25 }
 0x5b0   : > { %5460 = vrot.lane.b32.xlu1 %v4920_v22, %s8968_s11 }
 0x5b1   : > { %v8782_v51 = vpop.permute.xlu1 %8781  ;;  %v5184_v46 = vcombine.low %v5151_v17, %v5167_v36 }
 0x5b2   : > { %v8777_v13 = vpop.permute.xlu0 %8776  ;;  %v8784_v35 = vunpack.i.h.bf16 %v8782_v51  ;;  %v8783_v52 = vunpack.i.l.bf16 %v8782_v51 }
 0x5b3   : > { %v8779_v9 = vunpack.i.h.bf16 %v8777_v13  ;;  %v8778_v18 = vunpack.i.l.bf16 %v8777_v13  ;;  %5482 = vrot.lane.b32.xlu0 %v5338_v45, %s8974_s23  ;;  %v5339_v45 = vcombine.high %v5335_v3, %v12011_v24  ;;  %v5192_v25 = vrot.slane %v5184_v46, %v9280_v39 }
 0x5b4   : > { %5544 = vrot.lane.b32.xlu1 %v5251_v33, %s8973_s22  ;;  %v4913_v33 = vcombine.high %v11491_v2, %v11485_v16 }
 0x5b5   : > { %v7989_v27 = vsel %vm4079_vm2, %v12073_v44, %v8779_v9  ;;  %v7988_v1 = vsel %vm4079_vm2, %v12074_v49, %v8778_v18  ;;  %v5202_v54 = vcombine.high %v5192_v25, %v12011_v24 }
 0x5b6   : > { %v7996_v23 = vsel %vm5632_vm3, %v7988_v1, %v8783_v52  ;;  %v7997_v5 = vsel %vm5632_vm3, %v7989_v27, %v8784_v35  ;;  %v12081_v52 = vld [vmem:[#allocation14_spill] sm:$0xff] }
 0x5b7   : > { %5510 = vrot.lane.b32.xlu0 %v5067_v15, %s8960_s26 }
 0x5b8   : > { %5572 = vrot.lane.b32.xlu1 %v4988_v37, %s8968_s11  ;;  %v8787_v11 = vpop.permute.xlu1 %8786  ;;  %v12080_v37 = vld [vmem:[#allocation16_spill] sm:$0xff] }
 0x5b9   : > { %v8789_v14 = vunpack.i.h.bf16 %v8787_v11  ;;  %v8788_v40 = vunpack.i.l.bf16 %v8787_v11  ;;  %v12082_v44 = vcombine.low %v12080_v37, %v12081_v52 }
 0x5bb   : > { %v8005_v58 = vsel %vm8002_vm4, %v7996_v23, %v8788_v40  ;;  %v8006_v38 = vsel %vm8002_vm4, %v7997_v5, %v8789_v14  ;;  %5608 = vrot.lane.b32.xlu0 %v11558_v26, %s8963_s29  ;;  %v4927_v40 = vrot.slane %v4913_v33, %v9280_v39  ;;  %v5260_v23 = vrot.slane %v5252_v61, %v9280_v39 }
 0x5bc   : > { %5448 = vrot.lane.b32.xlu1 %v5201_v41, %s8972_s21  ;;  %v8016_v42 = vpack.c.bf16 %v8006_v38, %v8005_v58  ;;  %v4981_v5 = vcombine.high %v11528_v55, %v11518_v30 }
 0x5bd   : > { %v4931_v0 = vcombine.high %v4927_v40, %v12011_v24  ;;  %v5270_v6 = vcombine.high %v5260_v23, %v12011_v24 }
 0x5be   : > { %8726 = vmatmul.mubr.msk.bf16.vlgmr.msra.gmra.mrb[64].mxu0 %vm433_vm0, %v8016_v42  ;;  %v4995_v38 = vrot.slane %v4981_v5, %v9280_v39 }
 0x5bf   : > { %5498 = vrot.lane.b32.xlu0 %v5335_v3, %s8963_s29 }
 0x5c0   : > { %5476 = vrot.lane.b32.xlu1 %v4930_v34, %s8974_s23  ;;  %v4999_v28 = vcombine.high %v4995_v38, %v12011_v24  ;;  %v5185_v34 = vcombine.high %v5151_v17, %v5167_v36  ;;  %v5271_v17 = vcombine.high %v11558_v26, %v12011_v24 }
 0x5c1   : > { %v8792_v20 = vpop.permute.xlu0 %8791 }
 0x5c2   : > { %v8794_v51 = vunpack.i.h.bf16 %v8792_v20  ;;  %v8793_v13 = vunpack.i.l.bf16 %v8792_v20  ;;  %v5199_v31 = vrot.slane %v5185_v34, %v9280_v39  ;;  %v5135_v20 = vcombine.high %v11515_v32, %v12011_v24 }
 0x5c3   : > { %5610 = vrot.lane.b32.xlu0 %v11583_v47, %s8963_s29 }
 0x5c4   : > { %5560 = vrot.lane.b32.xlu1 %v5269_v56, %s8972_s21  ;;  %v7991_v35 = vsel %vm4079_vm2, %v12079_v63, %v8794_v51  ;;  %v7990_v27 = vsel %vm4079_vm2, %v12082_v44, %v8793_v13  ;;  %v5203_v36 = vcombine.high %v5199_v31, %v12011_v24 }
 0x5c5   : > { %v8797_v22 = vpop.permute.xlu0 %8796 }
 0x5c6   : > { %v8799_v9 = vunpack.i.h.bf16 %v8797_v22  ;;  %v8798_v18 = vunpack.i.l.bf16 %v8797_v22  ;;  %v5407_v22 = vcombine.high %v11583_v47, %v12011_v24 }
 0x5c7   : > { %5514 = vrot.lane.b32.xlu0 %v5339_v45, %s8960_s26 }
 0x5c8   : > { %5588 = vrot.lane.b32.xlu1 %v4998_v29, %s8974_s23  ;;  %v7998_v11 = vsel %vm5632_vm3, %v7990_v27, %v8798_v18  ;;  %v7999_v14 = vsel %vm5632_vm3, %v7991_v35, %v8799_v9 }
 0x5c9   : > { %v8802_v15 = vpop.permute.xlu0 %8801 }
 0x5ca   : > { %v8804_v49 = vunpack.i.h.bf16 %v8802_v15  ;;  %v8803_v1 = vunpack.i.l.bf16 %v8802_v15 }
 0x5cc   : > { %5464 = vrot.lane.b32.xlu1 %v5192_v25, %s8968_s11  ;;  %v8007_v16 = vsel %vm8002_vm4, %v7998_v11, %v8803_v1  ;;  %v8008_v2 = vsel %vm8002_vm4, %v7999_v14, %v8804_v49  ;;  %v12085_v1 = vld [vmem:[#allocation12_spill] sm:$0xff] }
 0x5cd   : > { %v8017_v10 = vpack.c.bf16 %v8008_v2, %v8007_v16  ;;  %v5413_v53 = vpop.permute.xlu0 %5412 }
 0x5cf   : > { %8729 = vmatprep.mubr.msk.bf16.mxu0 %vm433_vm0, %v8017_v10 }
 0x5d0   : > { %5492 = vrot.lane.b32.xlu1 %v4927_v40, %s8963_s29 }
 0x5d1   : > { %v11615_v41 = vpop.permute.xlu0 %5414 }
 0x5d2   : > { %v5634_v11 = vsel %vm5632_vm3, %v12085_v1, %v11615_v41 }
 0x5d4   : > { %5576 = vrot.lane.b32.xlu1 %v5260_v23, %s8968_s11 }
 0x5d5   : > { %v5527_v58 = vpop.permute.xlu0 %5526 }
 0x5d6   : > { %v5667_v30 = vsel %vm5632_vm3, %v12083_v60, %v5527_v58 }
 0x5d8   : > { %5604 = vrot.lane.b32.xlu1 %v4995_v38, %s8963_s29 }
 0x5d9   : > { %v11623_v42 = vpop.permute.xlu0 %5416 }
 0x5dc   : > { %5480 = vrot.lane.b32.xlu1 %v5202_v54, %s8974_s23 }
 0x5dd   : > { %v5445_v19 = vpop.permute.xlu0 %5444 }
 0x5e0   : > { %5508 = vrot.lane.b32.xlu1 %v4931_v0, %s8960_s26 }
 0x5e1   : > { %v5543_v55 = vpop.permute.xlu0 %5542 }
 0x5e2   : > { %v11633_v3 = vsel %vm433_vm0, %v5667_v30, %v5543_v55 }
 0x5e4   : > { %5592 = vrot.lane.b32.xlu1 %v5270_v6, %s8974_s23 }
 0x5e5   : > { %v11643_v12 = vpop.permute.xlu0 %5418 }
 0x5e8   : > { %5620 = vrot.lane.b32.xlu1 %v4999_v28, %s8960_s26 }
 0x5e9   : > { %v5447_v56 = vpop.permute.xlu0 %5446 }
 0x5ec   : > { %5496 = vrot.lane.b32.xlu1 %v5199_v31, %s8963_s29 }
 0x5ed   : > { %v11653_v8 = vpop.permute.xlu0 %5530 }
 0x5f0   : > { %5594 = vrot.lane.b32.xlu1 %v5406_v59, %s8974_s23 }
 0x5f1   : > { %v11666_v24 = vpop.permute.xlu0 %5558 }
 0x5f4   : > { %5622 = vrot.lane.b32.xlu1 %v5135_v20, %s8960_s26 }
 0x5f5   : > { %v11675_v50 = vpop.permute.xlu0 %5434 }
 0x5f8   : > { %5512 = vrot.lane.b32.xlu1 %v5203_v36, %s8960_s26 }
 0x5f9   : > { %v5463_v49 = vpop.permute.xlu0 %5462 }
 0x5fa   : > { %v8807_v39 = vpop.permute.xlu1 %8806 }
 0x5fb   : > { %v8809_v32 = vunpack.i.h.bf16 %v8807_v39  ;;  %v8808_v45 = vunpack.i.l.bf16 %v8807_v39 }
 0x5fc   : > { %5624 = vrot.lane.b32.xlu1 %v5271_v17, %s8960_s26 }
 0x5fd   : > { %v7992_v26 = vsel %vm4079_vm2, %v7818_v57, %v8808_v45  ;;  %v7993_v9 = vsel %vm4079_vm2, %v7886_v4, %v8809_v32  ;;  %v12084_v57 = vld [vmem:[#allocation51_spill] sm:$0xff]  ;;  %v11687_v10 = vpop.permute.xlu0 %5546 }
 0x5fe   : > { %v8812_v46 = vpop.permute.xlu1 %8811  ;;  %v5633_v21 = vsel %vm5632_vm3, %v12084_v57, %v5413_v53 }
 0x5ff   : > { %v8814_v29 = vunpack.i.h.bf16 %v8812_v46  ;;  %v8813_v51 = vunpack.i.l.bf16 %v8812_v46 }
 0x600   : > { %5626 = vrot.lane.b32.xlu1 %v5407_v22, %s8960_s26 }
 0x601   : > { %v8000_v47 = vsel %vm5632_vm3, %v7992_v26, %v8813_v51  ;;  %v8001_v33 = vsel %vm5632_vm3, %v7993_v9, %v8814_v29  ;;  %v5575_v61 = vpop.permute.xlu0 %5574 }
 0x602   : > { %v8817_v13 = vpop.permute.xlu1 %8816 }
 0x603   : > { %v8819_v18 = vunpack.i.h.bf16 %v8817_v13  ;;  %v8818_v25 = vunpack.i.l.bf16 %v8817_v13 }
 0x605   : > { %v8009_v15 = vsel %vm8002_vm4, %v8000_v47, %v8818_v25  ;;  %v8010_v63 = vsel %vm8002_vm4, %v8001_v33, %v8819_v18  ;;  %v11695_v38 = vpop.permute.xlu0 %5450 }
 0x606   : > { %v8018_v48 = vpack.c.bf16 %v8010_v63, %v8009_v15  ;;  %v5525_v7 = vpop.permute.xlu1 %5524 }
 0x607   : > { %v5666_v52 = vsel %vm5632_vm3, %v11399_v43, %v5525_v7  ;;  %v12086_v43 = vld [vmem:[#allocation10_spill] sm:$0xff] }
 0x608   : > { %8730 = vmatmul.mubr.msk.bf16.gmra.mrb[68].mxu0 %vm433_vm0, %v8018_v48  ;;  %v5635_v23 = vsel %vm5632_vm3, %v12086_v43, %v11623_v42  ;;  %v12087_v43 = vld [vmem:[#allocation54_spill] sm:$0xff] }
 0x609   : > { %v5479_v60 = vpop.permute.xlu0 %5478 }
 0x60a   : > { %v5429_v4 = vpop.permute.xlu1 %5428 }
 0x60b   : > { %v5637_v35 = vsel %vm433_vm0, %v5633_v21, %v5429_v4 }
 0x60c   : > { %v5642_v37 = vsel %vm5641_vm5, %v5637_v35, %v5445_v19 }
 0x60d   : > { %v11700_v55 = vpop.permute.xlu0 %5562 }
 0x60e   : > { %v5541_v44 = vpop.permute.xlu1 %5540 }
 0x60f   : > { %v5670_v27 = vsel %vm433_vm0, %v5666_v52, %v5541_v44 }
 0x611   : > { %v5591_v42 = vpop.permute.xlu0 %5590 }
 0x612   : > { %v5431_v14 = vpop.permute.xlu1 %5430 }
 0x613   : > { %v5638_v16 = vsel %vm433_vm0, %v5634_v11, %v5431_v14 }
 0x614   : > { %v5643_v2 = vsel %vm5641_vm5, %v5638_v16, %v5447_v56 }
 0x615   : > { %v11702_v31 = vpop.permute.xlu0 %5466  ;;  %v5648_v4 = vsel %vm5646_vm6, %v5643_v2, %v5463_v49 }
 0x616   : > { %v5529_v53 = vpop.permute.xlu1 %5528 }
 0x617   : > { %v5668_v54 = vsel %vm5632_vm3, %v11442_v62, %v5529_v53 }
 0x619   : > { %v5495_v36 = vpop.permute.xlu0 %5494 }
 0x61a   : > { %v5557_v40 = vpop.permute.xlu1 %5556 }
 0x61b   : > { %v5674_v51 = vsel %vm5641_vm5, %v5670_v27, %v5557_v40  ;;  %v5653_v27 = vsel %vm5651_vm7, %v5648_v4, %v5479_v60 }
 0x61c   : > { %v5658_v11 = vsel %vm5656_vm8, %v5653_v27, %v5495_v36 }
 0x61d   : > { %v5579_v39 = vpop.permute.xlu0 %5578 }
 0x61e   : > { %v5433_v5 = vpop.permute.xlu1 %5432 }
 0x61f   : > { %v11693_v58 = vsel %vm433_vm0, %v5635_v23, %v5433_v5  ;;  %v5669_v23 = vsel %vm5632_vm3, %v12087_v43, %v11653_v8 }
 0x621   : > { %v5607_v46 = vpop.permute.xlu0 %5606 }
 0x622   : > { %v5461_v41 = vpop.permute.xlu1 %5460 }
 0x623   : > { %v5647_v13 = vsel %vm5646_vm6, %v5642_v37, %v5461_v41  ;;  %v5675_v37 = vsel %vm5641_vm5, %v11633_v3, %v11666_v24 }
 0x624   : > { %v5679_v52 = vsel %vm5646_vm6, %v5675_v37, %v5575_v61 }
 0x625   : > { %v11704_v32 = vpop.permute.xlu0 %5482  ;;  %v5683_v1 = vsel %vm5651_vm7, %v5679_v52, %v5591_v42 }
 0x626   : > { %v5545_v19 = vpop.permute.xlu1 %5544  ;;  %v5687_v14 = vsel %vm5656_vm8, %v5683_v1, %v5607_v46 }
 0x627   : > { %v5672_v0 = vsel %vm433_vm0, %v5668_v54, %v5545_v19  ;;  %v5673_v54 = vsel %vm433_vm0, %v5669_v23, %v11687_v10 }
 0x629   : > { %v5511_v9 = vpop.permute.xlu0 %5510 }
 0x62a   : > { %v5573_v30 = vpop.permute.xlu1 %5572  ;;  %v5663_v49 = vsel %vm5661_vm9, %v5658_v11, %v5511_v9 }
 0x62b   : > { %v5678_v26 = vsel %vm5646_vm6, %v5674_v51, %v5573_v30  ;;  %v5677_v30 = vsel %vm5641_vm5, %v5673_v54, %v11700_v55 }
 0x62d   : > { %v5609_v57 = vpop.permute.xlu0 %5608 }
 0x62e   : > { %v5449_v6 = vpop.permute.xlu1 %5448 }
 0x62f   : > { %v5644_v5 = vsel %vm5641_vm5, %v11693_v58, %v5449_v6  ;;  %v5681_v6 = vsel %vm5646_vm6, %v5677_v30, %v5579_v39 }
 0x631   : > { %v5499_v44 = vpop.permute.xlu0 %5498 }
 0x632   : > { %v5477_v28 = vpop.permute.xlu1 %5476 }
 0x633   : > { %v5652_v18 = vsel %vm5651_vm7, %v5647_v13, %v5477_v28 }
 0x635   : > { %v5611_v3 = vpop.permute.xlu0 %5610 }
 0x636   : > { %v5561_v34 = vpop.permute.xlu1 %5560 }
 0x637   : > { %v5676_v40 = vsel %vm5641_vm5, %v5672_v0, %v5561_v34  ;;  %v12088_v0 = vld [vmem:[#allocation13_spill] sm:$0xff] }
 0x638   : > { %v5636_v60 = vsel %vm5632_vm3, %v12088_v0, %v11643_v12 }
 0x639   : > { %v5640_v58 = vsel %vm433_vm0, %v5636_v60, %v11675_v50  ;;  %v12093_v60 = vld [vmem:[#allocation8_spill] sm:$0xff] }
 0x63a   : > { %v5589_v59 = vpop.permute.xlu1 %5588  ;;  %v5645_v12 = vsel %vm5641_vm5, %v5640_v58, %v11695_v38 }
 0x63b   : > { %v5682_v25 = vsel %vm5651_vm7, %v5678_v26, %v5589_v59  ;;  %v5650_v50 = vsel %vm5646_vm6, %v5645_v12, %v11702_v31  ;;  %v8429_v31 = vld [vmem:[%s11835_s6] ss:$0 sm:$0xff] }
 0x63e   : > { %v5465_v20 = vpop.permute.xlu1 %5464 }
 0x63f   : > { %v5649_v19 = vsel %vm5646_vm6, %v5644_v5, %v5465_v20  ;;  %v5515_v20 = vpop.permute.xlu0 %5514 }
 0x642   : > { %v5493_v56 = vpop.permute.xlu1 %5492 }
 0x643   : > { %v5657_v47 = vsel %vm5656_vm8, %v5652_v18, %v5493_v56  ;;  %v5655_v56 = vsel %vm5651_vm7, %v5650_v50, %v11704_v32  ;;  %v12089_v18 = vld [vmem:[#allocation4_spill] sm:$0xff] }
 0x644   : > { %v5660_v39 = vsel %vm5656_vm8, %v5655_v56, %v5499_v44 }
 0x646   : > { %v5577_v62 = vpop.permute.xlu1 %5576 }
 0x647   : > { %v5680_v24 = vsel %vm5646_vm6, %v5676_v40, %v5577_v62 }
 0x64a   : > { %v5605_v17 = vpop.permute.xlu1 %5604 }
 0x64b   : > { %v5686_v33 = vsel %vm5656_vm8, %v5682_v25, %v5605_v17  ;;  %v5665_v17 = vsel %vm5661_vm9, %v5660_v39, %v5515_v20 }
 0x64e   : > { %v5481_v22 = vpop.permute.xlu1 %5480 }
 0x64f   : > { %v5654_v8 = vsel %vm5651_vm7, %v5649_v19, %v5481_v22 }
 0x652   : > { %v5509_v45 = vpop.permute.xlu1 %5508 }
 0x653   : > { %v5662_v63 = vsel %vm5661_vm9, %v5657_v47, %v5509_v45  ;;  %v12090_v47 = vld [vmem:[#allocation2_spill] sm:$0xff] }
 0x656   : > { %v5593_v29 = vpop.permute.xlu1 %5592 }
 0x657   : > { %v5684_v41 = vsel %vm5651_vm7, %v5680_v24, %v5593_v29 }
 0x658   : > { %v5688_v42 = vsel %vm5656_vm8, %v5684_v41, %v5609_v57  ;;  %v12092_v57 = vld [vmem:[#allocation3_spill] sm:$0xff] }
 0x65a   : > { %v5621_v15 = vpop.permute.xlu1 %5620 }
 0x65b   : > { %v5690_v48 = vsel %vm5661_vm9, %v5686_v33, %v5621_v15 }
 0x65c   : > { %v5702_v7 = vcombine.low %v5662_v63, %v5690_v48  ;;  %v12091_v48 = vld [vmem:[#allocation5_spill] sm:$0xff] }
 0x65e   : > { %5710 = vst [vmem:[%s11718_s27] sm:$0xff] %v5702_v7  ;;  %v5497_v21 = vpop.permute.xlu1 %5496 }
 0x65f   : > { %v5659_v28 = vsel %vm5656_vm8, %v5654_v8, %v5497_v21  ;;  %v12094_v8 = vld [vmem:[#allocation6_spill] sm:$0xff] }
 0x662   : > { %v5595_v35 = vpop.permute.xlu1 %5594 }
 0x663   : > { %v5685_v34 = vsel %vm5651_vm7, %v5681_v6, %v5595_v35 }
 0x664   : > { %v5689_v38 = vsel %vm5656_vm8, %v5685_v34, %v5611_v3  ;;  %v12096_v34 = vld [vmem:[#allocation7_spill] sm:$0xff] }
 0x666   : > { %v5623_v16 = vpop.permute.xlu1 %5622 }
 0x667   : > { %v5691_v2 = vsel %vm5661_vm9, %v5687_v14, %v5623_v16 }
 0x668   : > { %v5703_v53 = vcombine.low %v5663_v49, %v5691_v2 }
 0x66a   : > { %5711 = vst [vmem:[%s11718_s27 + $0x8] sm:$0xff] %v5703_v53  ;;  %v5513_v61 = vpop.permute.xlu1 %5512 }
 0x66b   : > { %v5664_v55 = vsel %vm5661_vm9, %v5659_v28, %v5513_v61 }
 0x66e   : > { %v5625_v10 = vpop.permute.xlu1 %5624 }
 0x66f   : > { %v5692_v59 = vsel %vm5661_vm9, %v5688_v42, %v5625_v10  ;;  %v12095_v42 = vld [vmem:[#allocation9_spill] sm:$0xff] }
 0x670   : > { %v5704_v36 = vcombine.low %v5664_v55, %v5692_v59 }
 0x672   : > { %5712 = vst [vmem:[%s11718_s27 + $0x10] sm:$0xff] %v5704_v36  ;;  %v5627_v62 = vpop.permute.xlu1 %5626 }
 0x673   : > { %v5693_v46 = vsel %vm5661_vm9, %v5689_v38, %v5627_v62 }
 0x674   : > { %v5705_v22 = vcombine.low %v5665_v17, %v5693_v46 }
 0x676   : > { %5713 = vst [vmem:[%s11718_s27 + $0x18] sm:$0xff] %v5705_v22 }
 0x691   : > { %v8727_v45 = vpop.f32.mrb[64].mxu0 }
 0x692   : > { %v8093_v29 = vadd.f32 %v8727_v45, %v8429_v31  ;;  %v8084_v51 = vpop.f32.mrb[65].mxu0 }
 0x693   : > { %v8085_v32 = vadd.f32 %v8429_v31, %v8084_v51  ;;  %v8728_v13 = vpop.f32.mrb[66].mxu0 }
 0x694   : > { %v8096_v26 = vadd.f32 %v8728_v13, %v8429_v31  ;;  %v8087_v9 = vpop.f32.mrb[67].mxu0  ;;  %v8117_v25 = vadd.f32 %v8093_v29, %v12089_v18 }
 0x695   : > { %v8115_v33 = vadd.f32 %v8085_v32, %v12090_v47  ;;  %v8088_v15 = vadd.f32 %v8429_v31, %v8087_v9 }
 0x696   : > { %v8118_v7 = vadd.f32 %v8096_v26, %v12091_v48  ;;  %8125 = vst.msk [vmem:[%s11779_s14 + $0x10] sm:$0xff] %vm433_vm0, %v8117_v25  ;;  %v8154_v4 = vmul.f32 %v8117_v25, %v8117_v25  ;;  %v8134_v27 = vsel %vm433_vm0, %v8117_v25, 0.0 }
 0x697   : > { %8123 = vst.msk [vmem:[%s11779_s14] sm:$0xff] %vm433_vm0, %v8115_v33  ;;  %v8152_v63 = vmul.f32 %v8115_v33, %v8115_v33  ;;  %v8116_v21 = vadd.f32 %v8088_v15, %v12092_v57  ;;  %v8131_v35 = vsel %vm433_vm0, %v8115_v33, 0.0 }
 0x698   : > { %8126 = vst.msk [vmem:[%s11779_s14 + $0x18] sm:$0xff] %vm433_vm0, %v8118_v7  ;;  %v8155_v11 = vmul.f32 %v8118_v7, %v8118_v7  ;;  %v8163_v2 = vsel %vm433_vm0, %v8154_v4, 0.0  ;;  %v8136_v53 = vsel %vm433_vm0, %v8118_v7, 0.0 }
 0x699   : > { %8124 = vst.msk [vmem:[%s11779_s14 + $0x8] sm:$0xff] %vm433_vm0, %v8116_v21  ;;  %v8132_v37 = vsel %vm433_vm0, %v8116_v21, 0.0  ;;  %v8153_v52 = vmul.f32 %v8116_v21, %v8116_v21  ;;  %v8160_v1 = vsel %vm433_vm0, %v8152_v63, 0.0 }
 0x69a   : > { %v8133_v44 = vadd.f32 %v8132_v37, %v8131_v35  ;;  %v8165_v24 = vsel %vm433_vm0, %v8155_v11, 0.0 }
 0x69b   : > { %v8161_v14 = vsel %vm433_vm0, %v8153_v52, 0.0 }
 0x69c   : > { %v8135_v16 = vadd.f32 %v8134_v27, %v8133_v44  ;;  %v8162_v49 = vadd.f32 %v8161_v14, %v8160_v1 }
 0x69e   : > { %v8164_v40 = vadd.f32 %v8163_v2, %v8162_v49  ;;  %v8137_v3 = vadd.f32 %v8136_v53, %v8135_v16 }
 0x6a0   : > { %v8166_v61 = vadd.f32 %v8165_v24, %v8164_v40 }
 0x6db   : > { %v8731_v43 = vpop.f32.mrb[68].mxu0 }
 0x6dc   : > { %v8109_v23 = vadd.f32 %v8731_v43, %v8429_v31  ;;  %v8100_v5 = vpop.f32.mrb[69].mxu0 }
 0x6dd   : > { %v8101_v41 = vadd.f32 %v8429_v31, %v8100_v5  ;;  %v8732_v54 = vpop.f32.mrb[70].mxu0 }
 0x6de   : > { %v8112_v19 = vadd.f32 %v8732_v54, %v8429_v31  ;;  %v8103_v0 = vpop.f32.mrb[71].mxu0  ;;  %v8121_v30 = vadd.f32 %v8109_v23, %v12093_v60 }
 0x6df   : > { %v8119_v58 = vadd.f32 %v8101_v41, %v12094_v8  ;;  %v8104_v6 = vadd.f32 %v8429_v31, %v8103_v0 }
 0x6e0   : > { %v8122_v12 = vadd.f32 %v8112_v19, %v12095_v42  ;;  %8129 = vst.msk [vmem:[%s11779_s14 + $0x30] sm:$0xff] %vm433_vm0, %v8121_v30  ;;  %v8158_v50 = vmul.f32 %v8121_v30, %v8121_v30  ;;  %v8142_v38 = vsel %vm433_vm0, %v8121_v30, 0.0 }
 0x6e1   : > { %8127 = vst.msk [vmem:[%s11779_s14 + $0x20] sm:$0xff] %vm433_vm0, %v8119_v58  ;;  %v8138_v28 = vsel %vm433_vm0, %v8119_v58, 0.0  ;;  %v8156_v10 = vmul.f32 %v8119_v58, %v8119_v58  ;;  %v8120_v55 = vadd.f32 %v8104_v6, %v12096_v34 }
 0x6e2   : > { %v8139_v59 = vadd.f32 %v8138_v28, %v8137_v3  ;;  %8130 = vst.msk [vmem:[%s11779_s14 + $0x38] sm:$0xff] %vm433_vm0, %v8122_v12  ;;  %v8159_v17 = vmul.f32 %v8122_v12, %v8122_v12  ;;  %v8171_v45 = vsel %vm433_vm0, %v8158_v50, 0.0  ;;  %v8144_v29 = vsel %vm433_vm0, %v8122_v12, 0.0 }
 0x6e3   : > { %v8167_v20 = vsel %vm433_vm0, %v8156_v10, 0.0  ;;  %8128 = vst.msk [vmem:[%s11779_s14 + $0x28] sm:$0xff] %vm433_vm0, %v8120_v55  ;;  %v8140_v36 = vsel %vm433_vm0, %v8120_v55, 0.0  ;;  %v8157_v56 = vmul.f32 %v8120_v55, %v8120_v55 }
 0x6e4   : > { %v8168_v39 = vadd.f32 %v8167_v20, %v8166_v61  ;;  %v8141_v62 = vadd.f32 %v8140_v36, %v8139_v59  ;;  %v8173_v13 = vsel %vm433_vm0, %v8159_v17, 0.0 }
 0x6e5   : > { %v8169_v46 = vsel %vm433_vm0, %v8157_v56, 0.0 }
 0x6e6   : > { %v8143_v22 = vadd.f32 %v8142_v38, %v8141_v62  ;;  %v8170_v31 = vadd.f32 %v8169_v46, %v8168_v39 }
 0x6e8   : > { %v8145_v51 = vadd.f32 %v8144_v29, %v8143_v22  ;;  %v8172_v32 = vadd.f32 %v8171_v45, %v8170_v31 }
 0x6ea   : > { %v8146_v26 = vrot.slane %v8145_v51, 4  ;;  %v8174_v9 = vadd.f32 %v8173_v13, %v8172_v32 }
 0x6ec   : > { %v8147_v18 = vadd.f32 %v8146_v26, %v8145_v51  ;;  %v8175_v25 = vrot.slane %v8174_v9, 4 }
 0x6ee   : > { %v8148_v47 = vrot.slane %v8147_v18, 2  ;;  %v8176_v33 = vadd.f32 %v8175_v25, %v8174_v9 }
 0x6f0   : > { %v8149_v15 = vadd.f32 %v8148_v47, %v8147_v18  ;;  %v8177_v63 = vrot.slane %v8176_v33, 2 }
 0x6f2   : > { %v8150_v48 = vrot.slane %v8149_v15, 1  ;;  %v8178_v7 = vadd.f32 %v8177_v63, %v8176_v33 }
 0x6f4   : > { %v8151_v57 = vadd.f32 %v8150_v48, %v8149_v15  ;;  %v8179_v21 = vrot.slane %v8178_v7, 1 }
 0x6f6   : > { %v8180_v4 = vadd.f32 %v8179_v21, %v8178_v7  ;;  %8182 = vst.msk [vmem:[%s366_s17] sm:$0x1] %vm8181_vm10, %v8151_v57 }
 0x6f8   : > { %8183 = vst.msk [vmem:[%s366_s17 + $0x1] sm:$0x1] %vm8181_vm10, %v8180_v4 }
 0x6f9 PF: > { %s20_s30 = sadd.s32 1, %s8958_s30  }
 0x6fa   : > { %p17_p5 = scmp.ge.s32.totalorder %s20_s30, 4  }
 0x6fc   :  { %19 = sbr.rel (!%p17_p5) target bundleno = 1 (0x1), region = 102 }

// kernel: patchtst_encoder_forward.7
= control target key start
LH: loop header
LB: loop body
LE: loop exit
PB: predicated region body
PF: predicated region fallthrough
CT: control target
= control target key end

     0   :  { %s9042_s30 = smov 0   ;;  %s11706_s0 = inlined_call_operand.vmem [shape: f32[8,16,32], index: 0, kind: input, shape index: {}]   ;;  %s11707_s1 = inlined_call_operand.vmem [shape: f32[8,4,256], index: 1, kind: input, shape index: {}]   ;;  %s11708_s2 = inlined_call_operand.vmem [shape: f32[1,32], index: 2, kind: input, shape index: {}]   ;;  %s11709_s3 = inlined_call_operand.vmem [shape: f32[1,32], index: 3, kind: input, shape index: {}]   ;;  %s11710_s4 = inlined_call_operand.vmem [shape: bf16[32,96], index: 4, kind: input, shape index: {}]   ;;  %s11711_s5 = inlined_call_operand.vmem [shape: f32[1,96], index: 5, kind: input, shape index: {}]   ;;  %s11712_s6 = inlined_call_operand.vmem [shape: bf16[32,32], index: 6, kind: input, shape index: {}]   ;;  %s11713_s7 = inlined_call_operand.vmem [shape: f32[1,32], index: 7, kind: input, shape index: {}]   ;;  %s11714_s8 = inlined_call_operand.vmem [shape: f32[8,16,32], index: 8, kind: output, shape index: {0}]   ;;  %s11715_s9 = inlined_call_operand.vmem [shape: f32[2,2,32], index: 9, kind: output, shape index: {1}]  }
   0x1 LB: > { %s9048_s10 = sadd.s32 4294967295, %s8975_s30   ;;  %p8310_p0 = scmp.ge.s32.totalorder %s8975_s30, 1  ;;  %s8975_s30 = sphi %s9042_s30, %s20_s30  }
   0x2   : > { %p304_p1 = scmp.lt.s32.totalorder %s8975_s30, 3 }
   0x4   : > { %p305_p2 = pnand %p8310_p0, %p304_p1 }
   0x6   : > { %308 = sbr.rel (%p305_p2) target bundleno = 1785 (0x6f9), region = 52 }
   0xd   : > { %v8833_v0 = vld [vmem:[%s11710_s4] sm:$0xff]   ;;  %s8311_s13 = sshll.u32 %s9048_s10, 2  ;;  %v8834_v1 = vld [vmem:[%s11710_s4 + $0x8] sm:$0xff]   ;;  %vm443_vm0 = vcmask 261120   ;;  %s8977_s26 = smov 112   ;;  %v11716_v63 = vmov 0.0  }
   0xe   : > { %p353_p3 = scmp.lt.s32.totalorder %s8311_s13, 7  ;;  %8530 = vmatprep.subr.bf16.mxu0 %v8833_v0  ;;  %8746 = vmatprep.subr.bf16.mxu1 %v8833_v0  ;;  %v8321_v2 = vld [vmem:[%s11708_s2] ss:$0 sm:$0xff]  ;;  %s8978_s27 = smov 120   ;;  %vm8982_vm1 = vmmov 0   ;;  %vm4089_vm2 = vcmask 64512  }
   0xf   : > { %8531 = vmatpush3.bf16.msra.mxu0 %v8833_v0  ;;  %8748 = vmatpush3.bf16.msra.mxu1 %v8833_v0  ;;  %v8322_v3 = vld [vmem:[%s11709_s3] ss:$0 sm:$0xff]  ;;  %s8979_s28 = smov 104   ;;  %s8980_s29 = smov 96   ;;  %vm5734_vm3 = vcmask 130048   ;;  %vm8023_vm4 = vcmask 195584  }
  0x10   : > { %s11873_s13 = smov (!%p353_p3, %s8311_s13), 7  ;;  %8532 = vmatprep.subr.bf16.mxu0 %v8834_v1  ;;  %8747 = vmatprep.subr.bf16.mxu1 %v8834_v1  ;;  %v8323_v32 = vld [vmem:[%s11711_s5] ss:$0 sm:$0xff]  ;;  %s8985_s17 = smov 80   ;;  %vm8202_vm5 = vcmask 253952  }
  0x11   : > { %s8451_s16 = sshll.u32 %s11873_s13, 4  ;;  %s8452_s11 = sshll.u32 %s11873_s13, 3 }
  0x12   : > { %s357_s21 = scalar_lea.vmem %s11706_s0, %s8451_s16  ;;  %s9264_s15 = scalar_lea.vmem %s11707_s1, %s8452_s11 }
  0x13   : > { %8533 = vmatpush3.bf16.msra.mxu0 %v8834_v1  ;;  %v378_v4 = vld [vmem:[%s357_s21] sm:$0xff]  ;;  %v379_v5 = vld [vmem:[%s357_s21 + $0x8] sm:$0xff]  ;;  %v380_v6 = vld [vmem:[%s357_s21 + $0x10] sm:$0xff]  ;;  %8749 = vmatpush3.bf16.msra.mxu1 %v8834_v1  ;;  %s8986_s18 = smov 64   ;;  %s8987_s19 = smov 48  }
  0x14   : > { %v393_v7 = vmul.f32 %v8321_v2, %v378_v4  ;;  %v394_v8 = vmul.f32 %v8321_v2, %v379_v5  ;;  %v381_v9 = vld [vmem:[%s357_s21 + $0x18] sm:$0xff]  ;;  %v395_v10 = vmul.f32 %v8321_v2, %v380_v6  ;;  %v382_v11 = vld [vmem:[%s357_s21 + $0x20] sm:$0xff]  ;;  %v383_v12 = vld [vmem:[%s357_s21 + $0x28] sm:$0xff]  ;;  %8542 = vmatprep.subr.bf16.mxu1 %v11716_v63  ;;  %8554 = vmatprep.subr.bf16.mxu0 %v11716_v63  ;;  %s8988_s20 = smov 32   ;;  %s8990_s22 = smov 24  }
  0x15   : > { %v396_v13 = vmul.f32 %v8321_v2, %v381_v9  ;;  %v397_v14 = vmul.f32 %v8321_v2, %v382_v11  ;;  %v398_v15 = vmul.f32 %v8321_v2, %v383_v12  ;;  %v384_v16 = vld [vmem:[%s357_s21 + $0x30] sm:$0xff]  ;;  %v385_v17 = vld [vmem:[%s357_s21 + $0x38] sm:$0xff]  ;;  %v4874_v12 = vld [vmem:[%s9264_s15] sm:$0xff]  ;;  %s8989_s21 = smov 16   ;;  %s8991_s23 = smov 8  }
  0x16   : > { %v9073_v18 = vadd.f32 %v8322_v3, %v393_v7  ;;  %v9075_v19 = vadd.f32 %v8322_v3, %v394_v8  ;;  %v9077_v20 = vadd.f32 %v8322_v3, %v395_v10  ;;  %v399_v21 = vmul.f32 %v8321_v2, %v384_v16  ;;  %s11656_s14 = scalar_lea.vmem %s11714_s8, %s8451_s16  ;;  %p373_p4 = scmp.lt.s32.totalorder %s9048_s10, 1 }
  0x17   : > { %v9079_v22 = vadd.f32 %v8322_v3, %v396_v13  ;;  %v9081_v23 = vadd.f32 %v8322_v3, %v397_v14  ;;  %v9083_v24 = vadd.f32 %v8322_v3, %v398_v15  ;;  %v400_v25 = vmul.f32 %v8321_v2, %v385_v17 }
  0x18   : > { %11762 = vst [vmem:[#allocation2_spill] sm:$0xff] %v9073_v18  ;;  %11763 = vst [vmem:[#allocation3_spill] sm:$0xff] %v9075_v19  ;;  %v420_v26 = vpack.c.bf16 %v9075_v19, %v9073_v18  ;;  %v9087_v27 = vadd.f32 %v8322_v3, %v399_v21  ;;  %v8983_v8 = vmov 1983009808   ;;  %v606_v10 = vlaneseq  ;;  %s11875_s10 = smov (!%p373_p4, %s9048_s10), 1 }
  0x19   : > { %11764 = vst [vmem:[#allocation4_spill] sm:$0xff] %v9077_v20  ;;  %11765 = vst [vmem:[#allocation5_spill] sm:$0xff] %v9079_v22  ;;  %v421_v28 = vpack.c.bf16 %v9079_v22, %v9077_v20  ;;  %v422_v29 = vpack.c.bf16 %v9083_v24, %v9081_v23  ;;  %v9093_v30 = vadd.f32 %v8322_v3, %v400_v25  ;;  %v604_v9 = vunpack.c.l.s4 %v8983_v8  ;;  %s8320_s13 = sshll.u32 %s11875_s10, 1 }
  0x1a   : > { %11766 = vst [vmem:[#allocation6_spill] sm:$0xff] %v9081_v23  ;;  %11767 = vst [vmem:[#allocation7_spill] sm:$0xff] %v9083_v24  ;;  %8534 = vmatprep.mubr.msk.bf16.mxu0 %vm443_vm0, %v420_v26  ;;  %v607_v15 = vshrl.u32 %v606_v10, 7  ;;  %v8984_v16 = vmov 1934713408  }
  0x1b   : > { %11768 = vst [vmem:[#allocation8_spill] sm:$0xff] %v9087_v27  ;;  %11769 = vst [vmem:[#allocation9_spill] sm:$0xff] %v9093_v30  ;;  %8535 = vmatmul.mubr.msk.bf16.vlgmr.msra.gmra.mrb[0].mxu0 %vm443_vm0, %v421_v28  ;;  %8538 = vmatprep.mubr.msk.bf16.mxu1 %vm443_vm0, %v422_v29  ;;  %v423_v31 = vpack.c.bf16 %v9093_v30, %v9087_v27  ;;  %v605_v14 = vunpack.c.0.s8 %v604_v9  ;;  %v636_v17 = vunpack.c.l.s4 %v8984_v16 }
  0x1c   : > { %8556 = vmatprep.mubr.msk.bf16.mxu0 %vm8982_vm1, %v11716_v63 }
  0x1d   : > { %8539 = vmatmul.mubr.msk.bf16.vlgmr.msra.gmra.mrb[0].mxu1 %vm443_vm0, %v423_v31  ;;  %v9284_v28 = vsub.s32 %v605_v14, %v607_v15 }
  0x1e   : > { %8544 = vmatprep.mubr.msk.bf16.mxu1 %vm8982_vm1, %v11716_v63 }
  0xee   : > { %v8536_v33 = vpop.f32.mrb[0].mxu0 }
  0xef   : > { %v490_v34 = vpop.f32.mrb[1].mxu0  ;;  %v9116_v43 = vadd.f32 %v8536_v33, %v8323_v32  ;;  %v637_v33 = vunpack.c.0.s8 %v636_v17 }
  0xf0   : > { %v9104_v35 = vadd.f32 %v8323_v32, %v490_v34  ;;  %v8537_v36 = vpop.f32.mrb[2].mxu0  ;;  %v8540_v37 = vpop.f32.mrb[0].mxu1 }
  0xf1   : > { %v493_v38 = vpop.f32.mrb[3].mxu0  ;;  %v506_v39 = vpop.f32.mrb[1].mxu1  ;;  %v9118_v44 = vadd.f32 %v8537_v36, %v8323_v32  ;;  %v9142_v48 = vadd.f32 %v8540_v37, %v8323_v32  ;;  %v9305_v9 = vsub.s32 %v637_v33, %v607_v15 }
  0xf2   : > { %553 = vrot.lane.b32.xlu1 %v9104_v35, %s8977_s26  ;;  %529 = vrot.lane.b32.xlu0 %v9104_v35, %s8978_s27  ;;  %v8541_v40 = vpop.f32.mrb[2].mxu1  ;;  %v9109_v42 = vadd.f32 %v8323_v32, %v493_v38  ;;  %v9126_v45 = vadd.f32 %v8323_v32, %v506_v39 }
  0xf3   : > { %v509_v41 = vpop.f32.mrb[3].mxu1  ;;  %v9130_v46 = vadd.f32 %v8541_v40, %v8323_v32  ;;  %11773 = vst [vmem:[#allocation13_spill] sm:$0xff] %v9142_v48 }
  0xf4   : > { %11770 = vst [vmem:[#allocation10_spill] sm:$0xff] %v9126_v45  ;;  %v9138_v47 = vadd.f32 %v8323_v32, %v509_v41 }
  0xf5   : > { %11771 = vst [vmem:[#allocation11_spill] sm:$0xff] %v9130_v46 }
  0xf6   : > { %555 = vrot.lane.b32.xlu1 %v9109_v42, %s8977_s26  ;;  %531 = vrot.lane.b32.xlu0 %v9109_v42, %s8978_s27  ;;  %11772 = vst [vmem:[#allocation12_spill] sm:$0xff] %v9138_v47 }
  0xfa   : > { %579 = vrot.lane.b32.xlu1 %v9109_v42, %s8979_s28  ;;  %577 = vrot.lane.b32.xlu0 %v9104_v35, %s8979_s28 }
  0xfe   : > { %535 = vrot.lane.b32.xlu1 %v9118_v44, %s8978_s27  ;;  %533 = vrot.lane.b32.xlu0 %v9116_v43, %s8978_s27 }
 0x102   : > { %559 = vrot.lane.b32.xlu1 %v9118_v44, %s8977_s26  ;;  %557 = vrot.lane.b32.xlu0 %v9116_v43, %s8977_s26 }
 0x106   : > { %583 = vrot.lane.b32.xlu1 %v9118_v44, %s8979_s28  ;;  %581 = vrot.lane.b32.xlu0 %v9116_v43, %s8979_s28 }
 0x10a   : > { %543 = vrot.lane.b32.xlu1 %v9130_v46, %s8978_s27  ;;  %537 = vrot.lane.b32.xlu0 %v9126_v45, %s8978_s27 }
 0x10e   : > { %567 = vrot.lane.b32.xlu1 %v9130_v46, %s8977_s26  ;;  %561 = vrot.lane.b32.xlu0 %v9126_v45, %s8977_s26 }
 0x112   : > { %539 = vrot.lane.b32.xlu1 %v9138_v47, %s8978_s27  ;;  %585 = vrot.lane.b32.xlu0 %v9126_v45, %s8979_s28 }
 0x116   : > { %563 = vrot.lane.b32.xlu1 %v9138_v47, %s8977_s26  ;;  %541 = vrot.lane.b32.xlu0 %v9142_v48, %s8978_s27 }
 0x11a   : > { %587 = vrot.lane.b32.xlu1 %v9138_v47, %s8979_s28  ;;  %565 = vrot.lane.b32.xlu0 %v9142_v48, %s8977_s26 }
 0x11e   : > { %591 = vrot.lane.b32.xlu1 %v9130_v46, %s8979_s28  ;;  %589 = vrot.lane.b32.xlu0 %v9142_v48, %s8979_s28 }
 0x122   : > { %1691 = vrot.lane.b32.xlu1 %v9109_v42, %s8980_s29  ;;  %1689 = vrot.lane.b32.xlu0 %v9104_v35, %s8980_s29 }
 0x164   : > { %v9156_v49 = vpop.permute.xlu1 %553  ;;  %v9158_v50 = vpop.permute.xlu0 %529 }
 0x165   : > { %1705 = vrot.lane.b32.xlu0 %v9158_v50, %s8980_s29  ;;  %v601_v31 = vcombine.low %v9104_v35, %v9156_v49  ;;  %v602_v32 = vcombine.high %v9104_v35, %v9156_v49 }
 0x167   : > { %v609_v41 = vrot.slane %v601_v31, %v9284_v28  ;;  %v616_v8 = vrot.slane %v602_v32, %v9284_v28 }
 0x168   : > { %v9162_v51 = vpop.permute.xlu1 %555  ;;  %v9164_v52 = vpop.permute.xlu0 %531 }
 0x169   : > { %11774 = vst [vmem:[#allocation14_spill] sm:$0xff] %v9162_v51  ;;  %11775 = vst [vmem:[#allocation15_spill] sm:$0xff] %v9164_v52  ;;  %1721 = vrot.lane.b32.xlu0 %v9156_v49, %s8980_s29  ;;  %1707 = vrot.lane.b32.xlu1 %v9164_v52, %s8980_s29  ;;  %v669_v29 = vcombine.low %v9109_v42, %v9162_v51  ;;  %v670_v37 = vcombine.high %v9109_v42, %v9162_v51 }
 0x16b   : > { %v677_v40 = vrot.slane %v669_v29, %v9284_v28 }
 0x16c   : > { %v9170_v53 = vpop.permute.xlu1 %579  ;;  %v9172_v54 = vpop.permute.xlu0 %577 }
 0x16d   : > { %11776 = vst [vmem:[#allocation16_spill] sm:$0xff] %v9170_v53  ;;  %1723 = vrot.lane.b32.xlu1 %v9162_v51, %s8980_s29  ;;  %1737 = vrot.lane.b32.xlu0 %v9172_v54, %s8980_s29  ;;  %v685_v21 = vcombine.low %v9164_v52, %v9170_v53  ;;  %v617_v25 = vcombine.low %v9158_v50, %v9172_v54 }
 0x16e   : > { %v618_v26 = vcombine.high %v9158_v50, %v9172_v54  ;;  %v686_v34 = vcombine.high %v9164_v52, %v9170_v53 }
 0x16f   : > { %v693_v36 = vrot.slane %v685_v21, %v9284_v28  ;;  %v625_v38 = vrot.slane %v617_v25, %v9284_v28  ;;  %v684_v25 = vrot.slane %v670_v37, %v9284_v28 }
 0x170   : > { %v9178_v55 = vpop.permute.xlu1 %535  ;;  %v9180_v56 = vpop.permute.xlu0 %533  ;;  %v632_v39 = vrot.slane %v618_v26, %v9284_v28  ;;  %v700_v10 = vrot.slane %v686_v34, %v9284_v28 }
 0x171   : > { %1739 = vrot.lane.b32.xlu1 %v9170_v53, %s8980_s29  ;;  %1693 = vrot.lane.b32.xlu0 %v9116_v43, %s8980_s29  ;;  %v701_v14 = vcombine.low %v677_v40, %v693_v36  ;;  %v702_v16 = vcombine.high %v677_v40, %v693_v36  ;;  %v633_v26 = vcombine.low %v609_v41, %v625_v38 }
 0x172   : > { %v634_v29 = vcombine.high %v609_v41, %v625_v38  ;;  %v649_v15 = vcombine.low %v616_v8, %v632_v39  ;;  %v650_v31 = vcombine.high %v616_v8, %v632_v39  ;;  %v717_v36 = vcombine.low %v684_v25, %v700_v10  ;;  %v9327_v39 = vld [vmem:[%s9264_s15 + $0x8] sm:$0xff] }
 0x173   : > { %v718_v40 = vcombine.high %v684_v25, %v700_v10  ;;  %v709_v41 = vrot.slane %v701_v14, %v9305_v9  ;;  %v716_v8 = vrot.slane %v702_v16, %v9305_v9  ;;  %v641_v10 = vrot.slane %v633_v26, %v9305_v9 }
 0x174   : > { %v9186_v57 = vpop.permute.xlu1 %559  ;;  %v9188_v58 = vpop.permute.xlu0 %557  ;;  %v648_v25 = vrot.slane %v634_v29, %v9305_v9  ;;  %v657_v30 = vrot.slane %v649_v15, %v9305_v9 }
 0x175   : > { %1695 = vrot.lane.b32.xlu1 %v9118_v44, %s8980_s29  ;;  %1709 = vrot.lane.b32.xlu0 %v9180_v56, %s8980_s29  ;;  %v805_v32 = vcombine.low %v9118_v44, %v9186_v57  ;;  %v806_v33 = vcombine.high %v9118_v44, %v9186_v57  ;;  %v737_v37 = vcombine.low %v9116_v43, %v9188_v58 }
 0x176   : > { %v738_v23 = vcombine.high %v9116_v43, %v9188_v58  ;;  %v1213_v19 = vcombine.low %v709_v41, %v716_v8  ;;  %v8330_v22 = vcombine.high %v641_v10, %v648_v25 }
 0x177   : > { %v813_v27 = vrot.slane %v805_v32, %v9284_v28  ;;  %v820_v14 = vrot.slane %v806_v33, %v9284_v28  ;;  %v745_v26 = vrot.slane %v737_v37, %v9284_v28  ;;  %v8332_v37 = vcombine.high %v709_v41, %v716_v8 }
 0x178   : > { %v9194_v59 = vpop.permute.xlu1 %583  ;;  %v9196_v60 = vpop.permute.xlu0 %581  ;;  %v752_v18 = vrot.slane %v738_v23, %v9284_v28  ;;  %v9363_v41 = vrot.slane %v8330_v22, %v9284_v28 }
 0x179   : > { %11777 = vst [vmem:[#allocation17_spill] sm:$0xff] %v9194_v59  ;;  %1711 = vrot.lane.b32.xlu1 %v9178_v55, %s8980_s29  ;;  %1725 = vrot.lane.b32.xlu0 %v9188_v58, %s8980_s29  ;;  %v821_v17 = vcombine.low %v9178_v55, %v9194_v59  ;;  %v822_v21 = vcombine.high %v9178_v55, %v9194_v59 }
 0x17a   : > { %v753_v34 = vcombine.low %v9180_v56, %v9196_v60  ;;  %v754_v38 = vcombine.high %v9180_v56, %v9196_v60 }
 0x17b   : > { %v829_v63 = vrot.slane %v821_v17, %v9284_v28  ;;  %v836_v24 = vrot.slane %v822_v21, %v9284_v28  ;;  %v725_v17 = vrot.slane %v717_v36, %v9305_v9  ;;  %v732_v21 = vrot.slane %v718_v40, %v9305_v9 }
 0x17c   : > { %v9202_v61 = vpop.permute.xlu1 %543  ;;  %v9208_v62 = vpop.permute.xlu0 %537  ;;  %v761_v16 = vrot.slane %v753_v34, %v9284_v28  ;;  %v768_v29 = vrot.slane %v754_v38, %v9284_v28  ;;  %v1145_v34 = vcombine.low %v641_v10, %v648_v25 }
 0x17d   : > { %11778 = vst [vmem:[#allocation18_spill] sm:$0xff] %v9202_v61  ;;  %1727 = vrot.lane.b32.xlu1 %v9186_v57, %s8980_s29  ;;  %1741 = vrot.lane.b32.xlu0 %v9196_v60, %s8980_s29  ;;  %11779 = vst [vmem:[#allocation19_spill] sm:$0xff] %v9208_v62  ;;  %v837_v15 = vcombine.low %v813_v27, %v829_v63  ;;  %v853_v32 = vcombine.low %v820_v14, %v836_v24 }
 0x17e   : > { %v854_v33 = vcombine.high %v820_v14, %v836_v24  ;;  %v769_v53 = vcombine.low %v745_v26, %v761_v16  ;;  %v770_v40 = vcombine.high %v745_v26, %v761_v16  ;;  %v1229_v38 = vcombine.low %v725_v17, %v732_v21 }
 0x17f   : > { %v785_v51 = vcombine.low %v752_v18, %v768_v29  ;;  %v786_v52 = vcombine.high %v752_v18, %v768_v29  ;;  %v845_v24 = vrot.slane %v837_v15, %v9305_v9  ;;  %v861_v23 = vrot.slane %v853_v32, %v9305_v9  ;;  %v9389_v29 = vld [vmem:[%s9264_s15 + $0x10] sm:$0xff] }
 0x180   : > { %v9211_v0 = vpop.permute.xlu1 %567  ;;  %v9220_v2 = vpop.permute.xlu0 %561  ;;  %v9360_v10 = vrot.slane %v1145_v34, %v9284_v28  ;;  %v777_v25 = vrot.slane %v769_v53, %v9305_v9  ;;  %v9376_v14 = vrot.slane %v1213_v19, %v9284_v28  ;;  %v9379_v16 = vrot.slane %v8332_v37, %v9284_v28 }
 0x181   : > { %11780 = vst [vmem:[#allocation20_spill] sm:$0xff] %v9211_v0  ;;  %1743 = vrot.lane.b32.xlu1 %v9194_v59, %s8980_s29  ;;  %1697 = vrot.lane.b32.xlu0 %v9126_v45, %s8980_s29  ;;  %11782 = vst [vmem:[#allocation22_spill] sm:$0xff] %v9220_v2  ;;  %v793_v22 = vrot.slane %v785_v51, %v9305_v9  ;;  %v9386_v53 = vrot.slane %v1229_v38, %v9284_v28 }
 0x182   : > { %v874_v37 = vcombine.high %v9126_v45, %v9220_v2 }
 0x184   : > { %v9218_v1 = vpop.permute.xlu1 %539  ;;  %v9236_v4 = vpop.permute.xlu0 %585 }
 0x185   : > { %11781 = vst [vmem:[#allocation21_spill] sm:$0xff] %v9218_v1  ;;  %1699 = vrot.lane.b32.xlu1 %v9138_v47, %s8980_s29  ;;  %1713 = vrot.lane.b32.xlu0 %v9208_v62, %s8980_s29  ;;  %11784 = vst [vmem:[#allocation24_spill] sm:$0xff] %v9236_v4  ;;  %v889_v51 = vcombine.low %v9208_v62, %v9236_v4 }
 0x188   : > { %v9230_v3 = vpop.permute.xlu1 %563  ;;  %v9244_v6 = vpop.permute.xlu0 %541 }
 0x189   : > { %1715 = vrot.lane.b32.xlu1 %v9218_v1, %s8980_s29  ;;  %11783 = vst [vmem:[#allocation23_spill] sm:$0xff] %v9230_v3  ;;  %1729 = vrot.lane.b32.xlu0 %v9220_v2, %s8980_s29  ;;  %11786 = vst [vmem:[#allocation26_spill] sm:$0xff] %v9244_v6 }
 0x18c   : > { %v9242_v5 = vpop.permute.xlu1 %587  ;;  %v9254_v7 = vpop.permute.xlu0 %565 }
 0x18d   : > { %1731 = vrot.lane.b32.xlu1 %v9230_v3, %s8980_s29  ;;  %1745 = vrot.lane.b32.xlu0 %v9236_v4, %s8980_s29  ;;  %11785 = vst [vmem:[#allocation25_spill] sm:$0xff] %v9242_v5  ;;  %11787 = vst [vmem:[#allocation27_spill] sm:$0xff] %v9254_v7  ;;  %v957_v38 = vcombine.low %v9218_v1, %v9242_v5 }
 0x190   : > { %v9266_v11 = vpop.permute.xlu0 %589  ;;  %v9273_v13 = vpop.permute.xlu1 %591 }
 0x191   : > { %1747 = vrot.lane.b32.xlu1 %v9242_v5, %s8980_s29  ;;  %1701 = vrot.lane.b32.xlu0 %v9142_v48, %s8980_s29  ;;  %11788 = vst [vmem:[#allocation28_spill] sm:$0xff] %v9266_v11  ;;  %11789 = vst [vmem:[#allocation29_spill] sm:$0xff] %v9273_v13 }
 0x195   : > { %1703 = vrot.lane.b32.xlu1 %v9130_v46, %s8980_s29  ;;  %1717 = vrot.lane.b32.xlu0 %v9244_v6, %s8980_s29 }
 0x199   : > { %1719 = vrot.lane.b32.xlu1 %v9202_v61, %s8980_s29  ;;  %1733 = vrot.lane.b32.xlu0 %v9254_v7, %s8980_s29 }
 0x19d   : > { %1735 = vrot.lane.b32.xlu1 %v9211_v0, %s8980_s29  ;;  %1749 = vrot.lane.b32.xlu0 %v9266_v11, %s8980_s29 }
 0x1a1   : > { %1751 = vrot.lane.b32.xlu1 %v9273_v13, %s8980_s29  ;;  %4890 = vrot.lane.b32.xlu0 %v4874_v12, %s8977_s26 }
 0x1a5   : > { %4906 = vrot.lane.b32.xlu1 %v4874_v12, %s8980_s29  ;;  %4922 = vrot.lane.b32.xlu0 %v4874_v12, %s8985_s17 }
 0x1a9   : > { %4938 = vrot.lane.b32.xlu1 %v4874_v12, %s8986_s18  ;;  %4954 = vrot.lane.b32.xlu0 %v4874_v12, %s8987_s19 }
 0x1ad   : > { %4970 = vrot.lane.b32.xlu1 %v4874_v12, %s8988_s20  ;;  %4986 = vrot.lane.b32.xlu0 %v4874_v12, %s8989_s21  ;;  %v664_v12 = vrot.slane %v650_v31, %v9305_v9  ;;  %v838_v31 = vcombine.high %v813_v27, %v829_v63  ;;  %v8333_v63 = vcombine.high %v725_v17, %v732_v21 }
 0x1af   : > { %v1161_v20 = vcombine.low %v657_v30, %v664_v12  ;;  %v8331_v36 = vcombine.high %v657_v30, %v664_v12  ;;  %v852_v27 = vrot.slane %v838_v31, %v9305_v9  ;;  %v868_v30 = vrot.slane %v854_v33, %v9305_v9 }
 0x1b0   : > { %v784_v12 = vrot.slane %v770_v40, %v9305_v9  ;;  %v9392_v19 = vrot.slane %v8333_v63, %v9284_v28  ;;  %v1177_v33 = vcombine.low %v9360_v10, %v9363_v41  ;;  %v873_v40 = vcombine.low %v9126_v45, %v9220_v2 }
 0x1b1   : > { %4892 = vrot.lane.b32.xlu1 %v9327_v39, %s8977_s26  ;;  %4908 = vrot.lane.b32.xlu0 %v9327_v39, %s8980_s29  ;;  %v9366_v18 = vrot.slane %v1161_v20, %v9284_v28  ;;  %v9369_v8 = vrot.slane %v8331_v36, %v9284_v28  ;;  %v800_v20 = vrot.slane %v786_v52, %v9305_v9 }
 0x1b2   : > { %v1349_v17 = vcombine.low %v845_v24, %v852_v27  ;;  %v8336_v21 = vcombine.high %v845_v24, %v852_v27  ;;  %v1365_v26 = vcombine.low %v861_v23, %v868_v30  ;;  %v8337_v15 = vcombine.high %v861_v23, %v868_v30 }
 0x1b3   : > { %v890_v52 = vcombine.high %v9208_v62, %v9236_v4  ;;  %v1281_v31 = vcombine.low %v777_v25, %v784_v12  ;;  %v8334_v32 = vcombine.high %v777_v25, %v784_v12  ;;  %v1193_v34 = vcombine.low %v9366_v18, %v9369_v8 }
 0x1b4   : > { %v1297_v36 = vcombine.low %v793_v22, %v800_v20  ;;  %v9416_v24 = vrot.slane %v8336_v21, %v9284_v28  ;;  %v9419_v27 = vrot.slane %v1365_v26, %v9284_v28  ;;  %v8335_v23 = vcombine.high %v793_v22, %v800_v20 }
 0x1b5   : > { %4924 = vrot.lane.b32.xlu1 %v9327_v39, %s8985_s17  ;;  %4940 = vrot.lane.b32.xlu0 %v9327_v39, %s8986_s18  ;;  %v9422_v30 = vrot.slane %v8337_v15, %v9284_v28  ;;  %v897_v63 = vrot.slane %v889_v51, %v9284_v28  ;;  %v904_v25 = vrot.slane %v890_v52, %v9284_v28 }
 0x1b6   : > { %v941_v12 = vcombine.low %v9138_v47, %v9230_v3  ;;  %v9432_v21 = vrot.slane %v8334_v32, %v9284_v28  ;;  %v1077_v26 = vcombine.low %v9130_v46, %v9211_v0  ;;  %v958_v22 = vcombine.high %v9218_v1, %v9242_v5 }
 0x1b7   : > { %v1078_v20 = vcombine.high %v9130_v46, %v9211_v0  ;;  %v881_v15 = vrot.slane %v873_v40, %v9284_v28  ;;  %v888_v51 = vrot.slane %v874_v37, %v9284_v28  ;;  %v965_v52 = vrot.slane %v957_v38, %v9284_v28 }
 0x1b8   : > { %v9451_v32 = vrot.slane %v8335_v23, %v9284_v28  ;;  %v942_v5 = vcombine.high %v9138_v47, %v9230_v3  ;;  %v1093_v1 = vcombine.low %v9202_v61, %v9273_v13  ;;  %v949_v38 = vrot.slane %v941_v12, %v9284_v28 }
 0x1b9   : > { %4956 = vrot.lane.b32.xlu1 %v9327_v39, %s8987_s19  ;;  %4972 = vrot.lane.b32.xlu0 %v9327_v39, %s8988_s20  ;;  %v905_v40 = vcombine.low %v881_v15, %v897_v63  ;;  %v906_v0 = vcombine.high %v881_v15, %v897_v63  ;;  %v921_v37 = vcombine.low %v888_v51, %v904_v25 }
 0x1ba   : > { %v1085_v46 = vrot.slane %v1077_v26, %v9284_v28  ;;  %v922_v62 = vcombine.high %v888_v51, %v904_v25  ;;  %v9463_v23 = vrot.slane %v1177_v33, %v9305_v9  ;;  %v9466_v3 = vrot.slane %v1078_v20, %v9284_v28 }
 0x1bb   : > { %v973_v4 = vcombine.low %v949_v38, %v965_v52  ;;  %v974_v45 = vcombine.high %v949_v38, %v965_v52  ;;  %v9471_v63 = vrot.slane %v1193_v34, %v9305_v9  ;;  %v956_v25 = vrot.slane %v942_v5, %v9284_v28 }
 0x1bc   : > { %v1094_v12 = vcombine.high %v9202_v61, %v9273_v13  ;;  %v1101_v26 = vrot.slane %v1093_v1, %v9284_v28  ;;  %v1245_v33 = vcombine.low %v9376_v14, %v9379_v16  ;;  %v920_v20 = vrot.slane %v906_v0, %v9305_v9 }
 0x1bd   : > { %4988 = vrot.lane.b32.xlu1 %v9327_v39, %s8989_s21  ;;  %4894 = vrot.lane.b32.xlu0 %v9389_v29, %s8977_s26  ;;  %v9413_v39 = vrot.slane %v1349_v17, %v9284_v28  ;;  %v9429_v17 = vrot.slane %v1281_v31, %v9284_v28  ;;  %v9448_v31 = vrot.slane %v1297_v36, %v9284_v28 }
 0x1be   : > { %v972_v36 = vrot.slane %v958_v22, %v9284_v28  ;;  %v913_v22 = vrot.slane %v905_v40, %v9305_v9  ;;  %v929_v15 = vrot.slane %v921_v37, %v9305_v9  ;;  %v1025_v34 = vcombine.low %v9244_v6, %v9266_v11 }
 0x1bf   : > { %v936_v5 = vrot.slane %v922_v62, %v9305_v9  ;;  %v1026_v1 = vcombine.high %v9244_v6, %v9266_v11  ;;  %v981_v38 = vrot.slane %v973_v4, %v9305_v9  ;;  %v988_v40 = vrot.slane %v974_v45, %v9305_v9  ;;  %v9498_v62 = vld [vmem:[%s9264_s15 + $0x18] sm:$0xff] }
 0x1c0   : > { %v989_v51 = vcombine.low %v956_v25, %v972_v36  ;;  %v990_v52 = vcombine.high %v956_v25, %v972_v36  ;;  %v1009_v0 = vcombine.low %v9142_v48, %v9254_v7  ;;  %v1010_v37 = vcombine.high %v9142_v48, %v9254_v7 }
 0x1c1   : > { %4910 = vrot.lane.b32.xlu1 %v9389_v29, %s8980_s29  ;;  %4926 = vrot.lane.b32.xlu0 %v9389_v29, %s8985_s17  ;;  %v1108_v36 = vrot.slane %v1094_v12, %v9284_v28  ;;  %v1109_v25 = vcombine.low %v1085_v46, %v1101_v26  ;;  %v1110_v13 = vcombine.high %v1085_v46, %v1101_v26 }
 0x1c2   : > { %v1261_v4 = vcombine.low %v9386_v53, %v9392_v19  ;;  %v1417_v11 = vcombine.low %v913_v22, %v920_v20  ;;  %v8338_v45 = vcombine.high %v913_v22, %v920_v20  ;;  %v1033_v61 = vrot.slane %v1025_v34, %v9284_v28 }
 0x1c3   : > { %v1433_v7 = vcombine.low %v929_v15, %v936_v5  ;;  %v997_v48 = vrot.slane %v989_v51, %v9305_v9  ;;  %v1040_v2 = vrot.slane %v1026_v1, %v9284_v28  ;;  %v8339_v46 = vcombine.high %v929_v15, %v936_v5 }
 0x1c4   : > { %v1485_v12 = vcombine.low %v981_v38, %v988_v40  ;;  %v1017_v26 = vrot.slane %v1009_v0, %v9284_v28  ;;  %v1024_v22 = vrot.slane %v1010_v37, %v9284_v28  ;;  %v1117_v20 = vrot.slane %v1109_v25, %v9305_v9 }
 0x1c5   : > { %4942 = vrot.lane.b32.xlu1 %v9389_v29, %s8986_s18  ;;  %4958 = vrot.lane.b32.xlu0 %v9389_v29, %s8987_s19  ;;  %v1124_v34 = vrot.slane %v1110_v13, %v9305_v9  ;;  %v1125_v51 = vcombine.low %v9466_v3, %v1108_v36  ;;  %v8340_v1 = vcombine.high %v981_v38, %v988_v40 }
 0x1c6   : > { %v1041_v6 = vcombine.low %v1017_v26, %v1033_v61  ;;  %v1042_v59 = vcombine.high %v1017_v26, %v1033_v61  ;;  %v9520_v15 = vrot.slane %v1245_v33, %v9305_v9  ;;  %v9523_v5 = vrot.slane %v1417_v11, %v9284_v28 }
 0x1c7   : > { %v1057_v37 = vcombine.low %v1024_v22, %v1040_v2  ;;  %v1058_v47 = vcombine.high %v1024_v22, %v1040_v2  ;;  %v9528_v13 = vrot.slane %v8338_v45, %v9284_v28  ;;  %v9534_v61 = vrot.slane %v8339_v46, %v9284_v28 }
 0x1c8   : > { %v9539_v11 = vrot.slane %v1485_v12, %v9284_v28  ;;  %v1133_v2 = vrot.slane %v1125_v51, %v9305_v9  ;;  %v1621_v40 = vcombine.low %v1117_v20, %v1124_v34  ;;  %v8344_v25 = vcombine.high %v1117_v20, %v1124_v34 }
 0x1c9   : > { %4974 = vrot.lane.b32.xlu1 %v9389_v29, %s8988_s20  ;;  %4990 = vrot.lane.b32.xlu0 %v9389_v29, %s8989_s21  ;;  %v1004_v29 = vrot.slane %v990_v52, %v9305_v9  ;;  %v1126_v52 = vcombine.high %v9466_v3, %v1108_v36  ;;  %v9531_v3 = vrot.slane %v1433_v7, %v9284_v28  ;;  %v9543_v36 = vpop.permute.xlu0 %1689 }
 0x1ca   : > { %v9546_v7 = vrot.slane %v8340_v1, %v9284_v28  ;;  %v1049_v45 = vrot.slane %v1041_v6, %v9305_v9  ;;  %v1065_v46 = vrot.slane %v1057_v37, %v9305_v9  ;;  %v1072_v12 = vrot.slane %v1058_v47, %v9305_v9 }
 0x1cb   : > { %v1501_v0 = vcombine.low %v997_v48, %v1004_v29  ;;  %v8341_v33 = vcombine.high %v997_v48, %v1004_v29  ;;  %v1140_v38 = vrot.slane %v1126_v52, %v9305_v9  ;;  %v1056_v48 = vrot.slane %v1042_v59, %v9305_v9  ;;  %v9574_v52 = vpop.permute.xlu1 %1691 }
 0x1cc   : > { %v1269_v26 = vrot.slane %v1261_v4, %v9305_v9  ;;  %v1178_v6 = vcombine.high %v9360_v10, %v9363_v41  ;;  %v1194_v59 = vcombine.high %v9366_v18, %v9369_v8  ;;  %v1246_v22 = vcombine.high %v9376_v14, %v9379_v16 }
 0x1cd   : > { %4896 = vrot.lane.b32.xlu1 %v9498_v62, %s8977_s26  ;;  %4912 = vrot.lane.b32.xlu0 %v9498_v62, %s8980_s29  ;;  %v9551_v29 = vrot.slane %v1501_v0, %v9284_v28  ;;  %v1262_v47 = vcombine.high %v9386_v53, %v9392_v19  ;;  %v9569_v20 = vrot.slane %v8341_v33, %v9284_v28 }
 0x1ce   : > { %v9572_v4 = vrot.slane %v1621_v40, %v9284_v28  ;;  %v1637_v34 = vcombine.low %v1133_v2, %v1140_v38  ;;  %v8345_v51 = vcombine.high %v1133_v2, %v1140_v38  ;;  %v9577_v41 = vrot.slane %v8344_v25, %v9284_v28 }
 0x1cf   : > { %v1553_v18 = vcombine.low %v1049_v45, %v1056_v48  ;;  %v1313_v8 = vcombine.low %v9429_v17, %v9432_v21  ;;  %v1329_v14 = vcombine.low %v9448_v31, %v9451_v32  ;;  %v8342_v16 = vcombine.high %v1049_v45, %v1056_v48 }
 0x1d0   : > { %11790 = vst [vmem:[#allocation30_spill] sm:$0xff] %v9572_v4  ;;  %v1569_v53 = vcombine.low %v1065_v46, %v1072_v12  ;;  %v8343_v19 = vcombine.high %v1065_v46, %v1072_v12  ;;  %v1277_v1 = vcombine.low %v9520_v15, %v1269_v26  ;;  %v9589_v0 = vrot.slane %v1178_v6, %v9305_v9 }
 0x1d1   : > { %4928 = vrot.lane.b32.xlu1 %v9498_v62, %s8985_s17  ;;  %4944 = vrot.lane.b32.xlu0 %v9498_v62, %s8986_s18  ;;  %v9592_v37 = vrot.slane %v1194_v59, %v9305_v9  ;;  %v9595_v33 = vrot.slane %v1246_v22, %v9305_v9  ;;  %v9598_v2 = vrot.slane %v1262_v47, %v9305_v9  ;;  %s376_s17 = scalar_lea.vmem %s11715_s9, %s8320_s13 }
 0x1d2   : > { %v9601_v38 = vrot.slane %v1637_v34, %v9284_v28  ;;  %v1210_v25 = vcombine.high %v9463_v23, %v9471_v63  ;;  %v1278_v45 = vcombine.high %v9520_v15, %v1269_v26  ;;  %v9610_v48 = vrot.slane %v1553_v18, %v9284_v28 }
 0x1d3   : > { %v9613_v46 = vrot.slane %v1313_v8, %v9305_v9  ;;  %v9616_v12 = vrot.slane %v1329_v14, %v9305_v9  ;;  %v1381_v6 = vcombine.low %v9413_v39, %v9416_v24  ;;  %v9621_v59 = vrot.slane %v8342_v16, %v9284_v28 }
 0x1d4   : > { %11791 = vst [vmem:[#allocation31_spill] sm:$0xff] %v9601_v38  ;;  %v9624_v22 = vrot.slane %v1569_v53, %v9284_v28  ;;  %v9627_v15 = vrot.slane %v8343_v19, %v9284_v28  ;;  %v1397_v26 = vcombine.low %v9419_v27, %v9422_v30  ;;  %v11793_v47 = vcombine.low %v9463_v23, %v9471_v63 }
 0x1d5   : > { %4960 = vrot.lane.b32.xlu1 %v9498_v62, %s8987_s19  ;;  %4976 = vrot.lane.b32.xlu0 %v9498_v62, %s8988_s20  ;;  %v1279_v18 = vcombine.low %v9595_v33, %v9598_v2  ;;  %v1212_v23 = vcombine.high %v9589_v0, %v9592_v37  ;;  %v1280_v53 = vcombine.high %v9595_v33, %v9598_v2 }
 0x1d6   : > { %v9638_v34 = vpack.c.bf16 %v1277_v1, %v11793_v47  ;;  %v9657_v1 = vrot.slane %v1381_v6, %v9305_v9  ;;  %v1398_v2 = vcombine.high %v9419_v27, %v9422_v30 }
 0x1d7   : > { %v1706_v10 = vpop.permute.xlu0 %1705 }
 0x1d9   : > { %4992 = vrot.lane.b32.xlu1 %v9498_v62, %s8989_s21  ;;  %2875 = vrot.lane.b32.xlu0 %v9109_v42, %s8986_s18  ;;  %v9604_v62 = vrot.slane %v8345_v51, %v9284_v28  ;;  %v1211_v51 = vcombine.low %v9589_v0, %v9592_v37 }
 0x1db   : > { %11792 = vst [vmem:[#allocation32_spill] sm:$0xff] %v9604_v62  ;;  %v1708_v40 = vpop.permute.xlu1 %1707  ;;  %v1722_v42 = vpop.permute.xlu0 %1721  ;;  %v9672_v6 = vpack.c.bf16 %v1279_v18, %v1211_v51  ;;  %v1382_v51 = vcombine.high %v9413_v39, %v9416_v24 }
 0x1dc   : > { %v1785_v8 = vcombine.low %v9543_v36, %v1722_v42  ;;  %v1786_v14 = vcombine.high %v9543_v36, %v1722_v42  ;;  %v9664_v42 = vrot.slane %v1397_v26, %v9305_v9 }
 0x1dd   : > { %2873 = vrot.lane.b32.xlu1 %v9104_v35, %s8986_s18  ;;  %2905 = vrot.lane.b32.xlu0 %v9156_v49, %s8986_s18  ;;  %v1314_v35 = vcombine.high %v9429_v17, %v9432_v21  ;;  %v9648_v49 = vpack.c.bf16 %v1278_v45, %v1210_v25  ;;  %v1330_v17 = vcombine.high %v9448_v31, %v9451_v32 }
 0x1de   : > { %v1800_v32 = vrot.slane %v1786_v14, %v9284_v28  ;;  %v1414_v33 = vcombine.high %v9657_v1, %v9664_v42 }
 0x1df   : > { %v1724_v16 = vpop.permute.xlu1 %1723  ;;  %v1738_v63 = vpop.permute.xlu0 %1737  ;;  %v9675_v31 = vrot.slane %v1314_v35, %v9305_v9 }
 0x1e0   : > { %v1801_v21 = vcombine.low %v1706_v10, %v1738_v63  ;;  %v1802_v36 = vcombine.high %v1706_v10, %v1738_v63  ;;  %v1853_v45 = vcombine.low %v9574_v52, %v1724_v16  ;;  %v1854_v47 = vcombine.high %v9574_v52, %v1724_v16 }
 0x1e1   : > { %2889 = vrot.lane.b32.xlu1 %v9158_v50, %s8986_s18  ;;  %2921 = vrot.lane.b32.xlu0 %v9172_v54, %s8986_s18  ;;  %v1793_v50 = vrot.slane %v1785_v8, %v9284_v28  ;;  %v9684_v54 = vrot.slane %v1330_v17, %v9305_v9 }
 0x1e2   : > { %v1809_v10 = vrot.slane %v1801_v21, %v9284_v28  ;;  %v1816_v26 = vrot.slane %v1802_v36, %v9284_v28  ;;  %v1861_v14 = vrot.slane %v1853_v45, %v9284_v28  ;;  %v1868_v21 = vrot.slane %v1854_v47, %v9284_v28 }
 0x1e3   : > { %v1740_v63 = vpop.permute.xlu1 %1739  ;;  %v9681_v52 = vpop.permute.xlu0 %1693 }
 0x1e4   : > { %v1869_v25 = vcombine.low %v1708_v40, %v1740_v63  ;;  %v1870_v19 = vcombine.high %v1708_v40, %v1740_v63  ;;  %v1817_v18 = vcombine.low %v1793_v50, %v1809_v10  ;;  %v1818_v35 = vcombine.high %v1793_v50, %v1809_v10 }
 0x1e5   : > { %v1833_v8 = vcombine.low %v1800_v32, %v1816_v26  ;;  %v1834_v16 = vcombine.high %v1800_v32, %v1816_v26  ;;  %2877 = vrot.lane.b32.xlu1 %v9116_v43, %s8986_s18  ;;  %2879 = vrot.lane.b32.xlu0 %v9118_v44, %s8986_s18 }
 0x1e6   : > { %v1877_v40 = vrot.slane %v1869_v25, %v9284_v28  ;;  %v1884_v36 = vrot.slane %v1870_v19, %v9284_v28  ;;  %v1825_v39 = vrot.slane %v1817_v18, %v9305_v9  ;;  %v1832_v24 = vrot.slane %v1818_v35, %v9305_v9 }
 0x1e7   : > { %v1841_v17 = vrot.slane %v1833_v8, %v9305_v9  ;;  %v1848_v50 = vrot.slane %v1834_v16, %v9305_v9  ;;  %v9700_v43 = vpop.permute.xlu1 %1695  ;;  %v9702_v25 = vpop.permute.xlu0 %1709 }
 0x1e8   : > { %v1885_v45 = vcombine.low %v1861_v14, %v1877_v40  ;;  %v1886_v32 = vcombine.high %v1861_v14, %v1877_v40  ;;  %v1901_v47 = vcombine.low %v1868_v21, %v1884_v36  ;;  %v1902_v10 = vcombine.high %v1868_v21, %v1884_v36 }
 0x1e9   : > { %v2329_v19 = vcombine.low %v1825_v39, %v1832_v24  ;;  %v8346_v26 = vcombine.high %v1825_v39, %v1832_v24  ;;  %v2345_v63 = vcombine.low %v1841_v17, %v1848_v50  ;;  %v8347_v44 = vcombine.high %v1841_v17, %v1848_v50  ;;  %2893 = vrot.lane.b32.xlu1 %v9180_v56, %s8986_s18 }
 0x1ea   : > { %v1893_v18 = vrot.slane %v1885_v45, %v9305_v9  ;;  %v1900_v35 = vrot.slane %v1886_v32, %v9305_v9  ;;  %v1909_v8 = vrot.slane %v1901_v47, %v9305_v9  ;;  %v1916_v16 = vrot.slane %v1902_v10, %v9305_v9  ;;  %2909 = vrot.lane.b32.xlu0 %v9188_v58, %s8986_s18 }
 0x1eb   : > { %v9712_v14 = vpop.permute.xlu1 %1711  ;;  %v9715_v21 = vrot.slane %v2329_v19, %v9284_v28  ;;  %v9718_v40 = vrot.slane %v8346_v26, %v9284_v28  ;;  %v9721_v56 = vrot.slane %v2345_v63, %v9284_v28  ;;  %v9724_v36 = vrot.slane %v8347_v44, %v9284_v28  ;;  %v1726_v45 = vpop.permute.xlu0 %1725 }
 0x1ec   : > { %v2397_v39 = vcombine.low %v1893_v18, %v1900_v35  ;;  %v8348_v24 = vcombine.high %v1893_v18, %v1900_v35  ;;  %v2413_v17 = vcombine.low %v1909_v8, %v1916_v16  ;;  %v8349_v50 = vcombine.high %v1909_v8, %v1916_v16  ;;  %v11794_v16 = vld [vmem:[#allocation12_spill] sm:$0xff] }
 0x1ed   : > { %2895 = vrot.lane.b32.xlu1 %v9178_v55, %s8986_s18  ;;  %v2361_v58 = vcombine.low %v9715_v21, %v9718_v40  ;;  %v2377_v32 = vcombine.low %v9721_v56, %v9724_v36  ;;  %v9738_v47 = vpack.c.bf16 %v1280_v53, %v1212_v23  ;;  %v1413_v10 = vcombine.low %v9657_v1, %v9664_v42 }
 0x1ee   : > { %2925 = vrot.lane.b32.xlu0 %v9196_v60, %s8986_s18  ;;  %v9745_v55 = vrot.slane %v2397_v39, %v9284_v28  ;;  %v9748_v19 = vrot.slane %v8348_v24, %v9284_v28  ;;  %v9751_v26 = vrot.slane %v2413_v17, %v9284_v28  ;;  %v9754_v0 = vrot.slane %v8349_v50, %v9284_v28 }
 0x1ef   : > { %v9756_v37 = vpop.permute.xlu1 %1727  ;;  %v1449_v23 = vcombine.low %v9523_v5, %v9528_v13  ;;  %v1742_v53 = vpop.permute.xlu0 %1741  ;;  %v9771_v18 = vrot.slane %v1382_v51, %v9305_v9  ;;  %v1465_v1 = vcombine.low %v9531_v3, %v9534_v61  ;;  %v9779_v27 = vrot.slane %v2361_v58, %v9305_v9 }
 0x1f0   : > { %v2429_v63 = vcombine.low %v9745_v55, %v9748_v19  ;;  %v2445_v44 = vcombine.low %v9751_v26, %v9754_v0  ;;  %v1937_v42 = vcombine.low %v9702_v25, %v1742_v53  ;;  %v9782_v30 = vrot.slane %v2377_v32, %v9305_v9 }
 0x1f1   : > { %2911 = vrot.lane.b32.xlu1 %v9186_v57, %s8986_s18  ;;  %v1921_v51 = vcombine.low %v9681_v52, %v1726_v45  ;;  %v1938_v8 = vcombine.high %v9702_v25, %v1742_v53  ;;  %v1922_v24 = vcombine.high %v9681_v52, %v1726_v45  ;;  %v11795_v50 = vcombine.low %v9613_v46, %v9616_v12 }
 0x1f2   : > { %2883 = vrot.lane.b32.xlu0 %v11794_v16, %s8986_s18  ;;  %v9791_v39 = vrot.slane %v2429_v63, %v9305_v9  ;;  %v9794_v57 = vrot.slane %v2445_v44, %v9305_v9  ;;  %v11796_v25 = vcombine.high %v9613_v46, %v9616_v12  ;;  %v9808_v53 = vrot.slane %v1398_v2, %v9305_v9  ;;  %v11797_v12 = vld [vmem:[#allocation17_spill] sm:$0xff] }
 0x1f3   : > { %v1744_v17 = vpop.permute.xlu1 %1743  ;;  %v9800_v58 = vpack.c.bf16 %v1413_v10, %v11795_v50  ;;  %v1945_v63 = vrot.slane %v1937_v42, %v9284_v28  ;;  %v9811_v44 = vpop.permute.xlu0 %1697  ;;  %v9816_v45 = vrot.slane %v1449_v23, %v9305_v9  ;;  %v9819_v10 = vrot.slane %v1465_v1, %v9305_v9  ;;  %v11798_v50 = vld [vmem:[#allocation22_spill] sm:$0xff] }
 0x1f4   : > { %v9805_v32 = vpack.c.bf16 %v1414_v33, %v11796_v25  ;;  %v2461_v52 = vcombine.low %v9791_v39, %v9794_v57  ;;  %v2005_v46 = vcombine.low %v9712_v14, %v1744_v17  ;;  %v2393_v33 = vcombine.low %v9779_v27, %v9782_v30 }
 0x1f5   : > { %2927 = vrot.lane.b32.xlu1 %v11797_v12, %s8986_s18  ;;  %v1517_v2 = vcombine.low %v9539_v11, %v9546_v7  ;;  %v1929_v23 = vrot.slane %v1921_v51, %v9284_v28  ;;  %v1989_v1 = vcombine.low %v9700_v43, %v9756_v37  ;;  %v1952_v16 = vrot.slane %v1938_v8, %v9284_v28 }
 0x1f6   : > { %2913 = vrot.lane.b32.xlu0 %v11798_v50, %s8986_s18  ;;  %v2362_v25 = vcombine.high %v9715_v21, %v9718_v40  ;;  %v1936_v12 = vrot.slane %v1922_v24, %v9284_v28  ;;  %v4073_v60 = vpack.c.bf16 %v2461_v52, %v2393_v33  ;;  %v2378_v42 = vcombine.high %v9721_v56, %v9724_v36  ;;  %v11799_v40 = vld [vmem:[#allocation10_spill] sm:$0xff] }
 0x1f7   : > { %v9839_v35 = vpop.permute.xlu1 %1699  ;;  %v2430_v51 = vcombine.high %v9745_v55, %v9748_v19  ;;  %v1990_v8 = vcombine.high %v9700_v43, %v9756_v37  ;;  %v1953_v38 = vcombine.low %v1929_v23, %v1945_v63  ;;  %v1954_v62 = vcombine.high %v1929_v23, %v1945_v63  ;;  %v9848_v4 = vpop.permute.xlu0 %1713  ;;  %v11800_v37 = vld [vmem:[#allocation24_spill] sm:$0xff] }
 0x1f8   : > { %v2006_v50 = vcombine.high %v9712_v14, %v1744_v17  ;;  %v2013_v21 = vrot.slane %v2005_v46, %v9284_v28  ;;  %v1415_v56 = vcombine.low %v9771_v18, %v9808_v53  ;;  %v1416_v36 = vcombine.high %v9771_v18, %v9808_v53 }
 0x1f9   : > { %2881 = vrot.lane.b32.xlu1 %v11799_v40, %s8986_s18  ;;  %v1450_v43 = vcombine.high %v9523_v5, %v9528_v13  ;;  %v1997_v55 = vrot.slane %v1989_v1, %v9284_v28  ;;  %v1969_v19 = vcombine.low %v1936_v12, %v1952_v16  ;;  %v1970_v14 = vcombine.high %v1936_v12, %v1952_v16  ;;  %v11801_v12 = vld [vmem:[#allocation19_spill] sm:$0xff] }
 0x1fa   : > { %2929 = vrot.lane.b32.xlu0 %v11800_v37, %s8986_s18  ;;  %v9863_v24 = vrot.slane %v2362_v25, %v9305_v9  ;;  %v4094_v17 = vsel %vm4089_vm2, %v4073_v60, 0  ;;  %v9867_v63 = vrot.slane %v2378_v42, %v9305_v9  ;;  %v9870_v18 = vrot.slane %v2430_v51, %v9305_v9 }
 0x1fb   : > { %v2446_v53 = vcombine.high %v9751_v26, %v9754_v0  ;;  %v9874_v52 = vpop.permute.xlu1 %1715  ;;  %v2004_v46 = vrot.slane %v1990_v8, %v9284_v28  ;;  %v1961_v33 = vrot.slane %v1953_v38, %v9305_v9  ;;  %v1968_v23 = vrot.slane %v1954_v62, %v9305_v9  ;;  %8543 = vmatpush3.bf16.xpose.msra.mxu1 %v4094_v17  ;;  %v9880_v60 = vpop.permute.xlu0 %1729  ;;  %v11803_v62 = vld [vmem:[#allocation11_spill] sm:$0xff] }
 0x1fc   : > { %v2020_v1 = vrot.slane %v2006_v50, %v9284_v28  ;;  %v2021_v42 = vcombine.low %v1997_v55, %v2013_v21  ;;  %v2022_v16 = vcombine.high %v1997_v55, %v2013_v21  ;;  %v11802_v26 = vmov 0.0  }
 0x1fd   : > { %v2460_v25 = vrot.slane %v2446_v53, %v9305_v9  ;;  %2897 = vrot.lane.b32.xlu1 %v11801_v12, %s8986_s18  ;;  %8548 = vmatprep.subr.bf16.mxu1 %v11802_v26  ;;  %v1977_v0 = vrot.slane %v1969_v19, %v9305_v9  ;;  %v1984_v38 = vrot.slane %v1970_v14, %v9305_v9  ;;  %v11804_v53 = vld [vmem:[#allocation13_spill] sm:$0xff] }
 0x1fe   : > { %2887 = vrot.lane.b32.xlu0 %v11803_v62, %s8986_s18  ;;  %v2394_v51 = vcombine.high %v9779_v27, %v9782_v30  ;;  %v2462_v8 = vcombine.high %v9791_v39, %v9794_v57  ;;  %v2395_v50 = vcombine.low %v9863_v24, %v9867_v63  ;;  %v1466_v55 = vcombine.high %v9531_v3, %v9534_v61 }
 0x1ff   : > { %v2463_v21 = vcombine.low %v9870_v18, %v2460_v25  ;;  %v9897_v40 = vpop.permute.xlu1 %1731  ;;  %v1518_v19 = vcombine.high %v9539_v11, %v9546_v7  ;;  %v2037_v14 = vcombine.low %v2004_v46, %v2020_v1  ;;  %v9903_v37 = vpop.permute.xlu0 %1745  ;;  %v9908_v39 = vrot.slane %v1517_v2, %v9305_v9 }
 0x200   : > { %v4074_v27 = vpack.c.bf16 %v2462_v8, %v2394_v51  ;;  %v9911_v57 = vrot.slane %v2021_v42, %v9305_v9  ;;  %v9914_v17 = vrot.slane %v2022_v16, %v9305_v9  ;;  %v2038_v3 = vcombine.high %v2004_v46, %v2020_v1  ;;  %v11805_v8 = vld [vmem:[#allocation27_spill] sm:$0xff] }
 0x201   : > { %v4075_v61 = vpack.c.bf16 %v2463_v21, %v2395_v50  ;;  %2885 = vrot.lane.b32.xlu1 %v11804_v53, %s8986_s18  ;;  %v2465_v12 = vcombine.low %v1961_v33, %v1968_v23  ;;  %v8350_v62 = vcombine.high %v1961_v33, %v1968_v23  ;;  %v2481_v51 = vcombine.low %v1977_v0, %v1984_v38 }
 0x202   : > { %2917 = vrot.lane.b32.xlu0 %v11805_v8, %s8986_s18  ;;  %v11806_v2 = vcombine.low %v9551_v29, %v9569_v20  ;;  %v8351_v30 = vcombine.high %v1977_v0, %v1984_v38  ;;  %8545 = vmatmul.mubr.msk.bf16.vlgmr.msra.gmra.mrb[4].mxu1 %vm4089_vm2, %v9638_v34  ;;  %v4141_v46 = vsel %vm4089_vm2, %v4074_v27, 0  ;;  %v2464_v33 = vcombine.high %v9870_v18, %v2460_v25 }
 0x203   : > { %v4188_v16 = vsel %vm4089_vm2, %v4075_v61, 0  ;;  %v9930_v1 = vpop.permute.xlu1 %1747  ;;  %8549 = vmatpush3.bf16.xpose.msra.mxu1 %v4141_v46  ;;  %v9933_v23 = vpop.permute.xlu0 %1701  ;;  %v11807_v50 = vcombine.low %v9675_v31, %v9684_v54  ;;  %v11808_v0 = vcombine.high %v9675_v31, %v9684_v54  ;;  %v2045_v27 = vrot.slane %v2037_v14, %v9305_v9  ;;  %v11809_v61 = vld [vmem:[#allocation26_spill] sm:$0xff]  ;;  %8550 = vmatprep.mubr.msk.bf16.mxu1 %vm8982_vm1, %v11802_v26 }
 0x204   : > { %v9924_v42 = vrot.slane %v11806_v2, %v9305_v9  ;;  %8555 = vmatpush3.bf16.xpose.msra.mxu0 %v4188_v16  ;;  %v2052_v18 = vrot.slane %v2038_v3, %v9305_v9  ;;  %v2533_v25 = vcombine.low %v9911_v57, %v9914_v17  ;;  %v2057_v31 = vcombine.low %v9811_v44, %v9880_v60 }
 0x205   : > { %v9938_v21 = vpack.c.bf16 %v1415_v56, %v11807_v50  ;;  %v9943_v38 = vpack.c.bf16 %v1416_v36, %v11808_v0  ;;  %2901 = vrot.lane.b32.xlu1 %v11809_v61, %s8986_s18  ;;  %v2396_v56 = vcombine.high %v9863_v24, %v9867_v63  ;;  %v2073_v54 = vcombine.low %v9848_v4, %v9903_v37 }
 0x206   : > { %8560 = vmatprep.subr.bf16.mxu1 %v11802_v26  ;;  %v9963_v36 = vrot.slane %v2465_v12, %v9284_v28  ;;  %8566 = vmatprep.subr.bf16.mxu0 %v11802_v26  ;;  %v9969_v24 = vrot.slane %v8350_v62, %v9284_v28  ;;  %v9972_v63 = vrot.slane %v2481_v51, %v9284_v28 }
 0x207   : > { %v9965_v14 = vpop.permute.xlu1 %1703  ;;  %v4076_v3 = vpack.c.bf16 %v2464_v33, %v2396_v56  ;;  %v9975_v53 = vrot.slane %v8351_v30, %v9284_v28  ;;  %v2058_v8 = vcombine.high %v9811_v44, %v9880_v60  ;;  %v2074_v12 = vcombine.high %v9848_v4, %v9903_v37  ;;  %v9981_v2 = vpop.permute.xlu0 %1717  ;;  %v11810_v44 = vld [vmem:[#allocation18_spill] sm:$0xff] }
 0x208   : > { %v9987_v62 = vrot.slane %v1450_v43, %v9305_v9  ;;  %v9990_v51 = vrot.slane %v1466_v55, %v9305_v9  ;;  %v8352_v30 = vcombine.high %v9911_v57, %v9914_v17  ;;  %v2549_v16 = vcombine.low %v2045_v27, %v2052_v18  ;;  %v11813_v43 = vld [vmem:[#allocation14_spill] sm:$0xff] }
 0x209   : > { %v8353_v46 = vcombine.high %v2045_v27, %v2052_v18  ;;  %2903 = vrot.lane.b32.xlu1 %v11810_v44, %s8986_s18  ;;  %v2065_v60 = vrot.slane %v2057_v31, %v9284_v28  ;;  %v2081_v5 = vrot.slane %v2073_v54, %v9284_v28  ;;  %v2141_v13 = vcombine.low %v9874_v52, %v9930_v1  ;;  %v11811_v31 = vld [vmem:[#allocation20_spill] sm:$0xff] }
 0x20a   : > { %8551 = vmatmul.mubr.msk.bf16.vlgmr.msra.gmra.mrb[8].mxu1 %vm4089_vm2, %v9648_v49  ;;  %v4235_v55 = vsel %vm4089_vm2, %v4076_v3, 0  ;;  %v2497_v37 = vcombine.low %v9963_v36, %v9969_v24  ;;  %v2513_v57 = vcombine.low %v9972_v63, %v9975_v53  ;;  %v2540_v17 = vrot.slane %v2533_v25, %v9284_v28 }
 0x20b   : > { %8557 = vmatmul.mubr.msk.bf16.vlgmr.msra.gmra.mrb[4].mxu0 %vm4089_vm2, %v9672_v6  ;;  %v10014_v33 = vpop.permute.xlu1 %1719  ;;  %v2072_v50 = vrot.slane %v2058_v8, %v9284_v28  ;;  %v2125_v6 = vcombine.low %v9839_v35, %v9897_v40  ;;  %v2126_v49 = vcombine.high %v9839_v35, %v9897_v40  ;;  %v2088_v0 = vrot.slane %v2074_v12, %v9284_v28  ;;  %v10022_v27 = vpop.permute.xlu0 %1733 }
 0x20c   : > { %8561 = vmatpush3.bf16.xpose.msra.mxu1 %v4235_v55  ;;  %v2142_v18 = vcombine.high %v9874_v52, %v9930_v1  ;;  %v2548_v25 = vrot.slane %v8352_v30, %v9284_v28  ;;  %v2556_v61 = vrot.slane %v2549_v16, %v9284_v28  ;;  %v2564_v56 = vrot.slane %v8353_v46, %v9284_v28 }
 0x20d   : > { %2919 = vrot.lane.b32.xlu1 %v11811_v31, %s8986_s18  ;;  %v2089_v54 = vcombine.low %v2065_v60, %v2081_v5  ;;  %v2090_v3 = vcombine.high %v2065_v60, %v2081_v5  ;;  %v2149_v35 = vrot.slane %v2141_v13, %v9284_v28  ;;  %8562 = vmatprep.mubr.msk.bf16.mxu1 %vm8982_vm1, %v11802_v26 }
 0x20e   : > { %8568 = vmatprep.mubr.msk.bf16.mxu0 %vm8982_vm1, %v11802_v26  ;;  %v2505_v52 = vrot.slane %v2497_v37, %v9305_v9  ;;  %v2521_v40 = vrot.slane %v2513_v57, %v9305_v9  ;;  %v2565_v1 = vcombine.low %v2540_v17, %v2548_v25  ;;  %v2581_v8 = vcombine.low %v2556_v61, %v2564_v56  ;;  %v11812_v57 = vld [vmem:[#allocation15_spill] sm:$0xff] }
 0x20f   : > { %v10038_v12 = vpop.permute.xlu1 %1735  ;;  %8572 = vmatprep.subr.bf16.mxu1 %v11802_v26  ;;  %v2133_v30 = vrot.slane %v2125_v6, %v9284_v28  ;;  %v2140_v16 = vrot.slane %v2126_v49, %v9284_v28  ;;  %v2105_v46 = vcombine.low %v2072_v50, %v2088_v0  ;;  %v1750_v44 = vpop.permute.xlu0 %1749  ;;  %v10047_v60 = vrot.slane %v1518_v19, %v9305_v9 }
 0x210   : > { %v2106_v5 = vcombine.high %v2072_v50, %v2088_v0  ;;  %v2156_v13 = vrot.slane %v2142_v18, %v9284_v28  ;;  %v2573_v55 = vrot.slane %v2565_v1, %v9305_v9  ;;  %v2589_v37 = vrot.slane %v2581_v8, %v9305_v9 }
 0x211   : > { %2891 = vrot.lane.b32.xlu1 %v11812_v57, %s8986_s18  ;;  %v10055_v6 = vrot.slane %v2089_v54, %v9305_v9  ;;  %v10058_v49 = vrot.slane %v2090_v3, %v9305_v9  ;;  %v2498_v11 = vcombine.high %v9963_v36, %v9969_v24  ;;  %v2514_v7 = vcombine.high %v9972_v63, %v9975_v53 }
 0x212   : > { %v2157_v19 = vcombine.low %v2133_v30, %v2149_v35  ;;  %v2529_v50 = vcombine.low %v2505_v52, %v2521_v40  ;;  %v2597_v0 = vcombine.low %v2573_v55, %v2589_v37  ;;  %v2598_v18 = vcombine.high %v2573_v55, %v2589_v37 }
 0x213   : > { %8563 = vmatmul.mubr.msk.bf16.vlgmr.msra.gmra.mrb[12].mxu1 %vm4089_vm2, %v9738_v47  ;;  %v10066_v31 = vpop.permute.xlu1 %1751  ;;  %v2158_v54 = vcombine.high %v2133_v30, %v2149_v35  ;;  %v2530_v1 = vcombine.high %v2505_v52, %v2521_v40  ;;  %v2566_v8 = vcombine.high %v2540_v17, %v2548_v25  ;;  %v2582_v3 = vcombine.high %v2556_v61, %v2564_v56  ;;  %v10068_v57 = vpop.permute.xlu0 %4890 }
 0x214   : > { %8574 = vmatprep.mubr.msk.bf16.mxu1 %vm8982_vm1, %v11802_v26  ;;  %v2173_v36 = vcombine.low %v2140_v16, %v2156_v13  ;;  %v2174_v24 = vcombine.high %v2140_v16, %v2156_v13  ;;  %v4077_v63 = vpack.c.bf16 %v2597_v0, %v2529_v50  ;;  %v2209_v53 = vcombine.low %v9981_v2, %v1750_v44 }
 0x215   : > { %2907 = vrot.lane.b32.xlu1 %v11813_v43, %s8986_s18  ;;  %v4078_v47 = vpack.c.bf16 %v2598_v18, %v2530_v1  ;;  %v10076_v55 = vrot.slane %v2498_v11, %v9305_v9  ;;  %v10079_v17 = vrot.slane %v2514_v7, %v9305_v9  ;;  %v10082_v25 = vrot.slane %v2566_v8, %v9305_v9 }
 0x216   : > { %v10085_v61 = vrot.slane %v2105_v46, %v9305_v9  ;;  %v10088_v56 = vrot.slane %v2106_v5, %v9305_v9  ;;  %v10091_v35 = vrot.slane %v2157_v19, %v9305_v9  ;;  %v4282_v43 = vsel %vm4089_vm2, %v4077_v63, 0 }
 0x217   : > { %v10094_v52 = vpop.permute.xlu1 %4906  ;;  %8567 = vmatpush3.bf16.xpose.msra.mxu0 %v4282_v43  ;;  %v2193_v40 = vcombine.low %v9933_v23, %v10022_v27  ;;  %v2210_v30 = vcombine.high %v9981_v2, %v1750_v44  ;;  %v4329_v16 = vsel %vm4089_vm2, %v4078_v47, 0  ;;  %v2596_v46 = vrot.slane %v2582_v3, %v9305_v9  ;;  %v10101_v13 = vpop.permute.xlu0 %4922 }
 0x218   : > { %v2172_v5 = vrot.slane %v2158_v54, %v9305_v9  ;;  %v2181_v37 = vrot.slane %v2173_v36, %v9305_v9  ;;  %v2188_v11 = vrot.slane %v2174_v24, %v9305_v9  ;;  %8578 = vmatprep.subr.bf16.mxu0 %v11802_v26  ;;  %8573 = vmatpush3.bf16.xpose.msra.mxu1 %v4329_v16 }
 0x219   : > { %v2194_v7 = vcombine.high %v9933_v23, %v10022_v27  ;;  %v2217_v2 = vrot.slane %v2209_v53, %v9284_v28  ;;  %v2531_v44 = vcombine.low %v10076_v55, %v10079_v17  ;;  %v2599_v19 = vcombine.low %v10082_v25, %v2596_v46  ;;  %8584 = vmatprep.subr.bf16.mxu1 %v11802_v26  ;;  %v11814_v23 = vld [vmem:[#allocation16_spill] sm:$0xff] }
 0x21a   : > { %v2601_v50 = vcombine.low %v10055_v6, %v10058_v49  ;;  %v2261_v0 = vcombine.low %v9965_v14, %v10038_v12  ;;  %v2262_v18 = vcombine.high %v9965_v14, %v10038_v12  ;;  %2923 = vrot.lane.b32.xlu1 %v11814_v23, %s8986_s18  ;;  %v8354_v1 = vcombine.high %v10055_v6, %v10058_v49 }
 0x21b   : > { %v10122_v27 = vpop.permute.xlu1 %4938  ;;  %v2201_v8 = vrot.slane %v2193_v40, %v9284_v28  ;;  %v2224_v3 = vrot.slane %v2210_v30, %v9284_v28  ;;  %v4079_v36 = vpack.c.bf16 %v2599_v19, %v2531_v44  ;;  %v10130_v24 = vpop.permute.xlu0 %4954  ;;  %v2617_v14 = vcombine.low %v10085_v61, %v10088_v56 }
 0x21c   : > { %v8355_v12 = vcombine.high %v10085_v61, %v10088_v56  ;;  %v2669_v63 = vcombine.low %v10091_v35, %v2172_v5  ;;  %v8356_v53 = vcombine.high %v10091_v35, %v2172_v5  ;;  %v2685_v47 = vcombine.low %v2181_v37, %v2188_v11 }
 0x21d   : > { %v2208_v6 = vrot.slane %v2194_v7, %v9284_v28  ;;  %v2225_v49 = vcombine.low %v2201_v8, %v2217_v2  ;;  %v2277_v43 = vcombine.low %v10014_v33, %v10066_v31  ;;  %v8357_v40 = vcombine.high %v2181_v37, %v2188_v11 }
 0x21e   : > { %v10142_v30 = vrot.slane %v2261_v0, %v9284_v28  ;;  %v10145_v16 = vrot.slane %v2262_v18, %v9284_v28  ;;  %8569 = vmatmul.mubr.msk.bf16.vlgmr.msra.gmra.mrb[8].mxu0 %vm4089_vm2, %v9800_v58  ;;  %v4376_v61 = vsel %vm4089_vm2, %v4079_v36, 0  ;;  %v2226_v35 = vcombine.high %v2201_v8, %v2217_v2 }
 0x21f   : > { %v10150_v56 = vpop.permute.xlu1 %4970  ;;  %v2241_v5 = vcombine.low %v2208_v6, %v2224_v3  ;;  %v2242_v7 = vcombine.high %v2208_v6, %v2224_v3  ;;  %8579 = vmatpush3.bf16.xpose.msra.mxu0 %v4376_v61  ;;  %8580 = vmatprep.mubr.msk.bf16.mxu0 %vm8982_vm1, %v11802_v26  ;;  %v10154_v37 = vpop.permute.xlu0 %4986  ;;  %v2278_v11 = vcombine.high %v10014_v33, %v10066_v31  ;;  %v11815_v33 = vld [vmem:[#allocation21_spill] sm:$0xff] }
 0x220   : > { %8575 = vmatmul.mubr.msk.bf16.vlgmr.msra.gmra.mrb[16].mxu1 %vm4089_vm2, %v9805_v32  ;;  %8590 = vmatprep.subr.bf16.mxu0 %v11802_v26  ;;  %v2532_v58 = vcombine.high %v10076_v55, %v10079_v17  ;;  %v2600_v2 = vcombine.high %v10082_v25, %v2596_v46  ;;  %v10165_v44 = vrot.slane %v2225_v49, %v9305_v9 }
 0x221   : > { %v2285_v19 = vrot.slane %v2277_v43, %v9284_v28  ;;  %v2608_v0 = vrot.slane %v2601_v50, %v9284_v28  ;;  %v2616_v18 = vrot.slane %v8354_v1, %v9284_v28  ;;  %2899 = vrot.lane.b32.xlu1 %v11815_v33, %s8986_s18  ;;  %v2624_v31 = vrot.slane %v2617_v14, %v9284_v28 }
 0x222   : > { %v4080_v32 = vpack.c.bf16 %v2600_v2, %v2532_v58  ;;  %v2632_v23 = vrot.slane %v8355_v12, %v9284_v28  ;;  %v2676_v55 = vrot.slane %v2669_v63, %v9284_v28  ;;  %8586 = vmatprep.mubr.msk.bf16.mxu1 %vm8982_vm1, %v11802_v26  ;;  %v2684_v46 = vrot.slane %v8356_v53, %v9284_v28  ;;  %v11816_v53 = vld [vmem:[#allocation23_spill] sm:$0xff] }
 0x223   : > { %v10177_v17 = vpop.permute.xlu1 %4892  ;;  %v2633_v25 = vcombine.low %v2608_v0, %v2616_v18  ;;  %v2692_v50 = vrot.slane %v2685_v47, %v9284_v28  ;;  %v2700_v1 = vrot.slane %v8357_v40, %v9284_v28  ;;  %v10182_v8 = vpop.permute.xlu0 %4908  ;;  %v10185_v3 = vrot.slane %v2226_v35, %v9305_v9 }
 0x224   : > { %v2292_v36 = vrot.slane %v2278_v11, %v9284_v28  ;;  %v4423_v14 = vsel %vm4089_vm2, %v4080_v32, 0  ;;  %v2649_v12 = vcombine.low %v2624_v31, %v2632_v23  ;;  %v2701_v6 = vcombine.low %v2676_v55, %v2684_v46 }
 0x225   : > { %8585 = vmatpush3.bf16.xpose.msra.mxu1 %v4423_v14  ;;  %v2641_v63 = vrot.slane %v2633_v25, %v9305_v9  ;;  %v2717_v49 = vcombine.low %v2692_v50, %v2700_v1  ;;  %2915 = vrot.lane.b32.xlu1 %v11816_v53, %s8986_s18  ;;  %v10193_v47 = vrot.slane %v2241_v5, %v9305_v9 }
 0x226   : > { %v2293_v43 = vcombine.low %v10142_v30, %v2285_v19  ;;  %v2294_v40 = vcombine.high %v10142_v30, %v2285_v19  ;;  %8581 = vmatmul.mubr.msk.bf16.vlgmr.msra.gmra.mrb[12].mxu0 %vm4089_vm2, %v9938_v21  ;;  %v2657_v61 = vrot.slane %v2649_v12, %v9305_v9  ;;  %v2256_v11 = vrot.slane %v2242_v7, %v9305_v9  ;;  %v11819_v12 = vld [vmem:[#allocation25_spill] sm:$0xff] }
 0x227   : > { %v10200_v35 = vpop.permute.xlu1 %4924  ;;  %v2709_v58 = vrot.slane %v2701_v6, %v9305_v9  ;;  %v2725_v2 = vrot.slane %v2717_v49, %v9305_v9  ;;  %8592 = vmatprep.mubr.msk.bf16.mxu0 %vm8982_vm1, %v11802_v26  ;;  %8596 = vmatprep.subr.bf16.mxu1 %v11802_v26  ;;  %v10208_v5 = vpop.permute.xlu0 %4940  ;;  %v2737_v21 = vcombine.low %v10165_v44, %v10185_v3 }
 0x228   : > { %11817 = vst [vmem:[#allocation12_spill] sm:$0xff] %v10200_v35  ;;  %11818 = vst [vmem:[#allocation17_spill] sm:$0xff] %v10208_v5  ;;  %v2309_v30 = vcombine.low %v10145_v16, %v2292_v36  ;;  %v2310_v19 = vcombine.high %v10145_v16, %v2292_v36  ;;  %v2665_v33 = vcombine.low %v2641_v63, %v2657_v61 }
 0x229   : > { %v2733_v7 = vcombine.low %v2709_v58, %v2725_v2  ;;  %v2666_v32 = vcombine.high %v2641_v63, %v2657_v61  ;;  %v2734_v25 = vcombine.high %v2709_v58, %v2725_v2  ;;  %v2634_v14 = vcombine.high %v2608_v0, %v2616_v18  ;;  %2931 = vrot.lane.b32.xlu1 %v11819_v12, %s8986_s18 }
 0x22a   : > { %v2301_v6 = vrot.slane %v2293_v43, %v9305_v9  ;;  %v2308_v49 = vrot.slane %v2294_v40, %v9305_v9  ;;  %v2650_v53 = vcombine.high %v2624_v31, %v2632_v23  ;;  %v2702_v34 = vcombine.high %v2676_v55, %v2684_v46 }
 0x22b   : > { %v10218_v4 = vpop.permute.xlu1 %4956  ;;  %v4081_v54 = vpack.c.bf16 %v2733_v7, %v2665_v33  ;;  %v4082_v5 = vpack.c.bf16 %v2734_v25, %v2666_v32  ;;  %v2648_v16 = vrot.slane %v2634_v14, %v9305_v9  ;;  %v2718_v36 = vcombine.high %v2692_v50, %v2700_v1  ;;  %v10221_v35 = vpop.permute.xlu0 %4972 }
 0x22c   : > { %v2317_v0 = vrot.slane %v2309_v30, %v9305_v9  ;;  %v2324_v18 = vrot.slane %v2310_v19, %v9305_v9  ;;  %8587 = vmatmul.mubr.msk.bf16.vlgmr.msra.gmra.mrb[20].mxu1 %vm4089_vm2, %v9943_v38  ;;  %v2664_v63 = vrot.slane %v2650_v53, %v9305_v9  ;;  %v2716_v31 = vrot.slane %v2702_v34, %v9305_v9 }
 0x22d   : > { %v8358_v23 = vcombine.high %v10165_v44, %v10185_v3  ;;  %v4470_v55 = vsel %vm4089_vm2, %v4081_v54, 0  ;;  %v4517_v46 = vsel %vm4089_vm2, %v4082_v5, 0  ;;  %v2732_v50 = vrot.slane %v2718_v36, %v9305_v9  ;;  %8598 = vmatprep.mubr.msk.bf16.mxu1 %vm8982_vm1, %v11802_v26 }
 0x22e   : > { %v2753_v1 = vcombine.low %v10193_v47, %v2256_v11  ;;  %v8359_v38 = vcombine.high %v10193_v47, %v2256_v11  ;;  %v2805_v43 = vcombine.low %v2301_v6, %v2308_v49  ;;  %8591 = vmatpush3.bf16.xpose.msra.mxu0 %v4470_v55  ;;  %8597 = vmatpush3.bf16.xpose.msra.mxu1 %v4517_v46 }
 0x22f   : > { %v10238_v34 = vpop.permute.xlu1 %4988  ;;  %v8360_v40 = vcombine.high %v2301_v6, %v2308_v49  ;;  %8602 = vmatprep.subr.bf16.mxu0 %v11802_v26  ;;  %v2667_v54 = vcombine.low %v2648_v16, %v2664_v63  ;;  %v2735_v44 = vcombine.low %v2716_v31, %v2732_v50  ;;  %8608 = vmatprep.subr.bf16.mxu1 %v11802_v26  ;;  %v10242_v3 = vpop.permute.xlu0 %4894 }
 0x230   : > { %v2821_v61 = vcombine.low %v2317_v0, %v2324_v18  ;;  %v2668_v58 = vcombine.high %v2648_v16, %v2664_v63  ;;  %v2736_v2 = vcombine.high %v2716_v31, %v2732_v50  ;;  %v2744_v5 = vrot.slane %v2737_v21, %v9284_v28 }
 0x231   : > { %v8361_v47 = vcombine.high %v2317_v0, %v2324_v18  ;;  %v4083_v11 = vpack.c.bf16 %v2735_v44, %v2667_v54  ;;  %v11820_v30 = vcombine.high %v9551_v29, %v9569_v20  ;;  %v2752_v33 = vrot.slane %v8358_v23, %v9284_v28 }
 0x232   : > { %v4084_v7 = vpack.c.bf16 %v2736_v2, %v2668_v58  ;;  %v2760_v32 = vrot.slane %v2753_v1, %v9284_v28  ;;  %v2768_v25 = vrot.slane %v8359_v38, %v9284_v28  ;;  %v2812_v14 = vrot.slane %v2805_v43, %v9284_v28 }
 0x233   : > { %v1548_v19 = vrot.slane %v11820_v30, %v9305_v9  ;;  %v10253_v12 = vpop.permute.xlu1 %4910  ;;  %v11821_v21 = vcombine.low %v9816_v45, %v9819_v10  ;;  %v11822_v6 = vcombine.low %v9908_v39, %v9924_v42  ;;  %v11823_v29 = vcombine.high %v9816_v45, %v9819_v10  ;;  %v10269_v0 = vpop.permute.xlu0 %4926  ;;  %v11827_v30 = vld [vmem:[#allocation31_spill] sm:$0xff] }
 0x234   : > { %v11824_v20 = vcombine.high %v9908_v39, %v9924_v42  ;;  %v2769_v16 = vcombine.low %v2744_v5, %v2752_v33  ;;  %v1585_v36 = vcombine.low %v9610_v48, %v9621_v59  ;;  %v2785_v18 = vcombine.low %v2760_v32, %v2768_v25  ;;  %v11825_v42 = vld [vmem:[#allocation30_spill] sm:$0xff] }
 0x235   : > { %v4065_v49 = vpack.c.bf16 %v11822_v6, %v11821_v21  ;;  %v2820_v63 = vrot.slane %v8360_v40, %v9284_v28  ;;  %v2828_v31 = vrot.slane %v2821_v61, %v9284_v28  ;;  %v1601_v23 = vcombine.low %v9624_v22, %v9627_v15 }
 0x236   : > { %v4066_v53 = vpack.c.bf16 %v11824_v20, %v11823_v29  ;;  %v4564_v45 = vsel %vm4089_vm2, %v4083_v11, 0  ;;  %v1551_v10 = vcombine.low %v10047_v60, %v1548_v19  ;;  %v2836_v39 = vrot.slane %v8361_v47, %v9284_v28  ;;  %v11826_v11 = vld [vmem:[#allocation32_spill] sm:$0xff] }
 0x237   : > { %8593 = vmatmul.mubr.msk.bf16.vlgmr.msra.gmra.mrb[16].mxu0 %vm4089_vm2, %v4065_v49  ;;  %v1653_v55 = vcombine.low %v11825_v42, %v9577_v41  ;;  %v4611_v46 = vsel %vm4089_vm2, %v4084_v7, 0  ;;  %v2777_v50 = vrot.slane %v2769_v16, %v9305_v9  ;;  %v2793_v1 = vrot.slane %v2785_v18, %v9305_v9  ;;  %v10287_v43 = vpop.permute.xlu1 %4942  ;;  %v10294_v61 = vpop.permute.xlu0 %4958 }
 0x238   : > { %8599 = vmatmul.mubr.msk.bf16.vlgmr.msra.gmra.mrb[24].mxu1 %vm4089_vm2, %v4066_v53  ;;  %8603 = vmatpush3.bf16.xpose.msra.mxu0 %v4564_v45  ;;  %v2837_v38 = vcombine.low %v2812_v14, %v2820_v63  ;;  %v1483_v40 = vcombine.low %v9987_v62, %v9990_v51  ;;  %v2853_v54 = vcombine.low %v2828_v31, %v2836_v39 }
 0x239   : > { %8604 = vmatprep.mubr.msk.bf16.mxu0 %vm8982_vm1, %v11802_v26  ;;  %8614 = vmatprep.subr.bf16.mxu0 %v11802_v26  ;;  %v1484_v44 = vcombine.high %v9987_v62, %v9990_v51  ;;  %v1552_v2 = vcombine.high %v10047_v60, %v1548_v19  ;;  %v1593_v47 = vrot.slane %v1585_v36, %v9305_v9 }
 0x23a   : > { %8609 = vmatpush3.bf16.xpose.msra.mxu1 %v4611_v46  ;;  %v2845_v58 = vrot.slane %v2837_v38, %v9305_v9  ;;  %8610 = vmatprep.mubr.msk.bf16.mxu1 %vm8982_vm1, %v11802_v26  ;;  %v1669_v7 = vcombine.low %v11827_v30, %v11826_v11  ;;  %v2861_v21 = vrot.slane %v2853_v54, %v9305_v9 }
 0x23b   : > { %v1609_v6 = vrot.slane %v1601_v23, %v9305_v9  ;;  %8620 = vmatprep.subr.bf16.mxu1 %v11802_v26  ;;  %v2770_v62 = vcombine.high %v2744_v5, %v2752_v33  ;;  %v1586_v51 = vcombine.high %v9610_v48, %v9621_v59  ;;  %v4067_v49 = vpack.c.bf16 %v1551_v10, %v1483_v40  ;;  %v10309_v19 = vpop.permute.xlu1 %4974  ;;  %v10311_v45 = vpop.permute.xlu0 %4990 }
 0x23c   : > { %v2801_v29 = vcombine.low %v2777_v50, %v2793_v1  ;;  %v1661_v20 = vrot.slane %v1653_v55, %v9305_v9  ;;  %v2786_v60 = vcombine.high %v2760_v32, %v2768_v25  ;;  %v2869_v53 = vcombine.low %v2845_v58, %v2861_v21 }
 0x23d   : > { %v2802_v16 = vcombine.high %v2777_v50, %v2793_v1  ;;  %v2870_v36 = vcombine.high %v2845_v58, %v2861_v21  ;;  %v2838_v18 = vcombine.high %v2812_v14, %v2820_v63  ;;  %v4068_v23 = vpack.c.bf16 %v1552_v2, %v1484_v44 }
 0x23e   : > { %v1677_v46 = vrot.slane %v1669_v7, %v9305_v9  ;;  %v2784_v5 = vrot.slane %v2770_v62, %v9305_v9  ;;  %v2854_v33 = vcombine.high %v2828_v31, %v2836_v39  ;;  %v4085_v48 = vpack.c.bf16 %v2869_v53, %v2801_v29 }
 0x23f   : > { %8605 = vmatmul.mubr.msk.bf16.vlgmr.msra.gmra.mrb[20].mxu0 %vm4089_vm2, %v4067_v49  ;;  %v4086_v59 = vpack.c.bf16 %v2870_v36, %v2802_v16  ;;  %v2800_v32 = vrot.slane %v2786_v60, %v9305_v9  ;;  %v2852_v25 = vrot.slane %v2838_v18, %v9305_v9  ;;  %v1617_v14 = vcombine.low %v1593_v47, %v1609_v6  ;;  %v10324_v31 = vpop.permute.xlu1 %4896  ;;  %v10332_v38 = vpop.permute.xlu0 %4912 }
 0x240   : > { %8616 = vmatprep.mubr.msk.bf16.mxu0 %vm8982_vm1, %v11802_v26  ;;  %v2868_v63 = vrot.slane %v2854_v33, %v9305_v9  ;;  %v1602_v10 = vcombine.high %v9624_v22, %v9627_v15  ;;  %v4658_v39 = vsel %vm4089_vm2, %v4085_v48, 0  ;;  %v1618_v50 = vcombine.high %v1593_v47, %v1609_v6 }
 0x241   : > { %8611 = vmatmul.mubr.msk.bf16.vlgmr.msra.gmra.mrb[28].mxu1 %vm4089_vm2, %v4068_v23  ;;  %v4705_v55 = vsel %vm4089_vm2, %v4086_v59, 0  ;;  %v1654_v1 = vcombine.high %v11825_v42, %v9577_v41  ;;  %8615 = vmatpush3.bf16.xpose.msra.mxu0 %v4658_v39  ;;  %v1685_v40 = vcombine.low %v1661_v20, %v1677_v46  ;;  %v1686_v22 = vcombine.high %v1661_v20, %v1677_v46 }
 0x242   : > { %8622 = vmatprep.mubr.msk.bf16.mxu1 %vm8982_vm1, %v11802_v26  ;;  %8621 = vmatpush3.bf16.xpose.msra.mxu1 %v4705_v55  ;;  %v2871_v54 = vcombine.low %v2852_v25, %v2868_v63  ;;  %v2803_v15 = vcombine.low %v2784_v5, %v2800_v32  ;;  %v1670_v44 = vcombine.high %v11827_v30, %v11826_v11 }
 0x243   : > { %8626 = vmatprep.subr.bf16.mxu0 %v11802_v26  ;;  %8632 = vmatprep.subr.bf16.mxu1 %v11802_v26  ;;  %v2872_v58 = vcombine.high %v2852_v25, %v2868_v63  ;;  %v2804_v2 = vcombine.high %v2784_v5, %v2800_v32  ;;  %v10338_v47 = vpop.permute.xlu1 %4928  ;;  %v10340_v42 = vpop.permute.xlu0 %4944  ;;  %v1600_v7 = vrot.slane %v1586_v51, %v9305_v9 }
 0x244   : > { %v4087_v41 = vpack.c.bf16 %v2871_v54, %v2803_v15  ;;  %11828 = vst [vmem:[#allocation22_spill] sm:$0xff] %v10340_v42  ;;  %v1616_v21 = vrot.slane %v1602_v10, %v9305_v9  ;;  %v4069_v62 = vpack.c.bf16 %v1685_v40, %v1617_v14  ;;  %v4070_v49 = vpack.c.bf16 %v1686_v22, %v1618_v50 }
 0x245   : > { %v4088_v6 = vpack.c.bf16 %v2872_v58, %v2804_v2  ;;  %v1668_v29 = vrot.slane %v1654_v1, %v9305_v9  ;;  %v1684_v11 = vrot.slane %v1670_v44, %v9305_v9 }
 0x246   : > { %v4752_v20 = vsel %vm4089_vm2, %v4087_v41, 0  ;;  %v1619_v53 = vcombine.low %v1600_v7, %v1616_v21  ;;  %v1620_v36 = vcombine.high %v1600_v7, %v1616_v21 }
 0x247   : > { %v10346_v30 = vpop.permute.xlu1 %4960  ;;  %v10351_v60 = vpop.permute.xlu0 %4976  ;;  %v4799_v51 = vsel %vm4089_vm2, %v4088_v6, 0  ;;  %v1687_v16 = vcombine.low %v1668_v29, %v1684_v11  ;;  %v1688_v18 = vcombine.high %v1668_v29, %v1684_v11 }
 0x248   : > { %11829 = vst [vmem:[#allocation10_spill] sm:$0xff] %v10346_v30  ;;  %8617 = vmatmul.mubr.msk.bf16.vlgmr.msra.gmra.mrb[24].mxu0 %vm4089_vm2, %v4069_v62  ;;  %11830 = vst [vmem:[#allocation24_spill] sm:$0xff] %v10351_v60 }
 0x249   : > { %8623 = vmatmul.mubr.msk.bf16.vlgmr.msra.gmra.mrb[32].mxu1 %vm4089_vm2, %v4070_v49  ;;  %8627 = vmatpush3.bf16.xpose.msra.mxu0 %v4752_v20  ;;  %v4071_v5 = vpack.c.bf16 %v1687_v16, %v1619_v53  ;;  %v4072_v33 = vpack.c.bf16 %v1688_v18, %v1620_v36 }
 0x24a   : > { %8628 = vmatprep.mubr.msk.bf16.mxu0 %vm8982_vm1, %v11802_v26  ;;  %8633 = vmatpush3.bf16.xpose.msra.mxu1 %v4799_v51 }
 0x24b   : > { %8634 = vmatprep.mubr.msk.bf16.mxu1 %vm8982_vm1, %v11802_v26  ;;  %v10358_v23 = vpop.permute.xlu1 %4992  ;;  %8638 = vmatprep.subr.bf16.mxu0 %v11802_v26  ;;  %v10362_v46 = vpop.permute.xlu0 %2875 }
 0x24c   : > { %11831 = vst [vmem:[#allocation19_spill] sm:$0xff] %v10358_v23  ;;  %8644 = vmatprep.subr.bf16.mxu1 %v11802_v26 }
 0x24f   : > { %v2874_v48 = vpop.permute.xlu1 %2873  ;;  %v2906_v59 = vpop.permute.xlu0 %2905 }
 0x250   : > { %8629 = vmatmul.mubr.msk.bf16.vlgmr.msra.gmra.mrb[28].mxu0 %vm4089_vm2, %v4071_v5  ;;  %v2969_v54 = vcombine.low %v2874_v48, %v2906_v59  ;;  %v2970_v15 = vcombine.high %v2874_v48, %v2906_v59 }
 0x251   : > { %8635 = vmatmul.mubr.msk.bf16.vlgmr.msra.gmra.mrb[36].mxu1 %vm4089_vm2, %v4072_v33  ;;  %8640 = vmatprep.mubr.msk.bf16.mxu0 %vm8982_vm1, %v11802_v26 }
 0x252   : > { %8646 = vmatprep.mubr.msk.bf16.mxu1 %vm8982_vm1, %v11802_v26  ;;  %v2977_v21 = vrot.slane %v2969_v54, %v9284_v28  ;;  %v2984_v49 = vrot.slane %v2970_v15, %v9284_v28 }
 0x253   : > { %v2890_v32 = vpop.permute.xlu1 %2889  ;;  %v2922_v25 = vpop.permute.xlu0 %2921 }
 0x254   : > { %v2985_v1 = vcombine.low %v2890_v32, %v2922_v25  ;;  %v2986_v44 = vcombine.high %v2890_v32, %v2922_v25 }
 0x256   : > { %v2993_v41 = vrot.slane %v2985_v1, %v9284_v28  ;;  %v3000_v29 = vrot.slane %v2986_v44, %v9284_v28 }
 0x257   : > { %v2878_v14 = vpop.permute.xlu1 %2877  ;;  %v2880_v63 = vpop.permute.xlu0 %2879 }
 0x258   : > { %v3001_v5 = vcombine.low %v2977_v21, %v2993_v41  ;;  %v3002_v33 = vcombine.high %v2977_v21, %v2993_v41 }
 0x25b   : > { %v2894_v10 = vpop.permute.xlu1 %2893 }
 0x25c   : > { %v2910_v39 = vpop.permute.xlu0 %2909 }
 0x25d   : > { %v3105_v48 = vcombine.low %v2878_v14, %v2910_v39  ;;  %v3106_v59 = vcombine.high %v2878_v14, %v2910_v39  ;;  %v3017_v39 = vcombine.low %v2984_v49, %v3000_v29 }
 0x25f   : > { %v2896_v55 = vpop.permute.xlu1 %2895  ;;  %v3113_v41 = vrot.slane %v3105_v48, %v9284_v28 }
 0x260   : > { %v2926_v50 = vpop.permute.xlu0 %2925 }
 0x261   : > { %v3121_v11 = vcombine.low %v2894_v10, %v2926_v50  ;;  %v3122_v20 = vcombine.high %v2894_v10, %v2926_v50 }
 0x263   : > { %v2912_v40 = vpop.permute.xlu1 %2911  ;;  %v3129_v10 = vrot.slane %v3121_v11, %v9284_v28  ;;  %v3136_v50 = vrot.slane %v3122_v20, %v9284_v28 }
 0x264   : > { %v10370_v22 = vpop.permute.xlu0 %2883  ;;  %v3173_v58 = vcombine.low %v2880_v63, %v2912_v40  ;;  %v3174_v2 = vcombine.high %v2880_v63, %v2912_v40 }
 0x266   : > { %v3181_v51 = vrot.slane %v3173_v58, %v9284_v28  ;;  %v3188_v53 = vrot.slane %v3174_v2, %v9284_v28  ;;  %v3018_v2 = vcombine.high %v2984_v49, %v3000_v29  ;;  %v3137_v29 = vcombine.low %v3113_v41, %v3129_v10 }
 0x267   : > { %v2928_v7 = vpop.permute.xlu1 %2927 }
 0x268   : > { %v3189_v6 = vcombine.low %v2896_v55, %v2928_v7  ;;  %v3190_v62 = vcombine.high %v2896_v55, %v2928_v7  ;;  %v2914_v18 = vpop.permute.xlu0 %2913  ;;  %v3120_v7 = vrot.slane %v3106_v59, %v9284_v28 }
 0x26a   : > { %v3197_v16 = vrot.slane %v3189_v6, %v9284_v28  ;;  %v3204_v36 = vrot.slane %v3190_v62, %v9284_v28 }
 0x26b   : > { %v2882_v32 = vpop.permute.xlu1 %2881 }
 0x26c   : > { %v3205_v25 = vcombine.low %v3181_v51, %v3197_v16  ;;  %v3206_v63 = vcombine.high %v3181_v51, %v3197_v16  ;;  %v3221_v55 = vcombine.low %v3188_v53, %v3204_v36  ;;  %v3222_v1 = vcombine.high %v3188_v53, %v3204_v36  ;;  %v2930_v51 = vpop.permute.xlu0 %2929 }
 0x26d   : > { %v3241_v40 = vcombine.low %v2882_v32, %v2914_v18  ;;  %v3242_v54 = vcombine.high %v2882_v32, %v2914_v18  ;;  %v3138_v16 = vcombine.high %v3113_v41, %v3129_v10  ;;  %v3153_v36 = vcombine.low %v3120_v7, %v3136_v50 }
 0x26e   : > { %v10383_v15 = vrot.slane %v3205_v25, %v9305_v9  ;;  %v10386_v44 = vrot.slane %v3206_v63, %v9305_v9  ;;  %v10389_v58 = vrot.slane %v3221_v55, %v9305_v9  ;;  %v10392_v14 = vrot.slane %v3222_v1, %v9305_v9 }
 0x26f   : > { %v2898_v21 = vpop.permute.xlu1 %2897  ;;  %v3154_v18 = vcombine.high %v3120_v7, %v3136_v50  ;;  %v3249_v48 = vrot.slane %v3241_v40, %v9284_v28  ;;  %v3256_v59 = vrot.slane %v3242_v54, %v9284_v28  ;;  %v3009_v55 = vrot.slane %v3001_v5, %v9305_v9 }
 0x270   : > { %v3717_v6 = vcombine.low %v10383_v15, %v10386_v44  ;;  %v8368_v62 = vcombine.high %v10383_v15, %v10386_v44  ;;  %v3733_v11 = vcombine.low %v10389_v58, %v10392_v14  ;;  %v8369_v20 = vcombine.high %v10389_v58, %v10392_v14 }
 0x271   : > { %v3257_v53 = vcombine.low %v2898_v21, %v2930_v51  ;;  %v3258_v49 = vcombine.high %v2898_v21, %v2930_v51  ;;  %v3016_v1 = vrot.slane %v3002_v33, %v9305_v9  ;;  %v3025_v15 = vrot.slane %v3017_v39, %v9305_v9 }
 0x272   : > { %v3032_v10 = vrot.slane %v3018_v2, %v9305_v9  ;;  %v3145_v54 = vrot.slane %v3137_v29, %v9305_v9  ;;  %v3152_v14 = vrot.slane %v3138_v16, %v9305_v9  ;;  %v3161_v41 = vrot.slane %v3153_v36, %v9305_v9 }
 0x273   : > { %v3265_v32 = vrot.slane %v3257_v53, %v9284_v28  ;;  %v3272_v25 = vrot.slane %v3258_v49, %v9284_v28  ;;  %v10408_v63 = vpop.permute.xlu1 %2885  ;;  %v3168_v7 = vrot.slane %v3154_v18, %v9305_v9  ;;  %v3513_v51 = vcombine.low %v3009_v55, %v3016_v1 }
 0x274   : > { %11832 = vst [vmem:[#allocation11_spill] sm:$0xff] %v10408_v63  ;;  %v8362_v53 = vcombine.high %v3009_v55, %v3016_v1  ;;  %v8363_v36 = vcombine.high %v3025_v15, %v3032_v10  ;;  %v8366_v18 = vcombine.high %v3145_v54, %v3152_v14 }
 0x275   : > { %v3273_v44 = vcombine.low %v3249_v48, %v3265_v32  ;;  %v3274_v50 = vcombine.high %v3249_v48, %v3265_v32  ;;  %v3289_v58 = vcombine.low %v3256_v59, %v3272_v25  ;;  %v3290_v40 = vcombine.high %v3256_v59, %v3272_v25 }
 0x276   : > { %v3529_v59 = vcombine.low %v3025_v15, %v3032_v10  ;;  %v3649_v32 = vcombine.low %v3145_v54, %v3152_v14  ;;  %v3665_v25 = vcombine.low %v3161_v41, %v3168_v7  ;;  %v3544_v55 = vrot.slane %v8363_v36, %v9284_v28 }
 0x277   : > { %v3281_v5 = vrot.slane %v3273_v44, %v9305_v9  ;;  %v3288_v33 = vrot.slane %v3274_v50, %v9305_v9  ;;  %v3297_v39 = vrot.slane %v3289_v58, %v9305_v9  ;;  %v3304_v2 = vrot.slane %v3290_v40, %v9305_v9  ;;  %v10422_v21 = vpop.permute.xlu1 %2901 }
 0x278   : > { %11833 = vst [vmem:[#allocation13_spill] sm:$0xff] %v10422_v21  ;;  %v8367_v44 = vcombine.high %v3161_v41, %v3168_v7  ;;  %v3520_v50 = vrot.slane %v3513_v51, %v9284_v28  ;;  %v3528_v58 = vrot.slane %v8362_v53, %v9284_v28  ;;  %v3536_v40 = vrot.slane %v3529_v59, %v9284_v28  ;;  %v10436_v41 = vpop.permute.xlu0 %2887 }
 0x279   : > { %v3785_v49 = vcombine.low %v3281_v5, %v3288_v33  ;;  %v8370_v29 = vcombine.high %v3281_v5, %v3288_v33  ;;  %v3801_v48 = vcombine.low %v3297_v39, %v3304_v2  ;;  %v8371_v16 = vcombine.high %v3297_v39, %v3304_v2  ;;  %11835 = vst [vmem:[#allocation26_spill] sm:$0xff] %v10436_v41 }
 0x27a   : > { %v3656_v1 = vrot.slane %v3649_v32, %v9284_v28  ;;  %v3664_v5 = vrot.slane %v8366_v18, %v9284_v28  ;;  %v3672_v15 = vrot.slane %v3665_v25, %v9284_v28  ;;  %v3680_v10 = vrot.slane %v8367_v44, %v9284_v28 }
 0x27b   : > { %v10424_v63 = vpop.permute.xlu1 %2903  ;;  %v3724_v54 = vrot.slane %v3717_v6, %v9284_v28  ;;  %v3732_v14 = vrot.slane %v8368_v62, %v9284_v28  ;;  %v3740_v33 = vrot.slane %v3733_v11, %v9284_v28  ;;  %v3748_v39 = vrot.slane %v8369_v20, %v9284_v28 }
 0x27c   : > { %11834 = vst [vmem:[#allocation27_spill] sm:$0xff] %v10424_v63  ;;  %v3546_v59 = vcombine.high %v3520_v50, %v3528_v58  ;;  %v3562_v36 = vcombine.high %v3536_v40, %v3544_v55  ;;  %v3681_v6 = vcombine.low %v3656_v1, %v3664_v5  ;;  %v3697_v32 = vcombine.low %v3672_v15, %v3680_v10 }
 0x27d   : > { %v3749_v62 = vcombine.low %v3724_v54, %v3732_v14  ;;  %v3765_v18 = vcombine.low %v3740_v33, %v3748_v39  ;;  %v3545_v25 = vcombine.low %v3520_v50, %v3528_v58  ;;  %v3561_v44 = vcombine.low %v3536_v40, %v3544_v55 }
 0x27e   : > { %v10447_v11 = vrot.slane %v3546_v59, %v9305_v9  ;;  %v10450_v20 = vrot.slane %v3562_v36, %v9305_v9  ;;  %v3689_v2 = vrot.slane %v3681_v6, %v9305_v9  ;;  %v3705_v51 = vrot.slane %v3697_v32, %v9305_v9 }
 0x27f   : > { %v10438_v7 = vpop.permute.xlu1 %2919  ;;  %v3773_v41 = vrot.slane %v3765_v18, %v9305_v9  ;;  %v3682_v21 = vcombine.high %v3656_v1, %v3664_v5  ;;  %v3698_v23 = vcombine.high %v3672_v15, %v3680_v10  ;;  %v10457_v50 = vrot.slane %v3545_v25, %v9305_v9 }
 0x280   : > { %11836 = vst [vmem:[#allocation18_spill] sm:$0xff] %v10438_v7  ;;  %v3757_v7 = vrot.slane %v3749_v62, %v9305_v9  ;;  %v10460_v58 = vrot.slane %v3561_v44, %v9305_v9  ;;  %v3792_v40 = vrot.slane %v3785_v49, %v9284_v28  ;;  %v3800_v55 = vrot.slane %v8370_v29, %v9284_v28 }
 0x281   : > { %v3808_v6 = vrot.slane %v3801_v48, %v9284_v28  ;;  %v3816_v32 = vrot.slane %v8371_v16, %v9284_v28  ;;  %v3713_v10 = vcombine.low %v3689_v2, %v3705_v51  ;;  %v3696_v49 = vrot.slane %v3682_v21, %v9305_v9 }
 0x282   : > { %v3781_v62 = vcombine.low %v3757_v7, %v3773_v41  ;;  %v3712_v29 = vrot.slane %v3698_v23, %v9305_v9  ;;  %v3817_v23 = vcombine.low %v3792_v40, %v3800_v55 }
 0x283   : > { %v2892_v53 = vpop.permute.xlu1 %2891  ;;  %v3833_v42 = vcombine.low %v3808_v6, %v3816_v32 }
 0x284   : > { %v10476_v44 = vpack.c.bf16 %v3781_v62, %v3713_v10  ;;  %v3715_v1 = vcombine.low %v3696_v49, %v3712_v29 }
 0x285   : > { %v10486_v10 = vrot.slane %v3833_v42, %v9305_v9 }
 0x287   : > { %v2908_v63 = vpop.permute.xlu1 %2907 }
 0x288   : > { %v3037_v59 = vcombine.low %v10362_v46, %v2908_v63  ;;  %v3038_v36 = vcombine.high %v10362_v46, %v2908_v63  ;;  %v3750_v46 = vcombine.high %v3724_v54, %v3732_v14  ;;  %v3766_v63 = vcombine.high %v3740_v33, %v3748_v39 }
 0x289   : > { %v3782_v54 = vcombine.high %v3757_v7, %v3773_v41 }
 0x28a   : > { %v3045_v48 = vrot.slane %v3037_v59, %v9284_v28  ;;  %v3052_v16 = vrot.slane %v3038_v36, %v9284_v28  ;;  %v3764_v30 = vrot.slane %v3750_v46, %v9305_v9  ;;  %v3780_v21 = vrot.slane %v3766_v63, %v9305_v9 }
 0x28c   : > { %v2924_v15 = vpop.permute.xlu1 %2923  ;;  %v3783_v36 = vcombine.low %v3764_v30, %v3780_v21  ;;  %v3784_v46 = vcombine.high %v3764_v30, %v3780_v21 }
 0x28d   : > { %v3053_v18 = vcombine.low %v2892_v53, %v2924_v15  ;;  %v3054_v25 = vcombine.high %v2892_v53, %v2924_v15  ;;  %v3714_v53 = vcombine.high %v3689_v2, %v3705_v51  ;;  %v10483_v15 = vrot.slane %v3817_v23, %v9305_v9 }
 0x28e   : > { %v10494_v51 = vpack.c.bf16 %v3783_v36, %v3715_v1 }
 0x28f   : > { %v3061_v5 = vrot.slane %v3053_v18, %v9284_v28  ;;  %v3068_v60 = vrot.slane %v3054_v25, %v9284_v28  ;;  %v10488_v62 = vpack.c.bf16 %v3782_v54, %v3714_v53  ;;  %v3818_v53 = vcombine.high %v3792_v40, %v3800_v55 }
 0x290   : > { %v3834_v54 = vcombine.high %v3808_v6, %v3816_v32 }
 0x291   : > { %v3069_v14 = vcombine.low %v3045_v48, %v3061_v5  ;;  %v3070_v33 = vcombine.high %v3045_v48, %v3061_v5  ;;  %v3085_v39 = vcombine.low %v3052_v16, %v3068_v60  ;;  %v3086_v59 = vcombine.high %v3052_v16, %v3068_v60  ;;  %11837 = vst [vmem:[#allocation20_spill] sm:$0xff] %v10488_v62 }
 0x292   : > { %v3849_v60 = vcombine.low %v10483_v15, %v10486_v10  ;;  %v3716_v5 = vcombine.high %v3696_v49, %v3712_v29  ;;  %v10512_v40 = vrot.slane %v3834_v54, %v9305_v9 }
 0x293   : > { %v3077_v18 = vrot.slane %v3069_v14, %v9305_v9  ;;  %v3084_v25 = vrot.slane %v3070_v33, %v9305_v9  ;;  %v3093_v2 = vrot.slane %v3085_v39, %v9305_v9  ;;  %v3100_v41 = vrot.slane %v3086_v59, %v9305_v9  ;;  %v2900_v7 = vpop.permute.xlu1 %2899 }
 0x294   : > { %v10498_v23 = vpack.c.bf16 %v3784_v46, %v3716_v5  ;;  %v3850_v14 = vcombine.high %v10483_v15, %v10486_v10  ;;  %v10509_v59 = vrot.slane %v3818_v53, %v9305_v9  ;;  %v4914_v15 = vrot.slane %v10094_v52, 4 }
 0x295   : > { %v3581_v42 = vcombine.low %v3077_v18, %v3084_v25  ;;  %v8364_v63 = vcombine.high %v3077_v18, %v3084_v25  ;;  %v3597_v48 = vcombine.low %v3093_v2, %v3100_v41  ;;  %v8365_v16 = vcombine.high %v3093_v2, %v3100_v41 }
 0x296   : > { %11838 = vst [vmem:[#allocation15_spill] sm:$0xff] %v10498_v23  ;;  %v3851_v18 = vcombine.low %v10509_v59, %v10512_v40  ;;  %v3852_v25 = vcombine.high %v10509_v59, %v10512_v40  ;;  %v4930_v10 = vrot.slane %v10101_v13, 4 }
 0x297   : > { %v3588_v33 = vrot.slane %v3581_v42, %v9284_v28  ;;  %v3596_v1 = vrot.slane %v8364_v63, %v9284_v28  ;;  %v3604_v39 = vrot.slane %v3597_v48, %v9284_v28  ;;  %v3612_v49 = vrot.slane %v8365_v16, %v9284_v28  ;;  %v2916_v30 = vpop.permute.xlu1 %2915 }
 0x298   : > { %v3309_v29 = vcombine.low %v10370_v22, %v2916_v30  ;;  %v3310_v21 = vcombine.high %v10370_v22, %v2916_v30  ;;  %v3577_v48 = vcombine.low %v10457_v50, %v10460_v58  ;;  %v3578_v16 = vcombine.high %v10457_v50, %v10460_v58 }
 0x299   : > { %v3613_v55 = vcombine.low %v3588_v33, %v3596_v1  ;;  %v3629_v6 = vcombine.low %v3604_v39, %v3612_v49  ;;  %v3614_v32 = vcombine.high %v3588_v33, %v3596_v1  ;;  %v3630_v36 = vcombine.high %v3604_v39, %v3612_v49 }
 0x29a   : > { %v3317_v39 = vrot.slane %v3309_v29, %v9284_v28  ;;  %v3324_v49 = vrot.slane %v3310_v21, %v9284_v28  ;;  %v11840_v50 = vcombine.high %v10447_v11, %v10450_v20 }
 0x29b   : > { %v2932_v2 = vpop.permute.xlu1 %2931  ;;  %v3621_v41 = vrot.slane %v3613_v55, %v9305_v9  ;;  %v3637_v22 = vrot.slane %v3629_v6, %v9305_v9  ;;  %v3628_v5 = vrot.slane %v3614_v32, %v9305_v9  ;;  %v3644_v46 = vrot.slane %v3630_v36, %v9305_v9 }
 0x29c   : > { %v3325_v42 = vcombine.low %v2900_v7, %v2932_v2  ;;  %v3326_v63 = vcombine.high %v2900_v7, %v2932_v2  ;;  %v11839_v55 = vcombine.low %v10447_v11, %v10450_v20 }
 0x29d   : > { %v3645_v53 = vcombine.low %v3621_v41, %v3637_v22  ;;  %v3646_v54 = vcombine.high %v3621_v41, %v3637_v22  ;;  %v3647_v33 = vcombine.low %v3628_v5, %v3644_v46  ;;  %v3648_v1 = vcombine.high %v3628_v5, %v3644_v46 }
 0x29e   : > { %v3333_v30 = vrot.slane %v3325_v42, %v9284_v28  ;;  %v3340_v59 = vrot.slane %v3326_v63, %v9284_v28 }
 0x29f   : > { %v6103_v40 = vpack.c.bf16 %v3645_v53, %v3577_v48  ;;  %v6104_v7 = vpack.c.bf16 %v3646_v54, %v3578_v16  ;;  %v10533_v6 = vpack.c.bf16 %v3647_v33, %v11839_v55  ;;  %v10538_v58 = vpack.c.bf16 %v3648_v1, %v11840_v50 }
 0x2a0   : > { %v3341_v32 = vcombine.low %v3317_v39, %v3333_v30  ;;  %v3342_v29 = vcombine.high %v3317_v39, %v3333_v30  ;;  %v3357_v36 = vcombine.low %v3324_v49, %v3340_v59  ;;  %v3358_v21 = vcombine.high %v3324_v49, %v3340_v59 }
 0x2a1   : > { %8639 = vmatpush3.bf16.msra.mxu0 %v6103_v40  ;;  %8645 = vmatpush3.bf16.msra.mxu1 %v6104_v7 }
 0x2a2   : > { %v3349_v2 = vrot.slane %v3341_v32, %v9305_v9  ;;  %v3356_v41 = vrot.slane %v3342_v29, %v9305_v9  ;;  %v3365_v22 = vrot.slane %v3357_v36, %v9305_v9  ;;  %v3372_v5 = vrot.slane %v3358_v21, %v9305_v9  ;;  %8650 = vmatprep.subr.bf16.mxu0 %v11802_v26 }
 0x2a3   : > { %8656 = vmatprep.subr.bf16.mxu1 %v11802_v26 }
 0x2a4   : > { %v3853_v11 = vcombine.low %v3349_v2, %v3356_v41  ;;  %v8372_v20 = vcombine.high %v3349_v2, %v3356_v41  ;;  %v3869_v46 = vcombine.low %v3365_v22, %v3372_v5  ;;  %v8373_v42 = vcombine.high %v3365_v22, %v3372_v5  ;;  %v8965_v41 = vld [vmem:[%s9264_s15] sm:$0xff] }
 0x2a5   : > { %v5030_v22 = vcombine.low %v8965_v41, %v10094_v52  ;;  %v5038_v5 = vcombine.low %v10068_v57, %v10101_v13 }
 0x2a6   : > { %v3860_v63 = vrot.slane %v3853_v11, %v9284_v28  ;;  %v3868_v48 = vrot.slane %v8372_v20, %v9284_v28  ;;  %v3876_v16 = vrot.slane %v3869_v46, %v9284_v28  ;;  %v3884_v53 = vrot.slane %v8373_v42, %v9284_v28 }
 0x2a7   : > { %v5064_v11 = vcombine.low %v10122_v27, %v10150_v56  ;;  %v4882_v20 = vrot.slane %v8965_v41, 4 }
 0x2a8   : > { %v3885_v54 = vcombine.low %v3860_v63, %v3868_v48  ;;  %v3901_v33 = vcombine.low %v3876_v16, %v3884_v53  ;;  %v3886_v1 = vcombine.high %v3860_v63, %v3868_v48  ;;  %v3902_v39 = vcombine.high %v3876_v16, %v3884_v53 }
 0x2a9   : > { %v5071_v46 = vrot.slane %v5064_v11, %v9284_v28  ;;  %v4946_v63 = vrot.slane %v10122_v27, 4  ;;  %v4962_v48 = vrot.slane %v10130_v24, 4  ;;  %v4978_v16 = vrot.slane %v10150_v56, 4 }
 0x2aa   : > { %v3893_v49 = vrot.slane %v3885_v54, %v9305_v9  ;;  %v3909_v30 = vrot.slane %v3901_v33, %v9305_v9  ;;  %v3900_v59 = vrot.slane %v3886_v1, %v9305_v9  ;;  %v3916_v40 = vrot.slane %v3902_v39, %v9305_v9 }
 0x2ab   : > { %v5098_v54 = vcombine.low %v4882_v20, %v4914_v15  ;;  %v5132_v33 = vcombine.low %v4946_v63, %v4978_v16  ;;  %v4899_v63 = vrot.slane %v10177_v17, 4 }
 0x2ac   : > { %v3917_v7 = vcombine.low %v3893_v49, %v3909_v30  ;;  %v3919_v55 = vcombine.low %v3900_v59, %v3916_v40  ;;  %v3918_v50 = vcombine.high %v3893_v49, %v3909_v30  ;;  %v3920_v32 = vcombine.high %v3900_v59, %v3916_v40 }
 0x2ad   : > { %v5105_v30 = vrot.slane %v5098_v54, %v9284_v28  ;;  %v11845_v54 = vld [vmem:[#allocation17_spill] sm:$0xff] }
 0x2ae   : > { %v10557_v29 = vpack.c.bf16 %v3917_v7, %v3849_v60  ;;  %v10559_v36 = vpack.c.bf16 %v3919_v55, %v3851_v18  ;;  %v10564_v21 = vpack.c.bf16 %v3918_v50, %v3850_v14  ;;  %v10566_v2 = vpack.c.bf16 %v3920_v32, %v3852_v25 }
 0x2af   : > { %v5072_v60 = vcombine.low %v10130_v24, %v10154_v37  ;;  %v4898_v18 = vrot.slane %v10068_v57, 4  ;;  %v5037_v14 = vrot.slane %v5030_v22, %v9284_v28  ;;  %v5045_v25 = vrot.slane %v5038_v5, %v9284_v28 }
 0x2b0   : > { %11841 = vst [vmem:[#allocation14_spill] sm:$0xff] %v10559_v36  ;;  %11842 = vst [vmem:[#allocation16_spill] sm:$0xff] %v10564_v21  ;;  %v4994_v57 = vrot.slane %v10154_v37, 4  ;;  %v5139_v24 = vrot.slane %v5132_v33, %v9284_v28 }
 0x2b1   : > { %11843 = vst [vmem:[#allocation21_spill] sm:$0xff] %v10566_v2  ;;  %v5079_v42 = vrot.slane %v5072_v60, %v9284_v28  ;;  %v5046_v53 = vcombine.low %v5037_v14, %v5045_v25  ;;  %v5106_v13 = vcombine.low %v4898_v18, %v4930_v10  ;;  %v5047_v37 = vcombine.high %v5037_v14, %v5045_v25  ;;  %v8966_v14 = vld [vmem:[%s9264_s15 + $0x8] sm:$0xff] }
 0x2b2   : > { %v5140_v1 = vcombine.low %v4962_v48, %v4994_v57  ;;  %v4883_v25 = vrot.slane %v8966_v14, 4  ;;  %v4915_v48 = vrot.slane %v10182_v8, 4  ;;  %v5208_v2 = vcombine.low %v10218_v4, %v10238_v34 }
 0x2b3   : > { %v5080_v52 = vcombine.low %v5071_v46, %v5079_v42  ;;  %v5054_v39 = vrot.slane %v5046_v53, %v9305_v9  ;;  %v5113_v27 = vrot.slane %v5106_v13, %v9284_v28  ;;  %v5081_v40 = vcombine.high %v5071_v46, %v5079_v42  ;;  %v11844_v53 = vld [vmem:[#allocation12_spill] sm:$0xff] }
 0x2b4   : > { %v5147_v56 = vrot.slane %v5140_v1, %v9284_v28  ;;  %v10596_v20 = vrot.slane %v5047_v37, %v9305_v9  ;;  %v4947_v13 = vrot.slane %v11845_v54, 4 }
 0x2b5   : > { %v5088_v49 = vrot.slane %v5080_v52, %v9305_v9  ;;  %v5114_v41 = vcombine.low %v5105_v30, %v5113_v27  ;;  %v5115_v11 = vcombine.high %v5105_v30, %v5113_v27  ;;  %v10599_v15 = vrot.slane %v5081_v40, %v9305_v9 }
 0x2b6   : > { %v5148_v22 = vcombine.low %v5139_v24, %v5147_v56  ;;  %v5149_v60 = vcombine.high %v5139_v24, %v5147_v56  ;;  %v4931_v52 = vrot.slane %v11844_v53, 4  ;;  %v4963_v40 = vrot.slane %v10218_v4, 4 }
 0x2b7   : > { %v5638_v55 = vcombine.low %v5054_v39, %v5088_v49  ;;  %v5122_v46 = vrot.slane %v5114_v41, %v9305_v9  ;;  %v10609_v16 = vrot.slane %v5115_v11, %v9305_v9  ;;  %v5642_v24 = vcombine.low %v10596_v20, %v10599_v15 }
 0x2b8   : > { %v5156_v42 = vrot.slane %v5148_v22, %v9305_v9  ;;  %v10612_v57 = vrot.slane %v5149_v60, %v9305_v9 }
 0x2ba   : > { %v5643_v60 = vcombine.low %v10609_v16, %v10612_v57 }
 0x2d5   : > { %v4130_v59 = vpop.f32.mrb[4].mxu1 }
 0x2d6   : > { %v4842_v7 = vmul.f32 0.35355338, %v4130_v59  ;;  %v8546_v50 = vpop.f32.mrb[5].mxu1 }
 0x2d7   : > { %v4133_v32 = vpop.f32.mrb[6].mxu1  ;;  %v5639_v50 = vcombine.low %v5122_v46, %v5156_v42 }
 0x2d8   : > { %v10593_v5 = vadd.f32 %v5638_v55, %v4842_v7  ;;  %v8547_v18 = vpop.f32.mrb[7].mxu1  ;;  %v4843_v1 = vmul.f32 0.35355338, %v4133_v32  ;;  %v4979_v7 = vrot.slane %v10221_v35, 4  ;;  %v4995_v55 = vrot.slane %v10238_v34, 4 }
 0x2da   : > { %v5735_v10 = vsel %vm5734_vm3, %v10593_v5, -inf }
 0x2db   : > { %5736 = vmax.xlane.f32.xlu0 %v5735_v10  ;;  %v8394_v10 = vcombine.high %v5054_v39, %v5088_v49  ;;  %v5234_v49 = vcombine.low %v4883_v25, %v4915_v48 }
 0x2dd   : > { %v4177_v30 = vpop.f32.mrb[8].mxu1 }
 0x2de   : > { %v4224_v33 = vpop.f32.mrb[4].mxu0  ;;  %v4844_v59 = vmul.f32 0.35355338, %v4177_v30  ;;  %v8552_v37 = vpop.f32.mrb[9].mxu1  ;;  %v5166_v30 = vcombine.low %v8966_v14, %v10182_v8  ;;  %v5242_v8 = vcombine.low %v4899_v63, %v4931_v52  ;;  %v5268_v14 = vcombine.low %v4947_v13, %v4979_v7 }
 0x2df   : > { %v4846_v27 = vmul.f32 0.35355338, %v4224_v33  ;;  %v8558_v56 = vpop.f32.mrb[5].mxu0  ;;  %v4180_v22 = vpop.f32.mrb[10].mxu1  ;;  %v5200_v37 = vcombine.low %v11845_v54, %v10221_v35  ;;  %v5241_v52 = vrot.slane %v5234_v49, %v9284_v28  ;;  %v4900_v49 = vrot.slane %v10242_v3, 4 }
 0x2e0   : > { %v4227_v41 = vpop.f32.mrb[6].mxu0  ;;  %v8553_v33 = vpop.f32.mrb[11].mxu1  ;;  %v5174_v56 = vcombine.low %v10177_v17, %v11844_v53  ;;  %v10638_v39 = vadd.f32 %v8394_v10, %v4844_v59  ;;  %v5276_v17 = vcombine.low %v4963_v40, %v4995_v55  ;;  %v4845_v53 = vmul.f32 0.35355338, %v4180_v22 }
 0x2e1   : > { %v10621_v11 = vadd.f32 %v5642_v24, %v4846_v27  ;;  %v4847_v32 = vmul.f32 0.35355338, %v4227_v41  ;;  %v8559_v18 = vpop.f32.mrb[7].mxu0  ;;  %v10632_v27 = vadd.f32 %v5639_v50, %v4843_v1  ;;  %v5173_v4 = vrot.slane %v5166_v30, %v9284_v28 }
 0x2e2   : > { %v5181_v34 = vrot.slane %v5174_v56, %v9284_v28  ;;  %v5207_v54 = vrot.slane %v5200_v37, %v9284_v28  ;;  %v5215_v59 = vrot.slane %v5208_v2, %v9284_v28  ;;  %v8395_v50 = vcombine.high %v5122_v46, %v5156_v42 }
 0x2e3   : > { %v10634_v24 = vadd.f32 %v5643_v60, %v4847_v32  ;;  %v5747_v41 = vsel %vm5734_vm3, %v10621_v11, -inf  ;;  %v5738_v25 = vsel %vm5734_vm3, %v10632_v27, -inf  ;;  %v5741_v63 = vsel %vm5734_vm3, %v10638_v39, -inf }
 0x2e4   : > { %5748 = vmax.xlane.f32.xlu1 %v5747_v41  ;;  %v5249_v40 = vrot.slane %v5242_v8, %v9284_v28  ;;  %v5275_v7 = vrot.slane %v5268_v14, %v9284_v28  ;;  %v5283_v55 = vrot.slane %v5276_v17, %v9284_v28  ;;  %v10654_v22 = vadd.f32 %v8395_v50, %v4845_v53  ;;  %v8967_v8 = vld [vmem:[%s9264_s15 + $0x10] sm:$0xff] }
 0x2e5   : > { %v5750_v35 = vsel %vm5734_vm3, %v10634_v24, -inf  ;;  %v5182_v46 = vcombine.low %v5173_v4, %v5181_v34  ;;  %v5216_v42 = vcombine.low %v5207_v54, %v5215_v59  ;;  %v5183_v37 = vcombine.high %v5173_v4, %v5181_v34 }
 0x2e6   : > { %5751 = vmax.xlane.f32.xlu0 %v5750_v35  ;;  %v4271_v1 = vpop.f32.mrb[12].mxu1  ;;  %v5250_v32 = vcombine.low %v5241_v52, %v5249_v40  ;;  %v5284_v60 = vcombine.low %v5275_v7, %v5283_v55  ;;  %v5744_v18 = vsel %vm5734_vm3, %v10654_v22, -inf  ;;  %v5217_v41 = vcombine.high %v5207_v54, %v5215_v59 }
 0x2e7   : > { %v8564_v48 = vpop.f32.mrb[13].mxu1  ;;  %v10659_v10 = vrot.slane %v5182_v46, %v9305_v9  ;;  %v10662_v33 = vrot.slane %v5216_v42, %v9305_v9  ;;  %v4884_v14 = vrot.slane %v8967_v8, 4  ;;  %v4916_v53 = vrot.slane %v10253_v12, 4 }
 0x2e8   : > { %5739 = vmax.xlane.f32.xlu1 %v5738_v25  ;;  %v4274_v13 = vpop.f32.mrb[14].mxu1  ;;  %v10665_v30 = vrot.slane %v5250_v32, %v9305_v9  ;;  %v10668_v56 = vrot.slane %v5284_v60, %v9305_v9  ;;  %v4848_v35 = vmul.f32 0.35355338, %v4271_v1  ;;  %v4932_v48 = vrot.slane %v10269_v0, 4 }
 0x2e9   : > { %v8565_v2 = vpop.f32.mrb[15].mxu1  ;;  %v5646_v25 = vcombine.low %v10659_v10, %v10662_v33  ;;  %v5251_v54 = vcombine.high %v5241_v52, %v5249_v40  ;;  %v5285_v59 = vcombine.high %v5275_v7, %v5283_v55  ;;  %v4849_v42 = vmul.f32 0.35355338, %v4274_v13 }
 0x2ea   : > { %5742 = vmax.xlane.f32.xlu0 %v5741_v63  ;;  %v8396_v2 = vcombine.high %v10596_v20, %v10599_v15  ;;  %v5647_v1 = vcombine.low %v10665_v30, %v10668_v56  ;;  %v8397_v20 = vcombine.high %v10609_v16, %v10612_v57  ;;  %v10687_v15 = vrot.slane %v5183_v37, %v9305_v9 }
 0x2eb   : > { %v10696_v55 = vrot.slane %v5217_v41, %v9305_v9  ;;  %v10701_v16 = vrot.slane %v5251_v54, %v9305_v9  ;;  %v10704_v57 = vrot.slane %v5285_v59, %v9305_v9  ;;  %v5302_v37 = vcombine.low %v8967_v8, %v10253_v12 }
 0x2ec   : > { %v10689_v40 = vadd.f32 %v8396_v2, %v4848_v35  ;;  %v5370_v35 = vcombine.low %v4884_v14, %v4916_v53  ;;  %v10707_v2 = vadd.f32 %v8397_v20, %v4849_v42  ;;  %v5344_v54 = vcombine.low %v10294_v61, %v10311_v45 }
 0x2ed   : > { %v5650_v8 = vcombine.low %v10687_v15, %v10696_v55  ;;  %v10730_v20 = vrot.slane %v5302_v37, %v9284_v28  ;;  %v8400_v36 = vcombine.high %v10687_v15, %v10696_v55  ;;  %v8401_v55 = vcombine.high %v10701_v16, %v10704_v57 }
 0x2ee   : > { %5745 = vmax.xlane.f32.xlu0 %v5744_v18  ;;  %v5753_v53 = vsel %vm5734_vm3, %v10689_v40, -inf }
 0x2f1   : > { %v4318_v17 = vpop.f32.mrb[8].mxu0 }
 0x2f2   : > { %v4850_v50 = vmul.f32 0.35355338, %v4318_v17  ;;  %v8570_v63 = vpop.f32.mrb[9].mxu0  ;;  %v4948_v17 = vrot.slane %v10287_v43, 4 }
 0x2f3   : > { %v4321_v4 = vpop.f32.mrb[10].mxu0  ;;  %v4365_v34 = vpop.f32.mrb[16].mxu1  ;;  %v4964_v63 = vrot.slane %v10294_v61, 4  ;;  %v5651_v61 = vcombine.low %v10701_v16, %v10704_v57 }
 0x2f4   : > { %v10678_v46 = vadd.f32 %v5646_v25, %v4850_v50  ;;  %v4851_v32 = vmul.f32 0.35355338, %v4321_v4  ;;  %v8571_v60 = vpop.f32.mrb[11].mxu0  ;;  %v8576_v18 = vpop.f32.mrb[17].mxu1  ;;  %v4980_v25 = vrot.slane %v10309_v19, 4  ;;  %v4996_v4 = vrot.slane %v10311_v45, 4 }
 0x2f5   : > { %v4368_v52 = vpop.f32.mrb[18].mxu1  ;;  %v5336_v60 = vcombine.low %v10287_v43, %v10309_v19  ;;  %v4852_v18 = vmul.f32 0.35355338, %v4365_v34  ;;  %v5756_v34 = vsel %vm5734_vm3, %v10707_v2, -inf }
 0x2f6   : > { %v10691_v13 = vadd.f32 %v5647_v1, %v4851_v32  ;;  %v5759_v7 = vsel %vm5734_vm3, %v10678_v46, -inf  ;;  %v8577_v50 = vpop.f32.mrb[19].mxu1  ;;  %v5310_v32 = vcombine.low %v10242_v3, %v10269_v0  ;;  %v5378_v1 = vcombine.low %v4900_v49, %v4932_v48 }
 0x2f7   : > { %5760 = vmax.xlane.f32.xlu1 %v5759_v7  ;;  %v5404_v42 = vcombine.low %v4948_v17, %v4980_v25  ;;  %v5412_v3 = vcombine.low %v4964_v63, %v4996_v4  ;;  %v8398_v0 = vcombine.high %v10659_v10, %v10662_v33  ;;  %v4853_v45 = vmul.f32 0.35355338, %v4368_v52 }
 0x2f8   : > { %v5762_v41 = vsel %vm5734_vm3, %v10691_v13, -inf  ;;  %v10733_v17 = vrot.slane %v5310_v32, %v9284_v28  ;;  %v10736_v10 = vrot.slane %v5336_v60, %v9284_v28  ;;  %v10739_v33 = vrot.slane %v5344_v54, %v9284_v28 }
 0x2f9   : > { %v4412_v59 = vpop.f32.mrb[12].mxu0  ;;  %5763 = vmax.xlane.f32.xlu0 %v5762_v41  ;;  %v10741_v63 = vadd.f32 %v8398_v0, %v4852_v18  ;;  %v8399_v52 = vcombine.high %v10665_v30, %v10668_v56  ;;  %v10750_v25 = vrot.slane %v5370_v35, %v9284_v28  ;;  %v10753_v4 = vrot.slane %v5378_v1, %v9284_v28 }
 0x2fa   : > { %v4854_v12 = vmul.f32 0.35355338, %v4412_v59  ;;  %v8582_v14 = vpop.f32.mrb[13].mxu0  ;;  %v10756_v37 = vrot.slane %v5404_v42, %v9284_v28  ;;  %v10759_v41 = vrot.slane %v5412_v3, %v9284_v28  ;;  %v5318_v35 = vcombine.low %v10730_v20, %v10733_v17  ;;  %v8968_v59 = vld [vmem:[%s9264_s15 + $0x18] sm:$0xff] }
 0x2fb   : > { %v4415_v43 = vpop.f32.mrb[14].mxu0  ;;  %5754 = vmax.xlane.f32.xlu1 %v5753_v53  ;;  %v10761_v56 = vadd.f32 %v8399_v52, %v4853_v45  ;;  %v5352_v1 = vcombine.low %v10736_v10, %v10739_v33  ;;  %v4885_v18 = vrot.slane %v8968_v59, 4  ;;  %v5386_v53 = vcombine.low %v10750_v25, %v10753_v4  ;;  %v11846_v52 = vld [vmem:[#allocation22_spill] sm:$0xff] }
 0x2fc   : > { %v10725_v19 = vadd.f32 %v5650_v8, %v4854_v12  ;;  %v4855_v49 = vmul.f32 0.35355338, %v4415_v43  ;;  %v8583_v48 = vpop.f32.mrb[15].mxu0  ;;  %v4917_v12 = vrot.slane %v10332_v38, 4  ;;  %v5765_v8 = vsel %vm5734_vm3, %v10741_v63, -inf }
 0x2fd   : > { %5757 = vmax.xlane.f32.xlu0 %v5756_v34  ;;  %v5420_v42 = vcombine.low %v10756_v37, %v10759_v41  ;;  %v5438_v3 = vcombine.low %v8968_v59, %v10332_v38  ;;  %v5768_v0 = vsel %vm5734_vm3, %v10761_v56, -inf  ;;  %v4901_v43 = vrot.slane %v10324_v31, 4 }
 0x2fe   : > { %v10745_v7 = vadd.f32 %v5651_v61, %v4855_v49  ;;  %v5771_v50 = vsel %vm5734_vm3, %v10725_v19, -inf  ;;  %v4933_v61 = vrot.slane %v10338_v47, 4  ;;  %v10783_v45 = vrot.slane %v5318_v35, %v9305_v9 }
 0x2ff   : > { %5772 = vmax.xlane.f32.xlu1 %v5771_v50  ;;  %v4459_v30 = vpop.f32.mrb[20].mxu1  ;;  %v10786_v49 = vrot.slane %v5352_v1, %v9305_v9  ;;  %v5319_v48 = vcombine.high %v10730_v20, %v10733_v17  ;;  %v5506_v34 = vcombine.low %v4885_v18, %v4917_v12  ;;  %v5446_v38 = vcombine.low %v10324_v31, %v10338_v47  ;;  %v11848_v20 = vld [vmem:[#allocation24_spill] sm:$0xff]  ;;  %v11849_v18 = vld [vmem:[#allocation19_spill] sm:$0xff] }
 0x300   : > { %v5774_v32 = vsel %vm5734_vm3, %v10745_v7, -inf  ;;  %v8588_v60 = vpop.f32.mrb[21].mxu1  ;;  %v4949_v50 = vrot.slane %v11846_v52, 4  ;;  %v10797_v35 = vrot.slane %v5386_v53, %v9305_v9  ;;  %v10800_v1 = vrot.slane %v5420_v42, %v9305_v9 }
 0x301   : > { %5775 = vmax.xlane.f32.xlu0 %v5774_v32  ;;  %v4462_v54 = vpop.f32.mrb[22].mxu1  ;;  %v5353_v32 = vcombine.high %v10736_v10, %v10739_v33  ;;  %v11847_v60 = vld [vmem:[#allocation10_spill] sm:$0xff]  ;;  %v4981_v17 = vrot.slane %v11848_v20, 4  ;;  %v4997_v31 = vrot.slane %v11849_v18, 4  ;;  %v4856_v47 = vmul.f32 0.35355338, %v4459_v30 }
 0x302   : > { %v8589_v14 = vpop.f32.mrb[23].mxu1  ;;  %v4965_v59 = vrot.slane %v11847_v60, 4  ;;  %v5472_v10 = vcombine.low %v11846_v52, %v11848_v20  ;;  %v5654_v53 = vcombine.low %v10783_v45, %v10786_v49  ;;  %v4857_v23 = vmul.f32 0.35355338, %v4462_v54 }
 0x303   : > { %5766 = vmax.xlane.f32.xlu1 %v5765_v8  ;;  %v10803_v8 = vrot.slane %v5438_v3, %v9284_v28  ;;  %v5480_v3 = vcombine.low %v11847_v60, %v11849_v18  ;;  %v5655_v20 = vcombine.low %v10797_v35, %v10800_v1  ;;  %v5540_v18 = vcombine.low %v4949_v50, %v4981_v17 }
 0x304   : > { %v10823_v15 = vadd.f32 %v8400_v36, %v4856_v47  ;;  %v10841_v36 = vrot.slane %v5472_v10, %v9284_v28  ;;  %v10846_v16 = vadd.f32 %v8401_v55, %v4857_v23 }
 0x305   : > { %5769 = vmax.xlane.f32.xlu0 %v5768_v0  ;;  %v5514_v0 = vcombine.low %v4901_v43, %v4933_v61  ;;  %v5387_v43 = vcombine.high %v10750_v25, %v10753_v4  ;;  %v10832_v4 = vrot.slane %v5319_v48, %v9305_v9 }
 0x306   : > { %v5777_v17 = vsel %vm5734_vm3, %v10823_v15, -inf }
 0x307   : > { %v10851_v48 = vrot.slane %v5387_v43, %v9305_v9  ;;  %v8402_v43 = vcombine.high %v10783_v45, %v10786_v49 }
 0x30a   : > { %v4506_v12 = vpop.f32.mrb[16].mxu0 }
 0x30b   : > { %v4553_v14 = vpop.f32.mrb[24].mxu1  ;;  %v4858_v33 = vmul.f32 0.35355338, %v4506_v12  ;;  %v8594_v42 = vpop.f32.mrb[17].mxu0 }
 0x30c   : > { %v8600_v21 = vpop.f32.mrb[25].mxu1  ;;  %v4509_v30 = vpop.f32.mrb[18].mxu0  ;;  %v5548_v42 = vcombine.low %v4965_v59, %v4997_v31  ;;  %v10863_v59 = vrot.slane %v5540_v18, %v9284_v28  ;;  %v4860_v47 = vmul.f32 0.35355338, %v4553_v14  ;;  %v5780_v14 = vsel %vm5734_vm3, %v10846_v16, -inf }
 0x30d   : > { %v4556_v62 = vpop.f32.mrb[26].mxu1  ;;  %v10817_v61 = vadd.f32 %v5654_v53, %v4858_v33  ;;  %v4859_v52 = vmul.f32 0.35355338, %v4509_v30  ;;  %v8595_v12 = vpop.f32.mrb[19].mxu0  ;;  %v5421_v21 = vcombine.high %v10756_v37, %v10759_v41  ;;  %v10835_v33 = vrot.slane %v5353_v32, %v9305_v9 }
 0x30e   : > { %v8601_v60 = vpop.f32.mrb[27].mxu1  ;;  %v10838_v37 = vrot.slane %v5446_v38, %v9284_v28  ;;  %v10844_v41 = vrot.slane %v5480_v3, %v9284_v28  ;;  %v10857_v38 = vrot.slane %v5506_v34, %v9284_v28  ;;  %v10860_v32 = vrot.slane %v5514_v0, %v9284_v28 }
 0x30f   : > { %v10827_v54 = vadd.f32 %v5655_v20, %v4859_v52  ;;  %v5783_v25 = vsel %vm5734_vm3, %v10817_v61, -inf  ;;  %v10854_v50 = vrot.slane %v5421_v21, %v9305_v9  ;;  %v10868_v31 = vrot.slane %v5548_v42, %v9284_v28 }
 0x310   : > { %5784 = vmax.xlane.f32.xlu1 %v5783_v25  ;;  %v5658_v34 = vcombine.low %v10832_v4, %v10835_v33  ;;  %v5454_v0 = vcombine.low %v10803_v8, %v10838_v37  ;;  %v5488_v30 = vcombine.low %v10841_v36, %v10844_v41  ;;  %v4861_v21 = vmul.f32 0.35355338, %v4556_v62 }
 0x311   : > { %v5786_v57 = vsel %vm5734_vm3, %v10827_v54, -inf  ;;  %v5659_v18 = vcombine.low %v10851_v48, %v10854_v50  ;;  %v8403_v25 = vcombine.high %v10797_v35, %v10800_v1  ;;  %v5522_v45 = vcombine.low %v10857_v38, %v10860_v32 }
 0x312   : > { %v4600_v23 = vpop.f32.mrb[20].mxu0  ;;  %5787 = vmax.xlane.f32.xlu0 %v5786_v57  ;;  %v10888_v57 = vadd.f32 %v8402_v43, %v4860_v47  ;;  %v10899_v35 = vrot.slane %v5454_v0, %v9305_v9  ;;  %v10902_v1 = vrot.slane %v5488_v30, %v9305_v9  ;;  %v5455_v0 = vcombine.high %v10803_v8, %v10838_v37 }
 0x313   : > { %v4862_v10 = vmul.f32 0.35355338, %v4600_v23  ;;  %v8606_v53 = vpop.f32.mrb[21].mxu0 }
 0x314   : > { %v4647_v3 = vpop.f32.mrb[28].mxu1  ;;  %v4603_v52 = vpop.f32.mrb[22].mxu0  ;;  %5778 = vmax.xlane.f32.xlu1 %v5777_v17  ;;  %v5556_v17 = vcombine.low %v10863_v59, %v10868_v31  ;;  %v5789_v43 = vsel %vm5734_vm3, %v10888_v57, -inf }
 0x315   : > { %v8612_v20 = vpop.f32.mrb[29].mxu1  ;;  %v10880_v12 = vadd.f32 %v5658_v34, %v4862_v10  ;;  %v4863_v60 = vmul.f32 0.35355338, %v4603_v52  ;;  %v8607_v42 = vpop.f32.mrb[23].mxu0  ;;  %v10896_v10 = vadd.f32 %v8403_v25, %v4861_v21  ;;  %v10907_v34 = vrot.slane %v5522_v45, %v9305_v9 }
 0x316   : > { %v4650_v55 = vpop.f32.mrb[30].mxu1  ;;  %5781 = vmax.xlane.f32.xlu0 %v5780_v14  ;;  %v10910_v53 = vrot.slane %v5556_v17, %v9305_v9  ;;  %v4864_v52 = vmul.f32 0.35355338, %v4647_v3  ;;  %v5489_v20 = vcombine.high %v10841_v36, %v10844_v41  ;;  %v8404_v45 = vcombine.high %v10832_v4, %v10835_v33 }
 0x317   : > { %v8613_v49 = vpop.f32.mrb[31].mxu1  ;;  %v10890_v23 = vadd.f32 %v5659_v18, %v4863_v60  ;;  %v5795_v62 = vsel %vm5734_vm3, %v10880_v12, -inf  ;;  %v5662_v60 = vcombine.low %v10899_v35, %v10902_v1  ;;  %v5792_v42 = vsel %vm5734_vm3, %v10896_v10, -inf }
 0x318   : > { %5796 = vmax.xlane.f32.xlu1 %v5795_v62  ;;  %v4865_v8 = vmul.f32 0.35355338, %v4650_v55  ;;  %v5523_v49 = vcombine.high %v10857_v38, %v10860_v32  ;;  %v5663_v62 = vcombine.low %v10907_v34, %v10910_v53  ;;  %v8405_v4 = vcombine.high %v10851_v48, %v10854_v50 }
 0x319   : > { %v5798_v47 = vsel %vm5734_vm3, %v10890_v23, -inf  ;;  %v5469_v32 = vrot.slane %v5455_v0, %v9305_v9  ;;  %v5503_v55 = vrot.slane %v5489_v20, %v9305_v9 }
 0x31a   : > { %5799 = vmax.xlane.f32.xlu0 %v5798_v47  ;;  %v5557_v47 = vcombine.high %v10863_v59, %v10868_v31  ;;  %v5537_v31 = vrot.slane %v5523_v49, %v9305_v9 }
 0x31b   : > { %v4694_v14 = vpop.f32.mrb[24].mxu0  ;;  %v5666_v0 = vcombine.low %v5469_v32, %v5503_v55 }
 0x31c   : > { %5790 = vmax.xlane.f32.xlu1 %v5789_v43  ;;  %v4741_v30 = vpop.f32.mrb[32].mxu1  ;;  %v4866_v21 = vmul.f32 0.35355338, %v4694_v14  ;;  %v8618_v18 = vpop.f32.mrb[25].mxu0  ;;  %v10932_v14 = vadd.f32 %v8404_v45, %v4864_v52  ;;  %v5571_v52 = vrot.slane %v5557_v47, %v9305_v9 }
 0x31d   : > { %v8624_v25 = vpop.f32.mrb[33].mxu1  ;;  %v4697_v37 = vpop.f32.mrb[26].mxu0 }
 0x31e   : > { %5793 = vmax.xlane.f32.xlu0 %v5792_v42  ;;  %v4744_v3 = vpop.f32.mrb[34].mxu1  ;;  %v10926_v36 = vadd.f32 %v5662_v60, %v4866_v21  ;;  %v4867_v41 = vmul.f32 0.35355338, %v4697_v37  ;;  %v8619_v17 = vpop.f32.mrb[27].mxu0  ;;  %v10942_v21 = vadd.f32 %v8405_v4, %v4865_v8  ;;  %v5801_v50 = vsel %vm5734_vm3, %v10932_v14, -inf }
 0x31f   : > { %v8625_v43 = vpop.f32.mrb[35].mxu1  ;;  %v4868_v60 = vmul.f32 0.35355338, %v4741_v30  ;;  %v8406_v25 = vcombine.high %v10899_v35, %v10902_v1  ;;  %v4869_v45 = vmul.f32 0.35355338, %v4744_v3  ;;  %v5667_v17 = vcombine.low %v5537_v31, %v5571_v52 }
 0x320   : > { %v10936_v33 = vadd.f32 %v5663_v62, %v4867_v41  ;;  %v5807_v38 = vsel %vm5734_vm3, %v10926_v36, -inf  ;;  %v5804_v37 = vsel %vm5734_vm3, %v10942_v21, -inf  ;;  %v8407_v4 = vcombine.high %v10907_v34, %v10910_v53 }
 0x321   : > { %5808 = vmax.xlane.f32.xlu1 %v5807_v38  ;;  %v8408_v38 = vcombine.high %v5469_v32, %v5503_v55  ;;  %v10958_v1 = vadd.f32 %v8406_v25, %v4868_v60  ;;  %v8409_v34 = vcombine.high %v5537_v31, %v5571_v52  ;;  %v11850_v31 = vld [vmem:[#allocation28_spill] sm:$0xff]  ;;  %v10982_v52 = vpop.permute.xlu0 %2917 }
 0x322   : > { %v5810_v59 = vsel %vm5734_vm3, %v10936_v33, -inf }
 0x323   : > { %v4788_v48 = vpop.f32.mrb[28].mxu0  ;;  %5811 = vmax.xlane.f32.xlu0 %v5810_v59  ;;  %v5813_v32 = vsel %vm5734_vm3, %v10958_v1, -inf }
 0x324   : > { %v4870_v18 = vmul.f32 0.35355338, %v4788_v48  ;;  %v8630_v42 = vpop.f32.mrb[29].mxu0  ;;  %v4835_v20 = vpop.f32.mrb[36].mxu1 }
 0x325   : > { %v4791_v8 = vpop.f32.mrb[30].mxu0  ;;  %5802 = vmax.xlane.f32.xlu1 %v5801_v50  ;;  %v8636_v49 = vpop.f32.mrb[37].mxu1  ;;  %v4872_v30 = vmul.f32 0.35355338, %v4835_v20  ;;  %v10964_v50 = vadd.f32 %v8407_v4, %v4869_v45 }
 0x326   : > { %v10954_v41 = vadd.f32 %v5666_v0, %v4870_v18  ;;  %v4871_v62 = vmul.f32 0.35355338, %v4791_v8  ;;  %v8631_v47 = vpop.f32.mrb[31].mxu0  ;;  %v4838_v43 = vpop.f32.mrb[38].mxu1 }
 0x327   : > { %5805 = vmax.xlane.f32.xlu0 %v5804_v37  ;;  %v8637_v35 = vpop.f32.mrb[39].mxu1  ;;  %v4873_v48 = vmul.f32 0.35355338, %v4838_v43  ;;  %v10966_v18 = vadd.f32 %v8408_v38, %v4872_v30  ;;  %v5816_v55 = vsel %vm5734_vm3, %v10964_v50, -inf }
 0x328   : > { %v10960_v3 = vadd.f32 %v5667_v17, %v4871_v62  ;;  %v5819_v59 = vsel %vm5734_vm3, %v10954_v41, -inf }
 0x329   : > { %5820 = vmax.xlane.f32.xlu1 %v5819_v59  ;;  %v10970_v53 = vadd.f32 %v8409_v34, %v4873_v48  ;;  %v5825_v60 = vsel %vm5734_vm3, %v10966_v18, -inf }
 0x32a   : > { %v5822_v0 = vsel %vm5734_vm3, %v10960_v3, -inf }
 0x32b   : > { %5823 = vmax.xlane.f32.xlu0 %v5822_v0  ;;  %v5828_v42 = vsel %vm5734_vm3, %v10970_v53, -inf }
 0x32d   : > { %5814 = vmax.xlane.f32.xlu1 %v5813_v32 }
 0x32f   : > { %5817 = vmax.xlane.f32.xlu0 %v5816_v55 }
 0x331   : > { %5826 = vmax.xlane.f32.xlu1 %v5825_v60 }
 0x333   : > { %5829 = vmax.xlane.f32.xlu0 %v5828_v42 }
 0x349   : > { %2933 = vrot.lane.b32.xlu0 %v11850_v31, %s8986_s18 }
 0x368   : > { %v5737_v20 = vpop.xlane.xlu0 %5736 }
 0x369   : > { %v5831_v25 = vsub.f32 %v10593_v5, %v5737_v20 }
 0x36b   : > { %v5863_v45 = vmul.f32 1.442695, %v5831_v25 }
 0x36d   : > { %8837 = vpow2.f32 %v5863_v45 }
 0x371   : > { %v5749_v8 = vpop.xlane.xlu1 %5748 }
 0x372   : > { %v5835_v37 = vsub.f32 %v10621_v11, %v5749_v8 }
 0x373   : > { %v5752_v49 = vpop.xlane.xlu0 %5751 }
 0x374   : > { %v5871_v62 = vmul.f32 1.442695, %v5835_v37  ;;  %v5836_v17 = vsub.f32 %v10634_v24, %v5752_v49 }
 0x375   : > { %v5740_v47 = vpop.xlane.xlu1 %5739 }
 0x376   : > { %8839 = vpow2.f32 %v5871_v62  ;;  %v5832_v30 = vsub.f32 %v10632_v27, %v5740_v47  ;;  %v5873_v43 = vmul.f32 1.442695, %v5836_v17 }
 0x377   : > { %v5743_v4 = vpop.xlane.xlu0 %5742  ;;  %v10988_v38 = vpop.eup %8837 }
 0x378   : > { %v5865_v35 = vmul.f32 1.442695, %v5832_v30  ;;  %8841 = vpow2.f32 %v5873_v43  ;;  %v5833_v5 = vsub.f32 %v10638_v39, %v5743_v4  ;;  %v5927_v59 = vsel %vm5734_vm3, %v10988_v38, 0.0 }
 0x379   : > { %5928 = vadd.xlane.f32.xlu1 %v5927_v59 }
 0x37a   : > { %8843 = vpow2.f32 %v5865_v35  ;;  %v5867_v11 = vmul.f32 1.442695, %v5833_v5 }
 0x37b   : > { %v5746_v48 = vpop.xlane.xlu0 %5745 }
 0x37c   : > { %8845 = vpow2.f32 %v5867_v11  ;;  %v5834_v24 = vsub.f32 %v10654_v22, %v5746_v48 }
 0x37e   : > { %v5869_v0 = vmul.f32 1.442695, %v5834_v24 }
 0x380   : > { %v10994_v27 = vpop.eup %8839  ;;  %8847 = vpow2.f32 %v5869_v0 }
 0x381   : > { %v5939_v34 = vsel %vm5734_vm3, %v10994_v27, 0.0 }
 0x382   : > { %v10998_v32 = vpop.eup %8841  ;;  %5940 = vadd.xlane.f32.xlu0 %v5939_v34 }
 0x383   : > { %v5942_v39 = vsel %vm5734_vm3, %v10998_v32, 0.0 }
 0x384   : > { %v11002_v55 = vpop.eup %8843  ;;  %5943 = vadd.xlane.f32.xlu1 %v5942_v39  ;;  %v5761_v60 = vpop.xlane.xlu1 %5760 }
 0x385   : > { %v5930_v22 = vsel %vm5734_vm3, %v11002_v55, 0.0  ;;  %v5839_v31 = vsub.f32 %v10678_v46, %v5761_v60 }
 0x386   : > { %v11006_v42 = vpop.eup %8845  ;;  %5931 = vadd.xlane.f32.xlu0 %v5930_v22  ;;  %v5764_v20 = vpop.xlane.xlu0 %5763 }
 0x387   : > { %v5933_v25 = vsel %vm5734_vm3, %v11006_v42, 0.0  ;;  %v5879_v45 = vmul.f32 1.442695, %v5839_v31  ;;  %v5840_v8 = vsub.f32 %v10691_v13, %v5764_v20 }
 0x388   : > { %5934 = vadd.xlane.f32.xlu1 %v5933_v25  ;;  %v5755_v37 = vpop.xlane.xlu1 %5754 }
 0x389   : > { %8849 = vpow2.f32 %v5879_v45  ;;  %v5881_v62 = vmul.f32 1.442695, %v5840_v8  ;;  %v5837_v17 = vsub.f32 %v10689_v40, %v5755_v37 }
 0x38a   : > { %v11012_v49 = vpop.eup %8847  ;;  %v5758_v47 = vpop.xlane.xlu0 %5757 }
 0x38b   : > { %v5936_v46 = vsel %vm5734_vm3, %v11012_v49, 0.0  ;;  %8851 = vpow2.f32 %v5881_v62  ;;  %v5875_v30 = vmul.f32 1.442695, %v5837_v17  ;;  %v5838_v43 = vsub.f32 %v10707_v2, %v5758_v47 }
 0x38c   : > { %5937 = vadd.xlane.f32.xlu0 %v5936_v46  ;;  %v5773_v4 = vpop.xlane.xlu1 %5772 }
 0x38d   : > { %8853 = vpow2.f32 %v5875_v30  ;;  %v5843_v13 = vsub.f32 %v10725_v19, %v5773_v4  ;;  %v5877_v11 = vmul.f32 1.442695, %v5838_v43 }
 0x38e   : > { %v5776_v35 = vpop.xlane.xlu0 %5775 }
 0x38f   : > { %v5887_v5 = vmul.f32 1.442695, %v5843_v13  ;;  %v5844_v59 = vsub.f32 %v10745_v7, %v5776_v35 }
 0x390   : > { %v5767_v48 = vpop.xlane.xlu1 %5766 }
 0x391   : > { %8855 = vpow2.f32 %v5887_v5  ;;  %v5889_v40 = vmul.f32 1.442695, %v5844_v59  ;;  %v5841_v24 = vsub.f32 %v10741_v63, %v5767_v48 }
 0x392   : > { %v5770_v0 = vpop.xlane.xlu0 %5769 }
 0x393   : > { %v11021_v34 = vpop.eup %8849  ;;  %8857 = vpow2.f32 %v5889_v40  ;;  %v5883_v39 = vmul.f32 1.442695, %v5841_v24  ;;  %v5842_v2 = vsub.f32 %v10761_v56, %v5770_v0 }
 0x394   : > { %8859 = vpow2.f32 %v5877_v11  ;;  %v5951_v19 = vsel %vm5734_vm3, %v11021_v34, 0.0 }
 0x395   : > { %v11026_v60 = vpop.eup %8851  ;;  %8861 = vpow2.f32 %v5883_v39  ;;  %v5885_v7 = vmul.f32 1.442695, %v5842_v2  ;;  %5952 = vadd.xlane.f32.xlu1 %v5951_v19 }
 0x396   : > { %v5954_v22 = vsel %vm5734_vm3, %v11026_v60, 0.0 }
 0x397   : > { %v11030_v63 = vpop.eup %8853  ;;  %5955 = vadd.xlane.f32.xlu0 %v5954_v22  ;;  %8863 = vpow2.f32 %v5885_v7 }
 0x398   : > { %v5945_v31 = vsel %vm5734_vm3, %v11030_v63, 0.0 }
 0x39b   : > { %v11034_v56 = vpop.eup %8855  ;;  %5946 = vadd.xlane.f32.xlu0 %v5945_v31 }
 0x39c   : > { %v5963_v47 = vsel %vm5734_vm3, %v11034_v56, 0.0 }
 0x39d   : > { %v5785_v20 = vpop.xlane.xlu1 %5784  ;;  %v11037_v45 = vpop.eup %8857 }
 0x39e   : > { %v5847_v25 = vsub.f32 %v10817_v61, %v5785_v20  ;;  %v11039_v37 = vpop.eup %8859  ;;  %v5966_v46 = vsel %vm5734_vm3, %v11037_v45, 0.0 }
 0x39f   : > { %v5788_v8 = vpop.xlane.xlu0 %5787  ;;  %v11046_v30 = vpop.eup %8861  ;;  %5964 = vadd.xlane.f32.xlu0 %v5963_v47  ;;  %5967 = vadd.xlane.f32.xlu1 %v5966_v46 }
 0x3a0   : > { %v5895_v62 = vmul.f32 1.442695, %v5847_v25  ;;  %v5848_v17 = vsub.f32 %v10827_v54, %v5788_v8  ;;  %v5948_v54 = vsel %vm5734_vm3, %v11039_v37, 0.0  ;;  %v5957_v5 = vsel %vm5734_vm3, %v11046_v30, 0.0 }
 0x3a1   : > { %v5779_v43 = vpop.xlane.xlu1 %5778  ;;  %v11053_v59 = vpop.eup %8863 }
 0x3a2   : > { %8865 = vpow2.f32 %v5895_v62  ;;  %v5897_v61 = vmul.f32 1.442695, %v5848_v17  ;;  %v5845_v4 = vsub.f32 %v10823_v15, %v5779_v43  ;;  %v5960_v39 = vsel %vm5734_vm3, %v11053_v59, 0.0 }
 0x3a3   : > { %v5782_v13 = vpop.xlane.xlu0 %5781  ;;  %5949 = vadd.xlane.f32.xlu0 %v5948_v54  ;;  %5958 = vadd.xlane.f32.xlu1 %v5957_v5 }
 0x3a4   : > { %8867 = vpow2.f32 %v5897_v61  ;;  %v5891_v35 = vmul.f32 1.442695, %v5845_v4  ;;  %v5846_v11 = vsub.f32 %v10846_v16, %v5782_v13 }
 0x3a5   : > { %v5797_v48 = vpop.xlane.xlu1 %5796 }
 0x3a6   : > { %8869 = vpow2.f32 %v5891_v35  ;;  %v5851_v40 = vsub.f32 %v10880_v12, %v5797_v48  ;;  %v5893_v2 = vmul.f32 1.442695, %v5846_v11 }
 0x3a7   : > { %v5800_v15 = vpop.xlane.xlu0 %5799  ;;  %5961 = vadd.xlane.f32.xlu0 %v5960_v39 }
 0x3a8   : > { %v5903_v24 = vmul.f32 1.442695, %v5851_v40  ;;  %v5852_v0 = vsub.f32 %v10890_v23, %v5800_v15 }
 0x3a9   : > { %v5791_v19 = vpop.xlane.xlu1 %5790 }
 0x3aa   : > { %8871 = vpow2.f32 %v5903_v24  ;;  %v5905_v7 = vmul.f32 1.442695, %v5852_v0  ;;  %v5849_v16 = vsub.f32 %v10888_v57, %v5791_v19 }
 0x3ab   : > { %v5794_v22 = vpop.xlane.xlu0 %5793 }
 0x3ac   : > { %v11061_v31 = vpop.eup %8865  ;;  %8873 = vpow2.f32 %v5905_v7  ;;  %v5899_v20 = vmul.f32 1.442695, %v5849_v16  ;;  %v5850_v12 = vsub.f32 %v10896_v10, %v5794_v22 }
 0x3ad   : > { %8875 = vpow2.f32 %v5893_v2  ;;  %v5975_v23 = vsel %vm5734_vm3, %v11061_v31, 0.0 }
 0x3ae   : > { %v11066_v25 = vpop.eup %8867  ;;  %8877 = vpow2.f32 %v5899_v20  ;;  %v5901_v8 = vmul.f32 1.442695, %v5850_v12  ;;  %5976 = vadd.xlane.f32.xlu1 %v5975_v23  ;;  %v5809_v62 = vpop.xlane.xlu1 %5808 }
 0x3af   : > { %v5978_v57 = vsel %vm5734_vm3, %v11066_v25, 0.0  ;;  %v5855_v47 = vsub.f32 %v10926_v36, %v5809_v62 }
 0x3b0   : > { %v11070_v17 = vpop.eup %8869  ;;  %5979 = vadd.xlane.f32.xlu0 %v5978_v57  ;;  %v5812_v46 = vpop.xlane.xlu0 %5811  ;;  %8879 = vpow2.f32 %v5901_v8 }
 0x3b1   : > { %v5911_v10 = vmul.f32 1.442695, %v5855_v47  ;;  %v5856_v43 = vsub.f32 %v10936_v33, %v5812_v46  ;;  %v5969_v4 = vsel %vm5734_vm3, %v11070_v17, 0.0 }
 0x3b2   : > { %v5803_v61 = vpop.xlane.xlu1 %5802 }
 0x3b3   : > { %8881 = vpow2.f32 %v5911_v10  ;;  %v5913_v35 = vmul.f32 1.442695, %v5856_v43  ;;  %v5853_v54 = vsub.f32 %v10932_v14, %v5803_v61 }
 0x3b4   : > { %v11076_v13 = vpop.eup %8871  ;;  %5970 = vadd.xlane.f32.xlu0 %v5969_v4  ;;  %v5806_v5 = vpop.xlane.xlu0 %5805 }
 0x3b5   : > { %8883 = vpow2.f32 %v5913_v35  ;;  %v5907_v36 = vmul.f32 1.442695, %v5853_v54  ;;  %v5854_v48 = vsub.f32 %v10942_v21, %v5806_v5  ;;  %v5987_v24 = vsel %vm5734_vm3, %v11076_v13, 0.0 }
 0x3b6   : > { %v11079_v11 = vpop.eup %8873  ;;  %v5821_v33 = vpop.xlane.xlu1 %5820 }
 0x3b7   : > { %v11082_v40 = vpop.eup %8875  ;;  %v5990_v15 = vsel %vm5734_vm3, %v11079_v11, 0.0  ;;  %8885 = vpow2.f32 %v5907_v36  ;;  %v5909_v39 = vmul.f32 1.442695, %v5854_v48  ;;  %v5859_v2 = vsub.f32 %v10954_v41, %v5821_v33 }
 0x3b8   : > { %v11088_v0 = vpop.eup %8877  ;;  %5991 = vadd.xlane.f32.xlu1 %v5990_v15  ;;  %5988 = vadd.xlane.f32.xlu0 %v5987_v24  ;;  %v5824_v14 = vpop.xlane.xlu0 %5823  ;;  %v5972_v7 = vsel %vm5734_vm3, %v11082_v40, 0.0 }
 0x3b9   : > { %v5981_v21 = vsel %vm5734_vm3, %v11088_v0, 0.0  ;;  %8887 = vpow2.f32 %v5909_v39  ;;  %v5919_v8 = vmul.f32 1.442695, %v5859_v2 }
 0x3ba   : > { %v5815_v19 = vpop.xlane.xlu1 %5814  ;;  %v11095_v16 = vpop.eup %8879 }
 0x3bb   : > { %v5857_v22 = vsub.f32 %v10958_v1, %v5815_v19  ;;  %v5984_v57 = vsel %vm5734_vm3, %v11095_v16, 0.0 }
 0x3bc   : > { %5982 = vadd.xlane.f32.xlu1 %v5981_v21  ;;  %5973 = vadd.xlane.f32.xlu0 %v5972_v7  ;;  %v5818_v20 = vpop.xlane.xlu0 %5817 }
 0x3bd   : > { %v11098_v12 = vpop.eup %8881  ;;  %v5915_v23 = vmul.f32 1.442695, %v5857_v22  ;;  %v5858_v41 = vsub.f32 %v10964_v50, %v5818_v20  ;;  %v11851_v22 = vld [vmem:[#allocation29_spill] sm:$0xff]  ;;  %v5860_v20 = vsub.f32 %v10960_v3, %v5824_v14 }
 0x3be   : > { %v5999_v62 = vsel %vm5734_vm3, %v11098_v12, 0.0  ;;  %v5827_v1 = vpop.xlane.xlu1 %5826 }
 0x3bf   : > { %v11105_v47 = vpop.eup %8883  ;;  %8889 = vpow2.f32 %v5915_v23  ;;  %v5917_v46 = vmul.f32 1.442695, %v5858_v41  ;;  %v5861_v10 = vsub.f32 %v10966_v18, %v5827_v1  ;;  %v5921_v23 = vmul.f32 1.442695, %v5860_v20 }
 0x3c0   : > { %6000 = vadd.xlane.f32.xlu1 %v5999_v62  ;;  %5985 = vadd.xlane.f32.xlu0 %v5984_v57  ;;  %8891 = vpow2.f32 %v5919_v8  ;;  %v6002_v43 = vsel %vm5734_vm3, %v11105_v47, 0.0  ;;  %v5830_v61 = vpop.xlane.xlu0 %5829 }
 0x3c1   : > { %v11110_v50 = vpop.eup %8885  ;;  %8893 = vpow2.f32 %v5917_v46  ;;  %v5923_v4 = vmul.f32 1.442695, %v5861_v10  ;;  %v5862_v35 = vsub.f32 %v10970_v53, %v5830_v61 }
 0x3c2   : > { %v5993_v54 = vsel %vm5734_vm3, %v11110_v50, 0.0 }
 0x3c3   : > { %v11115_v5 = vpop.eup %8887  ;;  %8895 = vpow2.f32 %v5923_v4  ;;  %v5925_v18 = vmul.f32 1.442695, %v5862_v35 }
 0x3c4   : > { %6003 = vadd.xlane.f32.xlu0 %v6002_v43  ;;  %v5996_v33 = vsel %vm5734_vm3, %v11115_v5, 0.0  ;;  %v11146_v62 = vpop.permute.xlu0 %2933 }
 0x3c5   : > { %8897 = vpow2.f32 %v5925_v18 }
 0x3c6   : > { %8899 = vpow2.f32 %v5921_v23 }
 0x3c8   : > { %5994 = vadd.xlane.f32.xlu0 %v5993_v54 }
 0x3c9   : > { %v11117_v36 = vpop.eup %8889 }
 0x3ca   : > { %v6005_v48 = vsel %vm5734_vm3, %v11117_v36, 0.0  ;;  %v11123_v15 = vpop.eup %8891 }
 0x3cb   : > { %6006 = vadd.xlane.f32.xlu1 %v6005_v48  ;;  %v6011_v53 = vsel %vm5734_vm3, %v11123_v15, 0.0  ;;  %v11127_v24 = vpop.eup %8893 }
 0x3cc   : > { %5997 = vadd.xlane.f32.xlu0 %v5996_v33  ;;  %v6008_v39 = vsel %vm5734_vm3, %v11127_v24, 0.0 }
 0x3cd   : > { %v11131_v2 = vpop.eup %8895 }
 0x3ce   : > { %v6017_v19 = vsel %vm5734_vm3, %v11131_v2, 0.0 }
 0x3cf   : > { %v11135_v21 = vpop.eup %8897 }
 0x3d0   : > { %6012 = vadd.xlane.f32.xlu0 %v6011_v53  ;;  %v6020_v7 = vsel %vm5734_vm3, %v11135_v21, 0.0  ;;  %v11142_v8 = vpop.eup %8899 }
 0x3d1   : > { %v6014_v41 = vsel %vm5734_vm3, %v11142_v8, 0.0 }
 0x3d4   : > { %6009 = vadd.xlane.f32.xlu0 %v6008_v39 }
 0x3d8   : > { %6018 = vadd.xlane.f32.xlu0 %v6017_v19 }
 0x3dc   : > { %2935 = vrot.lane.b32.xlu1 %v11851_v22, %s8986_s18  ;;  %6021 = vadd.xlane.f32.xlu0 %v6020_v7 }
 0x400   : > { %6015 = vadd.xlane.f32.xlu1 %v6014_v41 }
 0x406   : > { %v5929_v57 = vpop.xlane.xlu1 %5928 }
 0x407   : > { %8901 = vrcp.f32 %v5929_v57 }
 0x40f   : > { %v5941_v1 = vpop.xlane.xlu0 %5940 }
 0x411   : > { %v5944_v46 = vpop.xlane.xlu1 %5943  ;;  %v8902_v14 = vpop.eup %8901 }
 0x412   : > { %v6055_v4 = vmul.f32 %v8902_v14, %v10988_v38 }
 0x413   : > { %v5932_v10 = vpop.xlane.xlu0 %5931 }
 0x414   : > { %8903 = vrcp.f32 %v5932_v10 }
 0x415   : > { %v5935_v43 = vpop.xlane.xlu1 %5934  ;;  %8905 = vrcp.f32 %v5944_v46 }
 0x416   : > { %8907 = vrcp.f32 %v5935_v43 }
 0x417   : > { %8909 = vrcp.f32 %v5941_v1 }
 0x419   : > { %v5938_v3 = vpop.xlane.xlu0 %5937 }
 0x41a   : > { %8911 = vrcp.f32 %v5938_v3 }
 0x41e   : > { %v8904_v61 = vpop.eup %8903 }
 0x41f   : > { %v6056_v35 = vmul.f32 %v8904_v61, %v11002_v55  ;;  %v8906_v54 = vpop.eup %8905 }
 0x420   : > { %v8908_v48 = vpop.eup %8907  ;;  %v6060_v19 = vmul.f32 %v8906_v54, %v10998_v32 }
 0x421   : > { %v6087_v18 = vpack.c.bf16 %v6056_v35, %v6055_v4  ;;  %v8910_v33 = vpop.eup %8909  ;;  %v6057_v38 = vmul.f32 %v8908_v48, %v11006_v42 }
 0x422   : > { %v5953_v53 = vpop.xlane.xlu1 %5952  ;;  %v6059_v22 = vmul.f32 %v8910_v33, %v10994_v27  ;;  %v11852_v33 = vld [vmem:[#allocation20_spill] sm:$0xff] }
 0x423   : > { %8641 = vmatmul.mubr.msk.bf16.vlgmr.msra.gmra.mrb[32].mxu0 %vm5734_vm3, %v6087_v18  ;;  %8913 = vrcp.f32 %v5953_v53 }
 0x424   : > { %v8912_v39 = vpop.eup %8911  ;;  %8651 = vmatpush3.bf16.msra.mxu0 %v10533_v6  ;;  %8652 = vmatprep.mubr.msk.bf16.mxu0 %vm8982_vm1, %v11802_v26  ;;  %v5956_v7 = vpop.xlane.xlu0 %5955  ;;  %v6089_v6 = vpack.c.bf16 %v6060_v19, %v6059_v22 }
 0x425   : > { %v6058_v55 = vmul.f32 %v8912_v39, %v11012_v49  ;;  %8662 = vmatprep.subr.bf16.mxu0 %v11802_v26  ;;  %8915 = vrcp.f32 %v5956_v7 }
 0x427   : > { %v6088_v20 = vpack.c.bf16 %v6058_v55, %v6057_v38 }
 0x428   : > { %v5947_v23 = vpop.xlane.xlu0 %5946 }
 0x429   : > { %8647 = vmatmul.mubr.msk.bf16.vlgmr.msra.gmra.mrb[40].mxu1 %vm5734_vm3, %v6088_v20  ;;  %v11853_v20 = vld [vmem:[#allocation13_spill] sm:$0xff] }
 0x42a   : > { %8657 = vmatpush3.bf16.msra.mxu1 %v10538_v58  ;;  %8658 = vmatprep.mubr.msk.bf16.mxu1 %vm8982_vm1, %v11802_v26 }
 0x42b   : > { %8653 = vmatmul.mubr.msk.bf16.vlgmr.msra.gmra.mrb[36].mxu0 %vm5734_vm3, %v6089_v6  ;;  %8668 = vmatprep.subr.bf16.mxu1 %v11802_v26  ;;  %v11854_v6 = vld [vmem:[#allocation15_spill] sm:$0xff] }
 0x42c   : > { %8663 = vmatpush3.bf16.msra.mxu0 %v10476_v44  ;;  %8664 = vmatprep.mubr.msk.bf16.mxu0 %vm8982_vm1, %v11802_v26  ;;  %v5968_v27 = vpop.xlane.xlu1 %5967  ;;  %v5965_v32 = vpop.xlane.xlu0 %5964 }
 0x42d   : > { %8674 = vmatprep.subr.bf16.mxu0 %v11802_v26  ;;  %v8914_v42 = vpop.eup %8913  ;;  %8917 = vrcp.f32 %v5968_v27 }
 0x42e   : > { %8919 = vrcp.f32 %v5965_v32  ;;  %v6063_v49 = vmul.f32 %v8914_v42, %v11021_v34  ;;  %v11856_v42 = vld [vmem:[#allocation14_spill] sm:$0xff] }
 0x42f   : > { %v8916_v58 = vpop.eup %8915  ;;  %8921 = vrcp.f32 %v5947_v23 }
 0x430   : > { %v6064_v41 = vmul.f32 %v8916_v58, %v11026_v60  ;;  %v5950_v57 = vpop.xlane.xlu0 %5949  ;;  %v5959_v44 = vpop.xlane.xlu1 %5958 }
 0x431   : > { %8923 = vrcp.f32 %v5950_v57 }
 0x432   : > { %v6091_v1 = vpack.c.bf16 %v6064_v41, %v6063_v49 }
 0x434   : > { %v5962_v46 = vpop.xlane.xlu0 %5961  ;;  %8665 = vmatmul.mubr.msk.bf16.vlgmr.msra.gmra.mrb[40].mxu0 %vm5734_vm3, %v6091_v1 }
 0x435   : > { %8675 = vmatpush3.bf16.msra.mxu0 %v10494_v51  ;;  %8676 = vmatprep.mubr.msk.bf16.mxu0 %vm8982_vm1, %v11802_v26  ;;  %8925 = vrcp.f32 %v5962_v46 }
 0x436   : > { %8686 = vmatprep.subr.bf16.mxu0 %v11802_v26  ;;  %8927 = vrcp.f32 %v5959_v44 }
 0x437   : > { %v8918_v10 = vpop.eup %8917 }
 0x438   : > { %v8920_v34 = vpop.eup %8919  ;;  %v6068_v60 = vmul.f32 %v8918_v10, %v11037_v45 }
 0x439   : > { %v6067_v43 = vmul.f32 %v8920_v34, %v11034_v56  ;;  %v8922_v14 = vpop.eup %8921 }
 0x43a   : > { %v6061_v51 = vmul.f32 %v8922_v14, %v11030_v63 }
 0x43b   : > { %v5977_v3 = vpop.xlane.xlu1 %5976  ;;  %v6093_v4 = vpack.c.bf16 %v6068_v60, %v6067_v43  ;;  %v8924_v35 = vpop.eup %8923 }
 0x43c   : > { %8929 = vrcp.f32 %v5977_v3  ;;  %v6062_v54 = vmul.f32 %v8924_v35, %v11039_v37 }
 0x43d   : > { %v5980_v61 = vpop.xlane.xlu0 %5979  ;;  %8677 = vmatmul.mubr.msk.bf16.vlgmr.msra.gmra.mrb[44].mxu0 %vm5734_vm3, %v6093_v4 }
 0x43e   : > { %8931 = vrcp.f32 %v5980_v61  ;;  %8687 = vmatpush3.bf16.msra.mxu0 %v10557_v29  ;;  %8688 = vmatprep.mubr.msk.bf16.mxu0 %vm8982_vm1, %v11802_v26  ;;  %v6090_v56 = vpack.c.bf16 %v6062_v54, %v6061_v51 }
 0x43f   : > { %8698 = vmatprep.subr.bf16.mxu0 %v11802_v26  ;;  %v8926_v18 = vpop.eup %8925 }
 0x440   : > { %8659 = vmatmul.mubr.msk.bf16.vlgmr.msra.gmra.mrb[44].mxu1 %vm5734_vm3, %v6090_v56  ;;  %v8928_v48 = vpop.eup %8927  ;;  %v6066_v63 = vmul.f32 %v8926_v18, %v11053_v59  ;;  %v3393_v59 = vcombine.low %v11853_v20, %v11146_v62 }
 0x441   : > { %v5971_v45 = vpop.xlane.xlu0 %5970  ;;  %8669 = vmatpush3.bf16.msra.mxu1 %v11852_v33  ;;  %8670 = vmatprep.mubr.msk.bf16.mxu1 %vm8982_vm1, %v11802_v26  ;;  %v6065_v39 = vmul.f32 %v8928_v48, %v11046_v30  ;;  %v11855_v30 = vld [vmem:[#allocation11_spill] sm:$0xff] }
 0x442   : > { %8680 = vmatprep.subr.bf16.mxu1 %v11802_v26  ;;  %v3378_v58 = vcombine.high %v11855_v30, %v10982_v52  ;;  %v3401_v49 = vrot.slane %v3393_v59, %v9284_v28 }
 0x443   : > { %v6092_v22 = vpack.c.bf16 %v6066_v63, %v6065_v39 }
 0x445   : > { %v5992_v37 = vpop.xlane.xlu1 %5991  ;;  %v5989_v29 = vpop.xlane.xlu0 %5988 }
 0x446   : > { %v8930_v53 = vpop.eup %8929  ;;  %8933 = vrcp.f32 %v5992_v37 }
 0x447   : > { %8935 = vrcp.f32 %v5989_v29  ;;  %v6071_v38 = vmul.f32 %v8930_v53, %v11061_v31  ;;  %v3377_v31 = vcombine.low %v11855_v30, %v10982_v52  ;;  %v3392_v52 = vrot.slane %v3378_v58, %v9284_v28  ;;  %v11857_v53 = vld [vmem:[#allocation16_spill] sm:$0xff] }
 0x448   : > { %v8932_v19 = vpop.eup %8931  ;;  %8937 = vrcp.f32 %v5971_v45  ;;  %8671 = vmatmul.mubr.msk.bf16.vlgmr.msra.gmra.mrb[48].mxu1 %vm5734_vm3, %v6092_v22  ;;  %v11859_v22 = vld [vmem:[#allocation18_spill] sm:$0xff] }
 0x449   : > { %v6072_v55 = vmul.f32 %v8932_v19, %v11066_v25  ;;  %v5974_v7 = vpop.xlane.xlu0 %5973  ;;  %8681 = vmatpush3.bf16.msra.mxu1 %v11854_v6  ;;  %8682 = vmatprep.mubr.msk.bf16.mxu1 %vm8982_vm1, %v11802_v26  ;;  %v3394_v25 = vcombine.high %v11853_v20, %v11146_v62  ;;  %v5983_v32 = vpop.xlane.xlu1 %5982  ;;  %v3385_v57 = vrot.slane %v3377_v31, %v9284_v28  ;;  %v11861_v6 = vld [vmem:[#allocation27_spill] sm:$0xff] }
 0x44a   : > { %8939 = vrcp.f32 %v5974_v7  ;;  %8692 = vmatprep.subr.bf16.mxu1 %v11802_v26  ;;  %v11858_v7 = vld [vmem:[#allocation26_spill] sm:$0xff] }
 0x44b   : > { %v6095_v23 = vpack.c.bf16 %v6072_v55, %v6071_v38  ;;  %v3408_v1 = vrot.slane %v3394_v25, %v9284_v28  ;;  %v3409_v60 = vcombine.low %v3385_v57, %v3401_v49  ;;  %v3410_v43 = vcombine.high %v3385_v57, %v3401_v49 }
 0x44c   : > { %v11860_v20 = vcombine.low %v11858_v7, %v11859_v22 }
 0x44d   : > { %8689 = vmatmul.mubr.msk.bf16.vlgmr.msra.gmra.mrb[48].mxu0 %vm5734_vm3, %v6095_v23  ;;  %v5986_v27 = vpop.xlane.xlu0 %5985  ;;  %v3425_v61 = vcombine.low %v3392_v52, %v3408_v1  ;;  %v3426_v4 = vcombine.high %v3392_v52, %v3408_v1  ;;  %v6001_v35 = vpop.xlane.xlu1 %6000  ;;  %v11863_v52 = vld [vmem:[#allocation21_spill] sm:$0xff] }
 0x44e   : > { %8699 = vmatpush3.bf16.msra.mxu0 %v11856_v42  ;;  %8700 = vmatprep.mubr.msk.bf16.mxu0 %vm8982_vm1, %v11802_v26  ;;  %8941 = vrcp.f32 %v5986_v27  ;;  %v3453_v59 = vrot.slane %v11860_v20, %v9284_v28 }
 0x44f   : > { %8710 = vmatprep.subr.bf16.mxu0 %v11802_v26  ;;  %8943 = vrcp.f32 %v5983_v32  ;;  %v3433_v48 = vrot.slane %v3425_v61, %v9305_v9  ;;  %v3440_v33 = vrot.slane %v3426_v4, %v9305_v9 }
 0x450   : > { %v8934_v62 = vpop.eup %8933 }
 0x451   : > { %v8936_v41 = vpop.eup %8935  ;;  %v6004_v44 = vpop.xlane.xlu0 %6003  ;;  %v6076_v46 = vmul.f32 %v8934_v62, %v11079_v11  ;;  %v3417_v11 = vrot.slane %v3409_v60, %v9305_v9  ;;  %v3937_v19 = vcombine.low %v3433_v48, %v3440_v33  ;;  %v8375_v38 = vcombine.high %v3433_v48, %v3440_v33 }
 0x452   : > { %v6075_v10 = vmul.f32 %v8936_v41, %v11076_v13  ;;  %v8938_v34 = vpop.eup %8937  ;;  %v3424_v13 = vrot.slane %v3410_v43, %v9305_v9 }
 0x453   : > { %v6069_v54 = vmul.f32 %v8938_v34, %v11070_v17  ;;  %v3944_v62 = vrot.slane %v3937_v19, %v9284_v28  ;;  %v3952_v41 = vrot.slane %v8375_v38, %v9284_v28 }
 0x454   : > { %v6097_v3 = vpack.c.bf16 %v6076_v46, %v6075_v10  ;;  %v8940_v14 = vpop.eup %8939  ;;  %v3921_v37 = vcombine.low %v3417_v11, %v3424_v13  ;;  %v8374_v29 = vcombine.high %v3417_v11, %v3424_v13 }
 0x455   : > { %v5995_v51 = vpop.xlane.xlu0 %5994  ;;  %v6070_v45 = vmul.f32 %v8940_v14, %v11082_v40 }
 0x456   : > { %8701 = vmatmul.mubr.msk.bf16.vlgmr.msra.gmra.mrb[52].mxu0 %vm5734_vm3, %v6097_v3  ;;  %8945 = vrcp.f32 %v5995_v51  ;;  %v3928_v32 = vrot.slane %v3921_v37, %v9284_v28  ;;  %v3936_v42 = vrot.slane %v8374_v29, %v9284_v28 }
 0x457   : > { %8712 = vmatprep.mubr.msk.bf16.mxu0 %vm8982_vm1, %v11802_v26  ;;  %v6094_v56 = vpack.c.bf16 %v6070_v45, %v6069_v54  ;;  %v3970_v54 = vcombine.high %v3944_v62, %v3952_v41 }
 0x458   : > { %v8942_v18 = vpop.eup %8941  ;;  %v6007_v63 = vpop.xlane.xlu1 %6006  ;;  %v3954_v51 = vcombine.high %v3928_v32, %v3936_v42 }
 0x459   : > { %8683 = vmatmul.mubr.msk.bf16.vlgmr.msra.gmra.mrb[52].mxu1 %vm5734_vm3, %v6094_v56  ;;  %v5998_v17 = vpop.xlane.xlu0 %5997  ;;  %v8944_v40 = vpop.eup %8943  ;;  %v6074_v39 = vmul.f32 %v8942_v18, %v11095_v16  ;;  %v11862_v16 = vcombine.high %v11858_v7, %v11859_v22 }
 0x45a   : > { %8693 = vmatpush3.bf16.msra.mxu1 %v11857_v53  ;;  %8947 = vrcp.f32 %v5998_v17  ;;  %8694 = vmatprep.mubr.msk.bf16.mxu1 %vm8982_vm1, %v11802_v26  ;;  %v6073_v23 = vmul.f32 %v8944_v40, %v11088_v0  ;;  %v3968_v38 = vrot.slane %v3954_v51, %v9305_v9 }
 0x45b   : > { %8704 = vmatprep.subr.bf16.mxu1 %v11802_v26  ;;  %v3460_v27 = vrot.slane %v11862_v16, %v9284_v28  ;;  %8949 = vrcp.f32 %v6001_v35  ;;  %v3969_v35 = vcombine.low %v3944_v62, %v3952_v41 }
 0x45c   : > { %v2936_v55 = vpop.permute.xlu1 %2935  ;;  %8951 = vrcp.f32 %v6004_v44  ;;  %v6096_v49 = vpack.c.bf16 %v6074_v39, %v6073_v23  ;;  %v3953_v44 = vcombine.low %v3928_v32, %v3936_v42 }
 0x45d   : > { %v3461_v30 = vcombine.low %v11861_v6, %v2936_v55  ;;  %v3462_v31 = vcombine.high %v11861_v6, %v2936_v55  ;;  %v11240_v25 = vpop.xlane.xlu0 %6012  ;;  %8953 = vrcp.f32 %v6007_v63  ;;  %v3977_v19 = vrot.slane %v3969_v35, %v9305_v9 }
 0x45e   : > { %v3961_v63 = vrot.slane %v3953_v44, %v9305_v9 }
 0x45f   : > { %v3469_v58 = vrot.slane %v3461_v30, %v9284_v28  ;;  %v3476_v0 = vrot.slane %v3462_v31, %v9284_v28 }
 0x460   : > { %v8946_v60 = vpop.eup %8945  ;;  %v3986_v32 = vcombine.high %v3961_v63, %v3977_v19 }
 0x461   : > { %v3477_v57 = vcombine.low %v3453_v59, %v3469_v58  ;;  %v3478_v1 = vcombine.high %v3453_v59, %v3469_v58  ;;  %v3493_v46 = vcombine.low %v3460_v27, %v3476_v0  ;;  %v3494_v10 = vcombine.high %v3460_v27, %v3476_v0  ;;  %8695 = vmatmul.mubr.msk.bf16.vlgmr.msra.gmra.mrb[56].mxu1 %vm5734_vm3, %v6096_v49  ;;  %v6010_v34 = vpop.xlane.xlu0 %6009 }
 0x462   : > { %8705 = vmatpush3.bf16.msra.mxu1 %v11863_v52  ;;  %8955 = vrcp.f32 %v6010_v34  ;;  %8706 = vmatprep.mubr.msk.bf16.mxu1 %vm8982_vm1, %v11802_v26  ;;  %v6077_v48 = vmul.f32 %v8946_v60, %v11110_v50  ;;  %v3984_v50 = vrot.slane %v3970_v54, %v9305_v9  ;;  %v3985_v27 = vcombine.low %v3961_v63, %v3977_v19 }
 0x463   : > { %v3485_v43 = vrot.slane %v3477_v57, %v9305_v9  ;;  %v3492_v3 = vrot.slane %v3478_v1, %v9305_v9  ;;  %v3501_v14 = vrot.slane %v3493_v46, %v9305_v9  ;;  %v3508_v61 = vrot.slane %v3494_v10, %v9305_v9  ;;  %8716 = vmatprep.subr.bf16.mxu1 %v11802_v26 }
 0x464   : > { %v8948_v4 = vpop.eup %8947  ;;  %v3987_v42 = vcombine.low %v3968_v38, %v3984_v50  ;;  %v3988_v41 = vcombine.high %v3968_v38, %v3984_v50 }
 0x465   : > { %v3989_v45 = vcombine.low %v3485_v43, %v3492_v3  ;;  %v8376_v11 = vcombine.high %v3485_v43, %v3492_v3  ;;  %v4005_v13 = vcombine.low %v3501_v14, %v3508_v61  ;;  %v8377_v56 = vcombine.high %v3501_v14, %v3508_v61  ;;  %v6019_v18 = vpop.xlane.xlu0 %6018  ;;  %v8950_v53 = vpop.eup %8949 }
 0x466   : > { %v6078_v33 = vmul.f32 %v8948_v4, %v11115_v5  ;;  %v8952_v55 = vpop.eup %8951  ;;  %8957 = vrcp.f32 %v6019_v18  ;;  %v6079_v44 = vmul.f32 %v8950_v53, %v11098_v12 }
 0x467   : > { %v3996_v17 = vrot.slane %v3989_v45, %v9284_v28  ;;  %v4004_v40 = vrot.slane %v8376_v11, %v9284_v28  ;;  %v4012_v37 = vrot.slane %v4005_v13, %v9284_v28  ;;  %v4020_v29 = vrot.slane %v8377_v56, %v9284_v28  ;;  %v8954_v59 = vpop.eup %8953 }
 0x468   : > { %v6098_v39 = vpack.c.bf16 %v6078_v33, %v6077_v48  ;;  %v6080_v57 = vmul.f32 %v8952_v55, %v11105_v47  ;;  %v6081_v1 = vmul.f32 %v8954_v59, %v11117_v36 }
 0x469   : > { %v6022_v5 = vpop.xlane.xlu0 %6021  ;;  %v4021_v7 = vcombine.low %v3996_v17, %v4004_v40  ;;  %v4037_v22 = vcombine.low %v4012_v37, %v4020_v29  ;;  %v4022_v20 = vcombine.high %v3996_v17, %v4004_v40  ;;  %v4038_v23 = vcombine.high %v4012_v37, %v4020_v29 }
 0x46a   : > { %8707 = vmatmul.mubr.msk.bf16.vlgmr.msra.gmra.mrb[60].mxu1 %vm5734_vm3, %v6098_v39  ;;  %8959 = vrcp.f32 %v6022_v5  ;;  %v6099_v14 = vpack.c.bf16 %v6080_v57, %v6079_v44 }
 0x46b   : > { %v4029_v6 = vrot.slane %v4021_v7, %v9305_v9  ;;  %v4045_v30 = vrot.slane %v4037_v22, %v9305_v9  ;;  %8718 = vmatprep.mubr.msk.bf16.mxu1 %vm8982_vm1, %v11802_v26  ;;  %v4036_v31 = vrot.slane %v4022_v20, %v9305_v9  ;;  %v4052_v58 = vrot.slane %v4038_v23, %v9305_v9 }
 0x46c   : > { %v8956_v16 = vpop.eup %8955  ;;  %8961 = vrcp.f32 %v11240_v25 }
 0x46d   : > { %v6082_v0 = vmul.f32 %v8956_v16, %v11127_v24  ;;  %v4053_v49 = vcombine.low %v4029_v6, %v4045_v30  ;;  %v4054_v62 = vcombine.high %v4029_v6, %v4045_v30  ;;  %v4055_v46 = vcombine.low %v4036_v31, %v4052_v58 }
 0x46e   : > { %v4056_v10 = vcombine.high %v4036_v31, %v4052_v58 }
 0x46f   : > { %v6115_v34 = vpack.c.bf16 %v4053_v49, %v3985_v27  ;;  %v6116_v52 = vpack.c.bf16 %v4054_v62, %v3986_v32  ;;  %v6117_v60 = vpack.c.bf16 %v4055_v46, %v3987_v42  ;;  %v6100_v43 = vpack.c.bf16 %v6082_v0, %v6081_v1 }
 0x470   : > { %v6118_v3 = vpack.c.bf16 %v4056_v10, %v3988_v41  ;;  %v8958_v24 = vpop.eup %8957 }
 0x471   : > { %8711 = vmatpush3.bf16.msra.mxu0 %v6115_v34  ;;  %8717 = vmatpush3.bf16.msra.mxu1 %v6116_v52  ;;  %v6085_v12 = vmul.f32 %v8958_v24, %v11131_v2 }
 0x472   : > { %8722 = vmatprep.subr.bf16.mxu0 %v11802_v26  ;;  %8728 = vmatprep.subr.bf16.mxu1 %v11802_v26 }
 0x474   : > { %v8960_v47 = vpop.eup %8959  ;;  %8713 = vmatmul.mubr.msk.bf16.vlgmr.msra.gmra.mrb[56].mxu0 %vm5734_vm3, %v6099_v14  ;;  %8719 = vmatmul.mubr.msk.bf16.vlgmr.msra.gmra.mrb[64].mxu1 %vm5734_vm3, %v6100_v43 }
 0x475   : > { %v6086_v36 = vmul.f32 %v8960_v47, %v11135_v21  ;;  %8723 = vmatpush3.bf16.msra.mxu0 %v6117_v60  ;;  %8729 = vmatpush3.bf16.msra.mxu1 %v6118_v3 }
 0x476   : > { %8730 = vmatprep.mubr.msk.bf16.mxu1 %vm8982_vm1, %v11802_v26  ;;  %8724 = vmatprep.mubr.msk.bf16.mxu0 %vm8982_vm1, %v11802_v26  ;;  %v8962_v35 = vpop.eup %8961 }
 0x477   : > { %v6102_v61 = vpack.c.bf16 %v6086_v36, %v6085_v12  ;;  %v6083_v21 = vmul.f32 %v8962_v35, %v11123_v15 }
 0x47c   : > { %8731 = vmatmul.mubr.msk.bf16.vlgmr.msra.gmra.mrb[68].mxu1 %vm5734_vm3, %v6102_v61 }
 0x48d   : > { %v6016_v4 = vpop.xlane.xlu1 %6015 }
 0x48e   : > { %8963 = vrcp.f32 %v6016_v4 }
 0x498   : > { %v8964_v51 = vpop.eup %8963 }
 0x499   : > { %v6084_v54 = vmul.f32 %v8964_v51, %v11142_v8 }
 0x49b   : > { %v6101_v2 = vpack.c.bf16 %v6084_v54, %v6083_v21 }
 0x49d   : > { %8725 = vmatmul.mubr.msk.bf16.vlgmr.msra.gmra.mrb[60].mxu0 %vm5734_vm3, %v6101_v2 }
 0x4f6   : > { %v6156_v45 = vpop.f32.mrb[32].mxu0 }
 0x4f7   : > { %v8642_v11 = vpop.f32.mrb[33].mxu0 }
 0x4f8   : > { %v6159_v13 = vpop.f32.mrb[34].mxu0 }
 0x4f9   : > { %v8643_v26 = vpop.f32.mrb[35].mxu0 }
 0x4fc   : > { %v6200_v56 = vpop.f32.mrb[40].mxu1 }
 0x4fd   : > { %v8648_v18 = vpop.f32.mrb[41].mxu1 }
 0x4fe   : > { %v6244_v48 = vpop.f32.mrb[36].mxu0  ;;  %v6203_v33 = vpop.f32.mrb[42].mxu1 }
 0x4ff   : > { %v6823_v25 = vcombine.low %v6156_v45, %v6244_v48  ;;  %v6824_v63 = vcombine.high %v6156_v45, %v6244_v48  ;;  %v8654_v17 = vpop.f32.mrb[37].mxu0  ;;  %v8649_v40 = vpop.f32.mrb[43].mxu1 }
 0x500   : > { %v6247_v37 = vpop.f32.mrb[38].mxu0 }
 0x501   : > { %v6891_v29 = vcombine.low %v6159_v13, %v6247_v37  ;;  %v6892_v15 = vcombine.high %v6159_v13, %v6247_v37  ;;  %v8655_v53 = vpop.f32.mrb[39].mxu0  ;;  %v6831_v27 = vrot.slane %v6823_v25, %v9284_v28  ;;  %v6838_v32 = vrot.slane %v6824_v63, %v9284_v28 }
 0x503   : > { %v6899_v34 = vrot.slane %v6891_v29, %v9284_v28  ;;  %v6906_v52 = vrot.slane %v6892_v15, %v9284_v28 }
 0x507   : > { %v11297_v8 = vpop.f32.mrb[40].mxu0 }
 0x508   : > { %v8666_v39 = vpop.f32.mrb[41].mxu0 }
 0x509   : > { %v11299_v19 = vpop.f32.mrb[42].mxu0 }
 0x50a   : > { %v8667_v38 = vpop.f32.mrb[43].mxu0 }
 0x510   : > { %v11301_v50 = vpop.f32.mrb[44].mxu0 }
 0x511   : > { %v6959_v55 = vcombine.low %v11297_v8, %v11301_v50  ;;  %v6960_v5 = vcombine.high %v11297_v8, %v11301_v50  ;;  %v8678_v7 = vpop.f32.mrb[45].mxu0 }
 0x512   : > { %v11307_v22 = vpop.f32.mrb[46].mxu0 }
 0x513   : > { %v7027_v20 = vcombine.low %v11299_v19, %v11307_v22  ;;  %v7028_v59 = vcombine.high %v11299_v19, %v11307_v22  ;;  %v8679_v23 = vpop.f32.mrb[47].mxu0  ;;  %v6288_v6 = vpop.f32.mrb[44].mxu1 }
 0x514   : > { %v6839_v30 = vcombine.low %v6200_v56, %v6288_v6  ;;  %v6840_v31 = vcombine.high %v6200_v56, %v6288_v6  ;;  %v8660_v16 = vpop.f32.mrb[45].mxu1 }
 0x515   : > { %v6291_v42 = vpop.f32.mrb[46].mxu1  ;;  %v7035_v8 = vrot.slane %v7027_v20, %v9284_v28  ;;  %v7042_v50 = vrot.slane %v7028_v59, %v9284_v28 }
 0x516   : > { %v6847_v58 = vrot.slane %v6839_v30, %v9284_v28  ;;  %v6854_v0 = vrot.slane %v6840_v31, %v9284_v28  ;;  %v6907_v49 = vcombine.low %v6203_v33, %v6291_v42  ;;  %v6908_v62 = vcombine.high %v6203_v33, %v6291_v42  ;;  %v8661_v41 = vpop.f32.mrb[47].mxu1 }
 0x518   : > { %v6855_v57 = vcombine.low %v6831_v27, %v6847_v58  ;;  %v6856_v1 = vcombine.high %v6831_v27, %v6847_v58  ;;  %v6871_v46 = vcombine.low %v6838_v32, %v6854_v0  ;;  %v6872_v10 = vcombine.high %v6838_v32, %v6854_v0 }
 0x519   : > { %v6915_v44 = vrot.slane %v6907_v49, %v9284_v28  ;;  %v6922_v60 = vrot.slane %v6908_v62, %v9284_v28 }
 0x51a   : > { %v6863_v43 = vrot.slane %v6855_v57, %v9305_v9  ;;  %v6870_v3 = vrot.slane %v6856_v1, %v9305_v9  ;;  %v6879_v14 = vrot.slane %v6871_v46, %v9305_v9  ;;  %v6886_v24 = vrot.slane %v6872_v10, %v9305_v9 }
 0x51b   : > { %v6923_v47 = vcombine.low %v6899_v34, %v6915_v44  ;;  %v6924_v36 = vcombine.high %v6899_v34, %v6915_v44  ;;  %v6939_v12 = vcombine.low %v6906_v52, %v6922_v60  ;;  %v6940_v61 = vcombine.high %v6906_v52, %v6922_v60  ;;  %v11325_v4 = vpop.f32.mrb[48].mxu1 }
 0x51c   : > { %v7367_v35 = vcombine.low %v6863_v43, %v6870_v3  ;;  %v8426_v51 = vcombine.high %v6863_v43, %v6870_v3  ;;  %v7383_v21 = vcombine.low %v6879_v14, %v6886_v24  ;;  %v8427_v54 = vcombine.high %v6879_v14, %v6886_v24  ;;  %v8672_v2 = vpop.f32.mrb[49].mxu1 }
 0x51d   : > { %v6931_v45 = vrot.slane %v6923_v47, %v9305_v9  ;;  %v6938_v11 = vrot.slane %v6924_v36, %v9305_v9  ;;  %v6947_v13 = vrot.slane %v6939_v12, %v9305_v9  ;;  %v6954_v26 = vrot.slane %v6940_v61, %v9305_v9  ;;  %v11333_v18 = vpop.f32.mrb[50].mxu1 }
 0x51e   : > { %v7374_v48 = vrot.slane %v7367_v35, %v9284_v28  ;;  %v7382_v33 = vrot.slane %v8426_v51, %v9284_v28  ;;  %v7390_v25 = vrot.slane %v7383_v21, %v9284_v28  ;;  %v7398_v63 = vrot.slane %v8427_v54, %v9284_v28  ;;  %v8673_v40 = vpop.f32.mrb[51].mxu1 }
 0x51f   : > { %v7435_v37 = vcombine.low %v6931_v45, %v6938_v11  ;;  %v8428_v29 = vcombine.high %v6931_v45, %v6938_v11  ;;  %v7451_v15 = vcombine.low %v6947_v13, %v6954_v26  ;;  %v8429_v53 = vcombine.high %v6947_v13, %v6954_v26 }
 0x520   : > { %v11331_v56 = vpop.f32.mrb[48].mxu0  ;;  %v7400_v7 = vcombine.high %v7374_v48, %v7382_v33  ;;  %v7416_v23 = vcombine.high %v7390_v25, %v7398_v63  ;;  %v7399_v6 = vcombine.low %v7374_v48, %v7382_v33  ;;  %v7415_v30 = vcombine.low %v7390_v25, %v7398_v63 }
 0x521   : > { %v8690_v17 = vpop.f32.mrb[49].mxu0  ;;  %v7442_v31 = vrot.slane %v7435_v37, %v9284_v28  ;;  %v7450_v16 = vrot.slane %v8428_v29, %v9284_v28  ;;  %v7458_v27 = vrot.slane %v7451_v15, %v9284_v28  ;;  %v7466_v32 = vrot.slane %v8429_v53, %v9284_v28 }
 0x522   : > { %v11339_v39 = vpop.f32.mrb[50].mxu0  ;;  %v7414_v42 = vrot.slane %v7400_v7, %v9305_v9  ;;  %v7430_v58 = vrot.slane %v7416_v23, %v9305_v9  ;;  %v11348_v0 = vrot.slane %v7399_v6, %v9305_v9  ;;  %v11351_v49 = vrot.slane %v7415_v30, %v9305_v9 }
 0x523   : > { %v8691_v38 = vpop.f32.mrb[51].mxu0  ;;  %v7468_v62 = vcombine.high %v7442_v31, %v7450_v16  ;;  %v7484_v41 = vcombine.high %v7458_v27, %v7466_v32  ;;  %v7467_v57 = vcombine.low %v7442_v31, %v7450_v16  ;;  %v7483_v1 = vcombine.low %v7458_v27, %v7466_v32 }
 0x524   : > { %v7434_v46 = vcombine.high %v7414_v42, %v7430_v58  ;;  %v7432_v10 = vcombine.high %v11348_v0, %v11351_v49  ;;  %v7433_v34 = vcombine.low %v7414_v42, %v7430_v58  ;;  %v7431_v52 = vcombine.low %v11348_v0, %v11351_v49 }
 0x525   : > { %v7482_v44 = vrot.slane %v7468_v62, %v9305_v9  ;;  %v7498_v60 = vrot.slane %v7484_v41, %v9305_v9  ;;  %v11360_v43 = vrot.slane %v7467_v57, %v9305_v9  ;;  %v11363_v3 = vrot.slane %v7483_v1, %v9305_v9 }
 0x526   : > { %v6967_v63 = vrot.slane %v6959_v55, %v9284_v28  ;;  %v6974_v17 = vrot.slane %v6960_v5, %v9284_v28 }
 0x527   : > { %v7502_v12 = vcombine.high %v7482_v44, %v7498_v60  ;;  %v7500_v61 = vcombine.high %v11360_v43, %v11363_v3  ;;  %v7501_v51 = vcombine.low %v7482_v44, %v7498_v60  ;;  %v7499_v21 = vcombine.low %v11360_v43, %v11363_v3 }
 0x529   : > { %v6596_v14 = vpop.f32.mrb[52].mxu0  ;;  %v8783_v13 = vpack.i.bf16 %v7502_v12, %v7434_v46  ;;  %v8773_v26 = vpack.i.bf16 %v7500_v61, %v7432_v10 }
 0x52a   : > { %v7095_v24 = vcombine.low %v11331_v56, %v6596_v14  ;;  %v7096_v47 = vcombine.high %v11331_v56, %v6596_v14  ;;  %v8702_v36 = vpop.f32.mrb[53].mxu0  ;;  %v8778_v56 = vpack.i.bf16 %v7501_v51, %v7433_v34 }
 0x52b   : > { %v11369_v35 = vpop.f32.mrb[54].mxu0  ;;  %8784 = vrot.lane.b32.xlu0 %v8783_v13, %s8990_s22  ;;  %8774 = vrot.lane.b32.xlu1 %v8773_v26, %s8991_s23 }
 0x52c   : > { %v7163_v54 = vcombine.low %v11339_v39, %v11369_v35  ;;  %v7164_v2 = vcombine.high %v11339_v39, %v11369_v35  ;;  %v8703_v45 = vpop.f32.mrb[55].mxu0  ;;  %v6464_v11 = vpop.f32.mrb[52].mxu1  ;;  %v11402_v23 = vrot.slane %v7095_v24, %v9284_v28 }
 0x52d   : > { %v6975_v48 = vcombine.low %v11325_v4, %v6464_v11  ;;  %v6976_v33 = vcombine.high %v11325_v4, %v6464_v11  ;;  %v8684_v25 = vpop.f32.mrb[53].mxu1 }
 0x52e   : > { %v6467_v40 = vpop.f32.mrb[54].mxu1 }
 0x52f   : > { %v6983_v4 = vrot.slane %v6975_v48, %v9284_v28  ;;  %v6990_v37 = vrot.slane %v6976_v33, %v9284_v28  ;;  %v7043_v29 = vcombine.low %v11333_v18, %v6467_v40  ;;  %v7044_v55 = vcombine.high %v11333_v18, %v6467_v40  ;;  %v8685_v15 = vpop.f32.mrb[55].mxu1  ;;  %8779 = vrot.lane.b32.xlu1 %v8778_v56, %s8989_s21 }
 0x530   : > { %v11405_v18 = vrot.slane %v7096_v47, %v9284_v28 }
 0x531   : > { %v6991_v5 = vcombine.low %v6967_v63, %v6983_v4  ;;  %v6992_v53 = vcombine.high %v6967_v63, %v6983_v4  ;;  %v7007_v38 = vcombine.low %v6974_v17, %v6990_v37  ;;  %v7008_v7 = vcombine.high %v6974_v17, %v6990_v37 }
 0x532   : > { %v7051_v6 = vrot.slane %v7043_v29, %v9284_v28  ;;  %v7058_v30 = vrot.slane %v7044_v55, %v9284_v28  ;;  %v8835_v55 = vld [vmem:[%s11712_s6] sm:$0xff]  }
 0x533   : > { %v6999_v20 = vrot.slane %v6991_v5, %v9305_v9  ;;  %v7006_v19 = vrot.slane %v6992_v53, %v9305_v9  ;;  %v7015_v22 = vrot.slane %v7007_v38, %v9305_v9  ;;  %v7022_v59 = vrot.slane %v7008_v7, %v9305_v9  ;;  %8734 = vmatprep.subr.bf16.mxu0 %v8835_v55 }
 0x534   : > { %v7059_v31 = vcombine.low %v7035_v8, %v7051_v6  ;;  %v7060_v16 = vcombine.high %v7035_v8, %v7051_v6  ;;  %v7075_v27 = vcombine.low %v7042_v50, %v7058_v30  ;;  %v7076_v32 = vcombine.high %v7042_v50, %v7058_v30  ;;  %v6552_v42 = vpop.f32.mrb[56].mxu1  ;;  %8735 = vmatpush3.bf16.msra.mxu0 %v8835_v55 }
 0x535   : > { %v7503_v58 = vcombine.low %v6999_v20, %v7006_v19  ;;  %v8430_v62 = vcombine.high %v6999_v20, %v7006_v19  ;;  %v7519_v41 = vcombine.low %v7015_v22, %v7022_v59  ;;  %v8431_v57 = vcombine.high %v7015_v22, %v7022_v59  ;;  %v8696_v1 = vpop.f32.mrb[57].mxu1 }
 0x536   : > { %v7067_v46 = vrot.slane %v7059_v31, %v9305_v9  ;;  %v7074_v10 = vrot.slane %v7060_v16, %v9305_v9  ;;  %v7083_v34 = vrot.slane %v7075_v27, %v9305_v9  ;;  %v7090_v44 = vrot.slane %v7076_v32, %v9305_v9  ;;  %v6555_v60 = vpop.f32.mrb[58].mxu1 }
 0x537   : > { %v7510_v14 = vrot.slane %v7503_v58, %v9284_v28  ;;  %v7518_v24 = vrot.slane %v8430_v62, %v9284_v28  ;;  %v7526_v47 = vrot.slane %v7519_v41, %v9284_v28  ;;  %v7534_v36 = vrot.slane %v8431_v57, %v9284_v28  ;;  %v8697_v12 = vpop.f32.mrb[59].mxu1 }
 0x538   : > { %v7571_v61 = vcombine.low %v7067_v46, %v7074_v10  ;;  %v8432_v51 = vcombine.high %v7067_v46, %v7074_v10  ;;  %v7587_v45 = vcombine.low %v7083_v34, %v7090_v44  ;;  %v8433_v11 = vcombine.high %v7083_v34, %v7090_v44 }
 0x539   : > { %v7536_v13 = vcombine.high %v7510_v14, %v7518_v24  ;;  %v7552_v26 = vcombine.high %v7526_v47, %v7534_v36  ;;  %v7535_v56 = vcombine.low %v7510_v14, %v7518_v24  ;;  %v7551_v48 = vcombine.low %v7526_v47, %v7534_v36 }
 0x53a   : > { %v7578_v33 = vrot.slane %v7571_v61, %v9284_v28  ;;  %v7586_v25 = vrot.slane %v8432_v51, %v9284_v28  ;;  %v7594_v63 = vrot.slane %v7587_v45, %v9284_v28  ;;  %v7602_v17 = vrot.slane %v8433_v11, %v9284_v28 }
 0x53b   : > { %v11427_v40 = vrot.slane %v7536_v13, %v9305_v9  ;;  %v11430_v4 = vrot.slane %v7552_v26, %v9305_v9  ;;  %v11433_v37 = vrot.slane %v7535_v56, %v9305_v9  ;;  %v11436_v29 = vrot.slane %v7551_v48, %v9305_v9 }
 0x53c   : > { %v7604_v15 = vcombine.high %v7578_v33, %v7586_v25  ;;  %v7620_v8 = vcombine.high %v7594_v63, %v7602_v17  ;;  %v7603_v50 = vcombine.low %v7578_v33, %v7586_v25  ;;  %v7619_v5 = vcombine.low %v7594_v63, %v7602_v17 }
 0x53d   : > { %v6640_v53 = vpop.f32.mrb[60].mxu1  ;;  %v7569_v38 = vcombine.low %v11427_v40, %v11430_v4  ;;  %v7568_v7 = vcombine.high %v11433_v37, %v11436_v29  ;;  %v7570_v6 = vcombine.high %v11427_v40, %v11430_v4  ;;  %v7567_v30 = vcombine.low %v11433_v37, %v11436_v29 }
 0x53e   : > { %v7111_v20 = vcombine.low %v6552_v42, %v6640_v53  ;;  %v7112_v19 = vcombine.high %v6552_v42, %v6640_v53  ;;  %v8708_v22 = vpop.f32.mrb[61].mxu1  ;;  %v7618_v59 = vrot.slane %v7604_v15, %v9305_v9  ;;  %v7634_v31 = vrot.slane %v7620_v8, %v9305_v9 }
 0x53f   : > { %v7171_v16 = vrot.slane %v7163_v54, %v9284_v28  ;;  %v7178_v27 = vrot.slane %v7164_v2, %v9284_v28  ;;  %v6643_v32 = vpop.f32.mrb[62].mxu1  ;;  %v11460_v58 = vrot.slane %v7603_v50, %v9305_v9  ;;  %v11463_v42 = vrot.slane %v7619_v5, %v9305_v9 }
 0x540   : > { %v7119_v62 = vrot.slane %v7111_v20, %v9284_v28  ;;  %v7126_v41 = vrot.slane %v7112_v19, %v9284_v28  ;;  %v7179_v57 = vcombine.low %v6555_v60, %v6643_v32  ;;  %v7180_v1 = vcombine.high %v6555_v60, %v6643_v32  ;;  %v8709_v46 = vpop.f32.mrb[63].mxu1  ;;  %v8836_v60 = vld [vmem:[%s11712_s6 + $0x8] sm:$0xff]  }
 0x541   : > { %v7637_v54 = vcombine.low %v7618_v59, %v7634_v31  ;;  %v7636_v10 = vcombine.high %v11460_v58, %v11463_v42  ;;  %v7638_v39 = vcombine.high %v7618_v59, %v7634_v31  ;;  %v7635_v35 = vcombine.low %v11460_v58, %v11463_v42  ;;  %8736 = vmatprep.subr.bf16.mxu0 %v8836_v60 }
 0x542   : > { %v7127_v2 = vcombine.low %v11402_v23, %v7119_v62  ;;  %v7128_v34 = vcombine.high %v11402_v23, %v7119_v62  ;;  %v7143_v44 = vcombine.low %v11405_v18, %v7126_v41  ;;  %v7144_v14 = vcombine.high %v11405_v18, %v7126_v41  ;;  %8737 = vmatpush3.bf16.msra.mxu0 %v8836_v60 }
 0x543   : > { %v7187_v24 = vrot.slane %v7179_v57, %v9284_v28  ;;  %v7194_v47 = vrot.slane %v7180_v1, %v9284_v28  ;;  %v8793_v36 = vpack.i.bf16 %v7637_v54, %v7569_v38  ;;  %v8788_v12 = vpack.i.bf16 %v7636_v10, %v7568_v7 }
 0x544   : > { %v7135_v61 = vrot.slane %v7127_v2, %v9305_v9  ;;  %v7142_v51 = vrot.slane %v7128_v34, %v9305_v9  ;;  %v7151_v23 = vrot.slane %v7143_v44, %v9305_v9  ;;  %v7158_v45 = vrot.slane %v7144_v14, %v9305_v9 }
 0x545   : > { %v7195_v18 = vcombine.low %v7171_v16, %v7187_v24  ;;  %v7196_v11 = vcombine.high %v7171_v16, %v7187_v24  ;;  %v7211_v13 = vcombine.low %v7178_v27, %v7194_v47  ;;  %v7212_v26 = vcombine.high %v7178_v27, %v7194_v47  ;;  %8794 = vrot.lane.b32.xlu1 %v8793_v36, %s8989_s21 }
 0x546   : > { %v7639_v56 = vcombine.low %v7135_v61, %v7142_v51  ;;  %v8434_v48 = vcombine.high %v7135_v61, %v7142_v51  ;;  %v7655_v33 = vcombine.low %v7151_v23, %v7158_v45  ;;  %v8435_v25 = vcombine.high %v7151_v23, %v7158_v45  ;;  %8789 = vrot.lane.b32.xlu0 %v8788_v12, %s8991_s23 }
 0x547   : > { %v7203_v63 = vrot.slane %v7195_v18, %v9305_v9  ;;  %v7210_v17 = vrot.slane %v7196_v11, %v9305_v9  ;;  %v7219_v55 = vrot.slane %v7211_v13, %v9305_v9  ;;  %v7226_v15 = vrot.slane %v7212_v26, %v9305_v9  ;;  %v11490_v8 = vpop.f32.mrb[56].mxu0  ;;  %v11492_v50 = vpop.f32.mrb[64].mxu1 }
 0x548   : > { %v7646_v5 = vrot.slane %v7639_v56, %v9284_v28  ;;  %v7654_v53 = vrot.slane %v8434_v48, %v9284_v28  ;;  %v7662_v38 = vrot.slane %v7655_v33, %v9284_v28  ;;  %v7670_v7 = vrot.slane %v8435_v25, %v9284_v28  ;;  %v8714_v20 = vpop.f32.mrb[57].mxu0  ;;  %v8720_v19 = vpop.f32.mrb[65].mxu1 }
 0x549   : > { %v7707_v22 = vcombine.low %v7203_v63, %v7210_v17  ;;  %v8436_v59 = vcombine.high %v7203_v63, %v7210_v17  ;;  %v7723_v31 = vcombine.low %v7219_v55, %v7226_v15  ;;  %v8437_v16 = vcombine.high %v7219_v55, %v7226_v15  ;;  %v11498_v27 = vpop.f32.mrb[58].mxu0  ;;  %v11500_v32 = vpop.f32.mrb[66].mxu1 }
 0x54a   : > { %v8715_v62 = vpop.f32.mrb[59].mxu0  ;;  %v8798_v41 = vpack.i.bf16 %v7638_v39, %v7570_v6  ;;  %v8721_v57 = vpop.f32.mrb[67].mxu1  ;;  %v7671_v1 = vcombine.low %v7646_v5, %v7654_v53  ;;  %v7687_v46 = vcombine.low %v7662_v38, %v7670_v7  ;;  %v7672_v54 = vcombine.high %v7646_v5, %v7654_v53 }
 0x54b   : > { %v7714_v10 = vrot.slane %v7707_v22, %v9284_v28  ;;  %v7722_v2 = vrot.slane %v8436_v59, %v9284_v28  ;;  %v7730_v34 = vrot.slane %v7723_v31, %v9284_v28  ;;  %v7738_v44 = vrot.slane %v8437_v16, %v9284_v28 }
 0x54c   : > { %8799 = vrot.lane.b32.xlu1 %v8798_v41, %s8990_s22  ;;  %v11511_v14 = vrot.slane %v7671_v1, %v9305_v9  ;;  %v11514_v40 = vrot.slane %v7687_v46, %v9305_v9  ;;  %v7686_v4 = vrot.slane %v7672_v54, %v9305_v9  ;;  %v7688_v6 = vcombine.high %v7662_v38, %v7670_v7 }
 0x54d   : > { %v7739_v39 = vcombine.low %v7714_v10, %v7722_v2  ;;  %v7755_v60 = vcombine.low %v7730_v34, %v7738_v44  ;;  %v7740_v24 = vcombine.high %v7714_v10, %v7722_v2  ;;  %v7756_v47 = vcombine.high %v7730_v34, %v7738_v44 }
 0x54e   : > { %v7704_v36 = vcombine.high %v11511_v14, %v11514_v40  ;;  %v7702_v12 = vrot.slane %v7688_v6, %v9305_v9  ;;  %v7703_v61 = vcombine.low %v11511_v14, %v11514_v40 }
 0x54f   : > { %v6816_v51 = vpop.f32.mrb[68].mxu1  ;;  %v11523_v23 = vrot.slane %v7739_v39, %v9305_v9  ;;  %v11526_v45 = vrot.slane %v7755_v60, %v9305_v9  ;;  %v7754_v18 = vrot.slane %v7740_v24, %v9305_v9  ;;  %v7770_v11 = vrot.slane %v7756_v47, %v9305_v9 }
 0x550   : > { %v7247_v13 = vcombine.low %v11492_v50, %v6816_v51  ;;  %v7248_v26 = vcombine.high %v11492_v50, %v6816_v51  ;;  %v8732_v56 = vpop.f32.mrb[69].mxu1  ;;  %v7705_v48 = vcombine.low %v7686_v4, %v7702_v12  ;;  %v7706_v33 = vcombine.high %v7686_v4, %v7702_v12 }
 0x551   : > { %v6819_v25 = vpop.f32.mrb[70].mxu1  ;;  %v7772_v63 = vcombine.high %v11523_v23, %v11526_v45  ;;  %v7773_v17 = vcombine.low %v7754_v18, %v7770_v11  ;;  %v7774_v55 = vcombine.high %v7754_v18, %v7770_v11  ;;  %v7771_v15 = vcombine.low %v11523_v23, %v11526_v45 }
 0x552   : > { %v7315_v5 = vcombine.low %v11500_v32, %v6819_v25  ;;  %v7316_v53 = vcombine.high %v11500_v32, %v6819_v25  ;;  %v8733_v38 = vpop.f32.mrb[71].mxu1  ;;  %v7255_v16 = vrot.slane %v7247_v13, %v9284_v28  ;;  %v7262_v32 = vrot.slane %v7248_v26, %v9284_v28 }
 0x553   : > { %v8803_v7 = vpack.i.bf16 %v7772_v63, %v7704_v36  ;;  %v8808_v20 = vpack.i.bf16 %v7773_v17, %v7705_v48  ;;  %v8823_v50 = vpack.i.bf16 %v7774_v55, %v7706_v33 }
 0x554   : > { %v7330_v4 = vrot.slane %v7316_v53, %v9284_v28 }
 0x555   : > { %8804 = vrot.lane.b32.xlu0 %v8803_v7, %s8991_s23 }
 0x559   : > { %8809 = vrot.lane.b32.xlu0 %v8808_v20, %s8989_s21 }
 0x55d   : > { %8824 = vrot.lane.b32.xlu0 %v8823_v50, %s8990_s22 }
 0x570   : > { %v6772_v19 = vpop.f32.mrb[60].mxu0 }
 0x571   : > { %v7231_v22 = vcombine.low %v11490_v8, %v6772_v19  ;;  %v7232_v59 = vcombine.high %v11490_v8, %v6772_v19  ;;  %v8726_v31 = vpop.f32.mrb[61].mxu0  ;;  %v7323_v8 = vrot.slane %v7315_v5, %v9284_v28 }
 0x572   : > { %v6775_v62 = vpop.f32.mrb[62].mxu0 }
 0x573   : > { %v7239_v41 = vrot.slane %v7231_v22, %v9284_v28  ;;  %v7246_v57 = vrot.slane %v7232_v59, %v9284_v28  ;;  %v7299_v1 = vcombine.low %v11498_v27, %v6775_v62  ;;  %v7300_v46 = vcombine.high %v11498_v27, %v6775_v62  ;;  %v8727_v54 = vpop.f32.mrb[63].mxu0 }
 0x575   : > { %v7263_v10 = vcombine.low %v7239_v41, %v7255_v16  ;;  %v7264_v2 = vcombine.high %v7239_v41, %v7255_v16  ;;  %v7279_v34 = vcombine.low %v7246_v57, %v7262_v32  ;;  %v7280_v44 = vcombine.high %v7246_v57, %v7262_v32 }
 0x576   : > { %v7307_v6 = vrot.slane %v7299_v1, %v9284_v28  ;;  %v7314_v39 = vrot.slane %v7300_v46, %v9284_v28 }
 0x577   : > { %v7271_v60 = vrot.slane %v7263_v10, %v9305_v9  ;;  %v7278_v24 = vrot.slane %v7264_v2, %v9305_v9  ;;  %v7287_v47 = vrot.slane %v7279_v34, %v9305_v9  ;;  %v7294_v27 = vrot.slane %v7280_v44, %v9305_v9 }
 0x578   : > { %v7331_v36 = vcombine.low %v7307_v6, %v7323_v8  ;;  %v7332_v12 = vcombine.high %v7307_v6, %v7323_v8  ;;  %v7347_v51 = vcombine.low %v7314_v39, %v7330_v4  ;;  %v7348_v18 = vcombine.high %v7314_v39, %v7330_v4 }
 0x579   : > { %v7775_v11 = vcombine.low %v7271_v60, %v7278_v24  ;;  %v8438_v13 = vcombine.high %v7271_v60, %v7278_v24  ;;  %v7791_v26 = vcombine.low %v7287_v47, %v7294_v27  ;;  %v8439_v56 = vcombine.high %v7287_v47, %v7294_v27 }
 0x57a   : > { %v7339_v48 = vrot.slane %v7331_v36, %v9305_v9  ;;  %v7346_v33 = vrot.slane %v7332_v12, %v9305_v9  ;;  %v7355_v25 = vrot.slane %v7347_v51, %v9305_v9  ;;  %v7362_v63 = vrot.slane %v7348_v18, %v9305_v9 }
 0x57b   : > { %v7782_v17 = vrot.slane %v7775_v11, %v9284_v28  ;;  %v7790_v55 = vrot.slane %v8438_v13, %v9284_v28  ;;  %v7798_v5 = vrot.slane %v7791_v26, %v9284_v28  ;;  %v7806_v53 = vrot.slane %v8439_v56, %v9284_v28 }
 0x57c   : > { %v7843_v38 = vcombine.low %v7339_v48, %v7346_v33  ;;  %v8440_v7 = vcombine.high %v7339_v48, %v7346_v33  ;;  %v7859_v20 = vcombine.low %v7355_v25, %v7362_v63  ;;  %v8441_v50 = vcombine.high %v7355_v25, %v7362_v63 }
 0x57d   : > { %v7807_v19 = vcombine.low %v7782_v17, %v7790_v55  ;;  %v7823_v22 = vcombine.low %v7798_v5, %v7806_v53  ;;  %v7808_v59 = vcombine.high %v7782_v17, %v7790_v55  ;;  %v7824_v31 = vcombine.high %v7798_v5, %v7806_v53 }
 0x57e   : > { %v7850_v16 = vrot.slane %v7843_v38, %v9284_v28  ;;  %v7858_v32 = vrot.slane %v8440_v7, %v9284_v28  ;;  %v7866_v62 = vrot.slane %v7859_v20, %v9284_v28  ;;  %v7874_v41 = vrot.slane %v8441_v50, %v9284_v28 }
 0x57f   : > { %v11570_v57 = vrot.slane %v7807_v19, %v9305_v9  ;;  %v11573_v1 = vrot.slane %v7823_v22, %v9305_v9  ;;  %v7822_v46 = vrot.slane %v7808_v59, %v9305_v9  ;;  %v7838_v54 = vrot.slane %v7824_v31, %v9305_v9 }
 0x580   : > { %v7875_v10 = vcombine.low %v7850_v16, %v7858_v32  ;;  %v7891_v2 = vcombine.low %v7866_v62, %v7874_v41  ;;  %v7876_v34 = vcombine.high %v7850_v16, %v7858_v32  ;;  %v7892_v44 = vcombine.high %v7866_v62, %v7874_v41 }
 0x581   : > { %v7840_v8 = vcombine.high %v11570_v57, %v11573_v1  ;;  %v7841_v4 = vcombine.low %v7822_v46, %v7838_v54  ;;  %v7842_v6 = vcombine.high %v7822_v46, %v7838_v54  ;;  %v7839_v28 = vcombine.low %v11570_v57, %v11573_v1  ;;  %v8442_v57 = vld [vmem:[%s11713_s7] ss:$0 sm:$0xff] }
 0x582   : > { %v11582_v39 = vrot.slane %v7875_v10, %v9305_v9  ;;  %v11585_v60 = vrot.slane %v7891_v2, %v9305_v9  ;;  %v7890_v24 = vrot.slane %v7876_v34, %v9305_v9  ;;  %v7906_v47 = vrot.slane %v7892_v44, %v9305_v9 }
 0x584   : > { %v7908_v27 = vcombine.high %v11582_v39, %v11585_v60  ;;  %v7909_v36 = vcombine.low %v7890_v24, %v7906_v47  ;;  %v7910_v12 = vcombine.high %v7890_v24, %v7906_v47  ;;  %v7907_v51 = vcombine.low %v11582_v39, %v11585_v60 }
 0x586   : > { %v8813_v18 = vpack.i.bf16 %v7908_v27, %v7840_v8  ;;  %v8818_v11 = vpack.i.bf16 %v7909_v36, %v7841_v4  ;;  %v8828_v13 = vpack.i.bf16 %v7910_v12, %v7842_v6 }
 0x588   : > { %8814 = vrot.lane.b32.xlu1 %v8813_v18, %s8991_s23 }
 0x58c   : > { %8819 = vrot.lane.b32.xlu1 %v8818_v11, %s8989_s21 }
 0x590   : > { %8829 = vrot.lane.b32.xlu1 %v8828_v13, %s8990_s22 }
 0x59d   : > { %v8775_v26 = vpop.permute.xlu1 %8774  ;;  %v8785_v48 = vpop.permute.xlu0 %8784 }
 0x59e   : > { %v8777_v56 = vunpack.i.h.bf16 %v8775_v26  ;;  %v8776_v9 = vunpack.i.l.bf16 %v8775_v26  ;;  %v8787_v5 = vunpack.i.h.bf16 %v8785_v48  ;;  %v8786_v53 = vunpack.i.l.bf16 %v8785_v48 }
 0x5a0   : > { %v8007_v17 = vsel %vm4089_vm2, %v7431_v52, %v8776_v9  ;;  %v8008_v55 = vsel %vm4089_vm2, %v7499_v21, %v8777_v56 }
 0x5a1   : > { %v8780_v33 = vpop.permute.xlu1 %8779 }
 0x5a2   : > { %v8782_v25 = vunpack.i.h.bf16 %v8780_v33  ;;  %v8781_v63 = vunpack.i.l.bf16 %v8780_v33 }
 0x5a4   : > { %v8015_v38 = vsel %vm5734_vm3, %v8007_v17, %v8781_v63  ;;  %v8016_v7 = vsel %vm5734_vm3, %v8008_v55, %v8782_v25  ;;  %v11864_v55 = vld [vmem:[#allocation4_spill] sm:$0xff] }
 0x5a5   : > { %v8024_v20 = vsel %vm8023_vm4, %v8015_v38, %v8786_v53  ;;  %v8025_v50 = vsel %vm8023_vm4, %v8016_v7, %v8787_v5  ;;  %v11865_v53 = vld [vmem:[#allocation2_spill] sm:$0xff] }
 0x5a6   : > { %v8036_v19 = vpack.c.bf16 %v8025_v50, %v8024_v20  ;;  %v11866_v50 = vld [vmem:[#allocation5_spill] sm:$0xff] }
 0x5a8   : > { %8738 = vmatprep.mubr.msk.bf16.mxu0 %vm443_vm0, %v8036_v19 }
 0x5b7   : > { %v8795_v0 = vpop.permute.xlu1 %8794 }
 0x5b8   : > { %v8790_v49 = vpop.permute.xlu0 %8789  ;;  %v8797_v43 = vunpack.i.h.bf16 %v8795_v0  ;;  %v8796_v3 = vunpack.i.l.bf16 %v8795_v0  ;;  %v11867_v0 = vld [vmem:[#allocation3_spill] sm:$0xff] }
 0x5b9   : > { %v8792_v52 = vunpack.i.h.bf16 %v8790_v49  ;;  %v8791_v22 = vunpack.i.l.bf16 %v8790_v49 }
 0x5bb   : > { %v8010_v21 = vsel %vm4089_vm2, %v7635_v35, %v8792_v52  ;;  %v8009_v59 = vsel %vm4089_vm2, %v7567_v30, %v8791_v22 }
 0x5bc   : > { %v8017_v62 = vsel %vm5734_vm3, %v8009_v59, %v8796_v3  ;;  %v8018_v41 = vsel %vm5734_vm3, %v8010_v21, %v8797_v43 }
 0x5be   : > { %v8800_v31 = vpop.permute.xlu1 %8799 }
 0x5bf   : > { %v8802_v16 = vunpack.i.h.bf16 %v8800_v31  ;;  %v8801_v32 = vunpack.i.l.bf16 %v8800_v31 }
 0x5c1   : > { %v8026_v46 = vsel %vm8023_vm4, %v8017_v62, %v8801_v32  ;;  %v8027_v54 = vsel %vm8023_vm4, %v8018_v41, %v8802_v16 }
 0x5c2   : > { %v8037_v10 = vpack.c.bf16 %v8027_v54, %v8026_v46 }
 0x5c4   : > { %8739 = vmatmul.mubr.msk.bf16.vlgmr.msra.gmra.mrb[64].mxu0 %vm443_vm0, %v8037_v10 }
 0x5c7   : > { %v8805_v58 = vpop.permute.xlu0 %8804 }
 0x5c8   : > { %v8807_v35 = vunpack.i.h.bf16 %v8805_v58  ;;  %v8806_v37 = vunpack.i.l.bf16 %v8805_v58 }
 0x5ca   : > { %v8012_v34 = vsel %vm4089_vm2, %v7771_v15, %v8807_v35  ;;  %v8011_v44 = vsel %vm4089_vm2, %v7703_v61, %v8806_v37 }
 0x5cb   : > { %v8810_v42 = vpop.permute.xlu0 %8809 }
 0x5cc   : > { %v8812_v29 = vunpack.i.h.bf16 %v8810_v42  ;;  %v8811_v30 = vunpack.i.l.bf16 %v8810_v42 }
 0x5ce   : > { %v8019_v6 = vsel %vm5734_vm3, %v8011_v44, %v8811_v30  ;;  %v8020_v24 = vsel %vm5734_vm3, %v8012_v34, %v8812_v29 }
 0x5cf   : > { %v8825_v2 = vpop.permute.xlu0 %8824 }
 0x5d0   : > { %v8827_v8 = vunpack.i.h.bf16 %v8825_v2  ;;  %v8826_v4 = vunpack.i.l.bf16 %v8825_v2 }
 0x5d2   : > { %v8028_v47 = vsel %vm8023_vm4, %v8019_v6, %v8826_v4  ;;  %v8029_v27 = vsel %vm8023_vm4, %v8020_v24, %v8827_v8  ;;  %v11868_v4 = vld [vmem:[#allocation8_spill] sm:$0xff]  ;;  %v11869_v24 = vld [vmem:[#allocation6_spill] sm:$0xff] }
 0x5d3   : > { %v8038_v36 = vpack.c.bf16 %v8029_v27, %v8028_v47 }
 0x5d5   : > { %8742 = vmatprep.mubr.msk.bf16.mxu0 %vm443_vm0, %v8038_v36 }
 0x5fa   : > { %v8815_v23 = vpop.permute.xlu1 %8814 }
 0x5fb   : > { %v8817_v15 = vunpack.i.h.bf16 %v8815_v23  ;;  %v8816_v12 = vunpack.i.l.bf16 %v8815_v23 }
 0x5fd   : > { %v8013_v18 = vsel %vm4089_vm2, %v7839_v28, %v8816_v12  ;;  %v8014_v11 = vsel %vm4089_vm2, %v7907_v51, %v8817_v15  ;;  %v11871_v12 = vld [vmem:[#allocation7_spill] sm:$0xff] }
 0x5fe   : > { %v8820_v45 = vpop.permute.xlu1 %8819 }
 0x5ff   : > { %v8822_v14 = vunpack.i.h.bf16 %v8820_v45  ;;  %v8821_v40 = vunpack.i.l.bf16 %v8820_v45  ;;  %v11870_v45 = vld [vmem:[#allocation9_spill] sm:$0xff] }
 0x601   : > { %v8021_v56 = vsel %vm5734_vm3, %v8013_v18, %v8821_v40  ;;  %v8022_v9 = vsel %vm5734_vm3, %v8014_v11, %v8822_v14 }
 0x602   : > { %v8830_v61 = vpop.permute.xlu1 %8829 }
 0x603   : > { %v8832_v13 = vunpack.i.h.bf16 %v8830_v61  ;;  %v8831_v26 = vunpack.i.l.bf16 %v8830_v61 }
 0x605   : > { %v8030_v48 = vsel %vm8023_vm4, %v8021_v56, %v8831_v26  ;;  %v8031_v33 = vsel %vm8023_vm4, %v8022_v9, %v8832_v13 }
 0x606   : > { %v8039_v25 = vpack.c.bf16 %v8031_v33, %v8030_v48 }
 0x608   : > { %8743 = vmatmul.mubr.msk.bf16.gmra.mrb[68].mxu0 %vm443_vm0, %v8039_v25 }
 0x697   : > { %v8740_v1 = vpop.f32.mrb[64].mxu0 }
 0x698   : > { %v8114_v28 = vadd.f32 %v8740_v1, %v8442_v57  ;;  %v8105_v39 = vpop.f32.mrb[65].mxu0 }
 0x699   : > { %v8106_v60 = vadd.f32 %v8442_v57, %v8105_v39  ;;  %v8741_v51 = vpop.f32.mrb[66].mxu0 }
 0x69a   : > { %v8117_v63 = vadd.f32 %v8741_v51, %v8442_v57  ;;  %v8108_v17 = vpop.f32.mrb[67].mxu0  ;;  %v8138_v5 = vadd.f32 %v8114_v28, %v11864_v55 }
 0x69b   : > { %v8136_v38 = vadd.f32 %v8106_v60, %v11865_v53  ;;  %v8109_v7 = vadd.f32 %v8442_v57, %v8108_v17 }
 0x69c   : > { %v8139_v19 = vadd.f32 %v8117_v63, %v11866_v50  ;;  %8146 = vst.msk [vmem:[%s11656_s14 + $0x10] sm:$0xff] %vm443_vm0, %v8138_v5  ;;  %v8175_v52 = vmul.f32 %v8138_v5, %v8138_v5  ;;  %v8155_v59 = vsel %vm443_vm0, %v8138_v5, 0.0 }
 0x69d   : > { %8144 = vst.msk [vmem:[%s11656_s14] sm:$0xff] %vm443_vm0, %v8136_v38  ;;  %v8173_v20 = vmul.f32 %v8136_v38, %v8136_v38  ;;  %v8137_v49 = vadd.f32 %v8109_v7, %v11867_v0  ;;  %v8152_v22 = vsel %vm443_vm0, %v8136_v38, 0.0 }
 0x69e   : > { %8147 = vst.msk [vmem:[%s11656_s14 + $0x18] sm:$0xff] %vm443_vm0, %v8139_v19  ;;  %v8176_v16 = vmul.f32 %v8139_v19, %v8139_v19  ;;  %v8184_v46 = vsel %vm443_vm0, %v8175_v52, 0.0  ;;  %v8157_v54 = vsel %vm443_vm0, %v8139_v19, 0.0 }
 0x69f   : > { %8145 = vst.msk [vmem:[%s11656_s14 + $0x8] sm:$0xff] %vm443_vm0, %v8137_v49  ;;  %v8153_v43 = vsel %vm443_vm0, %v8137_v49, 0.0  ;;  %v8174_v3 = vmul.f32 %v8137_v49, %v8137_v49  ;;  %v8181_v31 = vsel %vm443_vm0, %v8173_v20, 0.0 }
 0x6a0   : > { %v8154_v21 = vadd.f32 %v8153_v43, %v8152_v22  ;;  %v8186_v42 = vsel %vm443_vm0, %v8176_v16, 0.0 }
 0x6a1   : > { %v8182_v32 = vsel %vm443_vm0, %v8174_v3, 0.0 }
 0x6a2   : > { %v8156_v62 = vadd.f32 %v8155_v59, %v8154_v21  ;;  %v8183_v41 = vadd.f32 %v8182_v32, %v8181_v31 }
 0x6a4   : > { %v8185_v10 = vadd.f32 %v8184_v46, %v8183_v41  ;;  %v8158_v58 = vadd.f32 %v8157_v54, %v8156_v62 }
 0x6a6   : > { %v8187_v35 = vadd.f32 %v8186_v42, %v8185_v10 }
 0x6db   : > { %v8744_v37 = vpop.f32.mrb[68].mxu0 }
 0x6dc   : > { %v8130_v29 = vadd.f32 %v8744_v37, %v8442_v57  ;;  %v8121_v30 = vpop.f32.mrb[69].mxu0 }
 0x6dd   : > { %v8122_v2 = vadd.f32 %v8442_v57, %v8121_v30  ;;  %v8745_v34 = vpop.f32.mrb[70].mxu0 }
 0x6de   : > { %v8133_v44 = vadd.f32 %v8745_v34, %v8442_v57  ;;  %v8124_v8 = vpop.f32.mrb[71].mxu0  ;;  %v8142_v6 = vadd.f32 %v8130_v29, %v11868_v4 }
 0x6df   : > { %v8140_v47 = vadd.f32 %v8122_v2, %v11869_v24  ;;  %v8125_v27 = vadd.f32 %v8442_v57, %v8124_v8 }
 0x6e0   : > { %v8143_v15 = vadd.f32 %v8133_v44, %v11870_v45  ;;  %8150 = vst.msk [vmem:[%s11656_s14 + $0x30] sm:$0xff] %vm443_vm0, %v8142_v6  ;;  %v8179_v61 = vmul.f32 %v8142_v6, %v8142_v6  ;;  %v8163_v9 = vsel %vm443_vm0, %v8142_v6, 0.0 }
 0x6e1   : > { %8148 = vst.msk [vmem:[%s11656_s14 + $0x20] sm:$0xff] %vm443_vm0, %v8140_v47  ;;  %v8159_v36 = vsel %vm443_vm0, %v8140_v47, 0.0  ;;  %v8177_v23 = vmul.f32 %v8140_v47, %v8140_v47  ;;  %v8141_v14 = vadd.f32 %v8125_v27, %v11871_v12 }
 0x6e2   : > { %v8160_v40 = vadd.f32 %v8159_v36, %v8158_v58  ;;  %8151 = vst.msk [vmem:[%s11656_s14 + $0x38] sm:$0xff] %vm443_vm0, %v8143_v15  ;;  %v8180_v48 = vmul.f32 %v8143_v15, %v8143_v15  ;;  %v8192_v1 = vsel %vm443_vm0, %v8179_v61, 0.0  ;;  %v8165_v28 = vsel %vm443_vm0, %v8143_v15, 0.0 }
 0x6e3   : > { %v8188_v18 = vsel %vm443_vm0, %v8177_v23, 0.0  ;;  %8149 = vst.msk [vmem:[%s11656_s14 + $0x28] sm:$0xff] %vm443_vm0, %v8141_v14  ;;  %v8161_v11 = vsel %vm443_vm0, %v8141_v14, 0.0  ;;  %v8178_v13 = vmul.f32 %v8141_v14, %v8141_v14 }
 0x6e4   : > { %v8189_v26 = vadd.f32 %v8188_v18, %v8187_v35  ;;  %v8162_v56 = vadd.f32 %v8161_v11, %v8160_v40  ;;  %v8194_v51 = vsel %vm443_vm0, %v8180_v48, 0.0 }
 0x6e5   : > { %v8190_v33 = vsel %vm443_vm0, %v8178_v13, 0.0 }
 0x6e6   : > { %v8164_v25 = vadd.f32 %v8163_v9, %v8162_v56  ;;  %v8191_v57 = vadd.f32 %v8190_v33, %v8189_v26 }
 0x6e8   : > { %v8166_v39 = vadd.f32 %v8165_v28, %v8164_v25  ;;  %v8193_v60 = vadd.f32 %v8192_v1, %v8191_v57 }
 0x6ea   : > { %v8167_v63 = vrot.slane %v8166_v39, 4  ;;  %v8195_v17 = vadd.f32 %v8194_v51, %v8193_v60 }
 0x6ec   : > { %v8168_v55 = vadd.f32 %v8167_v63, %v8166_v39  ;;  %v8196_v5 = vrot.slane %v8195_v17, 4 }
 0x6ee   : > { %v8169_v53 = vrot.slane %v8168_v55, 2  ;;  %v8197_v38 = vadd.f32 %v8196_v5, %v8195_v17 }
 0x6f0   : > { %v8170_v7 = vadd.f32 %v8169_v53, %v8168_v55  ;;  %v8198_v20 = vrot.slane %v8197_v38, 2 }
 0x6f2   : > { %v8171_v50 = vrot.slane %v8170_v7, 1  ;;  %v8199_v19 = vadd.f32 %v8198_v20, %v8197_v38 }
 0x6f4   : > { %v8172_v0 = vadd.f32 %v8171_v50, %v8170_v7  ;;  %v8200_v49 = vrot.slane %v8199_v19, 1 }
 0x6f6   : > { %v8201_v52 = vadd.f32 %v8200_v49, %v8199_v19  ;;  %8203 = vst.msk [vmem:[%s376_s17] sm:$0x1] %vm8202_vm5, %v8172_v0 }
 0x6f8   : > { %8204 = vst.msk [vmem:[%s376_s17 + $0x1] sm:$0x1] %vm8202_vm5, %v8201_v52 }
 0x6f9 PF: > { %s20_s30 = sadd.s32 1, %s8975_s30  }
 0x6fa   : > { %p17_p5 = scmp.ge.s32.totalorder %s20_s30, 4  }
 0x6fc   :  { %19 = sbr.rel (!%p17_p5) target bundleno = 1 (0x1), region = 97 }

</bundles_post_ra>
